<compile_context>
chip_gen: v7x
topology: tpu7x:2x2x1
jax: 0.10.0
libtpu: 0.0.40
codegen_flags: <defaults>
</compile_context>

<pallas_src>
import jax
import jax.numpy as jnp
from jax import lax
from jax.experimental import pallas as pl
from jax.experimental.pallas import tpu as pltpu

# ---- problem sizes (small, consistent with the module defaults) -------------
B = 2              # batch
L = 16             # sequence length ("input_features")
C = 32             # cnn_out_channels
H = 64             # hidden_size (module default)
FC1 = 64           # fc1 width (fixed by module)
NUM_CLASSES = 4
OUT_PAD = 128      # lane-dense padded logits width (sliced to NUM_CLASSES outside)
EPS = 1e-5

_VMEM = pl.BlockSpec(memory_space=pltpu.MemorySpace.VMEM)


# ---- single fused kernel: conv+BN+ReLU -> BiLSTM -> attention -> FC ----------
def fused_kernel(x_ref, convw_ref, convb_ref, gamma_ref, beta_ref,
                 wi_ref, bg_ref, whf_ref, whb_ref,
                 wa_ref, ba_ref, w1_ref, b1_ref, w2_ref, b2_ref,
                 o_ref, xproj_ref, hseqf_ref, hseqb_ref):
    f32 = jnp.float32
    bf16 = jnp.bfloat16

    # --- Conv1d(1 -> C, k=3, pad=1), batch-first (B, L, C) --------------------
    # Neighbour taps via tiny shift matrices: (x @ S)[b, l] = x[b, l -/+ 1],
    # zero at the boundary -> the pad=1 behaviour without any jnp.pad/transpose.
    x = x_ref[:, 0, :]                                            # (B, L)
    li = lax.broadcasted_iota(jnp.int32, (L, L), 0)
    lj = lax.broadcasted_iota(jnp.int32, (L, L), 1)
    shift_prev = (lj == li + 1).astype(f32)                       # -> x[:, l-1]
    shift_next = (li == lj + 1).astype(f32)                       # -> x[:, l+1]
    x_m1 = jnp.dot(x, shift_prev, preferred_element_type=f32)     # (B, L)
    x_p1 = jnp.dot(x, shift_next, preferred_element_type=f32)     # (B, L)
    w = convw_ref[...]                                            # (3, C)
    y = (x_m1[:, :, None] * w[0:1, :][None]
         + x[:, :, None] * w[1:2, :][None]
         + x_p1[:, :, None] * w[2:3, :][None]) + convb_ref[...][None]   # (B, L, C)

    # --- BatchNorm1d (training-mode batch stats over (B, L) per channel) + ReLU
    mean = jnp.mean(y, axis=(0, 1), keepdims=True)
    var = jnp.mean(jnp.square(y - mean), axis=(0, 1), keepdims=True)
    y = (y - mean) * lax.rsqrt(var + EPS)
    y = y * gamma_ref[...][None] + beta_ref[...][None]
    feat = jnp.maximum(y, 0.0)                                    # (B, L, C)

    # --- Hoisted input-to-gate projections: ONE matmul for both directions ----
    # Gate column layout per direction: [i | 2g | f | f | o | o]  (6H = 3 vregs),
    # g columns pre-scaled by 2 so tanh(g) = 2*sigmoid(2g) - 1 in the cell.
    feat2d = feat.reshape(B * L, C)                               # minor dim unchanged
    proj = (jnp.dot(feat2d, wi_ref[...], preferred_element_type=f32)
            + bg_ref[...])                                        # (B*L, 12H)
    for b in range(B):                                            # 2 aligned sublane stores
        xproj_ref[b] = proj[b * L:(b + 1) * L]

    # --- Interleaved, fully unrolled bidirectional LSTM recurrence ------------
    lane_lt_h = lax.broadcasted_iota(jnp.int32, (B, 2 * H), 1) < H   # i-half vs g-half

    def lstm_cell(xg, h2, c2, wh_ref):
        # xg: (B, 6H) precomputed input projection (+bias) for this timestep.
        # h2, c2: (B, 2H) hidden / cell state duplicated in both lane halves.
        # Recurrent matmul in bf16 (f32 accumulation) to cut MXU passes on the chain.
        g = xg + jnp.dot(h2.astype(bf16), wh_ref[...], preferred_element_type=f32)
        s = jax.nn.sigmoid(g)                            # single EUP pass over 6H lanes
        a = s[:, 0:2 * H]                                # [sig(i) | sig(2g)]
        act_a = jnp.where(lane_lt_h, a, 2.0 * a - 1.0)   # [sig(i) | tanh(g)]
        ig2 = act_a * pltpu.roll(act_a, shift=H, axis=1)  # [i*g | i*g]
        c2n = s[:, 2 * H:4 * H] * c2 + ig2               # [c' | c']
        h2n = s[:, 4 * H:6 * H] * jnp.tanh(c2n)          # [h' | h']
        return h2n, c2n

    zeros2h = jnp.zeros((B, 2 * H), f32)
    h2f, c2f, h2b, c2b = zeros2h, zeros2h, zeros2h, zeros2h
    for t in range(L):                                   # static, fully unrolled
        tb = L - 1 - t
        xgf = xproj_ref[:, t, 0:6 * H]                   # (B, 6H) forward gates
        xgb = xproj_ref[:, tb, 6 * H:12 * H]             # (B, 6H) backward gates
        h2f, c2f = lstm_cell(xgf, h2f, c2f, whf_ref)
        h2b, c2b = lstm_cell(xgb, h2b, c2b, whb_ref)
        hseqf_ref[:, t, :] = h2f                         # full 128-lane unmasked store
        hseqb_ref[:, tb, :] = h2b                        # full 128-lane unmasked store

    # Assemble lstm_out = [h_fwd | h_bwd] with one lane-mask select.
    lane2h = lax.broadcasted_iota(jnp.int32, (B, L, 2 * H), 2) < H
    hseq = jnp.where(lane2h, hseqf_ref[...], hseqb_ref[...])       # (B, L, 2H)

    # --- Attention pooling (2-D scores, softmax over time) + fc1(ReLU) + fc2 --
    s = jnp.sum(hseq * wa_ref[...][None], axis=-1) + ba_ref[...]    # (B, L)
    s = s - jnp.max(s, axis=1, keepdims=True)
    e = jnp.exp(s)
    attn = e * pl.reciprocal(jnp.sum(e, axis=1, keepdims=True), approx=True)
    ctx = jnp.sum(attn[:, :, None] * hseq, axis=1)                  # (B, 2H)

    h1 = jnp.maximum(jnp.dot(ctx, w1_ref[...], preferred_element_type=f32)
                     + b1_ref[...], 0.0)                            # (B, FC1)
    o_ref[...] = (jnp.dot(h1, w2_ref[...], preferred_element_type=f32)
                  + b2_ref[...])                                    # (B, OUT_PAD)


@jax.jit
def forward(x_nchw, p):
    # x_nchw: (B, 1, L) float32, matching PyTorch's Conv1d input layout.
    out_pad = pl.pallas_call(
        fused_kernel,
        out_shape=jax.ShapeDtypeStruct((B, OUT_PAD), jnp.float32),
        in_specs=[_VMEM] * 15,
        out_specs=_VMEM,
        scratch_shapes=[pltpu.VMEM((B, L, 12 * H), jnp.float32),   # hoisted gate projections
                        pltpu.VMEM((B, L, 2 * H), jnp.float32),    # forward h sequence (dup lanes)
                        pltpu.VMEM((B, L, 2 * H), jnp.float32)],   # backward h sequence (dup lanes)
    )(x_nchw, p["conv_w"], p["conv_b"], p["bn_gamma"], p["bn_beta"],
      p["lstm_wi"], p["lstm_bg"], p["lstm_whf"], p["lstm_whb"],
      p["attn_w"], p["attn_b"], p["fc1_w"], p["fc1_b"], p["fc2_wp"], p["fc2_bp"])
    return out_pad[:, :NUM_CLASSES]


# ---- deterministic parameter construction (PyTorch default-style uniform) ----
def _uniform(key, shape, bound):
    return jax.random.uniform(key, shape, jnp.float32, -bound, bound)


def _expand_gate_cols(wt):
    """(in, 4H) PyTorch gate order [i|f|g|o] -> (in, 6H) [i | 2g | f | f | o | o].

    g columns are pre-scaled by 2 so the kernel can apply a single full-width
    sigmoid and recover tanh(g) as 2*sigmoid(2g) - 1."""
    i = wt[:, 0:H]
    f = wt[:, H:2 * H]
    g = wt[:, 2 * H:3 * H]
    o = wt[:, 3 * H:4 * H]
    return jnp.concatenate([i, 2.0 * g, f, f, o, o], axis=1)


def make_params(key):
    ks = jax.random.split(key, 16)
    p = {}
    # Conv1d(1, C, 3): weight (C, 1, 3), bias (C,); fan_in = 1 * 3
    cb = 1.0 / jnp.sqrt(3.0)
    conv_w = _uniform(ks[0], (C, 1, 3), cb)
    p["conv_w"] = jnp.transpose(conv_w[:, 0, :], (1, 0))                 # (3, C)
    p["conv_b"] = _uniform(ks[1], (1, C), cb)
    # BatchNorm1d(C)
    p["bn_gamma"] = jnp.ones((1, C), jnp.float32)
    p["bn_beta"] = jnp.zeros((1, C), jnp.float32)

    # LSTM (bidirectional). Per direction: weight_ih (4H,C), weight_hh (4H,H),
    # b_ih + b_hh folded; columns expanded to the [i|2g|f|f|o|o] layout and the
    # recurrent matrix padded to 2H rows (the duplicated h-half hits zeros).
    # Recurrent matrices stored in bf16 (f32 accumulation inside the kernel).
    lb = 1.0 / jnp.sqrt(float(H))

    def lstm_dir(k0, k1, k2, k3):
        w_ih = _uniform(k0, (4 * H, C), lb)
        w_hh = _uniform(k1, (4 * H, H), lb)
        b_ih = _uniform(k2, (4 * H,), lb)
        b_hh = _uniform(k3, (4 * H,), lb)
        wi6 = _expand_gate_cols(jnp.transpose(w_ih))                     # (C, 6H)
        wh6 = _expand_gate_cols(jnp.transpose(w_hh))                     # (H, 6H)
        wh6 = jnp.concatenate([wh6, jnp.zeros((H, 6 * H), jnp.float32)], axis=0)  # (2H, 6H)
        b6 = _expand_gate_cols((b_ih + b_hh).reshape(1, 4 * H))          # (1, 6H)
        return wi6, wh6.astype(jnp.bfloat16), b6

    wi_f, wh_f, b_f = lstm_dir(ks[2], ks[3], ks[4], ks[5])
    wi_b, wh_b, b_b = lstm_dir(ks[6], ks[7], ks[8], ks[9])
    p["lstm_wi"] = jnp.concatenate([wi_f, wi_b], axis=1)                 # (C, 12H) f32
    p["lstm_bg"] = jnp.concatenate([b_f, b_b], axis=1)                   # (1, 12H) f32
    p["lstm_whf"] = wh_f                                                 # (2H, 6H) bf16
    p["lstm_whb"] = wh_b                                                 # (2H, 6H) bf16

    # attn: Linear(2H, 1)
    ab = 1.0 / jnp.sqrt(2.0 * H)
    p["attn_w"] = _uniform(ks[10], (1, 2 * H), ab)
    p["attn_b"] = _uniform(ks[11], (1, 1), ab)
    # fc1: Linear(2H, 64)
    f1b = 1.0 / jnp.sqrt(2.0 * H)
    p["fc1_w"] = jnp.transpose(_uniform(ks[12], (FC1, 2 * H), f1b))      # (2H, FC1)
    p["fc1_b"] = _uniform(ks[13], (1, FC1), f1b)
    # fc2: Linear(64, num_classes), lane-padded to OUT_PAD
    f2b = 1.0 / jnp.sqrt(float(FC1))
    w2 = jnp.transpose(_uniform(ks[14], (NUM_CLASSES, FC1), f2b))        # (FC1, NC)
    p["fc2_wp"] = jnp.zeros((FC1, OUT_PAD), jnp.float32).at[:, :NUM_CLASSES].set(w2)
    b2 = _uniform(ks[15], (1, NUM_CLASSES), f2b)
    p["fc2_bp"] = jnp.zeros((1, OUT_PAD), jnp.float32).at[:, :NUM_CLASSES].set(b2)
    return p


if __name__ == "__main__":
    key = jax.random.PRNGKey(0)
    k_x, k_p = jax.random.split(key)
    x = jax.random.normal(k_x, (B, 1, L), jnp.float32)   # PyTorch NCW input
    params = make_params(k_p)

    logits = forward(x, params)
    jax.block_until_ready(logits)
    assert logits.shape == (B, NUM_CLASSES)
    assert bool(jnp.all(jnp.isfinite(logits)))
    print("KERNEL_OK")
</pallas_src>

<mosaic_0001>
module attributes {stable_mosaic.version = 11 : i64} {
  func.func @fused_kernel(%arg0: memref<2x1x16xf32, #tpu.memory_space<vmem>>, %arg1: memref<3x32xf32, #tpu.memory_space<vmem>>, %arg2: memref<1x32xf32, #tpu.memory_space<vmem>>, %arg3: memref<1x32xf32, #tpu.memory_space<vmem>>, %arg4: memref<1x32xf32, #tpu.memory_space<vmem>>, %arg5: memref<32x768xf32, #tpu.memory_space<vmem>>, %arg6: memref<1x768xf32, #tpu.memory_space<vmem>>, %arg7: memref<128x384xbf16, #tpu.memory_space<vmem>>, %arg8: memref<128x384xbf16, #tpu.memory_space<vmem>>, %arg9: memref<1x128xf32, #tpu.memory_space<vmem>>, %arg10: memref<1x1xf32, #tpu.memory_space<vmem>>, %arg11: memref<128x64xf32, #tpu.memory_space<vmem>>, %arg12: memref<1x64xf32, #tpu.memory_space<vmem>>, %arg13: memref<64x128xf32, #tpu.memory_space<vmem>>, %arg14: memref<1x128xf32, #tpu.memory_space<vmem>>, %arg15: memref<2x128xf32, #tpu.memory_space<vmem>>, %arg16: memref<2x16x768xf32, #tpu.memory_space<vmem>>, %arg17: memref<2x16x128xf32, #tpu.memory_space<vmem>>, %arg18: memref<2x16x128xf32, #tpu.memory_space<vmem>>) attributes {dimension_semantics = [], scalar_prefetch = 0 : i64, scratch_operands = 3 : i64, tpu.core_type = #tpu.core_type<tc>} {
    %c0 = arith.constant 0 : index
    %c0_0 = arith.constant 0 : index
    %c0_1 = arith.constant 0 : index
    %0 = vector.load %arg0[%c0, %c0_0, %c0_1] : memref<2x1x16xf32, #tpu.memory_space<vmem>>, vector<2x1x16xf32>
    %1 = vector.shape_cast %0 : vector<2x1x16xf32> to vector<2x16xf32>
    %2 = tpu.iota {dimensions = array<i32: 0>} : vector<16x16xi32>
    %3 = tpu.iota {dimensions = array<i32: 1>} : vector<16x16xi32>
    %c1_i32 = arith.constant 1 : i32
    %4 = vector.broadcast %c1_i32 : i32 to vector<16x16xi32>
    %5 = arith.addi %2, %4 : vector<16x16xi32>
    %6 = arith.cmpi eq, %3, %5 : vector<16x16xi32>
    %7 = arith.extui %6 : vector<16x16xi1> to vector<16x16xi32>
    %8 = arith.sitofp %7 : vector<16x16xi32> to vector<16x16xf32>
    %c1_i32_2 = arith.constant 1 : i32
    %9 = vector.broadcast %c1_i32_2 : i32 to vector<16x16xi32>
    %10 = arith.addi %3, %9 : vector<16x16xi32>
    %11 = arith.cmpi eq, %2, %10 : vector<16x16xi32>
    %12 = arith.extui %11 : vector<16x16xi1> to vector<16x16xi32>
    %13 = arith.sitofp %12 : vector<16x16xi32> to vector<16x16xf32>
    %cst = arith.constant dense<0.000000e+00> : vector<2x16xf32>
    %14 = tpu.matmul %1, %8, %cst {dimension_numbers = #tpu.dot_dimension_numbers<[1], [0], [0], [1], [0, 0, 1, 1], [], []>} : vector<2x16xf32>, vector<16x16xf32>, vector<2x16xf32> -> vector<2x16xf32>
    %cst_3 = arith.constant dense<0.000000e+00> : vector<2x16xf32>
    %15 = tpu.matmul %1, %13, %cst_3 {dimension_numbers = #tpu.dot_dimension_numbers<[1], [0], [0], [1], [0, 0, 1, 1], [], []>} : vector<2x16xf32>, vector<16x16xf32>, vector<2x16xf32> -> vector<2x16xf32>
    %c0_4 = arith.constant 0 : index
    %c0_5 = arith.constant 0 : index
    %16 = vector.load %arg1[%c0_4, %c0_5] : memref<3x32xf32, #tpu.memory_space<vmem>>, vector<3x32xf32>
    %17 = vector.shape_cast %14 : vector<2x16xf32> to vector<2x16x1xf32>
    %18 = vector.extract_strided_slice %16 {offsets = [0, 0], sizes = [1, 32], strides = [1, 1]} : vector<3x32xf32> to vector<1x32xf32>
    %19 = vector.shape_cast %18 : vector<1x32xf32> to vector<1x1x32xf32>
    %20 = vector.broadcast %17 : vector<2x16x1xf32> to vector<2x16x32xf32>
    %21 = vector.broadcast %19 : vector<1x1x32xf32> to vector<2x16x32xf32>
    %22 = arith.mulf %20, %21 : vector<2x16x32xf32>
    %23 = vector.shape_cast %1 : vector<2x16xf32> to vector<2x16x1xf32>
    %24 = vector.extract_strided_slice %16 {offsets = [1, 0], sizes = [1, 32], strides = [1, 1]} : vector<3x32xf32> to vector<1x32xf32>
    %25 = vector.shape_cast %24 : vector<1x32xf32> to vector<1x1x32xf32>
    %26 = vector.broadcast %23 : vector<2x16x1xf32> to vector<2x16x32xf32>
    %27 = vector.broadcast %25 : vector<1x1x32xf32> to vector<2x16x32xf32>
    %28 = arith.mulf %26, %27 : vector<2x16x32xf32>
    %29 = arith.addf %22, %28 : vector<2x16x32xf32>
    %30 = vector.shape_cast %15 : vector<2x16xf32> to vector<2x16x1xf32>
    %31 = vector.extract_strided_slice %16 {offsets = [2, 0], sizes = [1, 32], strides = [1, 1]} : vector<3x32xf32> to vector<1x32xf32>
    %32 = vector.shape_cast %31 : vector<1x32xf32> to vector<1x1x32xf32>
    %33 = vector.broadcast %30 : vector<2x16x1xf32> to vector<2x16x32xf32>
    %34 = vector.broadcast %32 : vector<1x1x32xf32> to vector<2x16x32xf32>
    %35 = arith.mulf %33, %34 : vector<2x16x32xf32>
    %36 = arith.addf %29, %35 : vector<2x16x32xf32>
    %c0_6 = arith.constant 0 : index
    %c0_7 = arith.constant 0 : index
    %37 = vector.load %arg2[%c0_6, %c0_7] : memref<1x32xf32, #tpu.memory_space<vmem>>, vector<1x32xf32>
    %38 = vector.shape_cast %37 : vector<1x32xf32> to vector<1x1x32xf32>
    %39 = vector.broadcast %38 : vector<1x1x32xf32> to vector<2x16x32xf32>
    %40 = arith.addf %36, %39 : vector<2x16x32xf32>
    %cst_8 = arith.constant dense<0.000000e+00> : vector<32xf32>
    %41 = vector.multi_reduction <add>, %40, %cst_8 [0, 1] : vector<2x16x32xf32> to vector<32xf32>
    %42 = vector.shape_cast %41 : vector<32xf32> to vector<1x1x32xf32>
    %cst_9 = arith.constant 3.200000e+01 : f32
    %43 = vector.broadcast %cst_9 : f32 to vector<1x1x32xf32>
    %44 = arith.divf %42, %43 : vector<1x1x32xf32>
    %45 = vector.broadcast %44 : vector<1x1x32xf32> to vector<2x16x32xf32>
    %46 = arith.subf %40, %45 : vector<2x16x32xf32>
    %47 = arith.mulf %46, %46 : vector<2x16x32xf32>
    %cst_10 = arith.constant dense<0.000000e+00> : vector<32xf32>
    %48 = vector.multi_reduction <add>, %47, %cst_10 [0, 1] : vector<2x16x32xf32> to vector<32xf32>
    %49 = vector.shape_cast %48 : vector<32xf32> to vector<1x1x32xf32>
    %cst_11 = arith.constant 3.200000e+01 : f32
    %50 = vector.broadcast %cst_11 : f32 to vector<1x1x32xf32>
    %51 = arith.divf %49, %50 : vector<1x1x32xf32>
    %52 = vector.broadcast %44 : vector<1x1x32xf32> to vector<2x16x32xf32>
    %53 = arith.subf %40, %52 : vector<2x16x32xf32>
    %cst_12 = arith.constant 9.99999974E-6 : f32
    %54 = vector.broadcast %cst_12 : f32 to vector<1x1x32xf32>
    %55 = arith.addf %51, %54 : vector<1x1x32xf32>
    %56 = math.rsqrt %55 : vector<1x1x32xf32>
    %57 = vector.broadcast %56 : vector<1x1x32xf32> to vector<2x16x32xf32>
    %58 = arith.mulf %53, %57 : vector<2x16x32xf32>
    %c0_13 = arith.constant 0 : index
    %c0_14 = arith.constant 0 : index
    %59 = vector.load %arg3[%c0_13, %c0_14] : memref<1x32xf32, #tpu.memory_space<vmem>>, vector<1x32xf32>
    %60 = vector.shape_cast %59 : vector<1x32xf32> to vector<1x1x32xf32>
    %61 = vector.broadcast %60 : vector<1x1x32xf32> to vector<2x16x32xf32>
    %62 = arith.mulf %58, %61 : vector<2x16x32xf32>
    %c0_15 = arith.constant 0 : index
    %c0_16 = arith.constant 0 : index
    %63 = vector.load %arg4[%c0_15, %c0_16] : memref<1x32xf32, #tpu.memory_space<vmem>>, vector<1x32xf32>
    %64 = vector.shape_cast %63 : vector<1x32xf32> to vector<1x1x32xf32>
    %65 = vector.broadcast %64 : vector<1x1x32xf32> to vector<2x16x32xf32>
    %66 = arith.addf %62, %65 : vector<2x16x32xf32>
    %cst_17 = arith.constant 0.000000e+00 : f32
    %67 = vector.broadcast %cst_17 : f32 to vector<2x16x32xf32>
    %68 = arith.maximumf %66, %67 : vector<2x16x32xf32>
    %69 = vector.shape_cast %68 : vector<2x16x32xf32> to vector<32x32xf32>
    %c0_18 = arith.constant 0 : index
    %c0_19 = arith.constant 0 : index
    %70 = vector.load %arg5[%c0_18, %c0_19] : memref<32x768xf32, #tpu.memory_space<vmem>>, vector<32x768xf32>
    %cst_20 = arith.constant dense<0.000000e+00> : vector<32x768xf32>
    %71 = tpu.matmul %69, %70, %cst_20 {dimension_numbers = #tpu.dot_dimension_numbers<[1], [0], [0], [1], [0, 0, 1, 1], [], []>} : vector<32x32xf32>, vector<32x768xf32>, vector<32x768xf32> -> vector<32x768xf32>
    %c0_21 = arith.constant 0 : index
    %c0_22 = arith.constant 0 : index
    %72 = vector.load %arg6[%c0_21, %c0_22] : memref<1x768xf32, #tpu.memory_space<vmem>>, vector<1x768xf32>
    %73 = vector.broadcast %72 : vector<1x768xf32> to vector<32x768xf32>
    %74 = arith.addf %71, %73 : vector<32x768xf32>
    %75 = vector.extract_strided_slice %74 {offsets = [0, 0], sizes = [16, 768], strides = [1, 1]} : vector<32x768xf32> to vector<16x768xf32>
    %c0_23 = arith.constant 0 : index
    %c0_24 = arith.constant 0 : index
    %c0_25 = arith.constant 0 : index
    %76 = vector.load %arg16[%c0_23, %c0_24, %c0_25] : memref<2x16x768xf32, #tpu.memory_space<vmem>>, vector<1x16x768xf32>
    %77 = vector.shape_cast %76 : vector<1x16x768xf32> to vector<16x768xf32>
    %78 = vector.shape_cast %75 : vector<16x768xf32> to vector<1x16x768xf32>
    tpu.vector_store %arg16[%c0_23, %c0_24, %c0_25], %78 {strides = array<i32>} : memref<2x16x768xf32, #tpu.memory_space<vmem>>, vector<1x16x768xf32>,
    %79 = vector.extract_strided_slice %74 {offsets = [16, 0], sizes = [16, 768], strides = [1, 1]} : vector<32x768xf32> to vector<16x768xf32>
    %c1 = arith.constant 1 : index
    %c0_26 = arith.constant 0 : index
    %c0_27 = arith.constant 0 : index
    %80 = vector.load %arg16[%c1, %c0_26, %c0_27] : memref<2x16x768xf32, #tpu.memory_space<vmem>>, vector<1x16x768xf32>
    %81 = vector.shape_cast %80 : vector<1x16x768xf32> to vector<16x768xf32>
    %82 = vector.shape_cast %79 : vector<16x768xf32> to vector<1x16x768xf32>
    tpu.vector_store %arg16[%c1, %c0_26, %c0_27], %82 {strides = array<i32>} : memref<2x16x768xf32, #tpu.memory_space<vmem>>, vector<1x16x768xf32>,
    %83 = tpu.iota {dimensions = array<i32: 1>} : vector<2x128xi32>
    %c64_i32 = arith.constant 64 : i32
    %84 = vector.broadcast %c64_i32 : i32 to vector<2x128xi32>
    %85 = arith.cmpi slt, %83, %84 : vector<2x128xi32>
    %cst_28 = arith.constant 0.000000e+00 : f32
    %86 = vector.broadcast %cst_28 : f32 to vector<2x128xf32>
    %c0_29 = arith.constant 0 : index
    %c0_30 = arith.constant 0 : index
    %c0_31 = arith.constant 0 : index
    %87 = vector.load %arg16[%c0_29, %c0_30, %c0_31] : memref<2x16x768xf32, #tpu.memory_space<vmem>>, vector<2x1x384xf32>
    %88 = vector.shape_cast %87 : vector<2x1x384xf32> to vector<2x384xf32>
    %c0_32 = arith.constant 0 : index
    %c15 = arith.constant 15 : index
    %c384 = arith.constant 384 : index
    %89 = vector.load %arg16[%c0_32, %c15, %c384] : memref<2x16x768xf32, #tpu.memory_space<vmem>>, vector<2x1x384xf32>
    %90 = vector.shape_cast %89 : vector<2x1x384xf32> to vector<2x384xf32>
    %91 = arith.truncf %86 : vector<2x128xf32> to vector<2x128xbf16>
    %c0_33 = arith.constant 0 : index
    %c0_34 = arith.constant 0 : index
    %92 = vector.load %arg7[%c0_33, %c0_34] : memref<128x384xbf16, #tpu.memory_space<vmem>>, vector<128x384xbf16>
    %cst_35 = arith.constant dense<0.000000e+00> : vector<2x384xf32>
    %93 = tpu.matmul %91, %92, %cst_35 {dimension_numbers = #tpu.dot_dimension_numbers<[1], [0], [0], [1], [0, 0, 1, 1], [], []>} : vector<2x128xbf16>, vector<128x384xbf16>, vector<2x384xf32> -> vector<2x384xf32>
    %94 = arith.addf %88, %93 : vector<2x384xf32>
    %95 = arith.negf %94 : vector<2x384xf32>
    %96 = math.exp %95 : vector<2x384xf32>
    %cst_36 = arith.constant 1.000000e+00 : f32
    %97 = vector.broadcast %cst_36 : f32 to vector<2x384xf32>
    %98 = arith.addf %97, %96 : vector<2x384xf32>
    %99 = arith.divf %97, %98 : vector<2x384xf32>
    %100 = vector.extract_strided_slice %99 {offsets = [0, 0], sizes = [2, 128], strides = [1, 1]} : vector<2x384xf32> to vector<2x128xf32>
    %cst_37 = arith.constant 2.000000e+00 : f32
    %101 = vector.broadcast %cst_37 : f32 to vector<2x128xf32>
    %102 = arith.mulf %101, %100 : vector<2x128xf32>
    %cst_38 = arith.constant 1.000000e+00 : f32
    %103 = vector.broadcast %cst_38 : f32 to vector<2x128xf32>
    %104 = arith.subf %102, %103 : vector<2x128xf32>
    %105 = arith.select %85, %100, %104 : vector<2x128xi1>, vector<2x128xf32>
    %c64_i32_39 = arith.constant 64 : i32
    %106 = tpu.dynamic_rotate %105 by %c64_i32_39 dim 1 : vector<2x128xf32>, i32 -> vector<2x128xf32>
    %107 = arith.mulf %105, %106 : vector<2x128xf32>
    %108 = vector.extract_strided_slice %99 {offsets = [0, 128], sizes = [2, 128], strides = [1, 1]} : vector<2x384xf32> to vector<2x128xf32>
    %109 = arith.mulf %108, %86 : vector<2x128xf32>
    %110 = arith.addf %109, %107 : vector<2x128xf32>
    %111 = vector.extract_strided_slice %99 {offsets = [0, 256], sizes = [2, 128], strides = [1, 1]} : vector<2x384xf32> to vector<2x128xf32>
    %112 = math.tanh %110 : vector<2x128xf32>
    %113 = arith.mulf %111, %112 : vector<2x128xf32>
    %114 = arith.truncf %86 : vector<2x128xf32> to vector<2x128xbf16>
    %c0_40 = arith.constant 0 : index
    %c0_41 = arith.constant 0 : index
    %115 = vector.load %arg8[%c0_40, %c0_41] : memref<128x384xbf16, #tpu.memory_space<vmem>>, vector<128x384xbf16>
    %cst_42 = arith.constant dense<0.000000e+00> : vector<2x384xf32>
    %116 = tpu.matmul %114, %115, %cst_42 {dimension_numbers = #tpu.dot_dimension_numbers<[1], [0], [0], [1], [0, 0, 1, 1], [], []>} : vector<2x128xbf16>, vector<128x384xbf16>, vector<2x384xf32> -> vector<2x384xf32>
    %117 = arith.addf %90, %116 : vector<2x384xf32>
    %118 = arith.negf %117 : vector<2x384xf32>
    %119 = math.exp %118 : vector<2x384xf32>
    %cst_43 = arith.constant 1.000000e+00 : f32
    %120 = vector.broadcast %cst_43 : f32 to vector<2x384xf32>
    %121 = arith.addf %120, %119 : vector<2x384xf32>
    %122 = arith.divf %120, %121 : vector<2x384xf32>
    %123 = vector.extract_strided_slice %122 {offsets = [0, 0], sizes = [2, 128], strides = [1, 1]} : vector<2x384xf32> to vector<2x128xf32>
    %cst_44 = arith.constant 2.000000e+00 : f32
    %124 = vector.broadcast %cst_44 : f32 to vector<2x128xf32>
    %125 = arith.mulf %124, %123 : vector<2x128xf32>
    %cst_45 = arith.constant 1.000000e+00 : f32
    %126 = vector.broadcast %cst_45 : f32 to vector<2x128xf32>
    %127 = arith.subf %125, %126 : vector<2x128xf32>
    %128 = arith.select %85, %123, %127 : vector<2x128xi1>, vector<2x128xf32>
    %c64_i32_46 = arith.constant 64 : i32
    %129 = tpu.dynamic_rotate %128 by %c64_i32_46 dim 1 : vector<2x128xf32>, i32 -> vector<2x128xf32>
    %130 = arith.mulf %128, %129 : vector<2x128xf32>
    %131 = vector.extract_strided_slice %122 {offsets = [0, 128], sizes = [2, 128], strides = [1, 1]} : vector<2x384xf32> to vector<2x128xf32>
    %132 = arith.mulf %131, %86 : vector<2x128xf32>
    %133 = arith.addf %132, %130 : vector<2x128xf32>
    %134 = vector.extract_strided_slice %122 {offsets = [0, 256], sizes = [2, 128], strides = [1, 1]} : vector<2x384xf32> to vector<2x128xf32>
    %135 = math.tanh %133 : vector<2x128xf32>
    %136 = arith.mulf %134, %135 : vector<2x128xf32>
    %c0_47 = arith.constant 0 : index
    %c0_48 = arith.constant 0 : index
    %c0_49 = arith.constant 0 : index
    %137 = vector.load %arg17[%c0_47, %c0_48, %c0_49] : memref<2x16x128xf32, #tpu.memory_space<vmem>>, vector<2x1x128xf32>
    %138 = vector.shape_cast %137 : vector<2x1x128xf32> to vector<2x128xf32>
    %139 = vector.shape_cast %113 : vector<2x128xf32> to vector<2x1x128xf32>
    tpu.vector_store %arg17[%c0_47, %c0_48, %c0_49], %139 {strides = array<i32>} : memref<2x16x128xf32, #tpu.memory_space<vmem>>, vector<2x1x128xf32>,
    %c0_50 = arith.constant 0 : index
    %c15_51 = arith.constant 15 : index
    %c0_52 = arith.constant 0 : index
    %140 = vector.load %arg18[%c0_50, %c15_51, %c0_52] : memref<2x16x128xf32, #tpu.memory_space<vmem>>, vector<2x1x128xf32>
    %141 = vector.shape_cast %140 : vector<2x1x128xf32> to vector<2x128xf32>
    %142 = vector.shape_cast %136 : vector<2x128xf32> to vector<2x1x128xf32>
    tpu.vector_store %arg18[%c0_50, %c15_51, %c0_52], %142 {strides = array<i32>} : memref<2x16x128xf32, #tpu.memory_space<vmem>>, vector<2x1x128xf32>,
    %c0_53 = arith.constant 0 : index
    %c1_54 = arith.constant 1 : index
    %c0_55 = arith.constant 0 : index
    %143 = vector.load %arg16[%c0_53, %c1_54, %c0_55] : memref<2x16x768xf32, #tpu.memory_space<vmem>>, vector<2x1x384xf32>
    %144 = vector.shape_cast %143 : vector<2x1x384xf32> to vector<2x384xf32>
    %c0_56 = arith.constant 0 : index
    %c14 = arith.constant 14 : index
    %c384_57 = arith.constant 384 : index
    %145 = vector.load %arg16[%c0_56, %c14, %c384_57] : memref<2x16x768xf32, #tpu.memory_space<vmem>>, vector<2x1x384xf32>
    %146 = vector.shape_cast %145 : vector<2x1x384xf32> to vector<2x384xf32>
    %147 = arith.truncf %113 : vector<2x128xf32> to vector<2x128xbf16>
    %c0_58 = arith.constant 0 : index
    %c0_59 = arith.constant 0 : index
    %148 = vector.load %arg7[%c0_58, %c0_59] : memref<128x384xbf16, #tpu.memory_space<vmem>>, vector<128x384xbf16>
    %cst_60 = arith.constant dense<0.000000e+00> : vector<2x384xf32>
    %149 = tpu.matmul %147, %148, %cst_60 {dimension_numbers = #tpu.dot_dimension_numbers<[1], [0], [0], [1], [0, 0, 1, 1], [], []>} : vector<2x128xbf16>, vector<128x384xbf16>, vector<2x384xf32> -> vector<2x384xf32>
    %150 = arith.addf %144, %149 : vector<2x384xf32>
    %151 = arith.negf %150 : vector<2x384xf32>
    %152 = math.exp %151 : vector<2x384xf32>
    %cst_61 = arith.constant 1.000000e+00 : f32
    %153 = vector.broadcast %cst_61 : f32 to vector<2x384xf32>
    %154 = arith.addf %153, %152 : vector<2x384xf32>
    %155 = arith.divf %153, %154 : vector<2x384xf32>
    %156 = vector.extract_strided_slice %155 {offsets = [0, 0], sizes = [2, 128], strides = [1, 1]} : vector<2x384xf32> to vector<2x128xf32>
    %cst_62 = arith.constant 2.000000e+00 : f32
    %157 = vector.broadcast %cst_62 : f32 to vector<2x128xf32>
    %158 = arith.mulf %157, %156 : vector<2x128xf32>
    %cst_63 = arith.constant 1.000000e+00 : f32
    %159 = vector.broadcast %cst_63 : f32 to vector<2x128xf32>
    %160 = arith.subf %158, %159 : vector<2x128xf32>
    %161 = arith.select %85, %156, %160 : vector<2x128xi1>, vector<2x128xf32>
    %c64_i32_64 = arith.constant 64 : i32
    %162 = tpu.dynamic_rotate %161 by %c64_i32_64 dim 1 : vector<2x128xf32>, i32 -> vector<2x128xf32>
    %163 = arith.mulf %161, %162 : vector<2x128xf32>
    %164 = vector.extract_strided_slice %155 {offsets = [0, 128], sizes = [2, 128], strides = [1, 1]} : vector<2x384xf32> to vector<2x128xf32>
    %165 = arith.mulf %164, %110 : vector<2x128xf32>
    %166 = arith.addf %165, %163 : vector<2x128xf32>
    %167 = vector.extract_strided_slice %155 {offsets = [0, 256], sizes = [2, 128], strides = [1, 1]} : vector<2x384xf32> to vector<2x128xf32>
    %168 = math.tanh %166 : vector<2x128xf32>
    %169 = arith.mulf %167, %168 : vector<2x128xf32>
    %170 = arith.truncf %136 : vector<2x128xf32> to vector<2x128xbf16>
    %c0_65 = arith.constant 0 : index
    %c0_66 = arith.constant 0 : index
    %171 = vector.load %arg8[%c0_65, %c0_66] : memref<128x384xbf16, #tpu.memory_space<vmem>>, vector<128x384xbf16>
    %cst_67 = arith.constant dense<0.000000e+00> : vector<2x384xf32>
    %172 = tpu.matmul %170, %171, %cst_67 {dimension_numbers = #tpu.dot_dimension_numbers<[1], [0], [0], [1], [0, 0, 1, 1], [], []>} : vector<2x128xbf16>, vector<128x384xbf16>, vector<2x384xf32> -> vector<2x384xf32>
    %173 = arith.addf %146, %172 : vector<2x384xf32>
    %174 = arith.negf %173 : vector<2x384xf32>
    %175 = math.exp %174 : vector<2x384xf32>
    %cst_68 = arith.constant 1.000000e+00 : f32
    %176 = vector.broadcast %cst_68 : f32 to vector<2x384xf32>
    %177 = arith.addf %176, %175 : vector<2x384xf32>
    %178 = arith.divf %176, %177 : vector<2x384xf32>
    %179 = vector.extract_strided_slice %178 {offsets = [0, 0], sizes = [2, 128], strides = [1, 1]} : vector<2x384xf32> to vector<2x128xf32>
    %cst_69 = arith.constant 2.000000e+00 : f32
    %180 = vector.broadcast %cst_69 : f32 to vector<2x128xf32>
    %181 = arith.mulf %180, %179 : vector<2x128xf32>
    %cst_70 = arith.constant 1.000000e+00 : f32
    %182 = vector.broadcast %cst_70 : f32 to vector<2x128xf32>
    %183 = arith.subf %181, %182 : vector<2x128xf32>
    %184 = arith.select %85, %179, %183 : vector<2x128xi1>, vector<2x128xf32>
    %c64_i32_71 = arith.constant 64 : i32
    %185 = tpu.dynamic_rotate %184 by %c64_i32_71 dim 1 : vector<2x128xf32>, i32 -> vector<2x128xf32>
    %186 = arith.mulf %184, %185 : vector<2x128xf32>
    %187 = vector.extract_strided_slice %178 {offsets = [0, 128], sizes = [2, 128], strides = [1, 1]} : vector<2x384xf32> to vector<2x128xf32>
    %188 = arith.mulf %187, %133 : vector<2x128xf32>
    %189 = arith.addf %188, %186 : vector<2x128xf32>
    %190 = vector.extract_strided_slice %178 {offsets = [0, 256], sizes = [2, 128], strides = [1, 1]} : vector<2x384xf32> to vector<2x128xf32>
    %191 = math.tanh %189 : vector<2x128xf32>
    %192 = arith.mulf %190, %191 : vector<2x128xf32>
    %c0_72 = arith.constant 0 : index
    %c1_73 = arith.constant 1 : index
    %c0_74 = arith.constant 0 : index
    %193 = vector.load %arg17[%c0_72, %c1_73, %c0_74] : memref<2x16x128xf32, #tpu.memory_space<vmem>>, vector<2x1x128xf32>
    %194 = vector.shape_cast %193 : vector<2x1x128xf32> to vector<2x128xf32>
    %195 = vector.shape_cast %169 : vector<2x128xf32> to vector<2x1x128xf32>
    tpu.vector_store %arg17[%c0_72, %c1_73, %c0_74], %195 {strides = array<i32>} : memref<2x16x128xf32, #tpu.memory_space<vmem>>, vector<2x1x128xf32>,
    %c0_75 = arith.constant 0 : index
    %c14_76 = arith.constant 14 : index
    %c0_77 = arith.constant 0 : index
    %196 = vector.load %arg18[%c0_75, %c14_76, %c0_77] : memref<2x16x128xf32, #tpu.memory_space<vmem>>, vector<2x1x128xf32>
    %197 = vector.shape_cast %196 : vector<2x1x128xf32> to vector<2x128xf32>
    %198 = vector.shape_cast %192 : vector<2x128xf32> to vector<2x1x128xf32>
    tpu.vector_store %arg18[%c0_75, %c14_76, %c0_77], %198 {strides = array<i32>} : memref<2x16x128xf32, #tpu.memory_space<vmem>>, vector<2x1x128xf32>,
    %c0_78 = arith.constant 0 : index
    %c2 = arith.constant 2 : index
    %c0_79 = arith.constant 0 : index
    %199 = vector.load %arg16[%c0_78, %c2, %c0_79] : memref<2x16x768xf32, #tpu.memory_space<vmem>>, vector<2x1x384xf32>
    %200 = vector.shape_cast %199 : vector<2x1x384xf32> to vector<2x384xf32>
    %c0_80 = arith.constant 0 : index
    %c13 = arith.constant 13 : index
    %c384_81 = arith.constant 384 : index
    %201 = vector.load %arg16[%c0_80, %c13, %c384_81] : memref<2x16x768xf32, #tpu.memory_space<vmem>>, vector<2x1x384xf32>
    %202 = vector.shape_cast %201 : vector<2x1x384xf32> to vector<2x384xf32>
    %203 = arith.truncf %169 : vector<2x128xf32> to vector<2x128xbf16>
    %c0_82 = arith.constant 0 : index
    %c0_83 = arith.constant 0 : index
    %204 = vector.load %arg7[%c0_82, %c0_83] : memref<128x384xbf16, #tpu.memory_space<vmem>>, vector<128x384xbf16>
    %cst_84 = arith.constant dense<0.000000e+00> : vector<2x384xf32>
    %205 = tpu.matmul %203, %204, %cst_84 {dimension_numbers = #tpu.dot_dimension_numbers<[1], [0], [0], [1], [0, 0, 1, 1], [], []>} : vector<2x128xbf16>, vector<128x384xbf16>, vector<2x384xf32> -> vector<2x384xf32>
    %206 = arith.addf %200, %205 : vector<2x384xf32>
    %207 = arith.negf %206 : vector<2x384xf32>
    %208 = math.exp %207 : vector<2x384xf32>
    %cst_85 = arith.constant 1.000000e+00 : f32
    %209 = vector.broadcast %cst_85 : f32 to vector<2x384xf32>
    %210 = arith.addf %209, %208 : vector<2x384xf32>
    %211 = arith.divf %209, %210 : vector<2x384xf32>
    %212 = vector.extract_strided_slice %211 {offsets = [0, 0], sizes = [2, 128], strides = [1, 1]} : vector<2x384xf32> to vector<2x128xf32>
    %cst_86 = arith.constant 2.000000e+00 : f32
    %213 = vector.broadcast %cst_86 : f32 to vector<2x128xf32>
    %214 = arith.mulf %213, %212 : vector<2x128xf32>
    %cst_87 = arith.constant 1.000000e+00 : f32
    %215 = vector.broadcast %cst_87 : f32 to vector<2x128xf32>
    %216 = arith.subf %214, %215 : vector<2x128xf32>
    %217 = arith.select %85, %212, %216 : vector<2x128xi1>, vector<2x128xf32>
    %c64_i32_88 = arith.constant 64 : i32
    %218 = tpu.dynamic_rotate %217 by %c64_i32_88 dim 1 : vector<2x128xf32>, i32 -> vector<2x128xf32>
    %219 = arith.mulf %217, %218 : vector<2x128xf32>
    %220 = vector.extract_strided_slice %211 {offsets = [0, 128], sizes = [2, 128], strides = [1, 1]} : vector<2x384xf32> to vector<2x128xf32>
    %221 = arith.mulf %220, %166 : vector<2x128xf32>
    %222 = arith.addf %221, %219 : vector<2x128xf32>
    %223 = vector.extract_strided_slice %211 {offsets = [0, 256], sizes = [2, 128], strides = [1, 1]} : vector<2x384xf32> to vector<2x128xf32>
    %224 = math.tanh %222 : vector<2x128xf32>
    %225 = arith.mulf %223, %224 : vector<2x128xf32>
    %226 = arith.truncf %192 : vector<2x128xf32> to vector<2x128xbf16>
    %c0_89 = arith.constant 0 : index
    %c0_90 = arith.constant 0 : index
    %227 = vector.load %arg8[%c0_89, %c0_90] : memref<128x384xbf16, #tpu.memory_space<vmem>>, vector<128x384xbf16>
    %cst_91 = arith.constant dense<0.000000e+00> : vector<2x384xf32>
    %228 = tpu.matmul %226, %227, %cst_91 {dimension_numbers = #tpu.dot_dimension_numbers<[1], [0], [0], [1], [0, 0, 1, 1], [], []>} : vector<2x128xbf16>, vector<128x384xbf16>, vector<2x384xf32> -> vector<2x384xf32>
    %229 = arith.addf %202, %228 : vector<2x384xf32>
    %230 = arith.negf %229 : vector<2x384xf32>
    %231 = math.exp %230 : vector<2x384xf32>
    %cst_92 = arith.constant 1.000000e+00 : f32
    %232 = vector.broadcast %cst_92 : f32 to vector<2x384xf32>
    %233 = arith.addf %232, %231 : vector<2x384xf32>
    %234 = arith.divf %232, %233 : vector<2x384xf32>
    %235 = vector.extract_strided_slice %234 {offsets = [0, 0], sizes = [2, 128], strides = [1, 1]} : vector<2x384xf32> to vector<2x128xf32>
    %cst_93 = arith.constant 2.000000e+00 : f32
    %236 = vector.broadcast %cst_93 : f32 to vector<2x128xf32>
    %237 = arith.mulf %236, %235 : vector<2x128xf32>
    %cst_94 = arith.constant 1.000000e+00 : f32
    %238 = vector.broadcast %cst_94 : f32 to vector<2x128xf32>
    %239 = arith.subf %237, %238 : vector<2x128xf32>
    %240 = arith.select %85, %235, %239 : vector<2x128xi1>, vector<2x128xf32>
    %c64_i32_95 = arith.constant 64 : i32
    %241 = tpu.dynamic_rotate %240 by %c64_i32_95 dim 1 : vector<2x128xf32>, i32 -> vector<2x128xf32>
    %242 = arith.mulf %240, %241 : vector<2x128xf32>
    %243 = vector.extract_strided_slice %234 {offsets = [0, 128], sizes = [2, 128], strides = [1, 1]} : vector<2x384xf32> to vector<2x128xf32>
    %244 = arith.mulf %243, %189 : vector<2x128xf32>
    %245 = arith.addf %244, %242 : vector<2x128xf32>
    %246 = vector.extract_strided_slice %234 {offsets = [0, 256], sizes = [2, 128], strides = [1, 1]} : vector<2x384xf32> to vector<2x128xf32>
    %247 = math.tanh %245 : vector<2x128xf32>
    %248 = arith.mulf %246, %247 : vector<2x128xf32>
    %c0_96 = arith.constant 0 : index
    %c2_97 = arith.constant 2 : index
    %c0_98 = arith.constant 0 : index
    %249 = vector.load %arg17[%c0_96, %c2_97, %c0_98] : memref<2x16x128xf32, #tpu.memory_space<vmem>>, vector<2x1x128xf32>
    %250 = vector.shape_cast %249 : vector<2x1x128xf32> to vector<2x128xf32>
    %251 = vector.shape_cast %225 : vector<2x128xf32> to vector<2x1x128xf32>
    tpu.vector_store %arg17[%c0_96, %c2_97, %c0_98], %251 {strides = array<i32>} : memref<2x16x128xf32, #tpu.memory_space<vmem>>, vector<2x1x128xf32>,
    %c0_99 = arith.constant 0 : index
    %c13_100 = arith.constant 13 : index
    %c0_101 = arith.constant 0 : index
    %252 = vector.load %arg18[%c0_99, %c13_100, %c0_101] : memref<2x16x128xf32, #tpu.memory_space<vmem>>, vector<2x1x128xf32>
    %253 = vector.shape_cast %252 : vector<2x1x128xf32> to vector<2x128xf32>
    %254 = vector.shape_cast %248 : vector<2x128xf32> to vector<2x1x128xf32>
    tpu.vector_store %arg18[%c0_99, %c13_100, %c0_101], %254 {strides = array<i32>} : memref<2x16x128xf32, #tpu.memory_space<vmem>>, vector<2x1x128xf32>,
    %c0_102 = arith.constant 0 : index
    %c3 = arith.constant 3 : index
    %c0_103 = arith.constant 0 : index
    %255 = vector.load %arg16[%c0_102, %c3, %c0_103] : memref<2x16x768xf32, #tpu.memory_space<vmem>>, vector<2x1x384xf32>
    %256 = vector.shape_cast %255 : vector<2x1x384xf32> to vector<2x384xf32>
    %c0_104 = arith.constant 0 : index
    %c12 = arith.constant 12 : index
    %c384_105 = arith.constant 384 : index
    %257 = vector.load %arg16[%c0_104, %c12, %c384_105] : memref<2x16x768xf32, #tpu.memory_space<vmem>>, vector<2x1x384xf32>
    %258 = vector.shape_cast %257 : vector<2x1x384xf32> to vector<2x384xf32>
    %259 = arith.truncf %225 : vector<2x128xf32> to vector<2x128xbf16>
    %c0_106 = arith.constant 0 : index
    %c0_107 = arith.constant 0 : index
    %260 = vector.load %arg7[%c0_106, %c0_107] : memref<128x384xbf16, #tpu.memory_space<vmem>>, vector<128x384xbf16>
    %cst_108 = arith.constant dense<0.000000e+00> : vector<2x384xf32>
    %261 = tpu.matmul %259, %260, %cst_108 {dimension_numbers = #tpu.dot_dimension_numbers<[1], [0], [0], [1], [0, 0, 1, 1], [], []>} : vector<2x128xbf16>, vector<128x384xbf16>, vector<2x384xf32> -> vector<2x384xf32>
    %262 = arith.addf %256, %261 : vector<2x384xf32>
    %263 = arith.negf %262 : vector<2x384xf32>
    %264 = math.exp %263 : vector<2x384xf32>
    %cst_109 = arith.constant 1.000000e+00 : f32
    %265 = vector.broadcast %cst_109 : f32 to vector<2x384xf32>
    %266 = arith.addf %265, %264 : vector<2x384xf32>
    %267 = arith.divf %265, %266 : vector<2x384xf32>
    %268 = vector.extract_strided_slice %267 {offsets = [0, 0], sizes = [2, 128], strides = [1, 1]} : vector<2x384xf32> to vector<2x128xf32>
    %cst_110 = arith.constant 2.000000e+00 : f32
    %269 = vector.broadcast %cst_110 : f32 to vector<2x128xf32>
    %270 = arith.mulf %269, %268 : vector<2x128xf32>
    %cst_111 = arith.constant 1.000000e+00 : f32
    %271 = vector.broadcast %cst_111 : f32 to vector<2x128xf32>
    %272 = arith.subf %270, %271 : vector<2x128xf32>
    %273 = arith.select %85, %268, %272 : vector<2x128xi1>, vector<2x128xf32>
    %c64_i32_112 = arith.constant 64 : i32
    %274 = tpu.dynamic_rotate %273 by %c64_i32_112 dim 1 : vector<2x128xf32>, i32 -> vector<2x128xf32>
    %275 = arith.mulf %273, %274 : vector<2x128xf32>
    %276 = vector.extract_strided_slice %267 {offsets = [0, 128], sizes = [2, 128], strides = [1, 1]} : vector<2x384xf32> to vector<2x128xf32>
    %277 = arith.mulf %276, %222 : vector<2x128xf32>
    %278 = arith.addf %277, %275 : vector<2x128xf32>
    %279 = vector.extract_strided_slice %267 {offsets = [0, 256], sizes = [2, 128], strides = [1, 1]} : vector<2x384xf32> to vector<2x128xf32>
    %280 = math.tanh %278 : vector<2x128xf32>
    %281 = arith.mulf %279, %280 : vector<2x128xf32>
    %282 = arith.truncf %248 : vector<2x128xf32> to vector<2x128xbf16>
    %c0_113 = arith.constant 0 : index
    %c0_114 = arith.constant 0 : index
    %283 = vector.load %arg8[%c0_113, %c0_114] : memref<128x384xbf16, #tpu.memory_space<vmem>>, vector<128x384xbf16>
    %cst_115 = arith.constant dense<0.000000e+00> : vector<2x384xf32>
    %284 = tpu.matmul %282, %283, %cst_115 {dimension_numbers = #tpu.dot_dimension_numbers<[1], [0], [0], [1], [0, 0, 1, 1], [], []>} : vector<2x128xbf16>, vector<128x384xbf16>, vector<2x384xf32> -> vector<2x384xf32>
    %285 = arith.addf %258, %284 : vector<2x384xf32>
    %286 = arith.negf %285 : vector<2x384xf32>
    %287 = math.exp %286 : vector<2x384xf32>
    %cst_116 = arith.constant 1.000000e+00 : f32
    %288 = vector.broadcast %cst_116 : f32 to vector<2x384xf32>
    %289 = arith.addf %288, %287 : vector<2x384xf32>
    %290 = arith.divf %288, %289 : vector<2x384xf32>
    %291 = vector.extract_strided_slice %290 {offsets = [0, 0], sizes = [2, 128], strides = [1, 1]} : vector<2x384xf32> to vector<2x128xf32>
    %cst_117 = arith.constant 2.000000e+00 : f32
    %292 = vector.broadcast %cst_117 : f32 to vector<2x128xf32>
    %293 = arith.mulf %292, %291 : vector<2x128xf32>
    %cst_118 = arith.constant 1.000000e+00 : f32
    %294 = vector.broadcast %cst_118 : f32 to vector<2x128xf32>
    %295 = arith.subf %293, %294 : vector<2x128xf32>
    %296 = arith.select %85, %291, %295 : vector<2x128xi1>, vector<2x128xf32>
    %c64_i32_119 = arith.constant 64 : i32
    %297 = tpu.dynamic_rotate %296 by %c64_i32_119 dim 1 : vector<2x128xf32>, i32 -> vector<2x128xf32>
    %298 = arith.mulf %296, %297 : vector<2x128xf32>
    %299 = vector.extract_strided_slice %290 {offsets = [0, 128], sizes = [2, 128], strides = [1, 1]} : vector<2x384xf32> to vector<2x128xf32>
    %300 = arith.mulf %299, %245 : vector<2x128xf32>
    %301 = arith.addf %300, %298 : vector<2x128xf32>
    %302 = vector.extract_strided_slice %290 {offsets = [0, 256], sizes = [2, 128], strides = [1, 1]} : vector<2x384xf32> to vector<2x128xf32>
    %303 = math.tanh %301 : vector<2x128xf32>
    %304 = arith.mulf %302, %303 : vector<2x128xf32>
    %c0_120 = arith.constant 0 : index
    %c3_121 = arith.constant 3 : index
    %c0_122 = arith.constant 0 : index
    %305 = vector.load %arg17[%c0_120, %c3_121, %c0_122] : memref<2x16x128xf32, #tpu.memory_space<vmem>>, vector<2x1x128xf32>
    %306 = vector.shape_cast %305 : vector<2x1x128xf32> to vector<2x128xf32>
    %307 = vector.shape_cast %281 : vector<2x128xf32> to vector<2x1x128xf32>
    tpu.vector_store %arg17[%c0_120, %c3_121, %c0_122], %307 {strides = array<i32>} : memref<2x16x128xf32, #tpu.memory_space<vmem>>, vector<2x1x128xf32>,
    %c0_123 = arith.constant 0 : index
    %c12_124 = arith.constant 12 : index
    %c0_125 = arith.constant 0 : index
    %308 = vector.load %arg18[%c0_123, %c12_124, %c0_125] : memref<2x16x128xf32, #tpu.memory_space<vmem>>, vector<2x1x128xf32>
    %309 = vector.shape_cast %308 : vector<2x1x128xf32> to vector<2x128xf32>
    %310 = vector.shape_cast %304 : vector<2x128xf32> to vector<2x1x128xf32>
    tpu.vector_store %arg18[%c0_123, %c12_124, %c0_125], %310 {strides = array<i32>} : memref<2x16x128xf32, #tpu.memory_space<vmem>>, vector<2x1x128xf32>,
    %c0_126 = arith.constant 0 : index
    %c4 = arith.constant 4 : index
    %c0_127 = arith.constant 0 : index
    %311 = vector.load %arg16[%c0_126, %c4, %c0_127] : memref<2x16x768xf32, #tpu.memory_space<vmem>>, vector<2x1x384xf32>
    %312 = vector.shape_cast %311 : vector<2x1x384xf32> to vector<2x384xf32>
    %c0_128 = arith.constant 0 : index
    %c11 = arith.constant 11 : index
    %c384_129 = arith.constant 384 : index
    %313 = vector.load %arg16[%c0_128, %c11, %c384_129] : memref<2x16x768xf32, #tpu.memory_space<vmem>>, vector<2x1x384xf32>
    %314 = vector.shape_cast %313 : vector<2x1x384xf32> to vector<2x384xf32>
    %315 = arith.truncf %281 : vector<2x128xf32> to vector<2x128xbf16>
    %c0_130 = arith.constant 0 : index
    %c0_131 = arith.constant 0 : index
    %316 = vector.load %arg7[%c0_130, %c0_131] : memref<128x384xbf16, #tpu.memory_space<vmem>>, vector<128x384xbf16>
    %cst_132 = arith.constant dense<0.000000e+00> : vector<2x384xf32>
    %317 = tpu.matmul %315, %316, %cst_132 {dimension_numbers = #tpu.dot_dimension_numbers<[1], [0], [0], [1], [0, 0, 1, 1], [], []>} : vector<2x128xbf16>, vector<128x384xbf16>, vector<2x384xf32> -> vector<2x384xf32>
    %318 = arith.addf %312, %317 : vector<2x384xf32>
    %319 = arith.negf %318 : vector<2x384xf32>
    %320 = math.exp %319 : vector<2x384xf32>
    %cst_133 = arith.constant 1.000000e+00 : f32
    %321 = vector.broadcast %cst_133 : f32 to vector<2x384xf32>
    %322 = arith.addf %321, %320 : vector<2x384xf32>
    %323 = arith.divf %321, %322 : vector<2x384xf32>
    %324 = vector.extract_strided_slice %323 {offsets = [0, 0], sizes = [2, 128], strides = [1, 1]} : vector<2x384xf32> to vector<2x128xf32>
    %cst_134 = arith.constant 2.000000e+00 : f32
    %325 = vector.broadcast %cst_134 : f32 to vector<2x128xf32>
    %326 = arith.mulf %325, %324 : vector<2x128xf32>
    %cst_135 = arith.constant 1.000000e+00 : f32
    %327 = vector.broadcast %cst_135 : f32 to vector<2x128xf32>
    %328 = arith.subf %326, %327 : vector<2x128xf32>
    %329 = arith.select %85, %324, %328 : vector<2x128xi1>, vector<2x128xf32>
    %c64_i32_136 = arith.constant 64 : i32
    %330 = tpu.dynamic_rotate %329 by %c64_i32_136 dim 1 : vector<2x128xf32>, i32 -> vector<2x128xf32>
    %331 = arith.mulf %329, %330 : vector<2x128xf32>
    %332 = vector.extract_strided_slice %323 {offsets = [0, 128], sizes = [2, 128], strides = [1, 1]} : vector<2x384xf32> to vector<2x128xf32>
    %333 = arith.mulf %332, %278 : vector<2x128xf32>
    %334 = arith.addf %333, %331 : vector<2x128xf32>
    %335 = vector.extract_strided_slice %323 {offsets = [0, 256], sizes = [2, 128], strides = [1, 1]} : vector<2x384xf32> to vector<2x128xf32>
    %336 = math.tanh %334 : vector<2x128xf32>
    %337 = arith.mulf %335, %336 : vector<2x128xf32>
    %338 = arith.truncf %304 : vector<2x128xf32> to vector<2x128xbf16>
    %c0_137 = arith.constant 0 : index
    %c0_138 = arith.constant 0 : index
    %339 = vector.load %arg8[%c0_137, %c0_138] : memref<128x384xbf16, #tpu.memory_space<vmem>>, vector<128x384xbf16>
    %cst_139 = arith.constant dense<0.000000e+00> : vector<2x384xf32>
    %340 = tpu.matmul %338, %339, %cst_139 {dimension_numbers = #tpu.dot_dimension_numbers<[1], [0], [0], [1], [0, 0, 1, 1], [], []>} : vector<2x128xbf16>, vector<128x384xbf16>, vector<2x384xf32> -> vector<2x384xf32>
    %341 = arith.addf %314, %340 : vector<2x384xf32>
    %342 = arith.negf %341 : vector<2x384xf32>
    %343 = math.exp %342 : vector<2x384xf32>
    %cst_140 = arith.constant 1.000000e+00 : f32
    %344 = vector.broadcast %cst_140 : f32 to vector<2x384xf32>
    %345 = arith.addf %344, %343 : vector<2x384xf32>
    %346 = arith.divf %344, %345 : vector<2x384xf32>
    %347 = vector.extract_strided_slice %346 {offsets = [0, 0], sizes = [2, 128], strides = [1, 1]} : vector<2x384xf32> to vector<2x128xf32>
    %cst_141 = arith.constant 2.000000e+00 : f32
    %348 = vector.broadcast %cst_141 : f32 to vector<2x128xf32>
    %349 = arith.mulf %348, %347 : vector<2x128xf32>
    %cst_142 = arith.constant 1.000000e+00 : f32
    %350 = vector.broadcast %cst_142 : f32 to vector<2x128xf32>
    %351 = arith.subf %349, %350 : vector<2x128xf32>
    %352 = arith.select %85, %347, %351 : vector<2x128xi1>, vector<2x128xf32>
    %c64_i32_143 = arith.constant 64 : i32
    %353 = tpu.dynamic_rotate %352 by %c64_i32_143 dim 1 : vector<2x128xf32>, i32 -> vector<2x128xf32>
    %354 = arith.mulf %352, %353 : vector<2x128xf32>
    %355 = vector.extract_strided_slice %346 {offsets = [0, 128], sizes = [2, 128], strides = [1, 1]} : vector<2x384xf32> to vector<2x128xf32>
    %356 = arith.mulf %355, %301 : vector<2x128xf32>
    %357 = arith.addf %356, %354 : vector<2x128xf32>
    %358 = vector.extract_strided_slice %346 {offsets = [0, 256], sizes = [2, 128], strides = [1, 1]} : vector<2x384xf32> to vector<2x128xf32>
    %359 = math.tanh %357 : vector<2x128xf32>
    %360 = arith.mulf %358, %359 : vector<2x128xf32>
    %c0_144 = arith.constant 0 : index
    %c4_145 = arith.constant 4 : index
    %c0_146 = arith.constant 0 : index
    %361 = vector.load %arg17[%c0_144, %c4_145, %c0_146] : memref<2x16x128xf32, #tpu.memory_space<vmem>>, vector<2x1x128xf32>
    %362 = vector.shape_cast %361 : vector<2x1x128xf32> to vector<2x128xf32>
    %363 = vector.shape_cast %337 : vector<2x128xf32> to vector<2x1x128xf32>
    tpu.vector_store %arg17[%c0_144, %c4_145, %c0_146], %363 {strides = array<i32>} : memref<2x16x128xf32, #tpu.memory_space<vmem>>, vector<2x1x128xf32>,
    %c0_147 = arith.constant 0 : index
    %c11_148 = arith.constant 11 : index
    %c0_149 = arith.constant 0 : index
    %364 = vector.load %arg18[%c0_147, %c11_148, %c0_149] : memref<2x16x128xf32, #tpu.memory_space<vmem>>, vector<2x1x128xf32>
    %365 = vector.shape_cast %364 : vector<2x1x128xf32> to vector<2x128xf32>
    %366 = vector.shape_cast %360 : vector<2x128xf32> to vector<2x1x128xf32>
    tpu.vector_store %arg18[%c0_147, %c11_148, %c0_149], %366 {strides = array<i32>} : memref<2x16x128xf32, #tpu.memory_space<vmem>>, vector<2x1x128xf32>,
    %c0_150 = arith.constant 0 : index
    %c5 = arith.constant 5 : index
    %c0_151 = arith.constant 0 : index
    %367 = vector.load %arg16[%c0_150, %c5, %c0_151] : memref<2x16x768xf32, #tpu.memory_space<vmem>>, vector<2x1x384xf32>
    %368 = vector.shape_cast %367 : vector<2x1x384xf32> to vector<2x384xf32>
    %c0_152 = arith.constant 0 : index
    %c10 = arith.constant 10 : index
    %c384_153 = arith.constant 384 : index
    %369 = vector.load %arg16[%c0_152, %c10, %c384_153] : memref<2x16x768xf32, #tpu.memory_space<vmem>>, vector<2x1x384xf32>
    %370 = vector.shape_cast %369 : vector<2x1x384xf32> to vector<2x384xf32>
    %371 = arith.truncf %337 : vector<2x128xf32> to vector<2x128xbf16>
    %c0_154 = arith.constant 0 : index
    %c0_155 = arith.constant 0 : index
    %372 = vector.load %arg7[%c0_154, %c0_155] : memref<128x384xbf16, #tpu.memory_space<vmem>>, vector<128x384xbf16>
    %cst_156 = arith.constant dense<0.000000e+00> : vector<2x384xf32>
    %373 = tpu.matmul %371, %372, %cst_156 {dimension_numbers = #tpu.dot_dimension_numbers<[1], [0], [0], [1], [0, 0, 1, 1], [], []>} : vector<2x128xbf16>, vector<128x384xbf16>, vector<2x384xf32> -> vector<2x384xf32>
    %374 = arith.addf %368, %373 : vector<2x384xf32>
    %375 = arith.negf %374 : vector<2x384xf32>
    %376 = math.exp %375 : vector<2x384xf32>
    %cst_157 = arith.constant 1.000000e+00 : f32
    %377 = vector.broadcast %cst_157 : f32 to vector<2x384xf32>
    %378 = arith.addf %377, %376 : vector<2x384xf32>
    %379 = arith.divf %377, %378 : vector<2x384xf32>
    %380 = vector.extract_strided_slice %379 {offsets = [0, 0], sizes = [2, 128], strides = [1, 1]} : vector<2x384xf32> to vector<2x128xf32>
    %cst_158 = arith.constant 2.000000e+00 : f32
    %381 = vector.broadcast %cst_158 : f32 to vector<2x128xf32>
    %382 = arith.mulf %381, %380 : vector<2x128xf32>
    %cst_159 = arith.constant 1.000000e+00 : f32
    %383 = vector.broadcast %cst_159 : f32 to vector<2x128xf32>
    %384 = arith.subf %382, %383 : vector<2x128xf32>
    %385 = arith.select %85, %380, %384 : vector<2x128xi1>, vector<2x128xf32>
    %c64_i32_160 = arith.constant 64 : i32
    %386 = tpu.dynamic_rotate %385 by %c64_i32_160 dim 1 : vector<2x128xf32>, i32 -> vector<2x128xf32>
    %387 = arith.mulf %385, %386 : vector<2x128xf32>
    %388 = vector.extract_strided_slice %379 {offsets = [0, 128], sizes = [2, 128], strides = [1, 1]} : vector<2x384xf32> to vector<2x128xf32>
    %389 = arith.mulf %388, %334 : vector<2x128xf32>
    %390 = arith.addf %389, %387 : vector<2x128xf32>
    %391 = vector.extract_strided_slice %379 {offsets = [0, 256], sizes = [2, 128], strides = [1, 1]} : vector<2x384xf32> to vector<2x128xf32>
    %392 = math.tanh %390 : vector<2x128xf32>
    %393 = arith.mulf %391, %392 : vector<2x128xf32>
    %394 = arith.truncf %360 : vector<2x128xf32> to vector<2x128xbf16>
    %c0_161 = arith.constant 0 : index
    %c0_162 = arith.constant 0 : index
    %395 = vector.load %arg8[%c0_161, %c0_162] : memref<128x384xbf16, #tpu.memory_space<vmem>>, vector<128x384xbf16>
    %cst_163 = arith.constant dense<0.000000e+00> : vector<2x384xf32>
    %396 = tpu.matmul %394, %395, %cst_163 {dimension_numbers = #tpu.dot_dimension_numbers<[1], [0], [0], [1], [0, 0, 1, 1], [], []>} : vector<2x128xbf16>, vector<128x384xbf16>, vector<2x384xf32> -> vector<2x384xf32>
    %397 = arith.addf %370, %396 : vector<2x384xf32>
    %398 = arith.negf %397 : vector<2x384xf32>
    %399 = math.exp %398 : vector<2x384xf32>
    %cst_164 = arith.constant 1.000000e+00 : f32
    %400 = vector.broadcast %cst_164 : f32 to vector<2x384xf32>
    %401 = arith.addf %400, %399 : vector<2x384xf32>
    %402 = arith.divf %400, %401 : vector<2x384xf32>
    %403 = vector.extract_strided_slice %402 {offsets = [0, 0], sizes = [2, 128], strides = [1, 1]} : vector<2x384xf32> to vector<2x128xf32>
    %cst_165 = arith.constant 2.000000e+00 : f32
    %404 = vector.broadcast %cst_165 : f32 to vector<2x128xf32>
    %405 = arith.mulf %404, %403 : vector<2x128xf32>
    %cst_166 = arith.constant 1.000000e+00 : f32
    %406 = vector.broadcast %cst_166 : f32 to vector<2x128xf32>
    %407 = arith.subf %405, %406 : vector<2x128xf32>
    %408 = arith.select %85, %403, %407 : vector<2x128xi1>, vector<2x128xf32>
    %c64_i32_167 = arith.constant 64 : i32
    %409 = tpu.dynamic_rotate %408 by %c64_i32_167 dim 1 : vector<2x128xf32>, i32 -> vector<2x128xf32>
    %410 = arith.mulf %408, %409 : vector<2x128xf32>
    %411 = vector.extract_strided_slice %402 {offsets = [0, 128], sizes = [2, 128], strides = [1, 1]} : vector<2x384xf32> to vector<2x128xf32>
    %412 = arith.mulf %411, %357 : vector<2x128xf32>
    %413 = arith.addf %412, %410 : vector<2x128xf32>
    %414 = vector.extract_strided_slice %402 {offsets = [0, 256], sizes = [2, 128], strides = [1, 1]} : vector<2x384xf32> to vector<2x128xf32>
    %415 = math.tanh %413 : vector<2x128xf32>
    %416 = arith.mulf %414, %415 : vector<2x128xf32>
    %c0_168 = arith.constant 0 : index
    %c5_169 = arith.constant 5 : index
    %c0_170 = arith.constant 0 : index
    %417 = vector.load %arg17[%c0_168, %c5_169, %c0_170] : memref<2x16x128xf32, #tpu.memory_space<vmem>>, vector<2x1x128xf32>
    %418 = vector.shape_cast %417 : vector<2x1x128xf32> to vector<2x128xf32>
    %419 = vector.shape_cast %393 : vector<2x128xf32> to vector<2x1x128xf32>
    tpu.vector_store %arg17[%c0_168, %c5_169, %c0_170], %419 {strides = array<i32>} : memref<2x16x128xf32, #tpu.memory_space<vmem>>, vector<2x1x128xf32>,
    %c0_171 = arith.constant 0 : index
    %c10_172 = arith.constant 10 : index
    %c0_173 = arith.constant 0 : index
    %420 = vector.load %arg18[%c0_171, %c10_172, %c0_173] : memref<2x16x128xf32, #tpu.memory_space<vmem>>, vector<2x1x128xf32>
    %421 = vector.shape_cast %420 : vector<2x1x128xf32> to vector<2x128xf32>
    %422 = vector.shape_cast %416 : vector<2x128xf32> to vector<2x1x128xf32>
    tpu.vector_store %arg18[%c0_171, %c10_172, %c0_173], %422 {strides = array<i32>} : memref<2x16x128xf32, #tpu.memory_space<vmem>>, vector<2x1x128xf32>,
    %c0_174 = arith.constant 0 : index
    %c6 = arith.constant 6 : index
    %c0_175 = arith.constant 0 : index
    %423 = vector.load %arg16[%c0_174, %c6, %c0_175] : memref<2x16x768xf32, #tpu.memory_space<vmem>>, vector<2x1x384xf32>
    %424 = vector.shape_cast %423 : vector<2x1x384xf32> to vector<2x384xf32>
    %c0_176 = arith.constant 0 : index
    %c9 = arith.constant 9 : index
    %c384_177 = arith.constant 384 : index
    %425 = vector.load %arg16[%c0_176, %c9, %c384_177] : memref<2x16x768xf32, #tpu.memory_space<vmem>>, vector<2x1x384xf32>
    %426 = vector.shape_cast %425 : vector<2x1x384xf32> to vector<2x384xf32>
    %427 = arith.truncf %393 : vector<2x128xf32> to vector<2x128xbf16>
    %c0_178 = arith.constant 0 : index
    %c0_179 = arith.constant 0 : index
    %428 = vector.load %arg7[%c0_178, %c0_179] : memref<128x384xbf16, #tpu.memory_space<vmem>>, vector<128x384xbf16>
    %cst_180 = arith.constant dense<0.000000e+00> : vector<2x384xf32>
    %429 = tpu.matmul %427, %428, %cst_180 {dimension_numbers = #tpu.dot_dimension_numbers<[1], [0], [0], [1], [0, 0, 1, 1], [], []>} : vector<2x128xbf16>, vector<128x384xbf16>, vector<2x384xf32> -> vector<2x384xf32>
    %430 = arith.addf %424, %429 : vector<2x384xf32>
    %431 = arith.negf %430 : vector<2x384xf32>
    %432 = math.exp %431 : vector<2x384xf32>
    %cst_181 = arith.constant 1.000000e+00 : f32
    %433 = vector.broadcast %cst_181 : f32 to vector<2x384xf32>
    %434 = arith.addf %433, %432 : vector<2x384xf32>
    %435 = arith.divf %433, %434 : vector<2x384xf32>
    %436 = vector.extract_strided_slice %435 {offsets = [0, 0], sizes = [2, 128], strides = [1, 1]} : vector<2x384xf32> to vector<2x128xf32>
    %cst_182 = arith.constant 2.000000e+00 : f32
    %437 = vector.broadcast %cst_182 : f32 to vector<2x128xf32>
    %438 = arith.mulf %437, %436 : vector<2x128xf32>
    %cst_183 = arith.constant 1.000000e+00 : f32
    %439 = vector.broadcast %cst_183 : f32 to vector<2x128xf32>
    %440 = arith.subf %438, %439 : vector<2x128xf32>
    %441 = arith.select %85, %436, %440 : vector<2x128xi1>, vector<2x128xf32>
    %c64_i32_184 = arith.constant 64 : i32
    %442 = tpu.dynamic_rotate %441 by %c64_i32_184 dim 1 : vector<2x128xf32>, i32 -> vector<2x128xf32>
    %443 = arith.mulf %441, %442 : vector<2x128xf32>
    %444 = vector.extract_strided_slice %435 {offsets = [0, 128], sizes = [2, 128], strides = [1, 1]} : vector<2x384xf32> to vector<2x128xf32>
    %445 = arith.mulf %444, %390 : vector<2x128xf32>
    %446 = arith.addf %445, %443 : vector<2x128xf32>
    %447 = vector.extract_strided_slice %435 {offsets = [0, 256], sizes = [2, 128], strides = [1, 1]} : vector<2x384xf32> to vector<2x128xf32>
    %448 = math.tanh %446 : vector<2x128xf32>
    %449 = arith.mulf %447, %448 : vector<2x128xf32>
    %450 = arith.truncf %416 : vector<2x128xf32> to vector<2x128xbf16>
    %c0_185 = arith.constant 0 : index
    %c0_186 = arith.constant 0 : index
    %451 = vector.load %arg8[%c0_185, %c0_186] : memref<128x384xbf16, #tpu.memory_space<vmem>>, vector<128x384xbf16>
    %cst_187 = arith.constant dense<0.000000e+00> : vector<2x384xf32>
    %452 = tpu.matmul %450, %451, %cst_187 {dimension_numbers = #tpu.dot_dimension_numbers<[1], [0], [0], [1], [0, 0, 1, 1], [], []>} : vector<2x128xbf16>, vector<128x384xbf16>, vector<2x384xf32> -> vector<2x384xf32>
    %453 = arith.addf %426, %452 : vector<2x384xf32>
    %454 = arith.negf %453 : vector<2x384xf32>
    %455 = math.exp %454 : vector<2x384xf32>
    %cst_188 = arith.constant 1.000000e+00 : f32
    %456 = vector.broadcast %cst_188 : f32 to vector<2x384xf32>
    %457 = arith.addf %456, %455 : vector<2x384xf32>
    %458 = arith.divf %456, %457 : vector<2x384xf32>
    %459 = vector.extract_strided_slice %458 {offsets = [0, 0], sizes = [2, 128], strides = [1, 1]} : vector<2x384xf32> to vector<2x128xf32>
    %cst_189 = arith.constant 2.000000e+00 : f32
    %460 = vector.broadcast %cst_189 : f32 to vector<2x128xf32>
    %461 = arith.mulf %460, %459 : vector<2x128xf32>
    %cst_190 = arith.constant 1.000000e+00 : f32
    %462 = vector.broadcast %cst_190 : f32 to vector<2x128xf32>
    %463 = arith.subf %461, %462 : vector<2x128xf32>
    %464 = arith.select %85, %459, %463 : vector<2x128xi1>, vector<2x128xf32>
    %c64_i32_191 = arith.constant 64 : i32
    %465 = tpu.dynamic_rotate %464 by %c64_i32_191 dim 1 : vector<2x128xf32>, i32 -> vector<2x128xf32>
    %466 = arith.mulf %464, %465 : vector<2x128xf32>
    %467 = vector.extract_strided_slice %458 {offsets = [0, 128], sizes = [2, 128], strides = [1, 1]} : vector<2x384xf32> to vector<2x128xf32>
    %468 = arith.mulf %467, %413 : vector<2x128xf32>
    %469 = arith.addf %468, %466 : vector<2x128xf32>
    %470 = vector.extract_strided_slice %458 {offsets = [0, 256], sizes = [2, 128], strides = [1, 1]} : vector<2x384xf32> to vector<2x128xf32>
    %471 = math.tanh %469 : vector<2x128xf32>
    %472 = arith.mulf %470, %471 : vector<2x128xf32>
    %c0_192 = arith.constant 0 : index
    %c6_193 = arith.constant 6 : index
    %c0_194 = arith.constant 0 : index
    %473 = vector.load %arg17[%c0_192, %c6_193, %c0_194] : memref<2x16x128xf32, #tpu.memory_space<vmem>>, vector<2x1x128xf32>
    %474 = vector.shape_cast %473 : vector<2x1x128xf32> to vector<2x128xf32>
    %475 = vector.shape_cast %449 : vector<2x128xf32> to vector<2x1x128xf32>
    tpu.vector_store %arg17[%c0_192, %c6_193, %c0_194], %475 {strides = array<i32>} : memref<2x16x128xf32, #tpu.memory_space<vmem>>, vector<2x1x128xf32>,
    %c0_195 = arith.constant 0 : index
    %c9_196 = arith.constant 9 : index
    %c0_197 = arith.constant 0 : index
    %476 = vector.load %arg18[%c0_195, %c9_196, %c0_197] : memref<2x16x128xf32, #tpu.memory_space<vmem>>, vector<2x1x128xf32>
    %477 = vector.shape_cast %476 : vector<2x1x128xf32> to vector<2x128xf32>
    %478 = vector.shape_cast %472 : vector<2x128xf32> to vector<2x1x128xf32>
    tpu.vector_store %arg18[%c0_195, %c9_196, %c0_197], %478 {strides = array<i32>} : memref<2x16x128xf32, #tpu.memory_space<vmem>>, vector<2x1x128xf32>,
    %c0_198 = arith.constant 0 : index
    %c7 = arith.constant 7 : index
    %c0_199 = arith.constant 0 : index
    %479 = vector.load %arg16[%c0_198, %c7, %c0_199] : memref<2x16x768xf32, #tpu.memory_space<vmem>>, vector<2x1x384xf32>
    %480 = vector.shape_cast %479 : vector<2x1x384xf32> to vector<2x384xf32>
    %c0_200 = arith.constant 0 : index
    %c8 = arith.constant 8 : index
    %c384_201 = arith.constant 384 : index
    %481 = vector.load %arg16[%c0_200, %c8, %c384_201] : memref<2x16x768xf32, #tpu.memory_space<vmem>>, vector<2x1x384xf32>
    %482 = vector.shape_cast %481 : vector<2x1x384xf32> to vector<2x384xf32>
    %483 = arith.truncf %449 : vector<2x128xf32> to vector<2x128xbf16>
    %c0_202 = arith.constant 0 : index
    %c0_203 = arith.constant 0 : index
    %484 = vector.load %arg7[%c0_202, %c0_203] : memref<128x384xbf16, #tpu.memory_space<vmem>>, vector<128x384xbf16>
    %cst_204 = arith.constant dense<0.000000e+00> : vector<2x384xf32>
    %485 = tpu.matmul %483, %484, %cst_204 {dimension_numbers = #tpu.dot_dimension_numbers<[1], [0], [0], [1], [0, 0, 1, 1], [], []>} : vector<2x128xbf16>, vector<128x384xbf16>, vector<2x384xf32> -> vector<2x384xf32>
    %486 = arith.addf %480, %485 : vector<2x384xf32>
    %487 = arith.negf %486 : vector<2x384xf32>
    %488 = math.exp %487 : vector<2x384xf32>
    %cst_205 = arith.constant 1.000000e+00 : f32
    %489 = vector.broadcast %cst_205 : f32 to vector<2x384xf32>
    %490 = arith.addf %489, %488 : vector<2x384xf32>
    %491 = arith.divf %489, %490 : vector<2x384xf32>
    %492 = vector.extract_strided_slice %491 {offsets = [0, 0], sizes = [2, 128], strides = [1, 1]} : vector<2x384xf32> to vector<2x128xf32>
    %cst_206 = arith.constant 2.000000e+00 : f32
    %493 = vector.broadcast %cst_206 : f32 to vector<2x128xf32>
    %494 = arith.mulf %493, %492 : vector<2x128xf32>
    %cst_207 = arith.constant 1.000000e+00 : f32
    %495 = vector.broadcast %cst_207 : f32 to vector<2x128xf32>
    %496 = arith.subf %494, %495 : vector<2x128xf32>
    %497 = arith.select %85, %492, %496 : vector<2x128xi1>, vector<2x128xf32>
    %c64_i32_208 = arith.constant 64 : i32
    %498 = tpu.dynamic_rotate %497 by %c64_i32_208 dim 1 : vector<2x128xf32>, i32 -> vector<2x128xf32>
    %499 = arith.mulf %497, %498 : vector<2x128xf32>
    %500 = vector.extract_strided_slice %491 {offsets = [0, 128], sizes = [2, 128], strides = [1, 1]} : vector<2x384xf32> to vector<2x128xf32>
    %501 = arith.mulf %500, %446 : vector<2x128xf32>
    %502 = arith.addf %501, %499 : vector<2x128xf32>
    %503 = vector.extract_strided_slice %491 {offsets = [0, 256], sizes = [2, 128], strides = [1, 1]} : vector<2x384xf32> to vector<2x128xf32>
    %504 = math.tanh %502 : vector<2x128xf32>
    %505 = arith.mulf %503, %504 : vector<2x128xf32>
    %506 = arith.truncf %472 : vector<2x128xf32> to vector<2x128xbf16>
    %c0_209 = arith.constant 0 : index
    %c0_210 = arith.constant 0 : index
    %507 = vector.load %arg8[%c0_209, %c0_210] : memref<128x384xbf16, #tpu.memory_space<vmem>>, vector<128x384xbf16>
    %cst_211 = arith.constant dense<0.000000e+00> : vector<2x384xf32>
    %508 = tpu.matmul %506, %507, %cst_211 {dimension_numbers = #tpu.dot_dimension_numbers<[1], [0], [0], [1], [0, 0, 1, 1], [], []>} : vector<2x128xbf16>, vector<128x384xbf16>, vector<2x384xf32> -> vector<2x384xf32>
    %509 = arith.addf %482, %508 : vector<2x384xf32>
    %510 = arith.negf %509 : vector<2x384xf32>
    %511 = math.exp %510 : vector<2x384xf32>
    %cst_212 = arith.constant 1.000000e+00 : f32
    %512 = vector.broadcast %cst_212 : f32 to vector<2x384xf32>
    %513 = arith.addf %512, %511 : vector<2x384xf32>
    %514 = arith.divf %512, %513 : vector<2x384xf32>
    %515 = vector.extract_strided_slice %514 {offsets = [0, 0], sizes = [2, 128], strides = [1, 1]} : vector<2x384xf32> to vector<2x128xf32>
    %cst_213 = arith.constant 2.000000e+00 : f32
    %516 = vector.broadcast %cst_213 : f32 to vector<2x128xf32>
    %517 = arith.mulf %516, %515 : vector<2x128xf32>
    %cst_214 = arith.constant 1.000000e+00 : f32
    %518 = vector.broadcast %cst_214 : f32 to vector<2x128xf32>
    %519 = arith.subf %517, %518 : vector<2x128xf32>
    %520 = arith.select %85, %515, %519 : vector<2x128xi1>, vector<2x128xf32>
    %c64_i32_215 = arith.constant 64 : i32
    %521 = tpu.dynamic_rotate %520 by %c64_i32_215 dim 1 : vector<2x128xf32>, i32 -> vector<2x128xf32>
    %522 = arith.mulf %520, %521 : vector<2x128xf32>
    %523 = vector.extract_strided_slice %514 {offsets = [0, 128], sizes = [2, 128], strides = [1, 1]} : vector<2x384xf32> to vector<2x128xf32>
    %524 = arith.mulf %523, %469 : vector<2x128xf32>
    %525 = arith.addf %524, %522 : vector<2x128xf32>
    %526 = vector.extract_strided_slice %514 {offsets = [0, 256], sizes = [2, 128], strides = [1, 1]} : vector<2x384xf32> to vector<2x128xf32>
    %527 = math.tanh %525 : vector<2x128xf32>
    %528 = arith.mulf %526, %527 : vector<2x128xf32>
    %c0_216 = arith.constant 0 : index
    %c7_217 = arith.constant 7 : index
    %c0_218 = arith.constant 0 : index
    %529 = vector.load %arg17[%c0_216, %c7_217, %c0_218] : memref<2x16x128xf32, #tpu.memory_space<vmem>>, vector<2x1x128xf32>
    %530 = vector.shape_cast %529 : vector<2x1x128xf32> to vector<2x128xf32>
    %531 = vector.shape_cast %505 : vector<2x128xf32> to vector<2x1x128xf32>
    tpu.vector_store %arg17[%c0_216, %c7_217, %c0_218], %531 {strides = array<i32>} : memref<2x16x128xf32, #tpu.memory_space<vmem>>, vector<2x1x128xf32>,
    %c0_219 = arith.constant 0 : index
    %c8_220 = arith.constant 8 : index
    %c0_221 = arith.constant 0 : index
    %532 = vector.load %arg18[%c0_219, %c8_220, %c0_221] : memref<2x16x128xf32, #tpu.memory_space<vmem>>, vector<2x1x128xf32>
    %533 = vector.shape_cast %532 : vector<2x1x128xf32> to vector<2x128xf32>
    %534 = vector.shape_cast %528 : vector<2x128xf32> to vector<2x1x128xf32>
    tpu.vector_store %arg18[%c0_219, %c8_220, %c0_221], %534 {strides = array<i32>} : memref<2x16x128xf32, #tpu.memory_space<vmem>>, vector<2x1x128xf32>,
    %c0_222 = arith.constant 0 : index
    %c8_223 = arith.constant 8 : index
    %c0_224 = arith.constant 0 : index
    %535 = vector.load %arg16[%c0_222, %c8_223, %c0_224] : memref<2x16x768xf32, #tpu.memory_space<vmem>>, vector<2x1x384xf32>
    %536 = vector.shape_cast %535 : vector<2x1x384xf32> to vector<2x384xf32>
    %c0_225 = arith.constant 0 : index
    %c7_226 = arith.constant 7 : index
    %c384_227 = arith.constant 384 : index
    %537 = vector.load %arg16[%c0_225, %c7_226, %c384_227] : memref<2x16x768xf32, #tpu.memory_space<vmem>>, vector<2x1x384xf32>
    %538 = vector.shape_cast %537 : vector<2x1x384xf32> to vector<2x384xf32>
    %539 = arith.truncf %505 : vector<2x128xf32> to vector<2x128xbf16>
    %c0_228 = arith.constant 0 : index
    %c0_229 = arith.constant 0 : index
    %540 = vector.load %arg7[%c0_228, %c0_229] : memref<128x384xbf16, #tpu.memory_space<vmem>>, vector<128x384xbf16>
    %cst_230 = arith.constant dense<0.000000e+00> : vector<2x384xf32>
    %541 = tpu.matmul %539, %540, %cst_230 {dimension_numbers = #tpu.dot_dimension_numbers<[1], [0], [0], [1], [0, 0, 1, 1], [], []>} : vector<2x128xbf16>, vector<128x384xbf16>, vector<2x384xf32> -> vector<2x384xf32>
    %542 = arith.addf %536, %541 : vector<2x384xf32>
    %543 = arith.negf %542 : vector<2x384xf32>
    %544 = math.exp %543 : vector<2x384xf32>
    %cst_231 = arith.constant 1.000000e+00 : f32
    %545 = vector.broadcast %cst_231 : f32 to vector<2x384xf32>
    %546 = arith.addf %545, %544 : vector<2x384xf32>
    %547 = arith.divf %545, %546 : vector<2x384xf32>
    %548 = vector.extract_strided_slice %547 {offsets = [0, 0], sizes = [2, 128], strides = [1, 1]} : vector<2x384xf32> to vector<2x128xf32>
    %cst_232 = arith.constant 2.000000e+00 : f32
    %549 = vector.broadcast %cst_232 : f32 to vector<2x128xf32>
    %550 = arith.mulf %549, %548 : vector<2x128xf32>
    %cst_233 = arith.constant 1.000000e+00 : f32
    %551 = vector.broadcast %cst_233 : f32 to vector<2x128xf32>
    %552 = arith.subf %550, %551 : vector<2x128xf32>
    %553 = arith.select %85, %548, %552 : vector<2x128xi1>, vector<2x128xf32>
    %c64_i32_234 = arith.constant 64 : i32
    %554 = tpu.dynamic_rotate %553 by %c64_i32_234 dim 1 : vector<2x128xf32>, i32 -> vector<2x128xf32>
    %555 = arith.mulf %553, %554 : vector<2x128xf32>
    %556 = vector.extract_strided_slice %547 {offsets = [0, 128], sizes = [2, 128], strides = [1, 1]} : vector<2x384xf32> to vector<2x128xf32>
    %557 = arith.mulf %556, %502 : vector<2x128xf32>
    %558 = arith.addf %557, %555 : vector<2x128xf32>
    %559 = vector.extract_strided_slice %547 {offsets = [0, 256], sizes = [2, 128], strides = [1, 1]} : vector<2x384xf32> to vector<2x128xf32>
    %560 = math.tanh %558 : vector<2x128xf32>
    %561 = arith.mulf %559, %560 : vector<2x128xf32>
    %562 = arith.truncf %528 : vector<2x128xf32> to vector<2x128xbf16>
    %c0_235 = arith.constant 0 : index
    %c0_236 = arith.constant 0 : index
    %563 = vector.load %arg8[%c0_235, %c0_236] : memref<128x384xbf16, #tpu.memory_space<vmem>>, vector<128x384xbf16>
    %cst_237 = arith.constant dense<0.000000e+00> : vector<2x384xf32>
    %564 = tpu.matmul %562, %563, %cst_237 {dimension_numbers = #tpu.dot_dimension_numbers<[1], [0], [0], [1], [0, 0, 1, 1], [], []>} : vector<2x128xbf16>, vector<128x384xbf16>, vector<2x384xf32> -> vector<2x384xf32>
    %565 = arith.addf %538, %564 : vector<2x384xf32>
    %566 = arith.negf %565 : vector<2x384xf32>
    %567 = math.exp %566 : vector<2x384xf32>
    %cst_238 = arith.constant 1.000000e+00 : f32
    %568 = vector.broadcast %cst_238 : f32 to vector<2x384xf32>
    %569 = arith.addf %568, %567 : vector<2x384xf32>
    %570 = arith.divf %568, %569 : vector<2x384xf32>
    %571 = vector.extract_strided_slice %570 {offsets = [0, 0], sizes = [2, 128], strides = [1, 1]} : vector<2x384xf32> to vector<2x128xf32>
    %cst_239 = arith.constant 2.000000e+00 : f32
    %572 = vector.broadcast %cst_239 : f32 to vector<2x128xf32>
    %573 = arith.mulf %572, %571 : vector<2x128xf32>
    %cst_240 = arith.constant 1.000000e+00 : f32
    %574 = vector.broadcast %cst_240 : f32 to vector<2x128xf32>
    %575 = arith.subf %573, %574 : vector<2x128xf32>
    %576 = arith.select %85, %571, %575 : vector<2x128xi1>, vector<2x128xf32>
    %c64_i32_241 = arith.constant 64 : i32
    %577 = tpu.dynamic_rotate %576 by %c64_i32_241 dim 1 : vector<2x128xf32>, i32 -> vector<2x128xf32>
    %578 = arith.mulf %576, %577 : vector<2x128xf32>
    %579 = vector.extract_strided_slice %570 {offsets = [0, 128], sizes = [2, 128], strides = [1, 1]} : vector<2x384xf32> to vector<2x128xf32>
    %580 = arith.mulf %579, %525 : vector<2x128xf32>
    %581 = arith.addf %580, %578 : vector<2x128xf32>
    %582 = vector.extract_strided_slice %570 {offsets = [0, 256], sizes = [2, 128], strides = [1, 1]} : vector<2x384xf32> to vector<2x128xf32>
    %583 = math.tanh %581 : vector<2x128xf32>
    %584 = arith.mulf %582, %583 : vector<2x128xf32>
    %c0_242 = arith.constant 0 : index
    %c8_243 = arith.constant 8 : index
    %c0_244 = arith.constant 0 : index
    %585 = vector.load %arg17[%c0_242, %c8_243, %c0_244] : memref<2x16x128xf32, #tpu.memory_space<vmem>>, vector<2x1x128xf32>
    %586 = vector.shape_cast %585 : vector<2x1x128xf32> to vector<2x128xf32>
    %587 = vector.shape_cast %561 : vector<2x128xf32> to vector<2x1x128xf32>
    tpu.vector_store %arg17[%c0_242, %c8_243, %c0_244], %587 {strides = array<i32>} : memref<2x16x128xf32, #tpu.memory_space<vmem>>, vector<2x1x128xf32>,
    %c0_245 = arith.constant 0 : index
    %c7_246 = arith.constant 7 : index
    %c0_247 = arith.constant 0 : index
    %588 = vector.load %arg18[%c0_245, %c7_246, %c0_247] : memref<2x16x128xf32, #tpu.memory_space<vmem>>, vector<2x1x128xf32>
    %589 = vector.shape_cast %588 : vector<2x1x128xf32> to vector<2x128xf32>
    %590 = vector.shape_cast %584 : vector<2x128xf32> to vector<2x1x128xf32>
    tpu.vector_store %arg18[%c0_245, %c7_246, %c0_247], %590 {strides = array<i32>} : memref<2x16x128xf32, #tpu.memory_space<vmem>>, vector<2x1x128xf32>,
    %c0_248 = arith.constant 0 : index
    %c9_249 = arith.constant 9 : index
    %c0_250 = arith.constant 0 : index
    %591 = vector.load %arg16[%c0_248, %c9_249, %c0_250] : memref<2x16x768xf32, #tpu.memory_space<vmem>>, vector<2x1x384xf32>
    %592 = vector.shape_cast %591 : vector<2x1x384xf32> to vector<2x384xf32>
    %c0_251 = arith.constant 0 : index
    %c6_252 = arith.constant 6 : index
    %c384_253 = arith.constant 384 : index
    %593 = vector.load %arg16[%c0_251, %c6_252, %c384_253] : memref<2x16x768xf32, #tpu.memory_space<vmem>>, vector<2x1x384xf32>
    %594 = vector.shape_cast %593 : vector<2x1x384xf32> to vector<2x384xf32>
    %595 = arith.truncf %561 : vector<2x128xf32> to vector<2x128xbf16>
    %c0_254 = arith.constant 0 : index
    %c0_255 = arith.constant 0 : index
    %596 = vector.load %arg7[%c0_254, %c0_255] : memref<128x384xbf16, #tpu.memory_space<vmem>>, vector<128x384xbf16>
    %cst_256 = arith.constant dense<0.000000e+00> : vector<2x384xf32>
    %597 = tpu.matmul %595, %596, %cst_256 {dimension_numbers = #tpu.dot_dimension_numbers<[1], [0], [0], [1], [0, 0, 1, 1], [], []>} : vector<2x128xbf16>, vector<128x384xbf16>, vector<2x384xf32> -> vector<2x384xf32>
    %598 = arith.addf %592, %597 : vector<2x384xf32>
    %599 = arith.negf %598 : vector<2x384xf32>
    %600 = math.exp %599 : vector<2x384xf32>
    %cst_257 = arith.constant 1.000000e+00 : f32
    %601 = vector.broadcast %cst_257 : f32 to vector<2x384xf32>
    %602 = arith.addf %601, %600 : vector<2x384xf32>
    %603 = arith.divf %601, %602 : vector<2x384xf32>
    %604 = vector.extract_strided_slice %603 {offsets = [0, 0], sizes = [2, 128], strides = [1, 1]} : vector<2x384xf32> to vector<2x128xf32>
    %cst_258 = arith.constant 2.000000e+00 : f32
    %605 = vector.broadcast %cst_258 : f32 to vector<2x128xf32>
    %606 = arith.mulf %605, %604 : vector<2x128xf32>
    %cst_259 = arith.constant 1.000000e+00 : f32
    %607 = vector.broadcast %cst_259 : f32 to vector<2x128xf32>
    %608 = arith.subf %606, %607 : vector<2x128xf32>
    %609 = arith.select %85, %604, %608 : vector<2x128xi1>, vector<2x128xf32>
    %c64_i32_260 = arith.constant 64 : i32
    %610 = tpu.dynamic_rotate %609 by %c64_i32_260 dim 1 : vector<2x128xf32>, i32 -> vector<2x128xf32>
    %611 = arith.mulf %609, %610 : vector<2x128xf32>
    %612 = vector.extract_strided_slice %603 {offsets = [0, 128], sizes = [2, 128], strides = [1, 1]} : vector<2x384xf32> to vector<2x128xf32>
    %613 = arith.mulf %612, %558 : vector<2x128xf32>
    %614 = arith.addf %613, %611 : vector<2x128xf32>
    %615 = vector.extract_strided_slice %603 {offsets = [0, 256], sizes = [2, 128], strides = [1, 1]} : vector<2x384xf32> to vector<2x128xf32>
    %616 = math.tanh %614 : vector<2x128xf32>
    %617 = arith.mulf %615, %616 : vector<2x128xf32>
    %618 = arith.truncf %584 : vector<2x128xf32> to vector<2x128xbf16>
    %c0_261 = arith.constant 0 : index
    %c0_262 = arith.constant 0 : index
    %619 = vector.load %arg8[%c0_261, %c0_262] : memref<128x384xbf16, #tpu.memory_space<vmem>>, vector<128x384xbf16>
    %cst_263 = arith.constant dense<0.000000e+00> : vector<2x384xf32>
    %620 = tpu.matmul %618, %619, %cst_263 {dimension_numbers = #tpu.dot_dimension_numbers<[1], [0], [0], [1], [0, 0, 1, 1], [], []>} : vector<2x128xbf16>, vector<128x384xbf16>, vector<2x384xf32> -> vector<2x384xf32>
    %621 = arith.addf %594, %620 : vector<2x384xf32>
    %622 = arith.negf %621 : vector<2x384xf32>
    %623 = math.exp %622 : vector<2x384xf32>
    %cst_264 = arith.constant 1.000000e+00 : f32
    %624 = vector.broadcast %cst_264 : f32 to vector<2x384xf32>
    %625 = arith.addf %624, %623 : vector<2x384xf32>
    %626 = arith.divf %624, %625 : vector<2x384xf32>
    %627 = vector.extract_strided_slice %626 {offsets = [0, 0], sizes = [2, 128], strides = [1, 1]} : vector<2x384xf32> to vector<2x128xf32>
    %cst_265 = arith.constant 2.000000e+00 : f32
    %628 = vector.broadcast %cst_265 : f32 to vector<2x128xf32>
    %629 = arith.mulf %628, %627 : vector<2x128xf32>
    %cst_266 = arith.constant 1.000000e+00 : f32
    %630 = vector.broadcast %cst_266 : f32 to vector<2x128xf32>
    %631 = arith.subf %629, %630 : vector<2x128xf32>
    %632 = arith.select %85, %627, %631 : vector<2x128xi1>, vector<2x128xf32>
    %c64_i32_267 = arith.constant 64 : i32
    %633 = tpu.dynamic_rotate %632 by %c64_i32_267 dim 1 : vector<2x128xf32>, i32 -> vector<2x128xf32>
    %634 = arith.mulf %632, %633 : vector<2x128xf32>
    %635 = vector.extract_strided_slice %626 {offsets = [0, 128], sizes = [2, 128], strides = [1, 1]} : vector<2x384xf32> to vector<2x128xf32>
    %636 = arith.mulf %635, %581 : vector<2x128xf32>
    %637 = arith.addf %636, %634 : vector<2x128xf32>
    %638 = vector.extract_strided_slice %626 {offsets = [0, 256], sizes = [2, 128], strides = [1, 1]} : vector<2x384xf32> to vector<2x128xf32>
    %639 = math.tanh %637 : vector<2x128xf32>
    %640 = arith.mulf %638, %639 : vector<2x128xf32>
    %c0_268 = arith.constant 0 : index
    %c9_269 = arith.constant 9 : index
    %c0_270 = arith.constant 0 : index
    %641 = vector.load %arg17[%c0_268, %c9_269, %c0_270] : memref<2x16x128xf32, #tpu.memory_space<vmem>>, vector<2x1x128xf32>
    %642 = vector.shape_cast %641 : vector<2x1x128xf32> to vector<2x128xf32>
    %643 = vector.shape_cast %617 : vector<2x128xf32> to vector<2x1x128xf32>
    tpu.vector_store %arg17[%c0_268, %c9_269, %c0_270], %643 {strides = array<i32>} : memref<2x16x128xf32, #tpu.memory_space<vmem>>, vector<2x1x128xf32>,
    %c0_271 = arith.constant 0 : index
    %c6_272 = arith.constant 6 : index
    %c0_273 = arith.constant 0 : index
    %644 = vector.load %arg18[%c0_271, %c6_272, %c0_273] : memref<2x16x128xf32, #tpu.memory_space<vmem>>, vector<2x1x128xf32>
    %645 = vector.shape_cast %644 : vector<2x1x128xf32> to vector<2x128xf32>
    %646 = vector.shape_cast %640 : vector<2x128xf32> to vector<2x1x128xf32>
    tpu.vector_store %arg18[%c0_271, %c6_272, %c0_273], %646 {strides = array<i32>} : memref<2x16x128xf32, #tpu.memory_space<vmem>>, vector<2x1x128xf32>,
    %c0_274 = arith.constant 0 : index
    %c10_275 = arith.constant 10 : index
    %c0_276 = arith.constant 0 : index
    %647 = vector.load %arg16[%c0_274, %c10_275, %c0_276] : memref<2x16x768xf32, #tpu.memory_space<vmem>>, vector<2x1x384xf32>
    %648 = vector.shape_cast %647 : vector<2x1x384xf32> to vector<2x384xf32>
    %c0_277 = arith.constant 0 : index
    %c5_278 = arith.constant 5 : index
    %c384_279 = arith.constant 384 : index
    %649 = vector.load %arg16[%c0_277, %c5_278, %c384_279] : memref<2x16x768xf32, #tpu.memory_space<vmem>>, vector<2x1x384xf32>
    %650 = vector.shape_cast %649 : vector<2x1x384xf32> to vector<2x384xf32>
    %651 = arith.truncf %617 : vector<2x128xf32> to vector<2x128xbf16>
    %c0_280 = arith.constant 0 : index
    %c0_281 = arith.constant 0 : index
    %652 = vector.load %arg7[%c0_280, %c0_281] : memref<128x384xbf16, #tpu.memory_space<vmem>>, vector<128x384xbf16>
    %cst_282 = arith.constant dense<0.000000e+00> : vector<2x384xf32>
    %653 = tpu.matmul %651, %652, %cst_282 {dimension_numbers = #tpu.dot_dimension_numbers<[1], [0], [0], [1], [0, 0, 1, 1], [], []>} : vector<2x128xbf16>, vector<128x384xbf16>, vector<2x384xf32> -> vector<2x384xf32>
    %654 = arith.addf %648, %653 : vector<2x384xf32>
    %655 = arith.negf %654 : vector<2x384xf32>
    %656 = math.exp %655 : vector<2x384xf32>
    %cst_283 = arith.constant 1.000000e+00 : f32
    %657 = vector.broadcast %cst_283 : f32 to vector<2x384xf32>
    %658 = arith.addf %657, %656 : vector<2x384xf32>
    %659 = arith.divf %657, %658 : vector<2x384xf32>
    %660 = vector.extract_strided_slice %659 {offsets = [0, 0], sizes = [2, 128], strides = [1, 1]} : vector<2x384xf32> to vector<2x128xf32>
    %cst_284 = arith.constant 2.000000e+00 : f32
    %661 = vector.broadcast %cst_284 : f32 to vector<2x128xf32>
    %662 = arith.mulf %661, %660 : vector<2x128xf32>
    %cst_285 = arith.constant 1.000000e+00 : f32
    %663 = vector.broadcast %cst_285 : f32 to vector<2x128xf32>
    %664 = arith.subf %662, %663 : vector<2x128xf32>
    %665 = arith.select %85, %660, %664 : vector<2x128xi1>, vector<2x128xf32>
    %c64_i32_286 = arith.constant 64 : i32
    %666 = tpu.dynamic_rotate %665 by %c64_i32_286 dim 1 : vector<2x128xf32>, i32 -> vector<2x128xf32>
    %667 = arith.mulf %665, %666 : vector<2x128xf32>
    %668 = vector.extract_strided_slice %659 {offsets = [0, 128], sizes = [2, 128], strides = [1, 1]} : vector<2x384xf32> to vector<2x128xf32>
    %669 = arith.mulf %668, %614 : vector<2x128xf32>
    %670 = arith.addf %669, %667 : vector<2x128xf32>
    %671 = vector.extract_strided_slice %659 {offsets = [0, 256], sizes = [2, 128], strides = [1, 1]} : vector<2x384xf32> to vector<2x128xf32>
    %672 = math.tanh %670 : vector<2x128xf32>
    %673 = arith.mulf %671, %672 : vector<2x128xf32>
    %674 = arith.truncf %640 : vector<2x128xf32> to vector<2x128xbf16>
    %c0_287 = arith.constant 0 : index
    %c0_288 = arith.constant 0 : index
    %675 = vector.load %arg8[%c0_287, %c0_288] : memref<128x384xbf16, #tpu.memory_space<vmem>>, vector<128x384xbf16>
    %cst_289 = arith.constant dense<0.000000e+00> : vector<2x384xf32>
    %676 = tpu.matmul %674, %675, %cst_289 {dimension_numbers = #tpu.dot_dimension_numbers<[1], [0], [0], [1], [0, 0, 1, 1], [], []>} : vector<2x128xbf16>, vector<128x384xbf16>, vector<2x384xf32> -> vector<2x384xf32>
    %677 = arith.addf %650, %676 : vector<2x384xf32>
    %678 = arith.negf %677 : vector<2x384xf32>
    %679 = math.exp %678 : vector<2x384xf32>
    %cst_290 = arith.constant 1.000000e+00 : f32
    %680 = vector.broadcast %cst_290 : f32 to vector<2x384xf32>
    %681 = arith.addf %680, %679 : vector<2x384xf32>
    %682 = arith.divf %680, %681 : vector<2x384xf32>
    %683 = vector.extract_strided_slice %682 {offsets = [0, 0], sizes = [2, 128], strides = [1, 1]} : vector<2x384xf32> to vector<2x128xf32>
    %cst_291 = arith.constant 2.000000e+00 : f32
    %684 = vector.broadcast %cst_291 : f32 to vector<2x128xf32>
    %685 = arith.mulf %684, %683 : vector<2x128xf32>
    %cst_292 = arith.constant 1.000000e+00 : f32
    %686 = vector.broadcast %cst_292 : f32 to vector<2x128xf32>
    %687 = arith.subf %685, %686 : vector<2x128xf32>
    %688 = arith.select %85, %683, %687 : vector<2x128xi1>, vector<2x128xf32>
    %c64_i32_293 = arith.constant 64 : i32
    %689 = tpu.dynamic_rotate %688 by %c64_i32_293 dim 1 : vector<2x128xf32>, i32 -> vector<2x128xf32>
    %690 = arith.mulf %688, %689 : vector<2x128xf32>
    %691 = vector.extract_strided_slice %682 {offsets = [0, 128], sizes = [2, 128], strides = [1, 1]} : vector<2x384xf32> to vector<2x128xf32>
    %692 = arith.mulf %691, %637 : vector<2x128xf32>
    %693 = arith.addf %692, %690 : vector<2x128xf32>
    %694 = vector.extract_strided_slice %682 {offsets = [0, 256], sizes = [2, 128], strides = [1, 1]} : vector<2x384xf32> to vector<2x128xf32>
    %695 = math.tanh %693 : vector<2x128xf32>
    %696 = arith.mulf %694, %695 : vector<2x128xf32>
    %c0_294 = arith.constant 0 : index
    %c10_295 = arith.constant 10 : index
    %c0_296 = arith.constant 0 : index
    %697 = vector.load %arg17[%c0_294, %c10_295, %c0_296] : memref<2x16x128xf32, #tpu.memory_space<vmem>>, vector<2x1x128xf32>
    %698 = vector.shape_cast %697 : vector<2x1x128xf32> to vector<2x128xf32>
    %699 = vector.shape_cast %673 : vector<2x128xf32> to vector<2x1x128xf32>
    tpu.vector_store %arg17[%c0_294, %c10_295, %c0_296], %699 {strides = array<i32>} : memref<2x16x128xf32, #tpu.memory_space<vmem>>, vector<2x1x128xf32>,
    %c0_297 = arith.constant 0 : index
    %c5_298 = arith.constant 5 : index
    %c0_299 = arith.constant 0 : index
    %700 = vector.load %arg18[%c0_297, %c5_298, %c0_299] : memref<2x16x128xf32, #tpu.memory_space<vmem>>, vector<2x1x128xf32>
    %701 = vector.shape_cast %700 : vector<2x1x128xf32> to vector<2x128xf32>
    %702 = vector.shape_cast %696 : vector<2x128xf32> to vector<2x1x128xf32>
    tpu.vector_store %arg18[%c0_297, %c5_298, %c0_299], %702 {strides = array<i32>} : memref<2x16x128xf32, #tpu.memory_space<vmem>>, vector<2x1x128xf32>,
    %c0_300 = arith.constant 0 : index
    %c11_301 = arith.constant 11 : index
    %c0_302 = arith.constant 0 : index
    %703 = vector.load %arg16[%c0_300, %c11_301, %c0_302] : memref<2x16x768xf32, #tpu.memory_space<vmem>>, vector<2x1x384xf32>
    %704 = vector.shape_cast %703 : vector<2x1x384xf32> to vector<2x384xf32>
    %c0_303 = arith.constant 0 : index
    %c4_304 = arith.constant 4 : index
    %c384_305 = arith.constant 384 : index
    %705 = vector.load %arg16[%c0_303, %c4_304, %c384_305] : memref<2x16x768xf32, #tpu.memory_space<vmem>>, vector<2x1x384xf32>
    %706 = vector.shape_cast %705 : vector<2x1x384xf32> to vector<2x384xf32>
    %707 = arith.truncf %673 : vector<2x128xf32> to vector<2x128xbf16>
    %c0_306 = arith.constant 0 : index
    %c0_307 = arith.constant 0 : index
    %708 = vector.load %arg7[%c0_306, %c0_307] : memref<128x384xbf16, #tpu.memory_space<vmem>>, vector<128x384xbf16>
    %cst_308 = arith.constant dense<0.000000e+00> : vector<2x384xf32>
    %709 = tpu.matmul %707, %708, %cst_308 {dimension_numbers = #tpu.dot_dimension_numbers<[1], [0], [0], [1], [0, 0, 1, 1], [], []>} : vector<2x128xbf16>, vector<128x384xbf16>, vector<2x384xf32> -> vector<2x384xf32>
    %710 = arith.addf %704, %709 : vector<2x384xf32>
    %711 = arith.negf %710 : vector<2x384xf32>
    %712 = math.exp %711 : vector<2x384xf32>
    %cst_309 = arith.constant 1.000000e+00 : f32
    %713 = vector.broadcast %cst_309 : f32 to vector<2x384xf32>
    %714 = arith.addf %713, %712 : vector<2x384xf32>
    %715 = arith.divf %713, %714 : vector<2x384xf32>
    %716 = vector.extract_strided_slice %715 {offsets = [0, 0], sizes = [2, 128], strides = [1, 1]} : vector<2x384xf32> to vector<2x128xf32>
    %cst_310 = arith.constant 2.000000e+00 : f32
    %717 = vector.broadcast %cst_310 : f32 to vector<2x128xf32>
    %718 = arith.mulf %717, %716 : vector<2x128xf32>
    %cst_311 = arith.constant 1.000000e+00 : f32
    %719 = vector.broadcast %cst_311 : f32 to vector<2x128xf32>
    %720 = arith.subf %718, %719 : vector<2x128xf32>
    %721 = arith.select %85, %716, %720 : vector<2x128xi1>, vector<2x128xf32>
    %c64_i32_312 = arith.constant 64 : i32
    %722 = tpu.dynamic_rotate %721 by %c64_i32_312 dim 1 : vector<2x128xf32>, i32 -> vector<2x128xf32>
    %723 = arith.mulf %721, %722 : vector<2x128xf32>
    %724 = vector.extract_strided_slice %715 {offsets = [0, 128], sizes = [2, 128], strides = [1, 1]} : vector<2x384xf32> to vector<2x128xf32>
    %725 = arith.mulf %724, %670 : vector<2x128xf32>
    %726 = arith.addf %725, %723 : vector<2x128xf32>
    %727 = vector.extract_strided_slice %715 {offsets = [0, 256], sizes = [2, 128], strides = [1, 1]} : vector<2x384xf32> to vector<2x128xf32>
    %728 = math.tanh %726 : vector<2x128xf32>
    %729 = arith.mulf %727, %728 : vector<2x128xf32>
    %730 = arith.truncf %696 : vector<2x128xf32> to vector<2x128xbf16>
    %c0_313 = arith.constant 0 : index
    %c0_314 = arith.constant 0 : index
    %731 = vector.load %arg8[%c0_313, %c0_314] : memref<128x384xbf16, #tpu.memory_space<vmem>>, vector<128x384xbf16>
    %cst_315 = arith.constant dense<0.000000e+00> : vector<2x384xf32>
    %732 = tpu.matmul %730, %731, %cst_315 {dimension_numbers = #tpu.dot_dimension_numbers<[1], [0], [0], [1], [0, 0, 1, 1], [], []>} : vector<2x128xbf16>, vector<128x384xbf16>, vector<2x384xf32> -> vector<2x384xf32>
    %733 = arith.addf %706, %732 : vector<2x384xf32>
    %734 = arith.negf %733 : vector<2x384xf32>
    %735 = math.exp %734 : vector<2x384xf32>
    %cst_316 = arith.constant 1.000000e+00 : f32
    %736 = vector.broadcast %cst_316 : f32 to vector<2x384xf32>
    %737 = arith.addf %736, %735 : vector<2x384xf32>
    %738 = arith.divf %736, %737 : vector<2x384xf32>
    %739 = vector.extract_strided_slice %738 {offsets = [0, 0], sizes = [2, 128], strides = [1, 1]} : vector<2x384xf32> to vector<2x128xf32>
    %cst_317 = arith.constant 2.000000e+00 : f32
    %740 = vector.broadcast %cst_317 : f32 to vector<2x128xf32>
    %741 = arith.mulf %740, %739 : vector<2x128xf32>
    %cst_318 = arith.constant 1.000000e+00 : f32
    %742 = vector.broadcast %cst_318 : f32 to vector<2x128xf32>
    %743 = arith.subf %741, %742 : vector<2x128xf32>
    %744 = arith.select %85, %739, %743 : vector<2x128xi1>, vector<2x128xf32>
    %c64_i32_319 = arith.constant 64 : i32
    %745 = tpu.dynamic_rotate %744 by %c64_i32_319 dim 1 : vector<2x128xf32>, i32 -> vector<2x128xf32>
    %746 = arith.mulf %744, %745 : vector<2x128xf32>
    %747 = vector.extract_strided_slice %738 {offsets = [0, 128], sizes = [2, 128], strides = [1, 1]} : vector<2x384xf32> to vector<2x128xf32>
    %748 = arith.mulf %747, %693 : vector<2x128xf32>
    %749 = arith.addf %748, %746 : vector<2x128xf32>
    %750 = vector.extract_strided_slice %738 {offsets = [0, 256], sizes = [2, 128], strides = [1, 1]} : vector<2x384xf32> to vector<2x128xf32>
    %751 = math.tanh %749 : vector<2x128xf32>
    %752 = arith.mulf %750, %751 : vector<2x128xf32>
    %c0_320 = arith.constant 0 : index
    %c11_321 = arith.constant 11 : index
    %c0_322 = arith.constant 0 : index
    %753 = vector.load %arg17[%c0_320, %c11_321, %c0_322] : memref<2x16x128xf32, #tpu.memory_space<vmem>>, vector<2x1x128xf32>
    %754 = vector.shape_cast %753 : vector<2x1x128xf32> to vector<2x128xf32>
    %755 = vector.shape_cast %729 : vector<2x128xf32> to vector<2x1x128xf32>
    tpu.vector_store %arg17[%c0_320, %c11_321, %c0_322], %755 {strides = array<i32>} : memref<2x16x128xf32, #tpu.memory_space<vmem>>, vector<2x1x128xf32>,
    %c0_323 = arith.constant 0 : index
    %c4_324 = arith.constant 4 : index
    %c0_325 = arith.constant 0 : index
    %756 = vector.load %arg18[%c0_323, %c4_324, %c0_325] : memref<2x16x128xf32, #tpu.memory_space<vmem>>, vector<2x1x128xf32>
    %757 = vector.shape_cast %756 : vector<2x1x128xf32> to vector<2x128xf32>
    %758 = vector.shape_cast %752 : vector<2x128xf32> to vector<2x1x128xf32>
    tpu.vector_store %arg18[%c0_323, %c4_324, %c0_325], %758 {strides = array<i32>} : memref<2x16x128xf32, #tpu.memory_space<vmem>>, vector<2x1x128xf32>,
    %c0_326 = arith.constant 0 : index
    %c12_327 = arith.constant 12 : index
    %c0_328 = arith.constant 0 : index
    %759 = vector.load %arg16[%c0_326, %c12_327, %c0_328] : memref<2x16x768xf32, #tpu.memory_space<vmem>>, vector<2x1x384xf32>
    %760 = vector.shape_cast %759 : vector<2x1x384xf32> to vector<2x384xf32>
    %c0_329 = arith.constant 0 : index
    %c3_330 = arith.constant 3 : index
    %c384_331 = arith.constant 384 : index
    %761 = vector.load %arg16[%c0_329, %c3_330, %c384_331] : memref<2x16x768xf32, #tpu.memory_space<vmem>>, vector<2x1x384xf32>
    %762 = vector.shape_cast %761 : vector<2x1x384xf32> to vector<2x384xf32>
    %763 = arith.truncf %729 : vector<2x128xf32> to vector<2x128xbf16>
    %c0_332 = arith.constant 0 : index
    %c0_333 = arith.constant 0 : index
    %764 = vector.load %arg7[%c0_332, %c0_333] : memref<128x384xbf16, #tpu.memory_space<vmem>>, vector<128x384xbf16>
    %cst_334 = arith.constant dense<0.000000e+00> : vector<2x384xf32>
    %765 = tpu.matmul %763, %764, %cst_334 {dimension_numbers = #tpu.dot_dimension_numbers<[1], [0], [0], [1], [0, 0, 1, 1], [], []>} : vector<2x128xbf16>, vector<128x384xbf16>, vector<2x384xf32> -> vector<2x384xf32>
    %766 = arith.addf %760, %765 : vector<2x384xf32>
    %767 = arith.negf %766 : vector<2x384xf32>
    %768 = math.exp %767 : vector<2x384xf32>
    %cst_335 = arith.constant 1.000000e+00 : f32
    %769 = vector.broadcast %cst_335 : f32 to vector<2x384xf32>
    %770 = arith.addf %769, %768 : vector<2x384xf32>
    %771 = arith.divf %769, %770 : vector<2x384xf32>
    %772 = vector.extract_strided_slice %771 {offsets = [0, 0], sizes = [2, 128], strides = [1, 1]} : vector<2x384xf32> to vector<2x128xf32>
    %cst_336 = arith.constant 2.000000e+00 : f32
    %773 = vector.broadcast %cst_336 : f32 to vector<2x128xf32>
    %774 = arith.mulf %773, %772 : vector<2x128xf32>
    %cst_337 = arith.constant 1.000000e+00 : f32
    %775 = vector.broadcast %cst_337 : f32 to vector<2x128xf32>
    %776 = arith.subf %774, %775 : vector<2x128xf32>
    %777 = arith.select %85, %772, %776 : vector<2x128xi1>, vector<2x128xf32>
    %c64_i32_338 = arith.constant 64 : i32
    %778 = tpu.dynamic_rotate %777 by %c64_i32_338 dim 1 : vector<2x128xf32>, i32 -> vector<2x128xf32>
    %779 = arith.mulf %777, %778 : vector<2x128xf32>
    %780 = vector.extract_strided_slice %771 {offsets = [0, 128], sizes = [2, 128], strides = [1, 1]} : vector<2x384xf32> to vector<2x128xf32>
    %781 = arith.mulf %780, %726 : vector<2x128xf32>
    %782 = arith.addf %781, %779 : vector<2x128xf32>
    %783 = vector.extract_strided_slice %771 {offsets = [0, 256], sizes = [2, 128], strides = [1, 1]} : vector<2x384xf32> to vector<2x128xf32>
    %784 = math.tanh %782 : vector<2x128xf32>
    %785 = arith.mulf %783, %784 : vector<2x128xf32>
    %786 = arith.truncf %752 : vector<2x128xf32> to vector<2x128xbf16>
    %c0_339 = arith.constant 0 : index
    %c0_340 = arith.constant 0 : index
    %787 = vector.load %arg8[%c0_339, %c0_340] : memref<128x384xbf16, #tpu.memory_space<vmem>>, vector<128x384xbf16>
    %cst_341 = arith.constant dense<0.000000e+00> : vector<2x384xf32>
    %788 = tpu.matmul %786, %787, %cst_341 {dimension_numbers = #tpu.dot_dimension_numbers<[1], [0], [0], [1], [0, 0, 1, 1], [], []>} : vector<2x128xbf16>, vector<128x384xbf16>, vector<2x384xf32> -> vector<2x384xf32>
    %789 = arith.addf %762, %788 : vector<2x384xf32>
    %790 = arith.negf %789 : vector<2x384xf32>
    %791 = math.exp %790 : vector<2x384xf32>
    %cst_342 = arith.constant 1.000000e+00 : f32
    %792 = vector.broadcast %cst_342 : f32 to vector<2x384xf32>
    %793 = arith.addf %792, %791 : vector<2x384xf32>
    %794 = arith.divf %792, %793 : vector<2x384xf32>
    %795 = vector.extract_strided_slice %794 {offsets = [0, 0], sizes = [2, 128], strides = [1, 1]} : vector<2x384xf32> to vector<2x128xf32>
    %cst_343 = arith.constant 2.000000e+00 : f32
    %796 = vector.broadcast %cst_343 : f32 to vector<2x128xf32>
    %797 = arith.mulf %796, %795 : vector<2x128xf32>
    %cst_344 = arith.constant 1.000000e+00 : f32
    %798 = vector.broadcast %cst_344 : f32 to vector<2x128xf32>
    %799 = arith.subf %797, %798 : vector<2x128xf32>
    %800 = arith.select %85, %795, %799 : vector<2x128xi1>, vector<2x128xf32>
    %c64_i32_345 = arith.constant 64 : i32
    %801 = tpu.dynamic_rotate %800 by %c64_i32_345 dim 1 : vector<2x128xf32>, i32 -> vector<2x128xf32>
    %802 = arith.mulf %800, %801 : vector<2x128xf32>
    %803 = vector.extract_strided_slice %794 {offsets = [0, 128], sizes = [2, 128], strides = [1, 1]} : vector<2x384xf32> to vector<2x128xf32>
    %804 = arith.mulf %803, %749 : vector<2x128xf32>
    %805 = arith.addf %804, %802 : vector<2x128xf32>
    %806 = vector.extract_strided_slice %794 {offsets = [0, 256], sizes = [2, 128], strides = [1, 1]} : vector<2x384xf32> to vector<2x128xf32>
    %807 = math.tanh %805 : vector<2x128xf32>
    %808 = arith.mulf %806, %807 : vector<2x128xf32>
    %c0_346 = arith.constant 0 : index
    %c12_347 = arith.constant 12 : index
    %c0_348 = arith.constant 0 : index
    %809 = vector.load %arg17[%c0_346, %c12_347, %c0_348] : memref<2x16x128xf32, #tpu.memory_space<vmem>>, vector<2x1x128xf32>
    %810 = vector.shape_cast %809 : vector<2x1x128xf32> to vector<2x128xf32>
    %811 = vector.shape_cast %785 : vector<2x128xf32> to vector<2x1x128xf32>
    tpu.vector_store %arg17[%c0_346, %c12_347, %c0_348], %811 {strides = array<i32>} : memref<2x16x128xf32, #tpu.memory_space<vmem>>, vector<2x1x128xf32>,
    %c0_349 = arith.constant 0 : index
    %c3_350 = arith.constant 3 : index
    %c0_351 = arith.constant 0 : index
    %812 = vector.load %arg18[%c0_349, %c3_350, %c0_351] : memref<2x16x128xf32, #tpu.memory_space<vmem>>, vector<2x1x128xf32>
    %813 = vector.shape_cast %812 : vector<2x1x128xf32> to vector<2x128xf32>
    %814 = vector.shape_cast %808 : vector<2x128xf32> to vector<2x1x128xf32>
    tpu.vector_store %arg18[%c0_349, %c3_350, %c0_351], %814 {strides = array<i32>} : memref<2x16x128xf32, #tpu.memory_space<vmem>>, vector<2x1x128xf32>,
    %c0_352 = arith.constant 0 : index
    %c13_353 = arith.constant 13 : index
    %c0_354 = arith.constant 0 : index
    %815 = vector.load %arg16[%c0_352, %c13_353, %c0_354] : memref<2x16x768xf32, #tpu.memory_space<vmem>>, vector<2x1x384xf32>
    %816 = vector.shape_cast %815 : vector<2x1x384xf32> to vector<2x384xf32>
    %c0_355 = arith.constant 0 : index
    %c2_356 = arith.constant 2 : index
    %c384_357 = arith.constant 384 : index
    %817 = vector.load %arg16[%c0_355, %c2_356, %c384_357] : memref<2x16x768xf32, #tpu.memory_space<vmem>>, vector<2x1x384xf32>
    %818 = vector.shape_cast %817 : vector<2x1x384xf32> to vector<2x384xf32>
    %819 = arith.truncf %785 : vector<2x128xf32> to vector<2x128xbf16>
    %c0_358 = arith.constant 0 : index
    %c0_359 = arith.constant 0 : index
    %820 = vector.load %arg7[%c0_358, %c0_359] : memref<128x384xbf16, #tpu.memory_space<vmem>>, vector<128x384xbf16>
    %cst_360 = arith.constant dense<0.000000e+00> : vector<2x384xf32>
    %821 = tpu.matmul %819, %820, %cst_360 {dimension_numbers = #tpu.dot_dimension_numbers<[1], [0], [0], [1], [0, 0, 1, 1], [], []>} : vector<2x128xbf16>, vector<128x384xbf16>, vector<2x384xf32> -> vector<2x384xf32>
    %822 = arith.addf %816, %821 : vector<2x384xf32>
    %823 = arith.negf %822 : vector<2x384xf32>
    %824 = math.exp %823 : vector<2x384xf32>
    %cst_361 = arith.constant 1.000000e+00 : f32
    %825 = vector.broadcast %cst_361 : f32 to vector<2x384xf32>
    %826 = arith.addf %825, %824 : vector<2x384xf32>
    %827 = arith.divf %825, %826 : vector<2x384xf32>
    %828 = vector.extract_strided_slice %827 {offsets = [0, 0], sizes = [2, 128], strides = [1, 1]} : vector<2x384xf32> to vector<2x128xf32>
    %cst_362 = arith.constant 2.000000e+00 : f32
    %829 = vector.broadcast %cst_362 : f32 to vector<2x128xf32>
    %830 = arith.mulf %829, %828 : vector<2x128xf32>
    %cst_363 = arith.constant 1.000000e+00 : f32
    %831 = vector.broadcast %cst_363 : f32 to vector<2x128xf32>
    %832 = arith.subf %830, %831 : vector<2x128xf32>
    %833 = arith.select %85, %828, %832 : vector<2x128xi1>, vector<2x128xf32>
    %c64_i32_364 = arith.constant 64 : i32
    %834 = tpu.dynamic_rotate %833 by %c64_i32_364 dim 1 : vector<2x128xf32>, i32 -> vector<2x128xf32>
    %835 = arith.mulf %833, %834 : vector<2x128xf32>
    %836 = vector.extract_strided_slice %827 {offsets = [0, 128], sizes = [2, 128], strides = [1, 1]} : vector<2x384xf32> to vector<2x128xf32>
    %837 = arith.mulf %836, %782 : vector<2x128xf32>
    %838 = arith.addf %837, %835 : vector<2x128xf32>
    %839 = vector.extract_strided_slice %827 {offsets = [0, 256], sizes = [2, 128], strides = [1, 1]} : vector<2x384xf32> to vector<2x128xf32>
    %840 = math.tanh %838 : vector<2x128xf32>
    %841 = arith.mulf %839, %840 : vector<2x128xf32>
    %842 = arith.truncf %808 : vector<2x128xf32> to vector<2x128xbf16>
    %c0_365 = arith.constant 0 : index
    %c0_366 = arith.constant 0 : index
    %843 = vector.load %arg8[%c0_365, %c0_366] : memref<128x384xbf16, #tpu.memory_space<vmem>>, vector<128x384xbf16>
    %cst_367 = arith.constant dense<0.000000e+00> : vector<2x384xf32>
    %844 = tpu.matmul %842, %843, %cst_367 {dimension_numbers = #tpu.dot_dimension_numbers<[1], [0], [0], [1], [0, 0, 1, 1], [], []>} : vector<2x128xbf16>, vector<128x384xbf16>, vector<2x384xf32> -> vector<2x384xf32>
    %845 = arith.addf %818, %844 : vector<2x384xf32>
    %846 = arith.negf %845 : vector<2x384xf32>
    %847 = math.exp %846 : vector<2x384xf32>
    %cst_368 = arith.constant 1.000000e+00 : f32
    %848 = vector.broadcast %cst_368 : f32 to vector<2x384xf32>
    %849 = arith.addf %848, %847 : vector<2x384xf32>
    %850 = arith.divf %848, %849 : vector<2x384xf32>
    %851 = vector.extract_strided_slice %850 {offsets = [0, 0], sizes = [2, 128], strides = [1, 1]} : vector<2x384xf32> to vector<2x128xf32>
    %cst_369 = arith.constant 2.000000e+00 : f32
    %852 = vector.broadcast %cst_369 : f32 to vector<2x128xf32>
    %853 = arith.mulf %852, %851 : vector<2x128xf32>
    %cst_370 = arith.constant 1.000000e+00 : f32
    %854 = vector.broadcast %cst_370 : f32 to vector<2x128xf32>
    %855 = arith.subf %853, %854 : vector<2x128xf32>
    %856 = arith.select %85, %851, %855 : vector<2x128xi1>, vector<2x128xf32>
    %c64_i32_371 = arith.constant 64 : i32
    %857 = tpu.dynamic_rotate %856 by %c64_i32_371 dim 1 : vector<2x128xf32>, i32 -> vector<2x128xf32>
    %858 = arith.mulf %856, %857 : vector<2x128xf32>
    %859 = vector.extract_strided_slice %850 {offsets = [0, 128], sizes = [2, 128], strides = [1, 1]} : vector<2x384xf32> to vector<2x128xf32>
    %860 = arith.mulf %859, %805 : vector<2x128xf32>
    %861 = arith.addf %860, %858 : vector<2x128xf32>
    %862 = vector.extract_strided_slice %850 {offsets = [0, 256], sizes = [2, 128], strides = [1, 1]} : vector<2x384xf32> to vector<2x128xf32>
    %863 = math.tanh %861 : vector<2x128xf32>
    %864 = arith.mulf %862, %863 : vector<2x128xf32>
    %c0_372 = arith.constant 0 : index
    %c13_373 = arith.constant 13 : index
    %c0_374 = arith.constant 0 : index
    %865 = vector.load %arg17[%c0_372, %c13_373, %c0_374] : memref<2x16x128xf32, #tpu.memory_space<vmem>>, vector<2x1x128xf32>
    %866 = vector.shape_cast %865 : vector<2x1x128xf32> to vector<2x128xf32>
    %867 = vector.shape_cast %841 : vector<2x128xf32> to vector<2x1x128xf32>
    tpu.vector_store %arg17[%c0_372, %c13_373, %c0_374], %867 {strides = array<i32>} : memref<2x16x128xf32, #tpu.memory_space<vmem>>, vector<2x1x128xf32>,
    %c0_375 = arith.constant 0 : index
    %c2_376 = arith.constant 2 : index
    %c0_377 = arith.constant 0 : index
    %868 = vector.load %arg18[%c0_375, %c2_376, %c0_377] : memref<2x16x128xf32, #tpu.memory_space<vmem>>, vector<2x1x128xf32>
    %869 = vector.shape_cast %868 : vector<2x1x128xf32> to vector<2x128xf32>
    %870 = vector.shape_cast %864 : vector<2x128xf32> to vector<2x1x128xf32>
    tpu.vector_store %arg18[%c0_375, %c2_376, %c0_377], %870 {strides = array<i32>} : memref<2x16x128xf32, #tpu.memory_space<vmem>>, vector<2x1x128xf32>,
    %c0_378 = arith.constant 0 : index
    %c14_379 = arith.constant 14 : index
    %c0_380 = arith.constant 0 : index
    %871 = vector.load %arg16[%c0_378, %c14_379, %c0_380] : memref<2x16x768xf32, #tpu.memory_space<vmem>>, vector<2x1x384xf32>
    %872 = vector.shape_cast %871 : vector<2x1x384xf32> to vector<2x384xf32>
    %c0_381 = arith.constant 0 : index
    %c1_382 = arith.constant 1 : index
    %c384_383 = arith.constant 384 : index
    %873 = vector.load %arg16[%c0_381, %c1_382, %c384_383] : memref<2x16x768xf32, #tpu.memory_space<vmem>>, vector<2x1x384xf32>
    %874 = vector.shape_cast %873 : vector<2x1x384xf32> to vector<2x384xf32>
    %875 = arith.truncf %841 : vector<2x128xf32> to vector<2x128xbf16>
    %c0_384 = arith.constant 0 : index
    %c0_385 = arith.constant 0 : index
    %876 = vector.load %arg7[%c0_384, %c0_385] : memref<128x384xbf16, #tpu.memory_space<vmem>>, vector<128x384xbf16>
    %cst_386 = arith.constant dense<0.000000e+00> : vector<2x384xf32>
    %877 = tpu.matmul %875, %876, %cst_386 {dimension_numbers = #tpu.dot_dimension_numbers<[1], [0], [0], [1], [0, 0, 1, 1], [], []>} : vector<2x128xbf16>, vector<128x384xbf16>, vector<2x384xf32> -> vector<2x384xf32>
    %878 = arith.addf %872, %877 : vector<2x384xf32>
    %879 = arith.negf %878 : vector<2x384xf32>
    %880 = math.exp %879 : vector<2x384xf32>
    %cst_387 = arith.constant 1.000000e+00 : f32
    %881 = vector.broadcast %cst_387 : f32 to vector<2x384xf32>
    %882 = arith.addf %881, %880 : vector<2x384xf32>
    %883 = arith.divf %881, %882 : vector<2x384xf32>
    %884 = vector.extract_strided_slice %883 {offsets = [0, 0], sizes = [2, 128], strides = [1, 1]} : vector<2x384xf32> to vector<2x128xf32>
    %cst_388 = arith.constant 2.000000e+00 : f32
    %885 = vector.broadcast %cst_388 : f32 to vector<2x128xf32>
    %886 = arith.mulf %885, %884 : vector<2x128xf32>
    %cst_389 = arith.constant 1.000000e+00 : f32
    %887 = vector.broadcast %cst_389 : f32 to vector<2x128xf32>
    %888 = arith.subf %886, %887 : vector<2x128xf32>
    %889 = arith.select %85, %884, %888 : vector<2x128xi1>, vector<2x128xf32>
    %c64_i32_390 = arith.constant 64 : i32
    %890 = tpu.dynamic_rotate %889 by %c64_i32_390 dim 1 : vector<2x128xf32>, i32 -> vector<2x128xf32>
    %891 = arith.mulf %889, %890 : vector<2x128xf32>
    %892 = vector.extract_strided_slice %883 {offsets = [0, 128], sizes = [2, 128], strides = [1, 1]} : vector<2x384xf32> to vector<2x128xf32>
    %893 = arith.mulf %892, %838 : vector<2x128xf32>
    %894 = arith.addf %893, %891 : vector<2x128xf32>
    %895 = vector.extract_strided_slice %883 {offsets = [0, 256], sizes = [2, 128], strides = [1, 1]} : vector<2x384xf32> to vector<2x128xf32>
    %896 = math.tanh %894 : vector<2x128xf32>
    %897 = arith.mulf %895, %896 : vector<2x128xf32>
    %898 = arith.truncf %864 : vector<2x128xf32> to vector<2x128xbf16>
    %c0_391 = arith.constant 0 : index
    %c0_392 = arith.constant 0 : index
    %899 = vector.load %arg8[%c0_391, %c0_392] : memref<128x384xbf16, #tpu.memory_space<vmem>>, vector<128x384xbf16>
    %cst_393 = arith.constant dense<0.000000e+00> : vector<2x384xf32>
    %900 = tpu.matmul %898, %899, %cst_393 {dimension_numbers = #tpu.dot_dimension_numbers<[1], [0], [0], [1], [0, 0, 1, 1], [], []>} : vector<2x128xbf16>, vector<128x384xbf16>, vector<2x384xf32> -> vector<2x384xf32>
    %901 = arith.addf %874, %900 : vector<2x384xf32>
    %902 = arith.negf %901 : vector<2x384xf32>
    %903 = math.exp %902 : vector<2x384xf32>
    %cst_394 = arith.constant 1.000000e+00 : f32
    %904 = vector.broadcast %cst_394 : f32 to vector<2x384xf32>
    %905 = arith.addf %904, %903 : vector<2x384xf32>
    %906 = arith.divf %904, %905 : vector<2x384xf32>
    %907 = vector.extract_strided_slice %906 {offsets = [0, 0], sizes = [2, 128], strides = [1, 1]} : vector<2x384xf32> to vector<2x128xf32>
    %cst_395 = arith.constant 2.000000e+00 : f32
    %908 = vector.broadcast %cst_395 : f32 to vector<2x128xf32>
    %909 = arith.mulf %908, %907 : vector<2x128xf32>
    %cst_396 = arith.constant 1.000000e+00 : f32
    %910 = vector.broadcast %cst_396 : f32 to vector<2x128xf32>
    %911 = arith.subf %909, %910 : vector<2x128xf32>
    %912 = arith.select %85, %907, %911 : vector<2x128xi1>, vector<2x128xf32>
    %c64_i32_397 = arith.constant 64 : i32
    %913 = tpu.dynamic_rotate %912 by %c64_i32_397 dim 1 : vector<2x128xf32>, i32 -> vector<2x128xf32>
    %914 = arith.mulf %912, %913 : vector<2x128xf32>
    %915 = vector.extract_strided_slice %906 {offsets = [0, 128], sizes = [2, 128], strides = [1, 1]} : vector<2x384xf32> to vector<2x128xf32>
    %916 = arith.mulf %915, %861 : vector<2x128xf32>
    %917 = arith.addf %916, %914 : vector<2x128xf32>
    %918 = vector.extract_strided_slice %906 {offsets = [0, 256], sizes = [2, 128], strides = [1, 1]} : vector<2x384xf32> to vector<2x128xf32>
    %919 = math.tanh %917 : vector<2x128xf32>
    %920 = arith.mulf %918, %919 : vector<2x128xf32>
    %c0_398 = arith.constant 0 : index
    %c14_399 = arith.constant 14 : index
    %c0_400 = arith.constant 0 : index
    %921 = vector.load %arg17[%c0_398, %c14_399, %c0_400] : memref<2x16x128xf32, #tpu.memory_space<vmem>>, vector<2x1x128xf32>
    %922 = vector.shape_cast %921 : vector<2x1x128xf32> to vector<2x128xf32>
    %923 = vector.shape_cast %897 : vector<2x128xf32> to vector<2x1x128xf32>
    tpu.vector_store %arg17[%c0_398, %c14_399, %c0_400], %923 {strides = array<i32>} : memref<2x16x128xf32, #tpu.memory_space<vmem>>, vector<2x1x128xf32>,
    %c0_401 = arith.constant 0 : index
    %c1_402 = arith.constant 1 : index
    %c0_403 = arith.constant 0 : index
    %924 = vector.load %arg18[%c0_401, %c1_402, %c0_403] : memref<2x16x128xf32, #tpu.memory_space<vmem>>, vector<2x1x128xf32>
    %925 = vector.shape_cast %924 : vector<2x1x128xf32> to vector<2x128xf32>
    %926 = vector.shape_cast %920 : vector<2x128xf32> to vector<2x1x128xf32>
    tpu.vector_store %arg18[%c0_401, %c1_402, %c0_403], %926 {strides = array<i32>} : memref<2x16x128xf32, #tpu.memory_space<vmem>>, vector<2x1x128xf32>,
    %c0_404 = arith.constant 0 : index
    %c15_405 = arith.constant 15 : index
    %c0_406 = arith.constant 0 : index
    %927 = vector.load %arg16[%c0_404, %c15_405, %c0_406] : memref<2x16x768xf32, #tpu.memory_space<vmem>>, vector<2x1x384xf32>
    %928 = vector.shape_cast %927 : vector<2x1x384xf32> to vector<2x384xf32>
    %c0_407 = arith.constant 0 : index
    %c0_408 = arith.constant 0 : index
    %c384_409 = arith.constant 384 : index
    %929 = vector.load %arg16[%c0_407, %c0_408, %c384_409] : memref<2x16x768xf32, #tpu.memory_space<vmem>>, vector<2x1x384xf32>
    %930 = vector.shape_cast %929 : vector<2x1x384xf32> to vector<2x384xf32>
    %931 = arith.truncf %897 : vector<2x128xf32> to vector<2x128xbf16>
    %c0_410 = arith.constant 0 : index
    %c0_411 = arith.constant 0 : index
    %932 = vector.load %arg7[%c0_410, %c0_411] : memref<128x384xbf16, #tpu.memory_space<vmem>>, vector<128x384xbf16>
    %cst_412 = arith.constant dense<0.000000e+00> : vector<2x384xf32>
    %933 = tpu.matmul %931, %932, %cst_412 {dimension_numbers = #tpu.dot_dimension_numbers<[1], [0], [0], [1], [0, 0, 1, 1], [], []>} : vector<2x128xbf16>, vector<128x384xbf16>, vector<2x384xf32> -> vector<2x384xf32>
    %934 = arith.addf %928, %933 : vector<2x384xf32>
    %935 = arith.negf %934 : vector<2x384xf32>
    %936 = math.exp %935 : vector<2x384xf32>
    %cst_413 = arith.constant 1.000000e+00 : f32
    %937 = vector.broadcast %cst_413 : f32 to vector<2x384xf32>
    %938 = arith.addf %937, %936 : vector<2x384xf32>
    %939 = arith.divf %937, %938 : vector<2x384xf32>
    %940 = vector.extract_strided_slice %939 {offsets = [0, 0], sizes = [2, 128], strides = [1, 1]} : vector<2x384xf32> to vector<2x128xf32>
    %cst_414 = arith.constant 2.000000e+00 : f32
    %941 = vector.broadcast %cst_414 : f32 to vector<2x128xf32>
    %942 = arith.mulf %941, %940 : vector<2x128xf32>
    %cst_415 = arith.constant 1.000000e+00 : f32
    %943 = vector.broadcast %cst_415 : f32 to vector<2x128xf32>
    %944 = arith.subf %942, %943 : vector<2x128xf32>
    %945 = arith.select %85, %940, %944 : vector<2x128xi1>, vector<2x128xf32>
    %c64_i32_416 = arith.constant 64 : i32
    %946 = tpu.dynamic_rotate %945 by %c64_i32_416 dim 1 : vector<2x128xf32>, i32 -> vector<2x128xf32>
    %947 = arith.mulf %945, %946 : vector<2x128xf32>
    %948 = vector.extract_strided_slice %939 {offsets = [0, 128], sizes = [2, 128], strides = [1, 1]} : vector<2x384xf32> to vector<2x128xf32>
    %949 = arith.mulf %948, %894 : vector<2x128xf32>
    %950 = arith.addf %949, %947 : vector<2x128xf32>
    %951 = vector.extract_strided_slice %939 {offsets = [0, 256], sizes = [2, 128], strides = [1, 1]} : vector<2x384xf32> to vector<2x128xf32>
    %952 = math.tanh %950 : vector<2x128xf32>
    %953 = arith.mulf %951, %952 : vector<2x128xf32>
    %954 = arith.truncf %920 : vector<2x128xf32> to vector<2x128xbf16>
    %c0_417 = arith.constant 0 : index
    %c0_418 = arith.constant 0 : index
    %955 = vector.load %arg8[%c0_417, %c0_418] : memref<128x384xbf16, #tpu.memory_space<vmem>>, vector<128x384xbf16>
    %cst_419 = arith.constant dense<0.000000e+00> : vector<2x384xf32>
    %956 = tpu.matmul %954, %955, %cst_419 {dimension_numbers = #tpu.dot_dimension_numbers<[1], [0], [0], [1], [0, 0, 1, 1], [], []>} : vector<2x128xbf16>, vector<128x384xbf16>, vector<2x384xf32> -> vector<2x384xf32>
    %957 = arith.addf %930, %956 : vector<2x384xf32>
    %958 = arith.negf %957 : vector<2x384xf32>
    %959 = math.exp %958 : vector<2x384xf32>
    %cst_420 = arith.constant 1.000000e+00 : f32
    %960 = vector.broadcast %cst_420 : f32 to vector<2x384xf32>
    %961 = arith.addf %960, %959 : vector<2x384xf32>
    %962 = arith.divf %960, %961 : vector<2x384xf32>
    %963 = vector.extract_strided_slice %962 {offsets = [0, 0], sizes = [2, 128], strides = [1, 1]} : vector<2x384xf32> to vector<2x128xf32>
    %cst_421 = arith.constant 2.000000e+00 : f32
    %964 = vector.broadcast %cst_421 : f32 to vector<2x128xf32>
    %965 = arith.mulf %964, %963 : vector<2x128xf32>
    %cst_422 = arith.constant 1.000000e+00 : f32
    %966 = vector.broadcast %cst_422 : f32 to vector<2x128xf32>
    %967 = arith.subf %965, %966 : vector<2x128xf32>
    %968 = arith.select %85, %963, %967 : vector<2x128xi1>, vector<2x128xf32>
    %c64_i32_423 = arith.constant 64 : i32
    %969 = tpu.dynamic_rotate %968 by %c64_i32_423 dim 1 : vector<2x128xf32>, i32 -> vector<2x128xf32>
    %970 = arith.mulf %968, %969 : vector<2x128xf32>
    %971 = vector.extract_strided_slice %962 {offsets = [0, 128], sizes = [2, 128], strides = [1, 1]} : vector<2x384xf32> to vector<2x128xf32>
    %972 = arith.mulf %971, %917 : vector<2x128xf32>
    %973 = arith.addf %972, %970 : vector<2x128xf32>
    %974 = vector.extract_strided_slice %962 {offsets = [0, 256], sizes = [2, 128], strides = [1, 1]} : vector<2x384xf32> to vector<2x128xf32>
    %975 = math.tanh %973 : vector<2x128xf32>
    %976 = arith.mulf %974, %975 : vector<2x128xf32>
    %c0_424 = arith.constant 0 : index
    %c15_425 = arith.constant 15 : index
    %c0_426 = arith.constant 0 : index
    %977 = vector.load %arg17[%c0_424, %c15_425, %c0_426] : memref<2x16x128xf32, #tpu.memory_space<vmem>>, vector<2x1x128xf32>
    %978 = vector.shape_cast %977 : vector<2x1x128xf32> to vector<2x128xf32>
    %979 = vector.shape_cast %953 : vector<2x128xf32> to vector<2x1x128xf32>
    tpu.vector_store %arg17[%c0_424, %c15_425, %c0_426], %979 {strides = array<i32>} : memref<2x16x128xf32, #tpu.memory_space<vmem>>, vector<2x1x128xf32>,
    %c0_427 = arith.constant 0 : index
    %c0_428 = arith.constant 0 : index
    %c0_429 = arith.constant 0 : index
    %980 = vector.load %arg18[%c0_427, %c0_428, %c0_429] : memref<2x16x128xf32, #tpu.memory_space<vmem>>, vector<2x1x128xf32>
    %981 = vector.shape_cast %980 : vector<2x1x128xf32> to vector<2x128xf32>
    %982 = vector.shape_cast %976 : vector<2x128xf32> to vector<2x1x128xf32>
    tpu.vector_store %arg18[%c0_427, %c0_428, %c0_429], %982 {strides = array<i32>} : memref<2x16x128xf32, #tpu.memory_space<vmem>>, vector<2x1x128xf32>,
    %983 = tpu.iota {dimensions = array<i32: 2>} : vector<2x16x128xi32>
    %c64_i32_430 = arith.constant 64 : i32
    %984 = vector.broadcast %c64_i32_430 : i32 to vector<2x16x128xi32>
    %985 = arith.cmpi slt, %983, %984 : vector<2x16x128xi32>
    %c0_431 = arith.constant 0 : index
    %c0_432 = arith.constant 0 : index
    %c0_433 = arith.constant 0 : index
    %986 = vector.load %arg17[%c0_431, %c0_432, %c0_433] : memref<2x16x128xf32, #tpu.memory_space<vmem>>, vector<2x16x128xf32>
    %c0_434 = arith.constant 0 : index
    %c0_435 = arith.constant 0 : index
    %c0_436 = arith.constant 0 : index
    %987 = vector.load %arg18[%c0_434, %c0_435, %c0_436] : memref<2x16x128xf32, #tpu.memory_space<vmem>>, vector<2x16x128xf32>
    %988 = arith.select %985, %986, %987 : vector<2x16x128xi1>, vector<2x16x128xf32>
    %c0_437 = arith.constant 0 : index
    %c0_438 = arith.constant 0 : index
    %989 = vector.load %arg9[%c0_437, %c0_438] : memref<1x128xf32, #tpu.memory_space<vmem>>, vector<1x128xf32>
    %990 = vector.shape_cast %989 : vector<1x128xf32> to vector<1x1x128xf32>
    %991 = vector.broadcast %990 : vector<1x1x128xf32> to vector<2x16x128xf32>
    %992 = arith.mulf %988, %991 : vector<2x16x128xf32>
    %cst_439 = arith.constant dense<0.000000e+00> : vector<2x16xf32>
    %993 = vector.multi_reduction <add>, %992, %cst_439 [2] : vector<2x16x128xf32> to vector<2x16xf32>
    %c0_440 = arith.constant 0 : index
    %c0_441 = arith.constant 0 : index
    %994 = vector.load %arg10[%c0_440, %c0_441] : memref<1x1xf32, #tpu.memory_space<vmem>>, vector<1x1xf32>
    %995 = vector.broadcast %994 : vector<1x1xf32> to vector<2x16xf32>
    %996 = arith.addf %993, %995 : vector<2x16xf32>
    %cst_442 = arith.constant dense<0xFF800000> : vector<2xf32>
    %997 = vector.multi_reduction <maximumf>, %996, %cst_442 [1] : vector<2x16xf32> to vector<2xf32>
    %998 = vector.shape_cast %997 : vector<2xf32> to vector<2x1xf32>
    %999 = vector.broadcast %998 : vector<2x1xf32> to vector<2x16xf32>
    %1000 = arith.subf %996, %999 : vector<2x16xf32>
    %1001 = math.exp %1000 : vector<2x16xf32>
    %cst_443 = arith.constant dense<0.000000e+00> : vector<2xf32>
    %1002 = vector.multi_reduction <add>, %1001, %cst_443 [1] : vector<2x16xf32> to vector<2xf32>
    %1003 = vector.shape_cast %1002 : vector<2xf32> to vector<2x1xf32>
    %1004 = tpu.reciprocal %1003 {approx = true} : vector<2x1xf32> -> vector<2x1xf32>
    %1005 = vector.broadcast %1004 : vector<2x1xf32> to vector<2x16xf32>
    %1006 = arith.mulf %1001, %1005 : vector<2x16xf32>
    %1007 = vector.shape_cast %1006 : vector<2x16xf32> to vector<2x16x1xf32>
    %1008 = vector.broadcast %1007 : vector<2x16x1xf32> to vector<2x16x128xf32>
    %1009 = arith.mulf %1008, %988 : vector<2x16x128xf32>
    %cst_444 = arith.constant dense<0.000000e+00> : vector<2x128xf32>
    %1010 = vector.multi_reduction <add>, %1009, %cst_444 [1] : vector<2x16x128xf32> to vector<2x128xf32>
    %c0_445 = arith.constant 0 : index
    %c0_446 = arith.constant 0 : index
    %1011 = vector.load %arg11[%c0_445, %c0_446] : memref<128x64xf32, #tpu.memory_space<vmem>>, vector<128x64xf32>
    %cst_447 = arith.constant dense<0.000000e+00> : vector<2x64xf32>
    %1012 = tpu.matmul %1010, %1011, %cst_447 {dimension_numbers = #tpu.dot_dimension_numbers<[1], [0], [0], [1], [0, 0, 1, 1], [], []>} : vector<2x128xf32>, vector<128x64xf32>, vector<2x64xf32> -> vector<2x64xf32>
    %c0_448 = arith.constant 0 : index
    %c0_449 = arith.constant 0 : index
    %1013 = vector.load %arg12[%c0_448, %c0_449] : memref<1x64xf32, #tpu.memory_space<vmem>>, vector<1x64xf32>
    %1014 = vector.broadcast %1013 : vector<1x64xf32> to vector<2x64xf32>
    %1015 = arith.addf %1012, %1014 : vector<2x64xf32>
    %cst_450 = arith.constant 0.000000e+00 : f32
    %1016 = vector.broadcast %cst_450 : f32 to vector<2x64xf32>
    %1017 = arith.maximumf %1015, %1016 : vector<2x64xf32>
    %c0_451 = arith.constant 0 : index
    %c0_452 = arith.constant 0 : index
    %1018 = vector.load %arg13[%c0_451, %c0_452] : memref<64x128xf32, #tpu.memory_space<vmem>>, vector<64x128xf32>
    %cst_453 = arith.constant dense<0.000000e+00> : vector<2x128xf32>
    %1019 = tpu.matmul %1017, %1018, %cst_453 {dimension_numbers = #tpu.dot_dimension_numbers<[1], [0], [0], [1], [0, 0, 1, 1], [], []>} : vector<2x64xf32>, vector<64x128xf32>, vector<2x128xf32> -> vector<2x128xf32>
    %c0_454 = arith.constant 0 : index
    %c0_455 = arith.constant 0 : index
    %1020 = vector.load %arg14[%c0_454, %c0_455] : memref<1x128xf32, #tpu.memory_space<vmem>>, vector<1x128xf32>
    %1021 = vector.broadcast %1020 : vector<1x128xf32> to vector<2x128xf32>
    %1022 = arith.addf %1019, %1021 : vector<2x128xf32>
    %c0_456 = arith.constant 0 : index
    %c0_457 = arith.constant 0 : index
    %1023 = vector.load %arg15[%c0_456, %c0_457] : memref<2x128xf32, #tpu.memory_space<vmem>>, vector<2x128xf32>
    tpu.vector_store %arg15[%c0_456, %c0_457], %1022 {strides = array<i32>} : memref<2x128xf32, #tpu.memory_space<vmem>>, vector<2x128xf32>,
    return
  }
}

</mosaic_0001>

<bundles_post_ra>
// kernel: forward.1
= control target key start
LH: loop header
LB: loop body
LE: loop exit
PB: predicated region body
PF: predicated region fallthrough
CT: control target
= control target key end

     0   :  { %s19824_s0 = inlined_call_operand.vmem [shape: f32[2,1,16], index: 0, kind: input, shape index: {}]   ;;  %s19825_s1 = inlined_call_operand.vmem [shape: f32[3,32], index: 1, kind: input, shape index: {}]   ;;  %s19826_s2 = inlined_call_operand.vmem [shape: f32[1,32], index: 2, kind: input, shape index: {}]   ;;  %s19827_s3 = inlined_call_operand.vmem [shape: f32[1,32], index: 3, kind: input, shape index: {}]   ;;  %s19828_s4 = inlined_call_operand.vmem [shape: f32[1,32], index: 4, kind: input, shape index: {}]   ;;  %s19829_s5 = inlined_call_operand.vmem [shape: f32[32,768], index: 5, kind: input, shape index: {}]   ;;  %s19830_s6 = inlined_call_operand.vmem [shape: f32[1,768], index: 6, kind: input, shape index: {}]   ;;  %s19831_s7 = inlined_call_operand.hbm [shape: bf16[128,384], index: 7, kind: input, shape index: {}]   ;;  %s19832_s8 = inlined_call_operand.hbm [shape: bf16[128,384], index: 8, kind: input, shape index: {}]   ;;  %s19833_s9 = inlined_call_operand.vmem [shape: f32[1,128], index: 9, kind: input, shape index: {}]   ;;  %s19834_s10 = inlined_call_operand.<no memory space> [shape: f32[1,1], index: 10, kind: input, shape index: {}]   ;;  %s19835_s11 = inlined_call_operand.vmem [shape: f32[128,64], index: 11, kind: input, shape index: {}]   ;;  %s19836_s12 = inlined_call_operand.vmem [shape: f32[1,64], index: 12, kind: input, shape index: {}]   ;;  %s19837_s13 = inlined_call_operand.hbm [shape: f32[64,128], index: 13, kind: input, shape index: {}]   ;;  %s19838_s14 = inlined_call_operand.vmem [shape: f32[1,128], index: 14, kind: input, shape index: {}]   ;;  %s19839_s15 = inlined_call_operand.hbm [shape: f32[2,128], index: 15, kind: output, shape index: {}]  }
   0x1   :  { %v20_v0 = vstv %s19834_s10 }
   0x2   :  { %21 = vst [vmem:[#allocation5] sm:$0x1] %v20_v0 }
   0x3   :  { %22 = vsyncpa [#allocation7], 0 }
   0x4   :  { %23 = vsyncpa [#allocation10], 0 }
   0x5   :  { %24 = vsyncpa [#allocation8], 0  ;;  %s16904_s20 = smov [#allocation9]   ;;  %s16905_s22 = smov [#allocation6]  }
   0x6   :  { %s56_s21 = sshll.u32 %s16904_s20, 4  ;;  %s44_s23 = sshll.u32 %s16905_s22, 4  ;;  %s57_s21 = int_to_ptr.vmem [resolvable:$true] %s56_s21  ;;  %s17002_s23 = int_to_ptr.vmem [resolvable:$true] %s44_s23 }
   0x7   :  { %s16810_s26 = scalar_lea.hbm %s19832_s8, 3072 }
   0x8   :  { %p16811_p0 = scmp.ne.s32.totalorder %s19832_s8, %s16810_s26  ;;  %p16814_p1 = scmp.lt.u32.totalorder %s16810_s26, %s19832_s8 }
   0xa   :  { %p16816_p2 = pnand %p16814_p1, %p16811_p0 }
   0xc   :  { %16819 = shalt.err (!%p16816_p2)
}
   0xd   :  { %s16820_s30 = scalar_lea.vmem %s57_s21, 3072  ;;  %p16825_p4 = scmp.lt.s32.totalorder %s57_s21, %s57_s21 }
   0xe   :  { %p16821_p3 = scmp.ne.s32.totalorder %s57_s21, %s16820_s30  ;;  %p16826_p5 = scmp.lt.s32.totalorder %s16820_s30, %s16820_s30 }
  0x10   :  { %p16827_p6 = por %p16826_p5, %p16825_p4 }
  0x12   :  { %p16828_p7 = pnand %p16827_p6, %p16821_p3 }
  0x14   :  { %16831 = shalt.err (!%p16828_p7)
}
  0x15   :  { %s16906_s16 = smov 192   ;;  %s16907_s17 = smov 12  }
  0x16   :  { %62 = dma.hbm_to_vmem [thread:$0]  %s19832_s8, 3072, %s57_s21, [#allocation10], %s16906_s16, %s16906_s16, %s16907_s17  }
  0x17   :  { %s16832_s24 = scalar_lea.hbm %s19831_s7, 3072 }
  0x18   :  { %p16833_p8 = scmp.ne.s32.totalorder %s19831_s7, %s16832_s24  ;;  %p16836_p9 = scmp.lt.u32.totalorder %s16832_s24, %s19831_s7 }
  0x1a   :  { %p16838_p10 = pnand %p16836_p9, %p16833_p8 }
  0x1c   :  { %16841 = shalt.err (!%p16838_p10)
}
  0x1d   :  { %s16842_s10 = scalar_lea.vmem %s17002_s23, 3072  ;;  %p16847_p12 = scmp.lt.s32.totalorder %s17002_s23, %s17002_s23 }
  0x1e   :  { %p16843_p11 = scmp.ne.s32.totalorder %s17002_s23, %s16842_s10  ;;  %p16848_p13 = scmp.lt.s32.totalorder %s16842_s10, %s16842_s10 }
  0x20   :  { %p16849_p0 = por %p16848_p13, %p16847_p12 }
  0x22   :  { %p16850_p1 = pnand %p16849_p0, %p16843_p11 }
  0x24   :  { %16853 = shalt.err (!%p16850_p1)
}
  0x25   :  { %50 = dma.hbm_to_vmem [thread:$0]  %s19831_s7, 3072, %s17002_s23, [#allocation7], %s16906_s16, %s16906_s16, %s16907_s17  }
  0x26   :  { %s16908_s29 = smov [#allocation11]   ;;  %s16854_s20 = scalar_lea.hbm %s19837_s13, 1024 }
  0x27   :  { %s76_s30 = sshll.u32 %s16908_s29, 4  ;;  %p16855_p2 = scmp.ne.s32.totalorder %s19837_s13, %s16854_s20  ;;  %s77_s30 = int_to_ptr.vmem [resolvable:$true] %s76_s30 }
  0x28   :  { %p16858_p3 = scmp.lt.u32.totalorder %s16854_s20, %s19837_s13 }
  0x2a   :  { %p16860_p4 = pnand %p16858_p3, %p16855_p2 }
  0x2c   :  { %16863 = shalt.err (!%p16860_p4)
}
  0x2d   :  { %s16864_s27 = scalar_lea.vmem %s77_s30, 1024  ;;  %p16869_p6 = scmp.lt.s32.totalorder %s77_s30, %s77_s30 }
  0x2e   :  { %p16865_p5 = scmp.ne.s32.totalorder %s77_s30, %s16864_s27  ;;  %p16870_p7 = scmp.lt.s32.totalorder %s16864_s27, %s16864_s27 }
  0x30   :  { %p16871_p8 = por %p16870_p7, %p16869_p6 }
  0x32   :  { %p16872_p9 = pnand %p16871_p8, %p16865_p5 }
  0x34   :  { %16875 = shalt.err (!%p16872_p9)
}
  0x35   :  { %s16909_s7 = smov 128   ;;  %s16910_s23 = smov 8  }
  0x36   :  { %82 = dma.hbm_to_vmem [thread:$0]  %s19837_s13, 1024, %s77_s30, [#allocation10], %s16909_s7, %s16909_s7, %s16910_s23  }
  0x37   :  { %16898 = dma.done.wait [#allocation7], 3072  }
  0x38   :  { %16899 = vsyncadd [#allocation7], 4294964224 }
  0x39   :  { %16900 = dma.done.wait [#allocation10], 4096  }
  0x3a   :  { %16901 = vsyncadd [#allocation10], 4294963200  ;;  %v97_v1 = vlaneseq  ;;  %v16911_v2 = vmov 0.0|0.0   ;;  %v16912_v3 = vmov 1966171168   ;;  %vm16913_vm0 = vmmov 0  }
  0x3b   :  { %15691 = vmatprep.subr.bf16.mxu0 %v16911_v2  ;;  %v121_v4 = vunpack.c.l.s4 %v16912_v3  ;;  %15694 = vmatprep.subr.bf16.mxu1 %v16911_v2  ;;  %v16914_v7 = vmov 0.0   ;;  %v95_v15 = vld [vmem:[%s19824_s0] sm:$0x1]  ;;  %v96_v16 = vld [vmem:[%s19824_s0 + $0x1] sm:$0x1]  ;;  %vm134_vm7 = vcmask 130048  }
  0x3c   :  { %v17047_v5 = vshrl.u32 %v97_v1, 7  ;;  %v17049_v6 = vand.u32 127, %v97_v1  ;;  %14987 = vmatprep.mubr.msk.f32.mxu0 %vm16913_vm0, %v16914_v7  ;;  %14994 = vmatprep.mubr.msk.f32.mxu1 %vm16913_vm0, %v16914_v7  ;;  %v119_v17 = vcombine.low %v95_v15, %v96_v16  ;;  %v16915_v18 = vmov 1.0|1.0   ;;  %v458_v32 = vld [vmem:[%s19829_s5 + $0x8] sm:$0xff]  ;;  %v464_v33 = vld [vmem:[%s19829_s5 + $0x38] sm:$0xff] }
  0x3d   :  { %v122_v8 = vunpack.c.0.s8 %v121_v4  ;;  %v460_v34 = vld [vmem:[%s19829_s5 + $0x18] sm:$0xff]  ;;  %v15697_v35 = vpack.c.bf16 %v464_v33, %v458_v32  ;;  %v457_v36 = vld [vmem:[%s19829_s5] sm:$0xff]  ;;  %v463_v37 = vld [vmem:[%s19829_s5 + $0x30] sm:$0xff]  ;;  %vm387_vm8 = vcmask 261120   ;;  %vm1628_vm10 = vcmask 1041409   ;;  %s16918_s0 = smov [#allocation12]  }
  0x3e   :  { %v99_v9 = vadd.s32 8, %v17047_v5  ;;  %v102_v10 = vadd.s32 1, %v17047_v5  ;;  %v110_v11 = vadd.s32 1, %v17049_v6  ;;  %v17062_v13 = vsub.s32 0, %v17047_v5  ;;  %v466_v38 = vld [vmem:[%s19829_s5 + $0x48] sm:$0xff]  ;;  %v459_v41 = vld [vmem:[%s19829_s5 + $0x10] sm:$0xff] }
  0x3f   :  { %v17059_v12 = vsub.s32 %v122_v8, %v17047_v5  ;;  %v17080_v23 = vsub.s32 1, %v17047_v5  ;;  %v15699_v39 = vpack.c.bf16 %v463_v37, %v457_v36  ;;  %v15705_v40 = vpack.c.bf16 %v466_v38, %v460_v34  ;;  %v465_v42 = vld [vmem:[%s19829_s5 + $0x40] sm:$0xff]  ;;  %v470_v44 = vld [vmem:[%s19829_s5 + $0x68] sm:$0xff]  ;;  %v476_v45 = vld [vmem:[%s19829_s5 + $0x98] sm:$0xff]  ;;  %s13727_s21 = sshll.u32 %s16918_s0, 4  ;;  %s13728_s21 = int_to_ptr.vmem [resolvable:$true] %s13727_s21 }
  0x40   :  { %v103_v14 = vadd.s32 1, %v99_v9  ;;  %vm104_vm1 = vcmp.eq.s32.totalorder %v17049_v6, %v102_v10  ;;  %vm111_vm2 = vcmp.eq.s32.totalorder %v17047_v5, %v110_v11  ;;  %vm112_vm3 = vcmp.eq.s32.totalorder %v99_v9, %v110_v11  ;;  %v469_v46 = vld [vmem:[%s19829_s5 + $0x60] sm:$0xff]  ;;  %v475_v48 = vld [vmem:[%s19829_s5 + $0x90] sm:$0xff]  ;;  %v472_v49 = vld [vmem:[%s19829_s5 + $0x78] sm:$0xff]  ;;  %s16876_s29 = scalar_lea.vmem %s13728_s21, 32  ;;  %p16881_p11 = scmp.lt.s32.totalorder %s13728_s21, %s13728_s21 }
  0x41   :  { %vm15695_vm4 = vmpackc.low %vm112_vm3, %vm111_vm2  ;;  %v311_v19 = vrot.slane %v95_v15, %v17062_v13  ;;  %v126_v20 = vrot.slane %v119_v17, %v17059_v12  ;;  %v322_v22 = vrot.slane %v96_v16, %v17062_v13  ;;  %v15707_v43 = vpack.c.bf16 %v465_v42, %v459_v41  ;;  %v478_v50 = vld [vmem:[%s19829_s5 + $0xa8] sm:$0xff]  ;;  %v471_v53 = vld [vmem:[%s19829_s5 + $0x70] sm:$0xff]  ;;  %p16877_p10 = scmp.ne.s32.totalorder %s13728_s21, %s16876_s29  ;;  %p16882_p12 = scmp.lt.s32.totalorder %s16876_s29, %s16876_s29 }
  0x42   :  { %vm105_vm5 = vcmp.eq.s32.totalorder %v17049_v6, %v103_v14  ;;  %15696 = vmatpush3.bf16.msk.msra.mxu1 %vm15695_vm4, %v16915_v18  ;;  %v15701_v47 = vpack.c.bf16 %v476_v45, %v470_v44  ;;  %v15703_v51 = vpack.c.bf16 %v475_v48, %v469_v46  ;;  %v15709_v52 = vpack.c.bf16 %v478_v50, %v472_v49  ;;  %v477_v54 = vld [vmem:[%s19829_s5 + $0xa0] sm:$0xff]  ;;  %v462_v55 = vld [vmem:[%s19829_s5 + $0x28] sm:$0xff]  ;;  %v468_v57 = vld [vmem:[%s19829_s5 + $0x58] sm:$0xff] }
  0x43   :  { %vm15692_vm6 = vmpackc.low %vm105_vm5, %vm104_vm1  ;;  %313 = vbcast.lane.b32.xlu1 %v311_v19, 256  ;;  %v133_v21 = vrot.slane %v126_v20, %v17059_v12  ;;  %15706 = vmatprep.subr.bf16.mxu1 %v15705_v40  ;;  %v15711_v56 = vpack.c.bf16 %v477_v54, %v471_v53  ;;  %v15713_v58 = vpack.c.bf16 %v468_v57, %v462_v55  ;;  %v17140_v59 = vld [vmem:[#allocation6 + $0x4] ss:$12 sps:$4 sm:$0xff]   ;;  %v277_v0 = vld [vmem:[%s19825_s1] sm:$0x7]  ;;  %v366_v9 = vsub.s32 2, %v17047_v5  ;;  %p16883_p13 = por %p16882_p12, %p16881_p11 }
  0x44   :  { %15693 = vmatpush3.bf16.msk.msra.mxu0 %vm15692_vm6, %v16915_v18  ;;  %v333_v1 = vrot.slane %v277_v0, %v17080_v23  ;;  %v303_v8 = vrot.slane %v277_v0, %v17062_v13  ;;  %v16916_v10 = vmov 0   ;;  %v13747_v34 = vld [vmem:[%s19826_s2] ss:$0 sm:$0xff]  ;;  %vm817_vm9 = vcmp.lt.s32.totalorder %v17049_v6, 64 }
  0x45   :  { %14995 = vmatmul.mubr.msk.f32.vlgmr.msra.gmra.mrb[0].mxu1 %vm134_vm7, %v133_v21  ;;  %15698 = vmatprep.subr.bf16.mxu0 %v15697_v35  ;;  %v367_v18 = vrot.slane %v277_v0, %v366_v9  ;;  %vm13400_vm11 = vcmask 130112   ;;  %vm13413_vm12 = vcmask 123904   ;;  %vm13646_vm13 = vcmask 523264   ;;  %p16884_p0 = pnand %p16883_p13, %p16877_p10 }
  0x46   :  { %678 = vmatprep.mubr.f32.mxu1 %v16914_v7  ;;  %15708 = vmatpush1.bf16.msra.mxu1 %v15707_v43 }
  0x47   :  { %14988 = vmatmul.mubr.msk.f32.vlgmr.msra.gmra.mrb[0].mxu0 %vm134_vm7, %v133_v21  ;;  %317 = vbcast.lane.b32.xlu1 %v311_v19, 264 }
  0x48   :  { %589 = vmatprep.mubr.f32.mxu0 %v16914_v7  ;;  %15700 = vmatpush1.bf16.msra.mxu0 %v15699_v39 }
  0x49   :  { %15702 = vmatprep.subr.bf16.mxu0 %v15701_v47  ;;  %15710 = vmatprep.subr.bf16.mxu1 %v15709_v52 }
  0x4a   :  { %15712 = vmatpush1.bf16.msra.mxu1 %v15711_v56  ;;  %15772 = vset.pattern.permute.xlu1 %v16916_v10 }
  0x4b   :  { %324 = vbcast.lane.b32.xlu1 %v322_v22, 256  ;;  %985 = vmatprep.subr.bf16.mxu1 %v17140_v59 }
  0x4c   :  { %15704 = vmatpush1.bf16.msra.mxu0 %v15703_v51  ;;  %15773 = vset.pattern.permute.xlu0 %v16916_v10 }
  0x4d   :  { %15714 = vmatprep.subr.bf16.mxu0 %v15713_v58 }
  0x4f   :  { %328 = vbcast.lane.b32.xlu1 %v322_v22, 264 }
  0xb5   :  { %v314_v60 = vpop.permute.xlu1 %313 }
  0xb6   :  { %v334_v11 = vmul.f32 %v333_v1, %v314_v60 }
  0xb9   :  { %v318_v61 = vpop.permute.xlu1 %317 }
  0xba   :  { %v335_v15 = vmul.f32 %v333_v1, %v318_v61 }
  0xbd   :  { %v325_v62 = vpop.permute.xlu1 %324 }
  0xc1   :  { %v329_v3 = vpop.permute.xlu1 %328 }
 0x118   :  { %v273_v25 = vpop.f32.mrb[0].mxu1 }
 0x119   :  { %v345_v28 = vrot.slane %v273_v25, %v17062_v13  ;;  %v14996_v29 = vpop.f32.mrb[1].mxu1  ;;  %v356_v30 = vrot.slane %v273_v25, %v17080_v23 }
 0x11a   :  { %v203_v24 = vpop.f32.mrb[0].mxu0 }
 0x11b   :  { %v14989_v26 = vpop.f32.mrb[1].mxu0  ;;  %v281_v27 = vrot.slane %v203_v24, %v17062_v13  ;;  %351 = vbcast.lane.b32.xlu1 %v345_v28, 264  ;;  %v292_v31 = vrot.slane %v203_v24, %v17080_v23 }
 0x11d   :  { %283 = vbcast.lane.b32.xlu0 %v281_v27, 256 }
 0x11f   :  { %362 = vbcast.lane.b32.xlu1 %v356_v30, 264 }
 0x121   :  { %287 = vbcast.lane.b32.xlu0 %v281_v27, 264  ;;  %v336_v27 = vmul.f32 %v333_v1, %v325_v62 }
 0x125   :  { %294 = vbcast.lane.b32.xlu0 %v292_v31, 256 }
 0x129   :  { %347 = vbcast.lane.b32.xlu0 %v345_v28, 256 }
 0x12d   :  { %298 = vbcast.lane.b32.xlu0 %v292_v31, 264 }
 0x131   :  { %358 = vbcast.lane.b32.xlu0 %v356_v30, 256  ;;  %v337_v30 = vmul.f32 %v333_v1, %v329_v3 }
 0x18d   :  { %v352_v19 = vpop.permute.xlu1 %351 }
 0x18e   :  { %v369_v24 = vmul.f32 %v367_v18, %v352_v19 }
 0x18f   :  { %v284_v63 = vpop.permute.xlu0 %283 }
 0x190   :  { %v304_v16 = vmul.f32 %v303_v8, %v284_v63 }
 0x191   :  { %v363_v28 = vpop.permute.xlu1 %362 }
 0x192   :  { %v338_v21 = vadd.f32 %v334_v11, %v304_v16  ;;  %v371_v35 = vmul.f32 %v367_v18, %v363_v28 }
 0x193   :  { %v288_v4 = vpop.permute.xlu0 %287 }
 0x194   :  { %v305_v17 = vmul.f32 %v303_v8, %v288_v4 }
 0x196   :  { %v339_v22 = vadd.f32 %v335_v15, %v305_v17 }
 0x197   :  { %v295_v14 = vpop.permute.xlu0 %294 }
 0x198   :  { %v373_v31 = vadd.f32 %v369_v24, %v339_v22  ;;  %v306_v32 = vmul.f32 %v303_v8, %v295_v14 }
 0x19a   :  { %v384_v39 = vadd.f32 %v13747_v34, %v373_v31  ;;  %v340_v40 = vadd.f32 %v336_v27, %v306_v32 }
 0x19b   :  { %v348_v20 = vpop.permute.xlu0 %347 }
 0x19c   :  { %v368_v25 = vmul.f32 %v367_v18, %v348_v20  ;;  %v389_v45 = vsel %vm387_vm8, %v384_v39, 0.0 }
 0x19e   :  { %v372_v26 = vadd.f32 %v368_v25, %v338_v21 }
 0x19f   :  { %v299_v29 = vpop.permute.xlu0 %298 }
 0x1a0   :  { %v307_v33 = vmul.f32 %v303_v8, %v299_v29  ;;  %v383_v36 = vadd.f32 %v13747_v34, %v372_v26 }
 0x1a2   :  { %v341_v37 = vadd.f32 %v337_v30, %v307_v33  ;;  %v388_v43 = vsel %vm387_vm8, %v383_v36, 0.0  ;;  %v13748_v30 = vld [vmem:[%s19827_s3] ss:$0 sm:$0xff] }
 0x1a3   :  { %v359_v38 = vpop.permute.xlu0 %358  ;;  %v390_v48 = vadd.f32 %v389_v45, %v388_v43  ;;  %v13749_v33 = vld [vmem:[%s19828_s4] ss:$0 sm:$0xff] }
 0x1a4   :  { %v375_v41 = vadd.f32 %v371_v35, %v341_v37  ;;  %v370_v42 = vmul.f32 %v367_v18, %v359_v38  ;;  %v467_v37 = vld [vmem:[%s19829_s5 + $0x50] sm:$0xff] }
 0x1a6   :  { %v374_v44 = vadd.f32 %v370_v42, %v340_v40  ;;  %v386_v46 = vadd.f32 %v13747_v34, %v375_v41  ;;  %v480_v40 = vld [vmem:[%s19829_s5 + $0xb8] sm:$0xff] }
 0x1a8   :  { %v385_v47 = vadd.f32 %v13747_v34, %v374_v44  ;;  %v393_v51 = vsel %vm387_vm8, %v386_v46, 0.0  ;;  %v461_v34 = vld [vmem:[%s19829_s5 + $0x20] sm:$0xff] }
 0x1a9   :  { %v15715_v42 = vpack.c.bf16 %v467_v37, %v461_v34  ;;  %v17291_v34 = vld [vmem:[#allocation9 + $0x64] ss:$12 sps:$4 sm:$0xff]   ;;  %v17299_v37 = vld [vmem:[#allocation9 + $0x7c] ss:$12 sps:$4 sm:$0xff]  }
 0x1aa   :  { %v391_v49 = vsel %vm387_vm8, %v385_v47, 0.0 }
 0x1ab   :  { %v392_v50 = vadd.f32 %v391_v49, %v390_v48  ;;  %v473_v48 = vld [vmem:[%s19829_s5 + $0x80] sm:$0xff]  ;;  %v479_v49 = vld [vmem:[%s19829_s5 + $0xb0] sm:$0xff] }
 0x1ad   :  { %v394_v52 = vadd.f32 %v393_v51, %v392_v50  ;;  %v17188_v50 = vld [vmem:[#allocation6] ss:$12 sps:$4 sm:$0xff]  }
 0x1af   :  { %v395_v53 = vrot.slane %v394_v52, 4 }
 0x1b1   :  { %v396_v54 = vadd.f32 %v395_v53, %v394_v52  ;;  %v15719_v53 = vpack.c.bf16 %v479_v49, %v473_v48  ;;  %v15836_v48 = vld [vmem:[#allocation9 + $0x98] ss:$12 sps:$4 sm:$0xff]  }
 0x1b2   :  { %v481_v49 = vld [vmem:[%s19830_s6] sm:$0x3f]  ;;  %s16917_s6 = smov 64  }
 0x1b3   :  { %v397_v55 = vrot.slane %v396_v54, 2 }
 0x1b5   :  { %v398_v56 = vadd.f32 %v397_v55, %v396_v54  ;;  %v17194_v55 = vld [vmem:[#allocation6 + $0x1c] ss:$12 sps:$4 sm:$0xff]  }
 0x1b7   :  { %v399_v57 = vrot.slane %v398_v56, 1 }
 0x1b9   :  { %v400_v58 = vadd.f32 %v399_v57, %v398_v56  ;;  %v17197_v56 = vld [vmem:[#allocation6 + $0x18] ss:$12 sps:$4 sm:$0xff]  }
 0x1bb   :  { %v402_v60 = vmul.f32 0.03125, %v400_v58 }
 0x1bd   :  { %v403_v61 = vsub.f32 %v383_v36, %v402_v60  ;;  %v404_v62 = vsub.f32 %v384_v39, %v402_v60  ;;  %v405_v63 = vsub.f32 %v385_v47, %v402_v60  ;;  %v406_v0 = vsub.f32 %v386_v46, %v402_v60  ;;  %v474_v39 = vld [vmem:[%s19829_s5 + $0x88] sm:$0xff]  ;;  %v17204_v60 = vld [vmem:[#allocation6 + $0x34] ss:$12 sps:$4 sm:$0xff]  }
 0x1be   :  { %v15717_v43 = vpack.c.bf16 %v480_v40, %v474_v39  ;;  %v17305_v39 = vld [vmem:[#allocation9 + $0x78] ss:$12 sps:$4 sm:$0xff]   ;;  %v17308_v40 = vld [vmem:[#allocation9 + $0x94] ss:$12 sps:$4 sm:$0xff]  }
 0x1bf   :  { %v407_v1 = vmul.f32 %v403_v61, %v403_v61  ;;  %v408_v3 = vmul.f32 %v404_v62, %v404_v62  ;;  %v409_v4 = vmul.f32 %v405_v63, %v405_v63  ;;  %v410_v8 = vmul.f32 %v406_v0, %v406_v0 }
 0x1c1   :  { %v411_v11 = vsel %vm387_vm8, %v407_v1, 0.0  ;;  %v412_v14 = vsel %vm387_vm8, %v408_v3, 0.0  ;;  %v414_v16 = vsel %vm387_vm8, %v409_v4, 0.0  ;;  %v416_v18 = vsel %vm387_vm8, %v410_v8, 0.0  ;;  %v17222_v1 = vld [vmem:[#allocation6 + $0x64] ss:$12 sps:$4 sm:$0xff]  }
 0x1c2   :  { %v413_v15 = vadd.f32 %v412_v14, %v411_v11  ;;  %v15780_v3 = vld [vmem:[#allocation6 + $0x8] ss:$12 sps:$4 sm:$0xff]   ;;  %v17228_v4 = vld [vmem:[#allocation6 + $0x60] ss:$12 sps:$4 sm:$0xff]   ;;  %v17237_v14 = vld [vmem:[#allocation6 + $0x78] ss:$12 sps:$4 sm:$0xff]  }
 0x1c3   :  { %v17232_v8 = vld [vmem:[#allocation6 + $0x7c] ss:$12 sps:$4 sm:$0xff]   ;;  %v15784_v11 = vld [vmem:[#allocation6 + $0x20] ss:$12 sps:$4 sm:$0xff]  }
 0x1c4   :  { %v415_v17 = vadd.f32 %v414_v16, %v413_v15  ;;  %v17241_v15 = vld [vmem:[#allocation6 + $0x94] ss:$12 sps:$4 sm:$0xff]   ;;  %v15788_v16 = vld [vmem:[#allocation6 + $0x38] ss:$12 sps:$4 sm:$0xff]  }
 0x1c6   :  { %v417_v19 = vadd.f32 %v416_v18, %v415_v17  ;;  %v17246_v17 = vld [vmem:[#allocation6 + $0x90] ss:$12 sps:$4 sm:$0xff]   ;;  %v17250_v18 = vld [vmem:[#allocation6 + $0xac] ss:$12 sps:$4 sm:$0xff]  }
 0x1c8   :  { %v418_v20 = vrot.slane %v417_v19, 4 }
 0x1ca   :  { %v419_v21 = vadd.f32 %v418_v20, %v417_v19  ;;  %v15792_v19 = vld [vmem:[#allocation6 + $0x50] ss:$12 sps:$4 sm:$0xff]   ;;  %v17255_v20 = vld [vmem:[#allocation6 + $0xa8] ss:$12 sps:$4 sm:$0xff]  }
 0x1cc   :  { %v420_v22 = vrot.slane %v419_v21, 2 }
 0x1ce   :  { %v421_v24 = vadd.f32 %v420_v22, %v419_v21  ;;  %v17259_v21 = vld [vmem:[#allocation9 + $0x4] ss:$12 sps:$4 sm:$0xff]   ;;  %v15796_v22 = vld [vmem:[#allocation6 + $0x68] ss:$12 sps:$4 sm:$0xff]  }
 0x1d0   :  { %v422_v25 = vrot.slane %v421_v24, 1 }
 0x1d2   :  { %v423_v26 = vadd.f32 %v422_v25, %v421_v24  ;;  %v17265_v24 = vld [vmem:[#allocation9] ss:$12 sps:$4 sm:$0xff]   ;;  %v17268_v25 = vld [vmem:[#allocation9 + $0x1c] ss:$12 sps:$4 sm:$0xff]  }
 0x1d4   :  { %v424_v27 = vmul.f32 0.03125, %v423_v26  ;;  %v15800_v26 = vld [vmem:[#allocation6 + $0x80] ss:$12 sps:$4 sm:$0xff]  }
 0x1d6   :  { %v425_v28 = vadd.f32 1e-05, %v424_v27  ;;  %v17273_v27 = vld [vmem:[#allocation9 + $0x18] ss:$12 sps:$4 sm:$0xff]  }
 0x1d8   :  { %16414 = vrsqrt.f32 %v425_v28  ;;  %v17277_v28 = vld [vmem:[#allocation9 + $0x34] ss:$12 sps:$4 sm:$0xff]  }
 0x1e2   :  { %v16415_v29 = vpop.eup %16414 }
 0x1e3   :  { %v427_v31 = vmul.f32 %v16415_v29, %v403_v61  ;;  %v428_v32 = vmul.f32 %v16415_v29, %v404_v62  ;;  %v429_v35 = vmul.f32 %v16415_v29, %v405_v63  ;;  %v430_v47 = vmul.f32 %v16415_v29, %v406_v0  ;;  %v17208_v61 = vld [vmem:[#allocation6 + $0x30] ss:$12 sps:$4 sm:$0xff]   ;;  %v17214_v62 = vld [vmem:[#allocation6 + $0x4c] ss:$12 sps:$4 sm:$0xff]   ;;  %v17218_v0 = vld [vmem:[#allocation6 + $0x48] ss:$12 sps:$4 sm:$0xff]  }
 0x1e4   :  { %v15804_v29 = vld [vmem:[#allocation6 + $0x98] ss:$12 sps:$4 sm:$0xff]  }
 0x1e5   :  { %v438_v36 = vmul.f32 %v13748_v30, %v427_v31  ;;  %v439_v38 = vmul.f32 %v13748_v30, %v428_v32  ;;  %v440_v46 = vmul.f32 %v13748_v30, %v429_v35  ;;  %v441_v54 = vmul.f32 %v13748_v30, %v430_v47  ;;  %v17281_v30 = vld [vmem:[#allocation9 + $0x30] ss:$12 sps:$4 sm:$0xff]   ;;  %v17284_v31 = vld [vmem:[#allocation9 + $0x4c] ss:$12 sps:$4 sm:$0xff]   ;;  %v15812_v35 = vld [vmem:[#allocation9 + $0x8] ss:$12 sps:$4 sm:$0xff]  }
 0x1e6   :  { %v15808_v32 = vld [vmem:[#allocation6 + $0xb0] ss:$12 sps:$4 sm:$0xff]   ;;  %v15832_v47 = vld [vmem:[#allocation9 + $0x80] ss:$12 sps:$4 sm:$0xff]  }
 0x1e7   :  { %v449_v41 = vadd.f32 %v13749_v33, %v438_v36  ;;  %v450_v45 = vadd.f32 %v13749_v33, %v439_v38  ;;  %v451_v52 = vadd.f32 %v13749_v33, %v440_v46  ;;  %v452_v58 = vadd.f32 %v13749_v33, %v441_v54  ;;  %v17288_v33 = vld [vmem:[#allocation9 + $0x48] ss:$12 sps:$4 sm:$0xff]   ;;  %v17295_v36 = vld [vmem:[#allocation9 + $0x60] ss:$12 sps:$4 sm:$0xff]  }
 0x1e8   :  { %v15816_v38 = vld [vmem:[#allocation9 + $0x20] ss:$12 sps:$4 sm:$0xff]   ;;  %v15828_v46 = vld [vmem:[#allocation9 + $0x68] ss:$12 sps:$4 sm:$0xff]  }
 0x1e9   :  { %v453_v44 = vmax.f32 %v449_v41, 0.0  ;;  %v454_v51 = vmax.f32 %v450_v45, 0.0  ;;  %v455_v57 = vmax.f32 %v451_v52, 0.0  ;;  %v456_v63 = vmax.f32 %v452_v58, 0.0  ;;  %v15820_v41 = vld [vmem:[#allocation9 + $0x38] ss:$12 sps:$4 sm:$0xff]  }
 0x1ea   :  { %v17319_v45 = vld [vmem:[#allocation9 + $0xa8] ss:$12 sps:$4 sm:$0xff]   ;;  %v494_v52 = vrot.slane %v481_v49, %v366_v9 }
 0x1eb   :  { %13750 = vmatmul.mubr.msk.f32.vlgmr.msra.gmra.mrb[2].mxu0 %vm387_vm8, %v453_v44  ;;  %13754 = vmatmul.mubr.msk.f32.vlgmr.msra.gmra.mrb[2].mxu1 %vm387_vm8, %v453_v44 }
 0x1ec   :  { %15716 = vmatpush1.bf16.msra.mxu0 %v15715_v42  ;;  %595 = vmatprep.mubr.f32.mxu0 %v16914_v7  ;;  %v17312_v42 = vld [vmem:[#allocation9 + $0x90] ss:$12 sps:$4 sm:$0xff]  }
 0x1ed   :  { %684 = vmatprep.mubr.f32.mxu1 %v16914_v7  ;;  %15718 = vmatprep.subr.bf16.mxu0 %v15717_v43  ;;  %v17315_v43 = vld [vmem:[#allocation9 + $0xac] ss:$12 sps:$4 sm:$0xff]  }
 0x1ee   :  { %986 = vmatpush1.bf16.msra.mxu1 %v17188_v50 }
 0x1ef   :  { %13751 = vmatmul.mubr.msk.f32.gmra.mrb[4].mxu0 %vm387_vm8, %v454_v51  ;;  %13755 = vmatmul.mubr.msk.f32.gmra.mrb[4].mxu1 %vm387_vm8, %v454_v51 }
 0x1f0   :  { %601 = vmatprep.mubr.f32.mxu0 %v16914_v7  ;;  %690 = vmatprep.mubr.f32.mxu1 %v16914_v7 }
 0x1f1   :  { %15720 = vmatpush1.bf16.msra.mxu0 %v15719_v53  ;;  %987 = vmatprep.subr.bf16.mxu1 %v17194_v55  ;;  %v490_v53 = vrot.slane %v481_v49, %v17080_v23 }
 0x1f2   :  { %988 = vmatpush1.bf16.msra.mxu1 %v17197_v56  ;;  %14997 = vmatprep.subr.bf16.mxu0 %v16914_v7 }
 0x1f3   :  { %13752 = vmatmul.mubr.msk.f32.gmra.mrb[6].mxu0 %vm387_vm8, %v455_v57  ;;  %13756 = vmatmul.mubr.msk.f32.gmra.mrb[6].mxu1 %vm387_vm8, %v455_v57 }
 0x1f4   :  { %607 = vmatprep.mubr.f32.mxu0 %v16914_v7  ;;  %696 = vmatprep.mubr.f32.mxu1 %v16914_v7 }
 0x1f5   :  { %989 = vmatprep.subr.bf16.mxu1 %v17204_v60 }
 0x1f6   :  { %990 = vmatpush1.bf16.msra.mxu1 %v17208_v61 }
 0x1f7   :  { %13753 = vmatmul.mubr.msk.f32.gmra.mrb[8].mxu0 %vm387_vm8, %v456_v63  ;;  %13757 = vmatmul.mubr.msk.f32.gmra.mrb[8].mxu1 %vm387_vm8, %v456_v63 }
 0x1f8   :  { %767 = vmatprep.mubr.f32.mxu0 %v16914_v7  ;;  %991 = vmatprep.subr.bf16.mxu1 %v17214_v62 }
 0x1f9   :  { %1017 = vmatprep.mubr.bf16.mxu1 %v16916_v10 }
 0x1fa   :  { %992 = vmatpush1.bf16.msra.mxu1 %v17218_v0 }
 0x1fb   :  { %13758 = vmatmul.mubr.msk.f32.vlgmr.msra.gmra.mrb[10].mxu0 %vm387_vm8, %v453_v44  ;;  %993 = vmatprep.subr.bf16.mxu1 %v17222_v1  ;;  %v15824_v44 = vld [vmem:[#allocation9 + $0x50] ss:$12 sps:$4 sm:$0xff]  }
 0x1fc   :  { %14998 = vmatpush3.bf16.msra.mxu0 %v15780_v3  ;;  %773 = vmatprep.mubr.f32.mxu0 %v16914_v7 }
 0x1fd   :  { %14999 = vmatprep.subr.bf16.mxu0 %v16914_v7 }
 0x1fe   :  { %994 = vmatpush1.bf16.msra.mxu1 %v17228_v4 }
 0x1ff   :  { %13759 = vmatmul.mubr.msk.f32.gmra.mrb[12].mxu0 %vm387_vm8, %v454_v51  ;;  %995 = vmatprep.subr.bf16.mxu1 %v17232_v8  ;;  %v486_v51 = vrot.slane %v481_v49, %v17062_v13 }
 0x200   :  { %15000 = vmatpush3.bf16.msra.mxu0 %v15784_v11  ;;  %779 = vmatprep.mubr.f32.mxu0 %v16914_v7 }
 0x201   :  { %15001 = vmatprep.subr.bf16.mxu0 %v16914_v7 }
 0x202   :  { %996 = vmatpush1.bf16.msra.mxu1 %v17237_v14 }
 0x203   :  { %13760 = vmatmul.mubr.msk.f32.gmra.mrb[14].mxu0 %vm387_vm8, %v455_v57  ;;  %997 = vmatprep.subr.bf16.mxu1 %v17241_v15 }
 0x204   :  { %15002 = vmatpush3.bf16.msra.mxu0 %v15788_v16  ;;  %785 = vmatprep.mubr.f32.mxu0 %v16914_v7 }
 0x205   :  { %15003 = vmatprep.subr.bf16.mxu0 %v16914_v7 }
 0x206   :  { %998 = vmatpush1.bf16.msra.mxu1 %v17246_v17 }
 0x207   :  { %13761 = vmatmul.mubr.msk.f32.gmra.mrb[16].mxu0 %vm387_vm8, %v456_v63  ;;  %999 = vmatprep.subr.bf16.mxu1 %v17250_v18 }
 0x208   :  { %15004 = vmatpush3.bf16.msra.mxu0 %v15792_v19  ;;  %15013 = vmatprep.mubr.msk.bf16.mxu0 %vm16913_vm0, %v16914_v7 }
 0x209   :  { %15005 = vmatprep.subr.bf16.mxu0 %v16914_v7 }
 0x20a   :  { %1000 = vmatpush1.bf16.msra.mxu1 %v17255_v20 }
 0x20b   :  { %1361 = vmatprep.subr.bf16.mxu1 %v17259_v21 }
 0x20c   :  { %15006 = vmatpush3.bf16.msra.mxu0 %v15796_v22 }
 0x20d   :  { %15007 = vmatprep.subr.bf16.mxu0 %v16914_v7  ;;  %1018 = vmatmul.mubr.bf16.vlgmr.msra.gmra.mrb[12].mxu1 %v16916_v10 }
 0x20e   :  { %1362 = vmatpush1.bf16.msra.mxu1 %v17265_v24  ;;  %1393 = vmatprep.mubr.bf16.mxu1 %v16916_v10 }
 0x20f   :  { %1363 = vmatprep.subr.bf16.mxu1 %v17268_v25 }
 0x210   :  { %15008 = vmatpush3.bf16.msra.mxu0 %v15800_v26 }
 0x211   :  { %15009 = vmatprep.subr.bf16.mxu0 %v16914_v7 }
 0x212   :  { %1364 = vmatpush1.bf16.msra.mxu1 %v17273_v27 }
 0x213   :  { %1365 = vmatprep.subr.bf16.mxu1 %v17277_v28 }
 0x214   :  { %15010 = vmatpush3.bf16.msra.mxu0 %v15804_v29  ;;  %v505_v29 = vsub.s32 5, %v17047_v5 }
 0x215   :  { %15011 = vmatprep.subr.bf16.mxu0 %v16914_v7 }
 0x216   :  { %1366 = vmatpush1.bf16.msra.mxu1 %v17281_v30 }
 0x217   :  { %1367 = vmatprep.subr.bf16.mxu1 %v17284_v31 }
 0x218   :  { %15012 = vmatpush3.bf16.msra.mxu0 %v15808_v32 }
 0x219   :  { %15017 = vmatprep.subr.bf16.mxu0 %v16914_v7 }
 0x21a   :  { %1368 = vmatpush1.bf16.msra.mxu1 %v17288_v33 }
 0x21b   :  { %15014 = vmatmul.mubr.bf16.vlgmr.msra.gmra.mrb[20].mxu0 %v16916_v10  ;;  %1369 = vmatprep.subr.bf16.mxu1 %v17291_v34 }
 0x21c   :  { %15018 = vmatpush3.bf16.msra.mxu0 %v15812_v35  ;;  %15033 = vmatprep.mubr.msk.bf16.mxu0 %vm16913_vm0, %v16914_v7 }
 0x21d   :  { %15019 = vmatprep.subr.bf16.mxu0 %v16914_v7 }
 0x21e   :  { %1370 = vmatpush1.bf16.msra.mxu1 %v17295_v36 }
 0x21f   :  { %1371 = vmatprep.subr.bf16.mxu1 %v17299_v37 }
 0x220   :  { %15020 = vmatpush3.bf16.msra.mxu0 %v15816_v38 }
 0x221   :  { %15021 = vmatprep.subr.bf16.mxu0 %v16914_v7 }
 0x222   :  { %1372 = vmatpush1.bf16.msra.mxu1 %v17305_v39 }
 0x223   :  { %1373 = vmatprep.subr.bf16.mxu1 %v17308_v40 }
 0x224   :  { %15022 = vmatpush3.bf16.msra.mxu0 %v15820_v41 }
 0x225   :  { %15023 = vmatprep.subr.bf16.mxu0 %v16914_v7 }
 0x226   :  { %1374 = vmatpush1.bf16.msra.mxu1 %v17312_v42 }
 0x227   :  { %1375 = vmatprep.subr.bf16.mxu1 %v17315_v43 }
 0x228   :  { %15024 = vmatpush3.bf16.msra.mxu0 %v15824_v44 }
 0x229   :  { %15025 = vmatprep.subr.bf16.mxu0 %v16914_v7 }
 0x22a   :  { %1376 = vmatpush1.bf16.msra.mxu1 %v17319_v45 }
 0x22b   :  { %1760 = vmatprep.subr.bf16.mxu1 %v17140_v59  ;;  %v15837_v59 = vld [vmem:[#allocation9 + $0xb0] ss:$12 sps:$4 sm:$0xff]  }
 0x22c   :  { %15026 = vmatpush3.bf16.msra.mxu0 %v15828_v46 }
 0x22d   :  { %15027 = vmatprep.subr.bf16.mxu0 %v16914_v7  ;;  %1394 = vmatmul.mubr.bf16.vlgmr.msra.gmra.mrb[16].mxu1 %v16916_v10 }
 0x22e   :  { %1761 = vmatpush1.bf16.msra.mxu1 %v17188_v50  ;;  %1792 = vmatprep.mubr.bf16.mxu1 %v16916_v10  ;;  %v497_v50 = vsub.s32 3, %v17047_v5 }
 0x22f   :  { %1762 = vmatprep.subr.bf16.mxu1 %v17194_v55 }
 0x230   :  { %15028 = vmatpush3.bf16.msra.mxu0 %v15832_v47  ;;  %v498_v54 = vrot.slane %v481_v49, %v497_v50  ;;  %v506_v50 = vrot.slane %v481_v49, %v505_v29 }
 0x231   :  { %15029 = vmatprep.subr.bf16.mxu0 %v16914_v7 }
 0x232   :  { %1763 = vmatpush1.bf16.msra.mxu1 %v17197_v56 }
 0x233   :  { %1764 = vmatprep.subr.bf16.mxu1 %v17204_v60 }
 0x234   :  { %15030 = vmatpush3.bf16.msra.mxu0 %v15836_v48 }
 0x235   :  { %15031 = vmatprep.subr.bf16.mxu0 %v16914_v7 }
 0x236   :  { %1765 = vmatpush1.bf16.msra.mxu1 %v17208_v61 }
 0x237   :  { %1766 = vmatprep.subr.bf16.mxu1 %v17214_v62 }
 0x238   :  { %15032 = vmatpush3.bf16.msra.mxu0 %v15837_v59 }
 0x239   :  { %15037 = vmatprep.subr.bf16.mxu0 %v16914_v7 }
 0x23a   :  { %1767 = vmatpush1.bf16.msra.mxu1 %v17218_v0 }
 0x23b   :  { %15034 = vmatmul.mubr.bf16.vlgmr.msra.gmra.mrb[24].mxu0 %v16916_v10  ;;  %1768 = vmatprep.subr.bf16.mxu1 %v17222_v1 }
 0x23c   :  { %15053 = vmatprep.mubr.msk.bf16.mxu0 %vm16913_vm0, %v16914_v7 }
 0x23e   :  { %1769 = vmatpush1.bf16.msra.mxu1 %v17228_v4 }
 0x23f   :  { %1770 = vmatprep.subr.bf16.mxu1 %v17232_v8 }
 0x242   :  { %1771 = vmatpush1.bf16.msra.mxu1 %v17237_v14 }
 0x243   :  { %1772 = vmatprep.subr.bf16.mxu1 %v17241_v15 }
 0x246   :  { %1773 = vmatpush1.bf16.msra.mxu1 %v17246_v17 }
 0x247   :  { %1774 = vmatprep.subr.bf16.mxu1 %v17250_v18 }
 0x24a   :  { %1775 = vmatpush1.bf16.msra.mxu1 %v17255_v20 }
 0x24b   :  { %2146 = vmatprep.subr.bf16.mxu1 %v17259_v21  ;;  %v501_v21 = vsub.s32 4, %v17047_v5 }
 0x24d   :  { %v502_v47 = vrot.slane %v481_v49, %v501_v21 }
 0x2be   :  { %v591_v55 = vpop.f32.mrb[2].mxu0  ;;  %v680_v56 = vpop.f32.mrb[2].mxu1 }
 0x2bf   :  { %v592_v57 = vadd.f32 %v591_v55, %v486_v51  ;;  %v681_v58 = vadd.f32 %v680_v56, %v494_v52  ;;  %v593_v60 = vpop.f32.mrb[3].mxu0  ;;  %v682_v61 = vpop.f32.mrb[3].mxu1 }
 0x2c0   :  { %v594_v62 = vadd.f32 %v593_v60, %v490_v53  ;;  %v683_v63 = vadd.f32 %v682_v61, %v498_v54 }
 0x2c1   :  { %792 = vst [vmem:[#allocation2] sm:$0xff] %v592_v57  ;;  %794 = vst [vmem:[#allocation2 + $0x10] sm:$0xff] %v681_v58 }
 0x2c2   :  { %793 = vst [vmem:[#allocation2 + $0x8] sm:$0xff] %v594_v62  ;;  %795 = vst [vmem:[#allocation2 + $0x18] sm:$0xff] %v683_v63  ;;  %v597_v0 = vpop.f32.mrb[4].mxu0  ;;  %v686_v1 = vpop.f32.mrb[4].mxu1 }
 0x2c3   :  { %v598_v3 = vadd.f32 %v597_v0, %v486_v51  ;;  %v687_v4 = vadd.f32 %v686_v1, %v494_v52  ;;  %v599_v9 = vpop.f32.mrb[5].mxu0  ;;  %v688_v8 = vpop.f32.mrb[5].mxu1 }
 0x2c4   :  { %v600_v11 = vadd.f32 %v599_v9, %v490_v53  ;;  %v689_v14 = vadd.f32 %v688_v8, %v498_v54 }
 0x2c5   :  { %798 = vst [vmem:[#allocation2 + $0x30] sm:$0xff] %v598_v3  ;;  %800 = vst [vmem:[#allocation2 + $0x40] sm:$0xff] %v687_v4 }
 0x2c6   :  { %799 = vst [vmem:[#allocation2 + $0x38] sm:$0xff] %v600_v11  ;;  %801 = vst [vmem:[#allocation2 + $0x48] sm:$0xff] %v689_v14  ;;  %v603_v15 = vpop.f32.mrb[6].mxu0  ;;  %v692_v16 = vpop.f32.mrb[6].mxu1 }
 0x2c7   :  { %v604_v17 = vadd.f32 %v603_v15, %v486_v51  ;;  %v693_v18 = vadd.f32 %v692_v16, %v494_v52  ;;  %v605_v19 = vpop.f32.mrb[7].mxu0  ;;  %v694_v20 = vpop.f32.mrb[7].mxu1 }
 0x2c8   :  { %v606_v22 = vadd.f32 %v605_v19, %v490_v53  ;;  %v695_v26 = vadd.f32 %v694_v20, %v498_v54 }
 0x2c9   :  { %805 = vst [vmem:[#allocation2 + $0x60] sm:$0xff] %v604_v17  ;;  %807 = vst [vmem:[#allocation2 + $0x70] sm:$0xff] %v693_v18 }
 0x2ca   :  { %806 = vst [vmem:[#allocation2 + $0x68] sm:$0xff] %v606_v22  ;;  %808 = vst [vmem:[#allocation2 + $0x78] sm:$0xff] %v695_v26  ;;  %v609_v32 = vpop.f32.mrb[8].mxu0  ;;  %v698_v35 = vpop.f32.mrb[8].mxu1 }
 0x2cb   :  { %v610_v38 = vadd.f32 %v609_v32, %v486_v51  ;;  %v699_v41 = vadd.f32 %v698_v35, %v494_v52  ;;  %v611_v44 = vpop.f32.mrb[9].mxu0  ;;  %v700_v46 = vpop.f32.mrb[9].mxu1  ;;  %v818_v32 = vld [vmem:[#allocation2] ss:$8 sm:$0x7] }
 0x2cc   :  { %v612_v48 = vadd.f32 %v611_v44, %v490_v53  ;;  %v701_v59 = vadd.f32 %v700_v46, %v498_v54 }
 0x2cd   :  { %811 = vst [vmem:[#allocation2 + $0x90] sm:$0xff] %v610_v38  ;;  %813 = vst [vmem:[#allocation2 + $0xa0] sm:$0xff] %v699_v41 }
 0x2ce   :  { %812 = vst [vmem:[#allocation2 + $0x98] sm:$0xff] %v612_v48  ;;  %814 = vst [vmem:[#allocation2 + $0xa8] sm:$0xff] %v701_v59  ;;  %v769_v55 = vpop.f32.mrb[10].mxu0 }
 0x2cf   :  { %v770_v56 = vadd.f32 %v769_v55, %v502_v47  ;;  %v771_v57 = vpop.f32.mrb[11].mxu0 }
 0x2d0   :  { %v772_v58 = vadd.f32 %v771_v57, %v506_v50 }
 0x2d1   :  { %796 = vst [vmem:[#allocation2 + $0x20] sm:$0xff] %v770_v56  ;;  %v820_v35 = vld [vmem:[#allocation2 + $0x60] ss:$8 sm:$0x7] }
 0x2d2   :  { %797 = vst [vmem:[#allocation2 + $0x28] sm:$0xff] %v772_v58  ;;  %v775_v60 = vpop.f32.mrb[12].mxu0 }
 0x2d3   :  { %v776_v61 = vadd.f32 %v775_v60, %v502_v47  ;;  %v777_v51 = vpop.f32.mrb[13].mxu0 }
 0x2d4   :  { %v778_v52 = vadd.f32 %v777_v51, %v506_v50 }
 0x2d5   :  { %802 = vst [vmem:[#allocation2 + $0x50] sm:$0xff] %v776_v61 }
 0x2d6   :  { %803 = vst [vmem:[#allocation2 + $0x58] sm:$0xff] %v778_v52  ;;  %v781_v62 = vpop.f32.mrb[14].mxu0 }
 0x2d7   :  { %v782_v53 = vadd.f32 %v781_v62, %v502_v47  ;;  %v783_v54 = vpop.f32.mrb[15].mxu0 }
 0x2d8   :  { %v784_v49 = vadd.f32 %v783_v54, %v506_v50 }
 0x2d9   :  { %809 = vst [vmem:[#allocation2 + $0x80] sm:$0xff] %v782_v53  ;;  %v15838_v53 = vld [vmem:[#allocation6 + $0x8] ss:$12 sps:$4 sm:$0xff]  }
 0x2da   :  { %810 = vst [vmem:[#allocation2 + $0x88] sm:$0xff] %v784_v49  ;;  %v787_v63 = vpop.f32.mrb[16].mxu0  ;;  %15038 = vmatpush3.bf16.msra.mxu0 %v15838_v53 }
 0x2db   :  { %v788_v0 = vadd.f32 %v787_v63, %v502_v47  ;;  %v789_v1 = vpop.f32.mrb[17].mxu0  ;;  %15039 = vmatprep.subr.bf16.mxu0 %v16914_v7 }
 0x2dc   :  { %v790_v3 = vadd.f32 %v789_v1, %v506_v50 }
 0x2dd   :  { %815 = vst [vmem:[#allocation2 + $0xb0] sm:$0xff] %v788_v0 }
 0x2de   :  { %816 = vst [vmem:[#allocation2 + $0xb8] sm:$0xff] %v790_v3 }
 0x2e0   :  { %v1019_v4 = vpop.f32.mrb[12].mxu1 }
 0x2e1   :  { %v1021_v9 = vpop.f32.mrb[13].mxu1 }
 0x2e2   :  { %v1069_v8 = vcombine.low %v1019_v4, %v1021_v9  ;;  %v1023_v11 = vpop.f32.mrb[14].mxu1 }
 0x2e3   :  { %v1024_v14 = vpop.f32.mrb[15].mxu1  ;;  %v822_v11 = vld [vmem:[#allocation2 + $0x4f] ss:$8 sm:$0x7] }
 0x2e4   :  { %v1076_v15 = vrot.slane %v1069_v8, %v17059_v12 }
 0x2ee   :  { %v1060_v16 = vpop.f32.mrb[20].mxu0 }
 0x2ef   :  { %v1083_v17 = vrot.slane %v1060_v16, %v17059_v12  ;;  %v15015_v18 = vpop.f32.mrb[21].mxu0 }
 0x2f0   :  { %v1063_v19 = vpop.f32.mrb[22].mxu0  ;;  %v824_v18 = vld [vmem:[#allocation2 + $0xaf] ss:$8 sm:$0x7] }
 0x2f1   :  { %v1084_v20 = vcombine.low %v1076_v15, %v1083_v17  ;;  %v1085_v21 = vcombine.high %v1076_v15, %v1083_v17  ;;  %v15016_v22 = vpop.f32.mrb[23].mxu0  ;;  %v15839_v17 = vld [vmem:[#allocation6 + $0x20] ss:$12 sps:$4 sm:$0xff]  }
 0x2f2   :  { %15040 = vmatpush3.bf16.msra.mxu0 %v15839_v17 }
 0x2f3   :  { %v1092_v26 = vrot.slane %v1084_v20, %v17059_v12  ;;  %v1099_v29 = vrot.slane %v1085_v21, %v17059_v12  ;;  %15041 = vmatprep.subr.bf16.mxu0 %v16914_v7 }
 0x2f5   :  { %v1102_v38 = vadd.f32 %v1092_v26, %v818_v32  ;;  %v1103_v41 = vadd.f32 %v1099_v29, %v820_v35  ;;  %v15840_v35 = vld [vmem:[#allocation6 + $0x38] ss:$12 sps:$4 sm:$0xff]  }
 0x2f6   :  { %15042 = vmatpush3.bf16.msra.mxu0 %v15840_v35 }
 0x2f7   :  { %v13786_v44 = vmul.f32 -1.442695, %v1102_v38  ;;  %v13787_v46 = vmul.f32 -1.442695, %v1103_v41  ;;  %15043 = vmatprep.subr.bf16.mxu0 %v16914_v7 }
 0x2f9   :  { %16416 = vpow2.f32 %v13786_v44 }
 0x2fa   :  { %16418 = vpow2.f32 %v13787_v46  ;;  %v15841_v46 = vld [vmem:[#allocation6 + $0x50] ss:$12 sps:$4 sm:$0xff]  }
 0x2fb   :  { %15044 = vmatpush3.bf16.msra.mxu0 %v15841_v46 }
 0x2fc   :  { %15045 = vmatprep.subr.bf16.mxu0 %v16914_v7 }
 0x300   :  { %v1395_v47 = vpop.f32.mrb[16].mxu1 }
 0x301   :  { %v1397_v48 = vpop.f32.mrb[17].mxu1 }
 0x302   :  { %v1445_v59 = vcombine.low %v1395_v47, %v1397_v48  ;;  %v1399_v50 = vpop.f32.mrb[18].mxu1  ;;  %v15842_v48 = vld [vmem:[#allocation6 + $0x68] ss:$12 sps:$4 sm:$0xff]  }
 0x303   :  { %v16417_v55 = vpop.eup %16416  ;;  %v1400_v56 = vpop.f32.mrb[19].mxu1  ;;  %15046 = vmatpush3.bf16.msra.mxu0 %v15842_v48 }
 0x304   :  { %v16419_v57 = vpop.eup %16418  ;;  %v1110_v58 = vadd.f32 1.0, %v16417_v55  ;;  %v1452_v61 = vrot.slane %v1445_v59, %v17059_v12  ;;  %v15843_v59 = vld [vmem:[#allocation6 + $0x80] ss:$12 sps:$4 sm:$0xff]   ;;  %15047 = vmatprep.subr.bf16.mxu0 %v16914_v7 }
 0x305   :  { %v1111_v60 = vadd.f32 1.0, %v16419_v57 }
 0x306   :  { %16420 = vrcp.f32 %v1110_v58  ;;  %v15844_v58 = vld [vmem:[#allocation6 + $0x98] ss:$12 sps:$4 sm:$0xff]  }
 0x307   :  { %16422 = vrcp.f32 %v1111_v60  ;;  %15048 = vmatpush3.bf16.msra.mxu0 %v15843_v59  ;;  %v15845_v60 = vld [vmem:[#allocation6 + $0xb0] ss:$12 sps:$4 sm:$0xff]  }
 0x308   :  { %15049 = vmatprep.subr.bf16.mxu0 %v16914_v7 }
 0x30b   :  { %15050 = vmatpush3.bf16.msra.mxu0 %v15844_v58  ;;  %v15846_v58 = vld [vmem:[#allocation9 + $0x8] ss:$12 sps:$4 sm:$0xff]  }
 0x30c   :  { %15051 = vmatprep.subr.bf16.mxu0 %v16914_v7 }
 0x30e   :  { %v1436_v51 = vpop.f32.mrb[24].mxu0 }
 0x30f   :  { %v1459_v52 = vrot.slane %v1436_v51, %v17059_v12  ;;  %v15035_v62 = vpop.f32.mrb[25].mxu0  ;;  %15052 = vmatpush3.bf16.msra.mxu0 %v15845_v60 }
 0x310   :  { %v17366_v54 = vpop.eup %16420  ;;  %v1439_v49 = vpop.f32.mrb[26].mxu0  ;;  %15057 = vmatprep.subr.bf16.mxu0 %v16914_v7 }
 0x311   :  { %v17368_v63 = vpop.eup %16422  ;;  %v1460_v0 = vcombine.low %v1452_v61, %v1459_v52  ;;  %v1461_v1 = vcombine.high %v1452_v61, %v1459_v52  ;;  %v15036_v3 = vpop.f32.mrb[27].mxu0  ;;  %v1116_v4 = vmul.f32 2.0, %v17366_v54  ;;  %v1195_v35 = vrot.slane %v17366_v54, 2 }
 0x312   :  { %v1117_v9 = vmul.f32 2.0, %v17368_v63  ;;  %v1122_v8 = vcombine.low %v17366_v54, %v17368_v63  ;;  %v1161_v17 = vrot.slane %v17368_v63, 1 }
 0x313   :  { %v1468_v14 = vrot.slane %v1460_v0, %v17059_v12  ;;  %v1475_v15 = vrot.slane %v1461_v1, %v17059_v12  ;;  %v13788_v16 = vadd.f32 -1.0, %v1116_v4 }
 0x314   :  { %v13789_v19 = vadd.f32 -1.0, %v1117_v9  ;;  %v1129_v22 = vrot.slane %v1122_v8, %v17059_v12 }
 0x315   :  { %v1478_v20 = vadd.f32 %v1468_v14, %v822_v11  ;;  %v1479_v21 = vadd.f32 %v1475_v15, %v824_v18  ;;  %v1160_v15 = vrot.slane %v17366_v54, 1 }
 0x316   :  { %v1140_v26 = vcombine.low %v13788_v16, %v13789_v19  ;;  %v1136_v41 = vrot.slane %v1129_v22, %v17059_v12  ;;  %v1165_v22 = vmul.f32 0.0, %v1161_v17 }
 0x317   :  { %v13814_v29 = vmul.f32 -1.442695, %v1478_v20  ;;  %v13815_v32 = vmul.f32 -1.442695, %v1479_v21  ;;  %v1164_v19 = vmul.f32 0.0, %v1160_v15 }
 0x318   :  { %v1147_v38 = vrot.slane %v1140_v26, %v17059_v12 }
 0x319   :  { %16424 = vpow2.f32 %v13814_v29 }
 0x31a   :  { %16426 = vpow2.f32 %v13815_v32  ;;  %v1154_v44 = vrot.slane %v1147_v38, %v17059_v12 }
 0x31c   :  { %v1156_v47 = vsel %vm817_vm9, %v1136_v41, %v1154_v44  ;;  %v1196_v41 = vrot.slane %v17368_v63, 2  ;;  %v15847_v63 = vld [vmem:[#allocation9 + $0x20] ss:$12 sps:$4 sm:$0xff]  }
 0x31d   :  { %1157 = vrot.lane.b32.xlu0 %v1156_v47, %s16917_s6 }
 0x323   :  { %v16425_v50 = vpop.eup %16424 }
 0x324   :  { %v16427_v55 = vpop.eup %16426  ;;  %v1486_v56 = vadd.f32 1.0, %v16425_v50 }
 0x325   :  { %v1487_v57 = vadd.f32 1.0, %v16427_v55 }
 0x326   :  { %16428 = vrcp.f32 %v1486_v56 }
 0x327   :  { %16430 = vrcp.f32 %v1487_v57 }
 0x330   :  { %v17392_v61 = vpop.eup %16428 }
 0x331   :  { %v17394_v51 = vpop.eup %16430  ;;  %v1492_v52 = vmul.f32 2.0, %v17392_v61  ;;  %v1536_v54 = vrot.slane %v17392_v61, 1 }
 0x332   :  { %v1493_v62 = vmul.f32 2.0, %v17394_v51  ;;  %v1498_v53 = vcombine.low %v17392_v61, %v17394_v51 }
 0x333   :  { %v13816_v49 = vadd.f32 -1.0, %v1492_v52 }
 0x334   :  { %v13817_v0 = vadd.f32 -1.0, %v1493_v62  ;;  %v1505_v1 = vrot.slane %v1498_v53, %v17059_v12  ;;  %v1537_v53 = vrot.slane %v17394_v51, 1 }
 0x336   :  { %v1516_v3 = vcombine.low %v13816_v49, %v13817_v0  ;;  %v1512_v9 = vrot.slane %v1505_v1, %v17059_v12  ;;  %v1540_v0 = vmul.f32 0.0, %v1536_v54 }
 0x338   :  { %v1523_v4 = vrot.slane %v1516_v3, %v17059_v12 }
 0x33a   :  { %v1530_v8 = vrot.slane %v1523_v4, %v17059_v12  ;;  %v1541_v4 = vmul.f32 0.0, %v1537_v53 }
 0x33c   :  { %v1532_v11 = vsel %vm817_vm9, %v1512_v9, %v1530_v8 }
 0x33d   :  { %1533 = vrot.lane.b32.xlu1 %v1532_v11, %s16917_s6 }
 0x38f   :  { %v1158_v14 = vpop.permute.xlu0 %1157 }
 0x390   :  { %v1159_v16 = vmul.f32 %v1158_v14, %v1156_v47 }
 0x392   :  { %v1173_v18 = vrot.slane %v1159_v16, %v17059_v12 }
 0x394   :  { %v1174_v20 = vcombine.high %v1173_v18, %v1173_v18  ;;  %v1181_v21 = vrot.slane %v1173_v18, %v17059_v12 }
 0x396   :  { %v1188_v26 = vrot.slane %v1174_v20, %v17059_v12  ;;  %v17412_v29 = vadd.f32 %v1181_v21, %v1164_v19 }
 0x398   :  { %v17414_v32 = vadd.f32 %v1188_v26, %v1165_v22  ;;  %16432 = vtanh.f32 %v17412_v29 }
 0x39a   :  { %16434 = vtanh.f32 %v17414_v32 }
 0x3a2   :  { %v16433_v38 = vpop.eup %16432 }
 0x3a3   :  { %v1199_v44 = vmul.f32 %v16433_v38, %v1195_v35 }
 0x3a4   :  { %v16435_v46 = vpop.eup %16434 }
 0x3a5   :  { %v1200_v47 = vmul.f32 %v16435_v46, %v1196_v41  ;;  %1577 = vst [vmem:[#allocation3] sm:$0x1] %v1199_v44  ;;  %v1589_v48 = vpack.c.bf16 %v1199_v44, %v1199_v44 }
 0x3a7   :  { %1578 = vst [vmem:[#allocation3 + $0x10] sm:$0x1] %v1200_v47  ;;  %v1590_v59 = vpack.c.bf16 %v1200_v47, %v1200_v47  ;;  %v1625_v55 = vunpack.c.l.b16 %v1589_v48 }
 0x3a9   :  { %v1626_v50 = vunpack.c.l.b16 %v1590_v59  ;;  %v1582_v59 = vld [vmem:[#allocation2 + $0x1] ss:$8 sm:$0x7] }
 0x3ab   :  { %v1627_v56 = vrot.slane %v1626_v50, 7  ;;  %v1584_v50 = vld [vmem:[#allocation2 + $0x61] ss:$8 sm:$0x7] }
 0x3ad   :  { %v1629_v57 = vsel %vm1628_vm10, %v1627_v56, %v1625_v55 }
 0x3ae   :  { %v1630_v60 = vpack.c.b16 %v1629_v57, %v1629_v57 }
 0x3af   :  { %v1534_v52 = vpop.permute.xlu1 %1533 }
 0x3b0   :  { %v1535_v62 = vmul.f32 %v1534_v52, %v1532_v11  ;;  %1793 = vmatmul.mubr.bf16.vlgmr.msra.gmra.mrb[20].mxu1 %v1630_v60  ;;  %15054 = vmatmul.mubr.bf16.vlgmr.msra.gmra.mrb[28].mxu0 %v1630_v60  ;;  %v15849_v11 = vld [vmem:[#allocation9 + $0x50] ss:$12 sps:$4 sm:$0xff]  }
 0x3b1   :  { %2147 = vmatpush1.bf16.msra.mxu1 %v17265_v24  ;;  %15058 = vmatpush3.bf16.msra.mxu0 %v15846_v58  ;;  %v15848_v24 = vld [vmem:[#allocation9 + $0x38] ss:$12 sps:$4 sm:$0xff]  }
 0x3b2   :  { %v1549_v49 = vrot.slane %v1535_v62, %v17059_v12  ;;  %2148 = vmatprep.subr.bf16.mxu1 %v17268_v25  ;;  %15059 = vmatprep.subr.bf16.mxu0 %v16914_v7 }
 0x3b3   :  { %2178 = vmatprep.mubr.bf16.mxu1 %v16916_v10  ;;  %15073 = vmatprep.mubr.msk.bf16.mxu0 %vm16913_vm0, %v16914_v7 }
 0x3b4   :  { %v1550_v1 = vcombine.high %v1549_v49, %v1549_v49  ;;  %v1557_v3 = vrot.slane %v1549_v49, %v17059_v12 }
 0x3b5   :  { %2149 = vmatpush1.bf16.msra.mxu1 %v17273_v27  ;;  %15060 = vmatpush3.bf16.msra.mxu0 %v15847_v63  ;;  %v15850_v27 = vld [vmem:[#allocation9 + $0x68] ss:$12 sps:$4 sm:$0xff]  }
 0x3b6   :  { %v1564_v9 = vrot.slane %v1550_v1, %v17059_v12  ;;  %v17433_v8 = vadd.f32 %v1557_v3, %v1540_v0  ;;  %2150 = vmatprep.subr.bf16.mxu1 %v17277_v28  ;;  %15061 = vmatprep.subr.bf16.mxu0 %v16914_v7  ;;  %v15851_v28 = vld [vmem:[#allocation9 + $0x80] ss:$12 sps:$4 sm:$0xff]  }
 0x3b8   :  { %v17437_v25 = vadd.f32 %v1564_v9, %v1541_v4  ;;  %16436 = vtanh.f32 %v17433_v8 }
 0x3b9   :  { %2151 = vmatpush1.bf16.msra.mxu1 %v17281_v30  ;;  %15062 = vmatpush3.bf16.msra.mxu0 %v15848_v24  ;;  %v1571_v30 = vrot.slane %v17392_v61, 2 }
 0x3ba   :  { %16438 = vtanh.f32 %v17437_v25  ;;  %2152 = vmatprep.subr.bf16.mxu1 %v17284_v31  ;;  %15063 = vmatprep.subr.bf16.mxu0 %v16914_v7  ;;  %v1572_v31 = vrot.slane %v17394_v51, 2 }
 0x3bd   :  { %2153 = vmatpush1.bf16.msra.mxu1 %v17288_v33  ;;  %15064 = vmatpush3.bf16.msra.mxu0 %v15849_v11 }
 0x3be   :  { %2154 = vmatprep.subr.bf16.mxu1 %v17291_v34  ;;  %15065 = vmatprep.subr.bf16.mxu0 %v16914_v7  ;;  %v15852_v34 = vld [vmem:[#allocation9 + $0x98] ss:$12 sps:$4 sm:$0xff]  }
 0x3c1   :  { %2155 = vmatpush1.bf16.msra.mxu1 %v17295_v36  ;;  %15066 = vmatpush3.bf16.msra.mxu0 %v15850_v27 }
 0x3c2   :  { %v16437_v14 = vpop.eup %16436  ;;  %2156 = vmatprep.subr.bf16.mxu1 %v17299_v37  ;;  %15067 = vmatprep.subr.bf16.mxu0 %v16914_v7  ;;  %v15853_v37 = vld [vmem:[#allocation9 + $0xb0] ss:$12 sps:$4 sm:$0xff]  }
 0x3c3   :  { %v1575_v33 = vmul.f32 %v16437_v14, %v1571_v30  ;;  %v17474_v14 = vld [vmem:[#allocation6] ss:$12 sps:$4 sm:$0xff]  }
 0x3c4   :  { %v16439_v15 = vpop.eup %16438 }
 0x3c5   :  { %2157 = vmatpush1.bf16.msra.mxu1 %v17305_v39  ;;  %15068 = vmatpush3.bf16.msra.mxu0 %v15851_v28  ;;  %v1576_v16 = vmul.f32 %v16439_v15, %v1572_v31  ;;  %1579 = vst [vmem:[#allocation4 + $0xf] sm:$0x1] %v1575_v33  ;;  %v1976_v36 = vpack.c.bf16 %v1575_v33, %v1575_v33  ;;  %v17470_v28 = vld [vmem:[#allocation6 + $0x4] ss:$12 sps:$4 sm:$0xff]   ;;  %v15857_v31 = vld [vmem:[#allocation6 + $0x8] ss:$12 sps:$4 sm:$0xff]  }
 0x3c6   :  { %2158 = vmatprep.subr.bf16.mxu1 %v17308_v40  ;;  %15069 = vmatprep.subr.bf16.mxu0 %v16914_v7 }
 0x3c7   :  { %1580 = vst [vmem:[#allocation4 + $0x1f] sm:$0x1] %v1576_v16  ;;  %v1977_v61 = vpack.c.bf16 %v1576_v16, %v1576_v16  ;;  %v2012_v39 = vunpack.c.l.b16 %v1976_v36  ;;  %v1586_v36 = vld [vmem:[#allocation2 + $0x4e] ss:$8 sm:$0x7] }
 0x3c9   :  { %2159 = vmatpush1.bf16.msra.mxu1 %v17312_v42  ;;  %15070 = vmatpush3.bf16.msra.mxu0 %v15852_v34  ;;  %v2013_v51 = vunpack.c.l.b16 %v1977_v61 }
 0x3ca   :  { %2160 = vmatprep.subr.bf16.mxu1 %v17315_v43  ;;  %15071 = vmatprep.subr.bf16.mxu0 %v16914_v7 }
 0x3cb   :  { %v2014_v17 = vrot.slane %v2013_v51, 7  ;;  %v1588_v51 = vld [vmem:[#allocation2 + $0xae] ss:$8 sm:$0x7] }
 0x3cd   :  { %2161 = vmatpush1.bf16.msra.mxu1 %v17319_v45  ;;  %15072 = vmatpush3.bf16.msra.mxu0 %v15853_v37  ;;  %v2015_v40 = vsel %vm1628_vm10, %v2014_v17, %v2012_v39 }
 0x3ce   :  { %v2016_v18 = vpack.c.b16 %v2015_v40, %v2015_v40  ;;  %15077 = vmatprep.subr.bf16.mxu0 %v16914_v7  ;;  %2544 = vmatprep.subr.bf16.mxu1 %v17470_v28 }
 0x3d0   :  { %2179 = vmatmul.mubr.bf16.vlgmr.msra.gmra.mrb[24].mxu1 %v2016_v18  ;;  %15074 = vmatmul.mubr.bf16.vlgmr.msra.gmra.mrb[32].mxu0 %v2016_v18  ;;  %v17486_v18 = vld [vmem:[#allocation6 + $0x1c] ss:$12 sps:$4 sm:$0xff]  }
 0x3d1   :  { %2576 = vmatprep.mubr.bf16.mxu1 %v16916_v10  ;;  %15093 = vmatprep.mubr.msk.bf16.mxu0 %vm16913_vm0, %v16914_v7 }
 0x3d2   :  { %2545 = vmatpush1.bf16.msra.mxu1 %v17474_v14  ;;  %15078 = vmatpush3.bf16.msra.mxu0 %v15857_v31  ;;  %v17545_v31 = vld [vmem:[#allocation9 + $0x4] ss:$12 sps:$4 sm:$0xff]  }
 0x3d3   :  { %15079 = vmatprep.subr.bf16.mxu0 %v16914_v7  ;;  %2546 = vmatprep.subr.bf16.mxu1 %v17486_v18 }
 0x483   :  { %v1794_v42 = vpop.f32.mrb[20].mxu1  ;;  %v1835_v43 = vpop.f32.mrb[28].mxu0 }
 0x484   :  { %v1796_v19 = vpop.f32.mrb[21].mxu1  ;;  %v15055_v20 = vpop.f32.mrb[29].mxu0  ;;  %v1858_v38 = vrot.slane %v1835_v43, %v17059_v12  ;;  %v17489_v43 = vld [vmem:[#allocation6 + $0x18] ss:$12 sps:$4 sm:$0xff]  }
 0x485   :  { %v1844_v21 = vcombine.low %v1794_v42, %v1796_v19  ;;  %v1798_v22 = vpop.f32.mrb[22].mxu1  ;;  %v1838_v45 = vpop.f32.mrb[30].mxu0  ;;  %v15861_v19 = vld [vmem:[#allocation6 + $0x20] ss:$12 sps:$4 sm:$0xff]   ;;  %2547 = vmatpush1.bf16.msra.mxu1 %v17489_v43 }
 0x486   :  { %v1799_v26 = vpop.f32.mrb[23].mxu1  ;;  %v15056_v35 = vpop.f32.mrb[31].mxu0  ;;  %15080 = vmatpush3.bf16.msra.mxu0 %v15861_v19 }
 0x487   :  { %v1851_v41 = vrot.slane %v1844_v21, %v17059_v12  ;;  %15081 = vmatprep.subr.bf16.mxu0 %v16914_v7 }
 0x489   :  { %v1859_v44 = vcombine.low %v1851_v41, %v1858_v38  ;;  %v1860_v46 = vcombine.high %v1851_v41, %v1858_v38  ;;  %v17494_v38 = vld [vmem:[#allocation6 + $0x34] ss:$12 sps:$4 sm:$0xff]  }
 0x48a   :  { %2548 = vmatprep.subr.bf16.mxu1 %v17494_v38 }
 0x48b   :  { %v1867_v47 = vrot.slane %v1859_v44, %v17059_v12  ;;  %v1874_v48 = vrot.slane %v1860_v46, %v17059_v12  ;;  %v17498_v44 = vld [vmem:[#allocation6 + $0x30] ss:$12 sps:$4 sm:$0xff]   ;;  %v15865_v46 = vld [vmem:[#allocation6 + $0x38] ss:$12 sps:$4 sm:$0xff]  }
 0x48c   :  { %2549 = vmatpush1.bf16.msra.mxu1 %v17498_v44  ;;  %15082 = vmatpush3.bf16.msra.mxu0 %v15865_v46 }
 0x48d   :  { %v1877_v55 = vadd.f32 %v1867_v47, %v1582_v59  ;;  %v1878_v56 = vadd.f32 %v1874_v48, %v1584_v50  ;;  %v17504_v59 = vld [vmem:[#allocation6 + $0x48] ss:$12 sps:$4 sm:$0xff]   ;;  %v17506_v50 = vld [vmem:[#allocation6 + $0x4c] ss:$12 sps:$4 sm:$0xff]   ;;  %15083 = vmatprep.subr.bf16.mxu0 %v16914_v7 }
 0x48e   :  { %2550 = vmatprep.subr.bf16.mxu1 %v17506_v50 }
 0x48f   :  { %v13842_v57 = vmul.f32 -1.442695, %v1877_v55  ;;  %v13843_v58 = vmul.f32 -1.442695, %v1878_v56  ;;  %v15869_v55 = vld [vmem:[#allocation6 + $0x50] ss:$12 sps:$4 sm:$0xff]  }
 0x490   :  { %v17509_v56 = vld [vmem:[#allocation6 + $0x64] ss:$12 sps:$4 sm:$0xff]   ;;  %2551 = vmatpush1.bf16.msra.mxu1 %v17504_v59  ;;  %15084 = vmatpush3.bf16.msra.mxu0 %v15869_v55 }
 0x491   :  { %16440 = vpow2.f32 %v13842_v57  ;;  %2552 = vmatprep.subr.bf16.mxu1 %v17509_v56  ;;  %15085 = vmatprep.subr.bf16.mxu0 %v16914_v7 }
 0x492   :  { %16442 = vpow2.f32 %v13843_v58  ;;  %v17516_v58 = vld [vmem:[#allocation6 + $0x60] ss:$12 sps:$4 sm:$0xff]  }
 0x494   :  { %2553 = vmatpush1.bf16.msra.mxu1 %v17516_v58 }
 0x49b   :  { %v16441_v60 = vpop.eup %16440 }
 0x49c   :  { %v16443_v52 = vpop.eup %16442  ;;  %v1885_v54 = vadd.f32 1.0, %v16441_v60  ;;  %v15873_v60 = vld [vmem:[#allocation6 + $0x68] ss:$12 sps:$4 sm:$0xff]  }
 0x49d   :  { %v1886_v62 = vadd.f32 1.0, %v16443_v52  ;;  %v17520_v52 = vld [vmem:[#allocation6 + $0x7c] ss:$12 sps:$4 sm:$0xff]   ;;  %15086 = vmatpush3.bf16.msra.mxu0 %v15873_v60 }
 0x49e   :  { %16444 = vrcp.f32 %v1885_v54  ;;  %v17523_v54 = vld [vmem:[#allocation6 + $0x78] ss:$12 sps:$4 sm:$0xff]   ;;  %2554 = vmatprep.subr.bf16.mxu1 %v17520_v52  ;;  %15087 = vmatprep.subr.bf16.mxu0 %v16914_v7 }
 0x49f   :  { %16446 = vrcp.f32 %v1886_v62  ;;  %v15877_v62 = vld [vmem:[#allocation6 + $0x80] ss:$12 sps:$4 sm:$0xff]   ;;  %2555 = vmatpush1.bf16.msra.mxu1 %v17523_v54 }
 0x4a1   :  { %15088 = vmatpush3.bf16.msra.mxu0 %v15877_v62 }
 0x4a2   :  { %15089 = vmatprep.subr.bf16.mxu0 %v16914_v7 }
 0x4a3   :  { %v2180_v63 = vpop.f32.mrb[24].mxu1  ;;  %v2221_v53 = vpop.f32.mrb[32].mxu0 }
 0x4a4   :  { %v2182_v49 = vpop.f32.mrb[25].mxu1  ;;  %v15075_v0 = vpop.f32.mrb[33].mxu0  ;;  %v2244_v11 = vrot.slane %v2221_v53, %v17059_v12  ;;  %v17527_v53 = vld [vmem:[#allocation6 + $0x94] ss:$12 sps:$4 sm:$0xff]  }
 0x4a5   :  { %v2230_v1 = vcombine.low %v2180_v63, %v2182_v49  ;;  %v2184_v3 = vpop.f32.mrb[26].mxu1  ;;  %v2224_v24 = vpop.f32.mrb[34].mxu0  ;;  %2556 = vmatprep.subr.bf16.mxu1 %v17527_v53 }
 0x4a6   :  { %v2185_v4 = vpop.f32.mrb[27].mxu1  ;;  %v15076_v9 = vpop.f32.mrb[35].mxu0  ;;  %v17530_v3 = vld [vmem:[#allocation6 + $0x90] ss:$12 sps:$4 sm:$0xff]   ;;  %v15881_v24 = vld [vmem:[#allocation6 + $0x98] ss:$12 sps:$4 sm:$0xff]  }
 0x4a7   :  { %v2237_v27 = vrot.slane %v2230_v1, %v17059_v12  ;;  %v17534_v4 = vld [vmem:[#allocation6 + $0xac] ss:$12 sps:$4 sm:$0xff]   ;;  %2557 = vmatpush1.bf16.msra.mxu1 %v17530_v3  ;;  %15090 = vmatpush3.bf16.msra.mxu0 %v15881_v24  ;;  %v17537_v9 = vld [vmem:[#allocation6 + $0xa8] ss:$12 sps:$4 sm:$0xff]  }
 0x4a8   :  { %v17472_v30 = vpop.eup %16444  ;;  %2558 = vmatprep.subr.bf16.mxu1 %v17534_v4  ;;  %15091 = vmatprep.subr.bf16.mxu0 %v16914_v7 }
 0x4a9   :  { %v17476_v33 = vpop.eup %16446  ;;  %v2245_v15 = vcombine.low %v2237_v27, %v2244_v11  ;;  %v2246_v34 = vcombine.high %v2237_v27, %v2244_v11  ;;  %v1891_v16 = vmul.f32 2.0, %v17472_v30  ;;  %v15885_v11 = vld [vmem:[#allocation6 + $0xb0] ss:$12 sps:$4 sm:$0xff]  }
 0x4aa   :  { %v1892_v61 = vmul.f32 2.0, %v17476_v33  ;;  %v1897_v37 = vcombine.low %v17472_v30, %v17476_v33 }
 0x4ab   :  { %v2253_v39 = vrot.slane %v2245_v15, %v17059_v12  ;;  %v2260_v17 = vrot.slane %v2246_v34, %v17059_v12  ;;  %v13844_v40 = vadd.f32 -1.0, %v1891_v16  ;;  %2559 = vmatpush1.bf16.msra.mxu1 %v17537_v9  ;;  %15092 = vmatpush3.bf16.msra.mxu0 %v15885_v11 }
 0x4ac   :  { %v13845_v42 = vadd.f32 -1.0, %v1892_v61  ;;  %v1904_v22 = vrot.slane %v1897_v37, %v17059_v12  ;;  %15097 = vmatprep.subr.bf16.mxu0 %v16914_v7  ;;  %2930 = vmatprep.subr.bf16.mxu1 %v17545_v31 }
 0x4ad   :  { %v2263_v20 = vadd.f32 %v2253_v39, %v1586_v36  ;;  %v2264_v21 = vadd.f32 %v2260_v17, %v1588_v51 }
 0x4ae   :  { %v1915_v45 = vcombine.low %v13844_v40, %v13845_v42  ;;  %v1911_v47 = vrot.slane %v1904_v22, %v17059_v12 }
 0x4af   :  { %v13870_v26 = vmul.f32 -1.442695, %v2263_v20  ;;  %v13871_v35 = vmul.f32 -1.442695, %v2264_v21  ;;  %v1935_v21 = vrot.slane %v17472_v30, 1 }
 0x4b0   :  { %v1922_v41 = vrot.slane %v1915_v45, %v17059_v12  ;;  %v1936_v45 = vrot.slane %v17476_v33, 1 }
 0x4b1   :  { %16448 = vpow2.f32 %v13870_v26 }
 0x4b2   :  { %16450 = vpow2.f32 %v13871_v35  ;;  %v1929_v48 = vrot.slane %v1922_v41, %v17059_v12  ;;  %v1939_v35 = vmul.f32 %v1935_v21, %v17412_v29  ;;  %v1971_v29 = vrot.slane %v17476_v33, 2  ;;  %v17589_v21 = vld [vmem:[#allocation9 + $0x34] ss:$12 sps:$4 sm:$0xff]  }
 0x4b4   :  { %v1931_v57 = vsel %vm817_vm9, %v1911_v47, %v1929_v48  ;;  %v1940_v47 = vmul.f32 %v1936_v45, %v17414_v32 }
 0x4b5   :  { %1932 = vrot.lane.b32.xlu0 %v1931_v57, %s16917_s6 }
 0x4bb   :  { %v16449_v63 = vpop.eup %16448 }
 0x4bc   :  { %v16451_v49 = vpop.eup %16450  ;;  %v2271_v0 = vadd.f32 1.0, %v16449_v63 }
 0x4bd   :  { %v2272_v1 = vadd.f32 1.0, %v16451_v49 }
 0x4be   :  { %16452 = vrcp.f32 %v2271_v0 }
 0x4bf   :  { %16454 = vrcp.f32 %v2272_v1 }
 0x4c8   :  { %v17543_v27 = vpop.eup %16452 }
 0x4c9   :  { %v17547_v15 = vpop.eup %16454  ;;  %v2277_v34 = vmul.f32 2.0, %v17543_v27  ;;  %v2321_v33 = vrot.slane %v17543_v27, 1 }
 0x4ca   :  { %v2278_v16 = vmul.f32 2.0, %v17547_v15  ;;  %v2283_v36 = vcombine.low %v17543_v27, %v17547_v15 }
 0x4cb   :  { %v13872_v61 = vadd.f32 -1.0, %v2277_v34 }
 0x4cc   :  { %v13873_v37 = vadd.f32 -1.0, %v2278_v16  ;;  %v2290_v51 = vrot.slane %v2283_v36, %v17059_v12  ;;  %v17577_v36 = vld [vmem:[#allocation9] ss:$12 sps:$4 sm:$0xff]  }
 0x4ce   :  { %v2301_v39 = vcombine.low %v13872_v61, %v13873_v37  ;;  %v2297_v40 = vrot.slane %v2290_v51, %v17059_v12  ;;  %v15889_v61 = vld [vmem:[#allocation9 + $0x8] ss:$12 sps:$4 sm:$0xff]  }
 0x4d0   :  { %v2308_v17 = vrot.slane %v2301_v39, %v17059_v12 }
 0x4d2   :  { %v2315_v42 = vrot.slane %v2308_v17, %v17059_v12  ;;  %v17583_v17 = vld [vmem:[#allocation9 + $0x18] ss:$12 sps:$4 sm:$0xff]  }
 0x4d4   :  { %v2317_v19 = vsel %vm817_vm9, %v2297_v40, %v2315_v42  ;;  %v15893_v40 = vld [vmem:[#allocation9 + $0x20] ss:$12 sps:$4 sm:$0xff]   ;;  %v2322_v42 = vrot.slane %v17547_v15, 1 }
 0x4d5   :  { %2318 = vrot.lane.b32.xlu1 %v2317_v19, %s16917_s6 }
 0x527   :  { %v1933_v20 = vpop.permute.xlu0 %1932 }
 0x528   :  { %v1934_v22 = vmul.f32 %v1933_v20, %v1931_v57  ;;  %v1970_v57 = vrot.slane %v17472_v30, 2  ;;  %v17579_v30 = vld [vmem:[#allocation9 + $0x1c] ss:$12 sps:$4 sm:$0xff]  }
 0x52a   :  { %v1948_v26 = vrot.slane %v1934_v22, %v17059_v12 }
 0x52c   :  { %v1949_v41 = vcombine.high %v1948_v26, %v1948_v26  ;;  %v1956_v46 = vrot.slane %v1948_v26, %v17059_v12  ;;  %v17597_v26 = vld [vmem:[#allocation9 + $0x30] ss:$12 sps:$4 sm:$0xff]  }
 0x52e   :  { %v1963_v48 = vrot.slane %v1949_v41, %v17059_v12  ;;  %v17568_v55 = vadd.f32 %v1956_v46, %v1939_v35  ;;  %v15897_v35 = vld [vmem:[#allocation9 + $0x38] ss:$12 sps:$4 sm:$0xff]   ;;  %v2326_v41 = vmul.f32 %v2322_v42, %v17437_v25  ;;  %v15901_v25 = vld [vmem:[#allocation9 + $0x50] ss:$12 sps:$4 sm:$0xff]  }
 0x52f   :  { %v15917_v42 = vld [vmem:[#allocation9 + $0xb0] ss:$12 sps:$4 sm:$0xff]  }
 0x530   :  { %v17570_v60 = vadd.f32 %v1963_v48, %v1940_v47  ;;  %16456 = vtanh.f32 %v17568_v55 }
 0x532   :  { %16458 = vtanh.f32 %v17570_v60 }
 0x53a   :  { %v16457_v62 = vpop.eup %16456 }
 0x53b   :  { %v1974_v63 = vmul.f32 %v16457_v62, %v1970_v57  ;;  %v17611_v57 = vld [vmem:[#allocation9 + $0x48] ss:$12 sps:$4 sm:$0xff]   ;;  %v17616_v62 = vld [vmem:[#allocation9 + $0x64] ss:$12 sps:$4 sm:$0xff]  }
 0x53c   :  { %v16459_v49 = vpop.eup %16458 }
 0x53d   :  { %v1975_v0 = vmul.f32 %v16459_v49, %v1971_v29  ;;  %2362 = vst [vmem:[#allocation3 + $0x1] sm:$0x1] %v1974_v63  ;;  %v2374_v32 = vpack.c.bf16 %v1974_v63, %v1974_v63  ;;  %v17619_v29 = vld [vmem:[#allocation9 + $0x60] ss:$12 sps:$4 sm:$0xff]   ;;  %v15905_v63 = vld [vmem:[#allocation9 + $0x68] ss:$12 sps:$4 sm:$0xff]  }
 0x53e   :  { %v17623_v49 = vld [vmem:[#allocation9 + $0x7c] ss:$12 sps:$4 sm:$0xff]  }
 0x53f   :  { %2363 = vst [vmem:[#allocation3 + $0x11] sm:$0x1] %v1975_v0  ;;  %v2375_v1 = vpack.c.bf16 %v1975_v0, %v1975_v0  ;;  %v2410_v11 = vunpack.c.l.b16 %v2374_v32  ;;  %v17626_v0 = vld [vmem:[#allocation9 + $0x78] ss:$12 sps:$4 sm:$0xff]   ;;  %v15909_v32 = vld [vmem:[#allocation9 + $0x80] ss:$12 sps:$4 sm:$0xff]  }
 0x541   :  { %v2411_v24 = vunpack.c.l.b16 %v2375_v1  ;;  %v2356_v1 = vrot.slane %v17543_v27, 2  ;;  %v17639_v27 = vld [vmem:[#allocation9 + $0xac] ss:$12 sps:$4 sm:$0xff]  }
 0x543   :  { %v2412_v34 = vrot.slane %v2411_v24, 7 }
 0x545   :  { %v2413_v16 = vsel %vm1628_vm10, %v2412_v34, %v2410_v11  ;;  %v17631_v11 = vld [vmem:[#allocation9 + $0x94] ss:$12 sps:$4 sm:$0xff]   ;;  %v2357_v34 = vrot.slane %v17547_v15, 2 }
 0x546   :  { %v2414_v37 = vpack.c.b16 %v2413_v16, %v2413_v16  ;;  %v17642_v15 = vld [vmem:[#allocation9 + $0xa8] ss:$12 sps:$4 sm:$0xff]  }
 0x547   :  { %v2319_v51 = vpop.permute.xlu1 %2318 }
 0x548   :  { %v2320_v39 = vmul.f32 %v2319_v51, %v2317_v19  ;;  %2577 = vmatmul.mubr.bf16.vlgmr.msra.gmra.mrb[28].mxu1 %v2414_v37  ;;  %15094 = vmatmul.mubr.bf16.vlgmr.msra.gmra.mrb[36].mxu0 %v2414_v37  ;;  %v2325_v19 = vmul.f32 %v2321_v33, %v17433_v8  ;;  %v17605_v8 = vld [vmem:[#allocation9 + $0x4c] ss:$12 sps:$4 sm:$0xff]   ;;  %v17635_v37 = vld [vmem:[#allocation9 + $0x90] ss:$12 sps:$4 sm:$0xff]  }
 0x549   :  { %2931 = vmatpush1.bf16.msra.mxu1 %v17577_v36  ;;  %15098 = vmatpush3.bf16.msra.mxu0 %v15889_v61  ;;  %v15913_v51 = vld [vmem:[#allocation9 + $0x98] ss:$12 sps:$4 sm:$0xff]  }
 0x54a   :  { %v2334_v20 = vrot.slane %v2320_v39, %v17059_v12  ;;  %2932 = vmatprep.subr.bf16.mxu1 %v17579_v30  ;;  %15099 = vmatprep.subr.bf16.mxu0 %v16914_v7 }
 0x54b   :  { %2962 = vmatprep.mubr.bf16.mxu1 %v16916_v10  ;;  %15113 = vmatprep.mubr.msk.bf16.mxu0 %vm16913_vm0, %v16914_v7 }
 0x54c   :  { %v2335_v22 = vcombine.high %v2334_v20, %v2334_v20  ;;  %v2342_v45 = vrot.slane %v2334_v20, %v17059_v12 }
 0x54d   :  { %2933 = vmatpush1.bf16.msra.mxu1 %v17583_v17  ;;  %15100 = vmatpush3.bf16.msra.mxu0 %v15893_v40 }
 0x54e   :  { %v2349_v46 = vrot.slane %v2335_v22, %v17059_v12  ;;  %v17601_v47 = vadd.f32 %v2342_v45, %v2325_v19  ;;  %2934 = vmatprep.subr.bf16.mxu1 %v17589_v21  ;;  %15101 = vmatprep.subr.bf16.mxu0 %v16914_v7 }
 0x550   :  { %v17607_v48 = vadd.f32 %v2349_v46, %v2326_v41  ;;  %16460 = vtanh.f32 %v17601_v47 }
 0x551   :  { %2935 = vmatpush1.bf16.msra.mxu1 %v17597_v26  ;;  %15102 = vmatpush3.bf16.msra.mxu0 %v15897_v35 }
 0x552   :  { %16462 = vtanh.f32 %v17607_v48  ;;  %2936 = vmatprep.subr.bf16.mxu1 %v17605_v8  ;;  %15103 = vmatprep.subr.bf16.mxu0 %v16914_v7 }
 0x555   :  { %2937 = vmatpush1.bf16.msra.mxu1 %v17611_v57  ;;  %15104 = vmatpush3.bf16.msra.mxu0 %v15901_v25 }
 0x556   :  { %2938 = vmatprep.subr.bf16.mxu1 %v17616_v62  ;;  %15105 = vmatprep.subr.bf16.mxu0 %v16914_v7 }
 0x559   :  { %2939 = vmatpush1.bf16.msra.mxu1 %v17619_v29  ;;  %15106 = vmatpush3.bf16.msra.mxu0 %v15905_v63 }
 0x55a   :  { %v16461_v24 = vpop.eup %16460  ;;  %2940 = vmatprep.subr.bf16.mxu1 %v17623_v49  ;;  %15107 = vmatprep.subr.bf16.mxu0 %v16914_v7 }
 0x55b   :  { %v2360_v16 = vmul.f32 %v16461_v24, %v2356_v1 }
 0x55c   :  { %v16463_v61 = vpop.eup %16462 }
 0x55d   :  { %2941 = vmatpush1.bf16.msra.mxu1 %v17626_v0  ;;  %15108 = vmatpush3.bf16.msra.mxu0 %v15909_v32  ;;  %v2361_v33 = vmul.f32 %v16463_v61, %v2357_v34  ;;  %2364 = vst [vmem:[#allocation4 + $0xe] sm:$0x1] %v2360_v16  ;;  %v2760_v39 = vpack.c.bf16 %v2360_v16, %v2360_v16 }
 0x55e   :  { %2942 = vmatprep.subr.bf16.mxu1 %v17631_v11  ;;  %15109 = vmatprep.subr.bf16.mxu0 %v16914_v7 }
 0x55f   :  { %2365 = vst [vmem:[#allocation4 + $0x1e] sm:$0x1] %v2361_v33  ;;  %v2761_v40 = vpack.c.bf16 %v2361_v33, %v2361_v33  ;;  %v2796_v19 = vunpack.c.l.b16 %v2760_v39 }
 0x561   :  { %2943 = vmatpush1.bf16.msra.mxu1 %v17635_v37  ;;  %15110 = vmatpush3.bf16.msra.mxu0 %v15913_v51  ;;  %v2797_v20 = vunpack.c.l.b16 %v2761_v40 }
 0x562   :  { %2944 = vmatprep.subr.bf16.mxu1 %v17639_v27  ;;  %15111 = vmatprep.subr.bf16.mxu0 %v16914_v7 }
 0x563   :  { %v2798_v22 = vrot.slane %v2797_v20, 7 }
 0x565   :  { %2945 = vmatpush1.bf16.msra.mxu1 %v17642_v15  ;;  %15112 = vmatpush3.bf16.msra.mxu0 %v15917_v42  ;;  %v2799_v45 = vsel %vm1628_vm10, %v2798_v22, %v2796_v19 }
 0x566   :  { %v2800_v35 = vpack.c.b16 %v2799_v45, %v2799_v45  ;;  %3328 = vmatprep.subr.bf16.mxu1 %v17470_v28  ;;  %15117 = vmatprep.subr.bf16.mxu0 %v16914_v7 }
 0x568   :  { %2963 = vmatmul.mubr.bf16.vlgmr.msra.gmra.mrb[32].mxu1 %v2800_v35  ;;  %15114 = vmatmul.mubr.bf16.vlgmr.msra.gmra.mrb[40].mxu0 %v2800_v35 }
 0x569   :  { %3329 = vmatpush1.bf16.msra.mxu1 %v17474_v14  ;;  %3360 = vmatprep.mubr.bf16.mxu1 %v16916_v10 }
 0x56a   :  { %3330 = vmatprep.subr.bf16.mxu1 %v17486_v18  ;;  %15133 = vmatprep.mubr.msk.bf16.mxu0 %vm16913_vm0, %v16914_v7 }
 0x56d   :  { %3331 = vmatpush1.bf16.msra.mxu1 %v17489_v43 }
 0x56e   :  { %3332 = vmatprep.subr.bf16.mxu1 %v17494_v38 }
 0x571   :  { %3333 = vmatpush1.bf16.msra.mxu1 %v17498_v44 }
 0x572   :  { %3334 = vmatprep.subr.bf16.mxu1 %v17506_v50 }
 0x575   :  { %3335 = vmatpush1.bf16.msra.mxu1 %v17504_v59 }
 0x576   :  { %3336 = vmatprep.subr.bf16.mxu1 %v17509_v56 }
 0x579   :  { %3337 = vmatpush1.bf16.msra.mxu1 %v17516_v58 }
 0x57a   :  { %3338 = vmatprep.subr.bf16.mxu1 %v17520_v52 }
 0x57d   :  { %3339 = vmatpush1.bf16.msra.mxu1 %v17523_v54 }
 0x57e   :  { %3340 = vmatprep.subr.bf16.mxu1 %v17527_v53 }
 0x581   :  { %3341 = vmatpush1.bf16.msra.mxu1 %v17530_v3 }
 0x582   :  { %3342 = vmatprep.subr.bf16.mxu1 %v17534_v4 }
 0x585   :  { %3343 = vmatpush1.bf16.msra.mxu1 %v17537_v9  ;;  %v2367_v9 = vld [vmem:[#allocation2 + $0x2] ss:$8 sm:$0x7] }
 0x586   :  { %3714 = vmatprep.subr.bf16.mxu1 %v17545_v31  ;;  %v2369_v31 = vld [vmem:[#allocation2 + $0x62] ss:$8 sm:$0x7] }
 0x61b   :  { %v2578_v28 = vpop.f32.mrb[28].mxu1  ;;  %v2619_v14 = vpop.f32.mrb[36].mxu0 }
 0x61c   :  { %v2580_v18 = vpop.f32.mrb[29].mxu1  ;;  %v15095_v43 = vpop.f32.mrb[37].mxu0  ;;  %v2642_v58 = vrot.slane %v2619_v14, %v17059_v12 }
 0x61d   :  { %v2628_v38 = vcombine.low %v2578_v28, %v2580_v18  ;;  %v2582_v44 = vpop.f32.mrb[30].mxu1  ;;  %v2622_v59 = vpop.f32.mrb[38].mxu0  ;;  %v15918_v28 = vld [vmem:[#allocation6 + $0x8] ss:$12 sps:$4 sm:$0xff]  }
 0x61e   :  { %v2583_v50 = vpop.f32.mrb[31].mxu1  ;;  %v15096_v56 = vpop.f32.mrb[39].mxu0  ;;  %15118 = vmatpush3.bf16.msra.mxu0 %v15918_v28 }
 0x61f   :  { %v2635_v52 = vrot.slane %v2628_v38, %v17059_v12  ;;  %v2371_v50 = vld [vmem:[#allocation2 + $0x4d] ss:$8 sm:$0x7]  ;;  %15119 = vmatprep.subr.bf16.mxu0 %v16914_v7 }
 0x621   :  { %v2643_v54 = vcombine.low %v2635_v52, %v2642_v58  ;;  %v2644_v53 = vcombine.high %v2635_v52, %v2642_v58 }
 0x623   :  { %v2651_v3 = vrot.slane %v2643_v54, %v17059_v12  ;;  %v2658_v4 = vrot.slane %v2644_v53, %v17059_v12  ;;  %v2373_v54 = vld [vmem:[#allocation2 + $0xad] ss:$8 sm:$0x7] }
 0x625   :  { %v2661_v41 = vadd.f32 %v2651_v3, %v2367_v9  ;;  %v2662_v46 = vadd.f32 %v2658_v4, %v2369_v31  ;;  %v15919_v3 = vld [vmem:[#allocation6 + $0x20] ss:$12 sps:$4 sm:$0xff]  }
 0x626   :  { %15120 = vmatpush3.bf16.msra.mxu0 %v15919_v3 }
 0x627   :  { %v13898_v25 = vmul.f32 -1.442695, %v2661_v41  ;;  %v13899_v63 = vmul.f32 -1.442695, %v2662_v46  ;;  %15121 = vmatprep.subr.bf16.mxu0 %v16914_v7 }
 0x629   :  { %16464 = vpow2.f32 %v13898_v25 }
 0x62a   :  { %16466 = vpow2.f32 %v13899_v63 }
 0x633   :  { %v16465_v32 = vpop.eup %16464 }
 0x634   :  { %v16467_v1 = vpop.eup %16466  ;;  %v2669_v24 = vadd.f32 1.0, %v16465_v32  ;;  %v15920_v32 = vld [vmem:[#allocation6 + $0x38] ss:$12 sps:$4 sm:$0xff]  }
 0x635   :  { %v2670_v34 = vadd.f32 1.0, %v16467_v1  ;;  %15122 = vmatpush3.bf16.msra.mxu0 %v15920_v32 }
 0x636   :  { %16468 = vrcp.f32 %v2669_v24  ;;  %15123 = vmatprep.subr.bf16.mxu0 %v16914_v7 }
 0x637   :  { %16470 = vrcp.f32 %v2670_v34  ;;  %v15921_v34 = vld [vmem:[#allocation6 + $0x50] ss:$12 sps:$4 sm:$0xff]  }
 0x639   :  { %15124 = vmatpush3.bf16.msra.mxu0 %v15921_v34 }
 0x63a   :  { %15125 = vmatprep.subr.bf16.mxu0 %v16914_v7 }
 0x63b   :  { %v2964_v16 = vpop.f32.mrb[32].mxu1  ;;  %v3005_v61 = vpop.f32.mrb[40].mxu0 }
 0x63c   :  { %v2966_v51 = vpop.f32.mrb[33].mxu1  ;;  %v15115_v33 = vpop.f32.mrb[41].mxu0  ;;  %v3028_v22 = vrot.slane %v3005_v61, %v17059_v12  ;;  %v15922_v61 = vld [vmem:[#allocation6 + $0x68] ss:$12 sps:$4 sm:$0xff]  }
 0x63d   :  { %v3014_v39 = vcombine.low %v2964_v16, %v2966_v51  ;;  %v2968_v40 = vpop.f32.mrb[34].mxu1  ;;  %v3008_v42 = vpop.f32.mrb[42].mxu0  ;;  %15126 = vmatpush3.bf16.msra.mxu0 %v15922_v61  ;;  %v15923_v51 = vld [vmem:[#allocation6 + $0x80] ss:$12 sps:$4 sm:$0xff]  }
 0x63e   :  { %v2969_v20 = vpop.f32.mrb[35].mxu1  ;;  %v15116_v19 = vpop.f32.mrb[43].mxu0  ;;  %15127 = vmatprep.subr.bf16.mxu0 %v16914_v7 }
 0x63f   :  { %v3021_v45 = vrot.slane %v3014_v39, %v17059_v12  ;;  %v15924_v20 = vld [vmem:[#allocation6 + $0x98] ss:$12 sps:$4 sm:$0xff]   ;;  %v15925_v19 = vld [vmem:[#allocation6 + $0xb0] ss:$12 sps:$4 sm:$0xff]  }
 0x640   :  { %v17675_v35 = vpop.eup %16468 }
 0x641   :  { %v17677_v14 = vpop.eup %16470  ;;  %v3029_v18 = vcombine.low %v3021_v45, %v3028_v22  ;;  %v3030_v43 = vcombine.high %v3021_v45, %v3028_v22  ;;  %v2675_v38 = vmul.f32 2.0, %v17675_v35  ;;  %15128 = vmatpush3.bf16.msra.mxu0 %v15923_v51  ;;  %v2719_v3 = vrot.slane %v17675_v35, 1 }
 0x642   :  { %v2676_v44 = vmul.f32 2.0, %v17677_v14  ;;  %v2681_v59 = vcombine.low %v17675_v35, %v17677_v14  ;;  %15129 = vmatprep.subr.bf16.mxu0 %v16914_v7  ;;  %v2754_v34 = vrot.slane %v17675_v35, 2 }
 0x643   :  { %v3037_v56 = vrot.slane %v3029_v18, %v17059_v12  ;;  %v3044_v58 = vrot.slane %v3030_v43, %v17059_v12  ;;  %v13900_v52 = vadd.f32 -1.0, %v2675_v38 }
 0x644   :  { %v13901_v53 = vadd.f32 -1.0, %v2676_v44  ;;  %v2688_v31 = vrot.slane %v2681_v59, %v17059_v12 }
 0x645   :  { %v3047_v4 = vadd.f32 %v3037_v56, %v2371_v50  ;;  %v3048_v9 = vadd.f32 %v3044_v58, %v2373_v54  ;;  %15130 = vmatpush3.bf16.msra.mxu0 %v15924_v20 }
 0x646   :  { %v2699_v41 = vcombine.low %v13900_v52, %v13901_v53  ;;  %v2695_v1 = vrot.slane %v2688_v31, %v17059_v12  ;;  %15131 = vmatprep.subr.bf16.mxu0 %v16914_v7 }
 0x647   :  { %v13926_v46 = vmul.f32 -1.442695, %v3047_v4  ;;  %v13927_v25 = vmul.f32 -1.442695, %v3048_v9  ;;  %v2720_v9 = vrot.slane %v17677_v14, 1 }
 0x648   :  { %v2706_v63 = vrot.slane %v2699_v41, %v17059_v12  ;;  %v2723_v41 = vmul.f32 %v2719_v3, %v17568_v55  ;;  %v2755_v55 = vrot.slane %v17677_v14, 2  ;;  %v15927_v14 = vld [vmem:[#allocation9 + $0x20] ss:$12 sps:$4 sm:$0xff]  }
 0x649   :  { %16472 = vpow2.f32 %v13926_v46  ;;  %15132 = vmatpush3.bf16.msra.mxu0 %v15925_v19 }
 0x64a   :  { %16474 = vpow2.f32 %v13927_v25  ;;  %v2713_v24 = vrot.slane %v2706_v63, %v17059_v12  ;;  %15137 = vmatprep.subr.bf16.mxu0 %v16914_v7  ;;  %v2724_v63 = vmul.f32 %v2720_v9, %v17570_v60 }
 0x64c   :  { %v2715_v16 = vsel %vm817_vm9, %v2695_v1, %v2713_v24 }
 0x64d   :  { %2716 = vrot.lane.b32.xlu0 %v2715_v16, %s16917_s6 }
 0x653   :  { %v16473_v33 = vpop.eup %16472 }
 0x654   :  { %v16475_v39 = vpop.eup %16474  ;;  %v3055_v40 = vadd.f32 1.0, %v16473_v33 }
 0x655   :  { %v3056_v42 = vadd.f32 1.0, %v16475_v39 }
 0x656   :  { %16476 = vrcp.f32 %v3055_v40 }
 0x657   :  { %16478 = vrcp.f32 %v3056_v42 }
 0x660   :  { %v17700_v22 = vpop.eup %16476 }
 0x661   :  { %v17702_v45 = vpop.eup %16478  ;;  %v3061_v28 = vmul.f32 2.0, %v17700_v22  ;;  %v3105_v35 = vrot.slane %v17700_v22, 1 }
 0x662   :  { %v3062_v18 = vmul.f32 2.0, %v17702_v45  ;;  %v3067_v43 = vcombine.low %v17700_v22, %v17702_v45 }
 0x663   :  { %v13928_v38 = vadd.f32 -1.0, %v3061_v28  ;;  %v15926_v28 = vld [vmem:[#allocation9 + $0x8] ss:$12 sps:$4 sm:$0xff]  }
 0x664   :  { %v13929_v44 = vadd.f32 -1.0, %v3062_v18  ;;  %v3074_v59 = vrot.slane %v3067_v43, %v17059_v12 }
 0x666   :  { %v3085_v50 = vcombine.low %v13928_v38, %v13929_v44  ;;  %v3081_v58 = vrot.slane %v3074_v59, %v17059_v12  ;;  %v3106_v44 = vrot.slane %v17702_v45, 1 }
 0x668   :  { %v3092_v56 = vrot.slane %v3085_v50, %v17059_v12  ;;  %v3109_v50 = vmul.f32 %v3105_v35, %v17601_v47  ;;  %v3140_v47 = vrot.slane %v17700_v22, 2 }
 0x66a   :  { %v3099_v52 = vrot.slane %v3092_v56, %v17059_v12 }
 0x66c   :  { %v3101_v54 = vsel %vm817_vm9, %v3081_v58, %v3099_v52  ;;  %v15928_v58 = vld [vmem:[#allocation9 + $0x38] ss:$12 sps:$4 sm:$0xff]   ;;  %v3110_v52 = vmul.f32 %v3106_v44, %v17607_v48 }
 0x66d   :  { %3102 = vrot.lane.b32.xlu1 %v3101_v54, %s16917_s6 }
 0x6bf   :  { %v2717_v53 = vpop.permute.xlu0 %2716 }
 0x6c0   :  { %v2718_v4 = vmul.f32 %v2717_v53, %v2715_v16 }
 0x6c2   :  { %v2732_v31 = vrot.slane %v2718_v4, %v17059_v12 }
 0x6c4   :  { %v2733_v46 = vcombine.high %v2732_v31, %v2732_v31  ;;  %v2740_v25 = vrot.slane %v2732_v31, %v17059_v12 }
 0x6c6   :  { %v2747_v32 = vrot.slane %v2733_v46, %v17059_v12  ;;  %v17722_v1 = vadd.f32 %v2740_v25, %v2723_v41 }
 0x6c8   :  { %v17724_v24 = vadd.f32 %v2747_v32, %v2724_v63  ;;  %16480 = vtanh.f32 %v17722_v1 }
 0x6ca   :  { %16482 = vtanh.f32 %v17724_v24 }
 0x6d2   :  { %v16481_v16 = vpop.eup %16480 }
 0x6d3   :  { %v2758_v61 = vmul.f32 %v16481_v16, %v2754_v34 }
 0x6d4   :  { %v16483_v51 = vpop.eup %16482 }
 0x6d5   :  { %v2759_v33 = vmul.f32 %v16483_v51, %v2755_v55  ;;  %3146 = vst [vmem:[#allocation3 + $0x2] sm:$0x1] %v2758_v61  ;;  %v3158_v60 = vpack.c.bf16 %v2758_v61, %v2758_v61 }
 0x6d7   :  { %3147 = vst [vmem:[#allocation3 + $0x12] sm:$0x1] %v2759_v33  ;;  %v3159_v39 = vpack.c.bf16 %v2759_v33, %v2759_v33  ;;  %v3194_v42 = vunpack.c.l.b16 %v3158_v60 }
 0x6d9   :  { %v3195_v40 = vunpack.c.l.b16 %v3159_v39  ;;  %v3151_v39 = vld [vmem:[#allocation2 + $0x3] ss:$8 sm:$0x7] }
 0x6db   :  { %v3196_v20 = vrot.slane %v3195_v40, 7  ;;  %v3153_v40 = vld [vmem:[#allocation2 + $0x63] ss:$8 sm:$0x7] }
 0x6dd   :  { %v3197_v19 = vsel %vm1628_vm10, %v3196_v20, %v3194_v42 }
 0x6de   :  { %v3198_v18 = vpack.c.b16 %v3197_v19, %v3197_v19 }
 0x6df   :  { %v3103_v43 = vpop.permute.xlu1 %3102 }
 0x6e0   :  { %v3104_v38 = vmul.f32 %v3103_v43, %v3101_v54  ;;  %3361 = vmatmul.mubr.bf16.vlgmr.msra.gmra.mrb[36].mxu1 %v3198_v18  ;;  %15134 = vmatmul.mubr.bf16.vlgmr.msra.gmra.mrb[44].mxu0 %v3198_v18 }
 0x6e1   :  { %3715 = vmatpush1.bf16.msra.mxu1 %v17577_v36  ;;  %15138 = vmatpush3.bf16.msra.mxu0 %v15926_v28 }
 0x6e2   :  { %v3118_v59 = vrot.slane %v3104_v38, %v17059_v12  ;;  %3716 = vmatprep.subr.bf16.mxu1 %v17579_v30  ;;  %15139 = vmatprep.subr.bf16.mxu0 %v16914_v7 }
 0x6e3   :  { %3746 = vmatprep.mubr.bf16.mxu1 %v16916_v10  ;;  %15153 = vmatprep.mubr.msk.bf16.mxu0 %vm16913_vm0, %v16914_v7 }
 0x6e4   :  { %v3119_v56 = vcombine.high %v3118_v59, %v3118_v59  ;;  %v3126_v36 = vrot.slane %v3118_v59, %v17059_v12 }
 0x6e5   :  { %3717 = vmatpush1.bf16.msra.mxu1 %v17583_v17  ;;  %15140 = vmatpush3.bf16.msra.mxu0 %v15927_v14  ;;  %v15929_v17 = vld [vmem:[#allocation9 + $0x50] ss:$12 sps:$4 sm:$0xff]  }
 0x6e6   :  { %v3133_v30 = vrot.slane %v3119_v56, %v17059_v12  ;;  %v17745_v54 = vadd.f32 %v3126_v36, %v3109_v50  ;;  %3718 = vmatprep.subr.bf16.mxu1 %v17589_v21  ;;  %15141 = vmatprep.subr.bf16.mxu0 %v16914_v7  ;;  %v15930_v21 = vld [vmem:[#allocation9 + $0x68] ss:$12 sps:$4 sm:$0xff]  }
 0x6e8   :  { %v17749_v53 = vadd.f32 %v3133_v30, %v3110_v52  ;;  %16484 = vtanh.f32 %v17745_v54 }
 0x6e9   :  { %3719 = vmatpush1.bf16.msra.mxu1 %v17597_v26  ;;  %15142 = vmatpush3.bf16.msra.mxu0 %v15928_v58  ;;  %v15931_v26 = vld [vmem:[#allocation9 + $0x80] ss:$12 sps:$4 sm:$0xff]  }
 0x6ea   :  { %16486 = vtanh.f32 %v17749_v53  ;;  %3720 = vmatprep.subr.bf16.mxu1 %v17605_v8  ;;  %15143 = vmatprep.subr.bf16.mxu0 %v16914_v7  ;;  %v3141_v8 = vrot.slane %v17702_v45, 2 }
 0x6ed   :  { %3721 = vmatpush1.bf16.msra.mxu1 %v17611_v57  ;;  %15144 = vmatpush3.bf16.msra.mxu0 %v15929_v17 }
 0x6ee   :  { %3722 = vmatprep.subr.bf16.mxu1 %v17616_v62  ;;  %15145 = vmatprep.subr.bf16.mxu0 %v16914_v7  ;;  %v15932_v62 = vld [vmem:[#allocation9 + $0x98] ss:$12 sps:$4 sm:$0xff]  }
 0x6f1   :  { %3723 = vmatpush1.bf16.msra.mxu1 %v17619_v29  ;;  %15146 = vmatpush3.bf16.msra.mxu0 %v15930_v21 }
 0x6f2   :  { %v16485_v48 = vpop.eup %16484  ;;  %3724 = vmatprep.subr.bf16.mxu1 %v17623_v49  ;;  %15147 = vmatprep.subr.bf16.mxu0 %v16914_v7  ;;  %v15933_v49 = vld [vmem:[#allocation9 + $0xb0] ss:$12 sps:$4 sm:$0xff]  }
 0x6f3   :  { %v3144_v57 = vmul.f32 %v16485_v48, %v3140_v47  ;;  %v17786_v48 = vld [vmem:[#allocation6] ss:$12 sps:$4 sm:$0xff]  }
 0x6f4   :  { %v16487_v3 = vpop.eup %16486 }
 0x6f5   :  { %3725 = vmatpush1.bf16.msra.mxu1 %v17626_v0  ;;  %15148 = vmatpush3.bf16.msra.mxu0 %v15931_v26  ;;  %v3145_v4 = vmul.f32 %v16487_v3, %v3141_v8  ;;  %3148 = vst [vmem:[#allocation4 + $0xd] sm:$0x1] %v3144_v57  ;;  %v3544_v29 = vpack.c.bf16 %v3144_v57, %v3144_v57  ;;  %v17782_v26 = vld [vmem:[#allocation6 + $0x4] ss:$12 sps:$4 sm:$0xff]   ;;  %v15937_v8 = vld [vmem:[#allocation6 + $0x8] ss:$12 sps:$4 sm:$0xff]  }
 0x6f6   :  { %3726 = vmatprep.subr.bf16.mxu1 %v17631_v11  ;;  %15149 = vmatprep.subr.bf16.mxu0 %v16914_v7 }
 0x6f7   :  { %3149 = vst [vmem:[#allocation4 + $0x1d] sm:$0x1] %v3145_v4  ;;  %v3545_v22 = vpack.c.bf16 %v3145_v4, %v3145_v4  ;;  %v3580_v0 = vunpack.c.l.b16 %v3544_v29  ;;  %v3155_v29 = vld [vmem:[#allocation2 + $0x4c] ss:$8 sm:$0x7] }
 0x6f9   :  { %3727 = vmatpush1.bf16.msra.mxu1 %v17635_v37  ;;  %15150 = vmatpush3.bf16.msra.mxu0 %v15932_v62  ;;  %v3581_v45 = vunpack.c.l.b16 %v3545_v22 }
 0x6fa   :  { %3728 = vmatprep.subr.bf16.mxu1 %v17639_v27  ;;  %15151 = vmatprep.subr.bf16.mxu0 %v16914_v7 }
 0x6fb   :  { %v3582_v9 = vrot.slane %v3581_v45, 7  ;;  %v3157_v45 = vld [vmem:[#allocation2 + $0xac] ss:$8 sm:$0x7] }
 0x6fd   :  { %3729 = vmatpush1.bf16.msra.mxu1 %v17642_v15  ;;  %15152 = vmatpush3.bf16.msra.mxu0 %v15933_v49  ;;  %v3583_v11 = vsel %vm1628_vm10, %v3582_v9, %v3580_v0 }
 0x6fe   :  { %v3584_v31 = vpack.c.b16 %v3583_v11, %v3583_v11  ;;  %15157 = vmatprep.subr.bf16.mxu0 %v16914_v7  ;;  %4112 = vmatprep.subr.bf16.mxu1 %v17782_v26 }
 0x700   :  { %3747 = vmatmul.mubr.bf16.vlgmr.msra.gmra.mrb[40].mxu1 %v3584_v31  ;;  %15154 = vmatmul.mubr.bf16.vlgmr.msra.gmra.mrb[48].mxu0 %v3584_v31  ;;  %v17798_v31 = vld [vmem:[#allocation6 + $0x1c] ss:$12 sps:$4 sm:$0xff]  }
 0x701   :  { %4144 = vmatprep.mubr.bf16.mxu1 %v16916_v10  ;;  %15173 = vmatprep.mubr.msk.bf16.mxu0 %vm16913_vm0, %v16914_v7 }
 0x702   :  { %4113 = vmatpush1.bf16.msra.mxu1 %v17786_v48  ;;  %15158 = vmatpush3.bf16.msra.mxu0 %v15937_v8  ;;  %v17857_v8 = vld [vmem:[#allocation9 + $0x4] ss:$12 sps:$4 sm:$0xff]  }
 0x703   :  { %15159 = vmatprep.subr.bf16.mxu0 %v16914_v7  ;;  %4114 = vmatprep.subr.bf16.mxu1 %v17798_v31 }
 0x7b3   :  { %v3362_v37 = vpop.f32.mrb[36].mxu1  ;;  %v3403_v27 = vpop.f32.mrb[44].mxu0 }
 0x7b4   :  { %v3364_v41 = vpop.f32.mrb[37].mxu1  ;;  %v15135_v46 = vpop.f32.mrb[45].mxu0  ;;  %v3426_v16 = vrot.slane %v3403_v27, %v17059_v12  ;;  %v17801_v27 = vld [vmem:[#allocation6 + $0x18] ss:$12 sps:$4 sm:$0xff]  }
 0x7b5   :  { %v3412_v25 = vcombine.low %v3362_v37, %v3364_v41  ;;  %v3366_v63 = vpop.f32.mrb[38].mxu1  ;;  %v3406_v15 = vpop.f32.mrb[46].mxu0  ;;  %v15941_v41 = vld [vmem:[#allocation6 + $0x20] ss:$12 sps:$4 sm:$0xff]   ;;  %4115 = vmatpush1.bf16.msra.mxu1 %v17801_v27 }
 0x7b6   :  { %v3367_v32 = vpop.f32.mrb[39].mxu1  ;;  %v15136_v34 = vpop.f32.mrb[47].mxu0  ;;  %15160 = vmatpush3.bf16.msra.mxu0 %v15941_v41 }
 0x7b7   :  { %v3419_v55 = vrot.slane %v3412_v25, %v17059_v12  ;;  %15161 = vmatprep.subr.bf16.mxu0 %v16914_v7 }
 0x7b9   :  { %v3427_v61 = vcombine.low %v3419_v55, %v3426_v16  ;;  %v3428_v51 = vcombine.high %v3419_v55, %v3426_v16  ;;  %v17806_v16 = vld [vmem:[#allocation6 + $0x34] ss:$12 sps:$4 sm:$0xff]  }
 0x7ba   :  { %4116 = vmatprep.subr.bf16.mxu1 %v17806_v16 }
 0x7bb   :  { %v3435_v33 = vrot.slane %v3427_v61, %v17059_v12  ;;  %v3442_v60 = vrot.slane %v3428_v51, %v17059_v12  ;;  %v17810_v61 = vld [vmem:[#allocation6 + $0x30] ss:$12 sps:$4 sm:$0xff]   ;;  %v15945_v51 = vld [vmem:[#allocation6 + $0x38] ss:$12 sps:$4 sm:$0xff]  }
 0x7bc   :  { %4117 = vmatpush1.bf16.msra.mxu1 %v17810_v61  ;;  %15162 = vmatpush3.bf16.msra.mxu0 %v15945_v51 }
 0x7bd   :  { %v3445_v42 = vadd.f32 %v3435_v33, %v3151_v39  ;;  %v3446_v20 = vadd.f32 %v3442_v60, %v3153_v40  ;;  %v17816_v39 = vld [vmem:[#allocation6 + $0x48] ss:$12 sps:$4 sm:$0xff]   ;;  %v17818_v40 = vld [vmem:[#allocation6 + $0x4c] ss:$12 sps:$4 sm:$0xff]   ;;  %15163 = vmatprep.subr.bf16.mxu0 %v16914_v7 }
 0x7be   :  { %4118 = vmatprep.subr.bf16.mxu1 %v17818_v40 }
 0x7bf   :  { %v13954_v19 = vmul.f32 -1.442695, %v3445_v42  ;;  %v13955_v28 = vmul.f32 -1.442695, %v3446_v20  ;;  %v15949_v42 = vld [vmem:[#allocation6 + $0x50] ss:$12 sps:$4 sm:$0xff]  }
 0x7c0   :  { %v17821_v20 = vld [vmem:[#allocation6 + $0x64] ss:$12 sps:$4 sm:$0xff]   ;;  %4119 = vmatpush1.bf16.msra.mxu1 %v17816_v39  ;;  %15164 = vmatpush3.bf16.msra.mxu0 %v15949_v42 }
 0x7c1   :  { %16488 = vpow2.f32 %v13954_v19  ;;  %4120 = vmatprep.subr.bf16.mxu1 %v17821_v20  ;;  %15165 = vmatprep.subr.bf16.mxu0 %v16914_v7 }
 0x7c2   :  { %16490 = vpow2.f32 %v13955_v28  ;;  %v17828_v28 = vld [vmem:[#allocation6 + $0x60] ss:$12 sps:$4 sm:$0xff]  }
 0x7c4   :  { %4121 = vmatpush1.bf16.msra.mxu1 %v17828_v28 }
 0x7cb   :  { %v16489_v18 = vpop.eup %16488 }
 0x7cc   :  { %v16491_v43 = vpop.eup %16490  ;;  %v3453_v35 = vadd.f32 1.0, %v16489_v18  ;;  %v15953_v18 = vld [vmem:[#allocation6 + $0x68] ss:$12 sps:$4 sm:$0xff]  }
 0x7cd   :  { %v3454_v38 = vadd.f32 1.0, %v16491_v43  ;;  %v17832_v43 = vld [vmem:[#allocation6 + $0x7c] ss:$12 sps:$4 sm:$0xff]   ;;  %15166 = vmatpush3.bf16.msra.mxu0 %v15953_v18 }
 0x7ce   :  { %16492 = vrcp.f32 %v3453_v35  ;;  %v17835_v35 = vld [vmem:[#allocation6 + $0x78] ss:$12 sps:$4 sm:$0xff]   ;;  %4122 = vmatprep.subr.bf16.mxu1 %v17832_v43  ;;  %15167 = vmatprep.subr.bf16.mxu0 %v16914_v7 }
 0x7cf   :  { %16494 = vrcp.f32 %v3454_v38  ;;  %v15957_v38 = vld [vmem:[#allocation6 + $0x80] ss:$12 sps:$4 sm:$0xff]   ;;  %4123 = vmatpush1.bf16.msra.mxu1 %v17835_v35 }
 0x7d1   :  { %15168 = vmatpush3.bf16.msra.mxu0 %v15957_v38 }
 0x7d2   :  { %15169 = vmatprep.subr.bf16.mxu0 %v16914_v7 }
 0x7d3   :  { %v3748_v14 = vpop.f32.mrb[40].mxu1  ;;  %v3789_v44 = vpop.f32.mrb[48].mxu0 }
 0x7d4   :  { %v3750_v59 = vpop.f32.mrb[41].mxu1  ;;  %v15155_v50 = vpop.f32.mrb[49].mxu0  ;;  %v3812_v17 = vrot.slane %v3789_v44, %v17059_v12  ;;  %v17839_v44 = vld [vmem:[#allocation6 + $0x94] ss:$12 sps:$4 sm:$0xff]  }
 0x7d5   :  { %v3798_v56 = vcombine.low %v3748_v14, %v3750_v59  ;;  %v3752_v36 = vpop.f32.mrb[42].mxu1  ;;  %v3792_v58 = vpop.f32.mrb[50].mxu0  ;;  %4124 = vmatprep.subr.bf16.mxu1 %v17839_v44 }
 0x7d6   :  { %v3753_v52 = vpop.f32.mrb[43].mxu1  ;;  %v15156_v30 = vpop.f32.mrb[51].mxu0  ;;  %v17842_v36 = vld [vmem:[#allocation6 + $0x90] ss:$12 sps:$4 sm:$0xff]   ;;  %v15961_v58 = vld [vmem:[#allocation6 + $0x98] ss:$12 sps:$4 sm:$0xff]  }
 0x7d7   :  { %v3805_v21 = vrot.slane %v3798_v56, %v17059_v12  ;;  %v17846_v52 = vld [vmem:[#allocation6 + $0xac] ss:$12 sps:$4 sm:$0xff]   ;;  %4125 = vmatpush1.bf16.msra.mxu1 %v17842_v36  ;;  %15170 = vmatpush3.bf16.msra.mxu0 %v15961_v58  ;;  %v17849_v30 = vld [vmem:[#allocation6 + $0xa8] ss:$12 sps:$4 sm:$0xff]  }
 0x7d8   :  { %v17784_v47 = vpop.eup %16492  ;;  %4126 = vmatprep.subr.bf16.mxu1 %v17846_v52  ;;  %15171 = vmatprep.subr.bf16.mxu0 %v16914_v7 }
 0x7d9   :  { %v17788_v57 = vpop.eup %16494  ;;  %v3813_v3 = vcombine.low %v3805_v21, %v3812_v17  ;;  %v3814_v62 = vcombine.high %v3805_v21, %v3812_v17  ;;  %v3459_v4 = vmul.f32 2.0, %v17784_v47  ;;  %v15965_v17 = vld [vmem:[#allocation6 + $0xb0] ss:$12 sps:$4 sm:$0xff]  }
 0x7da   :  { %v3460_v22 = vmul.f32 2.0, %v17788_v57  ;;  %v3465_v49 = vcombine.low %v17784_v47, %v17788_v57 }
 0x7db   :  { %v3821_v0 = vrot.slane %v3813_v3, %v17059_v12  ;;  %v3828_v9 = vrot.slane %v3814_v62, %v17059_v12  ;;  %v13956_v11 = vadd.f32 -1.0, %v3459_v4  ;;  %4127 = vmatpush1.bf16.msra.mxu1 %v17849_v30  ;;  %15172 = vmatpush3.bf16.msra.mxu0 %v15965_v17 }
 0x7dc   :  { %v13957_v37 = vadd.f32 -1.0, %v3460_v22  ;;  %v3472_v63 = vrot.slane %v3465_v49, %v17059_v12  ;;  %15177 = vmatprep.subr.bf16.mxu0 %v16914_v7  ;;  %4498 = vmatprep.subr.bf16.mxu1 %v17857_v8 }
 0x7dd   :  { %v3831_v46 = vadd.f32 %v3821_v0, %v3155_v29  ;;  %v3832_v25 = vadd.f32 %v3828_v9, %v3157_v45 }
 0x7de   :  { %v3483_v15 = vcombine.low %v13956_v11, %v13957_v37  ;;  %v3479_v33 = vrot.slane %v3472_v63, %v17059_v12 }
 0x7df   :  { %v13982_v32 = vmul.f32 -1.442695, %v3831_v46  ;;  %v13983_v34 = vmul.f32 -1.442695, %v3832_v25  ;;  %v3503_v25 = vrot.slane %v17784_v47, 1 }
 0x7e0   :  { %v3490_v55 = vrot.slane %v3483_v15, %v17059_v12  ;;  %v3504_v15 = vrot.slane %v17788_v57, 1 }
 0x7e1   :  { %16496 = vpow2.f32 %v13982_v32 }
 0x7e2   :  { %16498 = vpow2.f32 %v13983_v34  ;;  %v3497_v60 = vrot.slane %v3490_v55, %v17059_v12  ;;  %v3507_v34 = vmul.f32 %v3503_v25, %v17722_v1  ;;  %v3539_v1 = vrot.slane %v17788_v57, 2  ;;  %v17901_v25 = vld [vmem:[#allocation9 + $0x34] ss:$12 sps:$4 sm:$0xff]  }
 0x7e4   :  { %v3499_v19 = vsel %vm817_vm9, %v3479_v33, %v3497_v60  ;;  %v3508_v33 = vmul.f32 %v3504_v15, %v17724_v24 }
 0x7e5   :  { %3500 = vrot.lane.b32.xlu0 %v3499_v19, %s16917_s6 }
 0x7eb   :  { %v16497_v14 = vpop.eup %16496 }
 0x7ec   :  { %v16499_v59 = vpop.eup %16498  ;;  %v3839_v50 = vadd.f32 1.0, %v16497_v14 }
 0x7ed   :  { %v3840_v56 = vadd.f32 1.0, %v16499_v59 }
 0x7ee   :  { %16500 = vrcp.f32 %v3839_v50 }
 0x7ef   :  { %16502 = vrcp.f32 %v3840_v56 }
 0x7f8   :  { %v17855_v21 = vpop.eup %16500 }
 0x7f9   :  { %v17859_v3 = vpop.eup %16502  ;;  %v3845_v62 = vmul.f32 2.0, %v17855_v21  ;;  %v3889_v57 = vrot.slane %v17855_v21, 1 }
 0x7fa   :  { %v3846_v4 = vmul.f32 2.0, %v17859_v3  ;;  %v3851_v29 = vcombine.low %v17855_v21, %v17859_v3 }
 0x7fb   :  { %v13984_v22 = vadd.f32 -1.0, %v3845_v62 }
 0x7fc   :  { %v13985_v49 = vadd.f32 -1.0, %v3846_v4  ;;  %v3858_v45 = vrot.slane %v3851_v29, %v17059_v12  ;;  %v17889_v29 = vld [vmem:[#allocation9] ss:$12 sps:$4 sm:$0xff]  }
 0x7fe   :  { %v3869_v0 = vcombine.low %v13984_v22, %v13985_v49  ;;  %v3865_v11 = vrot.slane %v3858_v45, %v17059_v12  ;;  %v15969_v22 = vld [vmem:[#allocation9 + $0x8] ss:$12 sps:$4 sm:$0xff]  }
 0x800   :  { %v3876_v9 = vrot.slane %v3869_v0, %v17059_v12 }
 0x802   :  { %v3883_v37 = vrot.slane %v3876_v9, %v17059_v12  ;;  %v17895_v9 = vld [vmem:[#allocation9 + $0x18] ss:$12 sps:$4 sm:$0xff]  }
 0x804   :  { %v3885_v41 = vsel %vm817_vm9, %v3865_v11, %v3883_v37  ;;  %v15973_v11 = vld [vmem:[#allocation9 + $0x20] ss:$12 sps:$4 sm:$0xff]   ;;  %v3890_v37 = vrot.slane %v17859_v3, 1 }
 0x805   :  { %3886 = vrot.lane.b32.xlu1 %v3885_v41, %s16917_s6 }
 0x857   :  { %v3501_v46 = vpop.permute.xlu0 %3500 }
 0x858   :  { %v3502_v63 = vmul.f32 %v3501_v46, %v3499_v19  ;;  %v3538_v19 = vrot.slane %v17784_v47, 2  ;;  %v17891_v47 = vld [vmem:[#allocation9 + $0x1c] ss:$12 sps:$4 sm:$0xff]  }
 0x85a   :  { %v3516_v32 = vrot.slane %v3502_v63, %v17059_v12 }
 0x85c   :  { %v3517_v55 = vcombine.high %v3516_v32, %v3516_v32  ;;  %v3524_v51 = vrot.slane %v3516_v32, %v17059_v12  ;;  %v17909_v32 = vld [vmem:[#allocation9 + $0x30] ss:$12 sps:$4 sm:$0xff]  }
 0x85e   :  { %v3531_v60 = vrot.slane %v3517_v55, %v17059_v12  ;;  %v17880_v42 = vadd.f32 %v3524_v51, %v3507_v34  ;;  %v15977_v34 = vld [vmem:[#allocation9 + $0x38] ss:$12 sps:$4 sm:$0xff]   ;;  %v3894_v55 = vmul.f32 %v3890_v37, %v17749_v53  ;;  %v15981_v53 = vld [vmem:[#allocation9 + $0x50] ss:$12 sps:$4 sm:$0xff]  }
 0x85f   :  { %v15997_v37 = vld [vmem:[#allocation9 + $0xb0] ss:$12 sps:$4 sm:$0xff]  }
 0x860   :  { %v17882_v18 = vadd.f32 %v3531_v60, %v3508_v33  ;;  %16504 = vtanh.f32 %v17880_v42 }
 0x862   :  { %16506 = vtanh.f32 %v17882_v18 }
 0x86a   :  { %v16505_v38 = vpop.eup %16504 }
 0x86b   :  { %v3542_v14 = vmul.f32 %v16505_v38, %v3538_v19  ;;  %v17923_v19 = vld [vmem:[#allocation9 + $0x48] ss:$12 sps:$4 sm:$0xff]   ;;  %v17928_v38 = vld [vmem:[#allocation9 + $0x64] ss:$12 sps:$4 sm:$0xff]  }
 0x86c   :  { %v16507_v59 = vpop.eup %16506 }
 0x86d   :  { %v3543_v50 = vmul.f32 %v16507_v59, %v3539_v1  ;;  %3930 = vst [vmem:[#allocation3 + $0x3] sm:$0x1] %v3542_v14  ;;  %v3942_v24 = vpack.c.bf16 %v3542_v14, %v3542_v14  ;;  %v17931_v1 = vld [vmem:[#allocation9 + $0x60] ss:$12 sps:$4 sm:$0xff]   ;;  %v15985_v14 = vld [vmem:[#allocation9 + $0x68] ss:$12 sps:$4 sm:$0xff]  }
 0x86e   :  { %v17935_v59 = vld [vmem:[#allocation9 + $0x7c] ss:$12 sps:$4 sm:$0xff]  }
 0x86f   :  { %3931 = vst [vmem:[#allocation3 + $0x13] sm:$0x1] %v3543_v50  ;;  %v3943_v56 = vpack.c.bf16 %v3543_v50, %v3543_v50  ;;  %v3978_v17 = vunpack.c.l.b16 %v3942_v24  ;;  %v17938_v50 = vld [vmem:[#allocation9 + $0x78] ss:$12 sps:$4 sm:$0xff]   ;;  %v15989_v24 = vld [vmem:[#allocation9 + $0x80] ss:$12 sps:$4 sm:$0xff]  }
 0x871   :  { %v3979_v58 = vunpack.c.l.b16 %v3943_v56  ;;  %v3924_v56 = vrot.slane %v17855_v21, 2  ;;  %v17951_v21 = vld [vmem:[#allocation9 + $0xac] ss:$12 sps:$4 sm:$0xff]  }
 0x873   :  { %v3980_v62 = vrot.slane %v3979_v58, 7 }
 0x875   :  { %v3981_v4 = vsel %vm1628_vm10, %v3980_v62, %v3978_v17  ;;  %v17943_v17 = vld [vmem:[#allocation9 + $0x94] ss:$12 sps:$4 sm:$0xff]   ;;  %v3925_v62 = vrot.slane %v17859_v3, 2 }
 0x876   :  { %v3982_v49 = vpack.c.b16 %v3981_v4, %v3981_v4  ;;  %v17954_v3 = vld [vmem:[#allocation9 + $0xa8] ss:$12 sps:$4 sm:$0xff]  }
 0x877   :  { %v3887_v45 = vpop.permute.xlu1 %3886 }
 0x878   :  { %v3888_v0 = vmul.f32 %v3887_v45, %v3885_v41  ;;  %4145 = vmatmul.mubr.bf16.vlgmr.msra.gmra.mrb[44].mxu1 %v3982_v49  ;;  %15174 = vmatmul.mubr.bf16.vlgmr.msra.gmra.mrb[52].mxu0 %v3982_v49  ;;  %v3893_v41 = vmul.f32 %v3889_v57, %v17745_v54  ;;  %v17917_v54 = vld [vmem:[#allocation9 + $0x4c] ss:$12 sps:$4 sm:$0xff]   ;;  %v17947_v49 = vld [vmem:[#allocation9 + $0x90] ss:$12 sps:$4 sm:$0xff]  }
 0x879   :  { %4499 = vmatpush1.bf16.msra.mxu1 %v17889_v29  ;;  %15178 = vmatpush3.bf16.msra.mxu0 %v15969_v22  ;;  %v15993_v45 = vld [vmem:[#allocation9 + $0x98] ss:$12 sps:$4 sm:$0xff]  }
 0x87a   :  { %v3902_v46 = vrot.slane %v3888_v0, %v17059_v12  ;;  %4500 = vmatprep.subr.bf16.mxu1 %v17891_v47  ;;  %15179 = vmatprep.subr.bf16.mxu0 %v16914_v7 }
 0x87b   :  { %4530 = vmatprep.mubr.bf16.mxu1 %v16916_v10  ;;  %15193 = vmatprep.mubr.msk.bf16.mxu0 %vm16913_vm0, %v16914_v7 }
 0x87c   :  { %v3903_v63 = vcombine.high %v3902_v46, %v3902_v46  ;;  %v3910_v15 = vrot.slane %v3902_v46, %v17059_v12 }
 0x87d   :  { %4501 = vmatpush1.bf16.msra.mxu1 %v17895_v9  ;;  %15180 = vmatpush3.bf16.msra.mxu0 %v15973_v11 }
 0x87e   :  { %v3917_v51 = vrot.slane %v3903_v63, %v17059_v12  ;;  %v17913_v33 = vadd.f32 %v3910_v15, %v3893_v41  ;;  %4502 = vmatprep.subr.bf16.mxu1 %v17901_v25  ;;  %15181 = vmatprep.subr.bf16.mxu0 %v16914_v7 }
 0x880   :  { %v17919_v60 = vadd.f32 %v3917_v51, %v3894_v55  ;;  %16508 = vtanh.f32 %v17913_v33 }
 0x881   :  { %4503 = vmatpush1.bf16.msra.mxu1 %v17909_v32  ;;  %15182 = vmatpush3.bf16.msra.mxu0 %v15977_v34 }
 0x882   :  { %16510 = vtanh.f32 %v17919_v60  ;;  %4504 = vmatprep.subr.bf16.mxu1 %v17917_v54  ;;  %15183 = vmatprep.subr.bf16.mxu0 %v16914_v7 }
 0x885   :  { %4505 = vmatpush1.bf16.msra.mxu1 %v17923_v19  ;;  %15184 = vmatpush3.bf16.msra.mxu0 %v15981_v53 }
 0x886   :  { %4506 = vmatprep.subr.bf16.mxu1 %v17928_v38  ;;  %15185 = vmatprep.subr.bf16.mxu0 %v16914_v7 }
 0x889   :  { %4507 = vmatpush1.bf16.msra.mxu1 %v17931_v1  ;;  %15186 = vmatpush3.bf16.msra.mxu0 %v15985_v14 }
 0x88a   :  { %v16509_v58 = vpop.eup %16508  ;;  %4508 = vmatprep.subr.bf16.mxu1 %v17935_v59  ;;  %15187 = vmatprep.subr.bf16.mxu0 %v16914_v7 }
 0x88b   :  { %v3928_v4 = vmul.f32 %v16509_v58, %v3924_v56 }
 0x88c   :  { %v16511_v22 = vpop.eup %16510 }
 0x88d   :  { %4509 = vmatpush1.bf16.msra.mxu1 %v17938_v50  ;;  %15188 = vmatpush3.bf16.msra.mxu0 %v15989_v24  ;;  %v3929_v57 = vmul.f32 %v16511_v22, %v3925_v62  ;;  %3932 = vst [vmem:[#allocation4 + $0xc] sm:$0x1] %v3928_v4  ;;  %v4328_v0 = vpack.c.bf16 %v3928_v4, %v3928_v4 }
 0x88e   :  { %4510 = vmatprep.subr.bf16.mxu1 %v17943_v17  ;;  %15189 = vmatprep.subr.bf16.mxu0 %v16914_v7 }
 0x88f   :  { %3933 = vst [vmem:[#allocation4 + $0x1c] sm:$0x1] %v3929_v57  ;;  %v4329_v11 = vpack.c.bf16 %v3929_v57, %v3929_v57  ;;  %v4364_v41 = vunpack.c.l.b16 %v4328_v0 }
 0x891   :  { %4511 = vmatpush1.bf16.msra.mxu1 %v17947_v49  ;;  %15190 = vmatpush3.bf16.msra.mxu0 %v15993_v45  ;;  %v4365_v46 = vunpack.c.l.b16 %v4329_v11 }
 0x892   :  { %4512 = vmatprep.subr.bf16.mxu1 %v17951_v21  ;;  %15191 = vmatprep.subr.bf16.mxu0 %v16914_v7 }
 0x893   :  { %v4366_v63 = vrot.slane %v4365_v46, 7 }
 0x895   :  { %4513 = vmatpush1.bf16.msra.mxu1 %v17954_v3  ;;  %15192 = vmatpush3.bf16.msra.mxu0 %v15997_v37  ;;  %v4367_v15 = vsel %vm1628_vm10, %v4366_v63, %v4364_v41 }
 0x896   :  { %v4368_v34 = vpack.c.b16 %v4367_v15, %v4367_v15  ;;  %4896 = vmatprep.subr.bf16.mxu1 %v17782_v26  ;;  %15197 = vmatprep.subr.bf16.mxu0 %v16914_v7 }
 0x898   :  { %4531 = vmatmul.mubr.bf16.vlgmr.msra.gmra.mrb[48].mxu1 %v4368_v34  ;;  %15194 = vmatmul.mubr.bf16.vlgmr.msra.gmra.mrb[56].mxu0 %v4368_v34 }
 0x899   :  { %4897 = vmatpush1.bf16.msra.mxu1 %v17786_v48  ;;  %4928 = vmatprep.mubr.bf16.mxu1 %v16916_v10 }
 0x89a   :  { %4898 = vmatprep.subr.bf16.mxu1 %v17798_v31  ;;  %15213 = vmatprep.mubr.msk.bf16.mxu0 %vm16913_vm0, %v16914_v7 }
 0x89d   :  { %4899 = vmatpush1.bf16.msra.mxu1 %v17801_v27 }
 0x89e   :  { %4900 = vmatprep.subr.bf16.mxu1 %v17806_v16 }
 0x8a1   :  { %4901 = vmatpush1.bf16.msra.mxu1 %v17810_v61 }
 0x8a2   :  { %4902 = vmatprep.subr.bf16.mxu1 %v17818_v40 }
 0x8a5   :  { %4903 = vmatpush1.bf16.msra.mxu1 %v17816_v39 }
 0x8a6   :  { %4904 = vmatprep.subr.bf16.mxu1 %v17821_v20 }
 0x8a9   :  { %4905 = vmatpush1.bf16.msra.mxu1 %v17828_v28 }
 0x8aa   :  { %4906 = vmatprep.subr.bf16.mxu1 %v17832_v43 }
 0x8ad   :  { %4907 = vmatpush1.bf16.msra.mxu1 %v17835_v35 }
 0x8ae   :  { %4908 = vmatprep.subr.bf16.mxu1 %v17839_v44 }
 0x8b1   :  { %4909 = vmatpush1.bf16.msra.mxu1 %v17842_v36 }
 0x8b2   :  { %4910 = vmatprep.subr.bf16.mxu1 %v17846_v52 }
 0x8b5   :  { %4911 = vmatpush1.bf16.msra.mxu1 %v17849_v30  ;;  %v3935_v30 = vld [vmem:[#allocation2 + $0x4] ss:$8 sm:$0x7] }
 0x8b6   :  { %5282 = vmatprep.subr.bf16.mxu1 %v17857_v8  ;;  %v3937_v8 = vld [vmem:[#allocation2 + $0x64] ss:$8 sm:$0x7] }
 0x94b   :  { %v4146_v26 = vpop.f32.mrb[44].mxu1  ;;  %v4187_v48 = vpop.f32.mrb[52].mxu0 }
 0x94c   :  { %v4148_v31 = vpop.f32.mrb[45].mxu1  ;;  %v15175_v27 = vpop.f32.mrb[53].mxu0  ;;  %v4210_v28 = vrot.slane %v4187_v48, %v17059_v12 }
 0x94d   :  { %v4196_v16 = vcombine.low %v4146_v26, %v4148_v31  ;;  %v4150_v61 = vpop.f32.mrb[46].mxu1  ;;  %v4190_v39 = vpop.f32.mrb[54].mxu0  ;;  %v15998_v26 = vld [vmem:[#allocation6 + $0x8] ss:$12 sps:$4 sm:$0xff]  }
 0x94e   :  { %v4151_v40 = vpop.f32.mrb[47].mxu1  ;;  %v15176_v20 = vpop.f32.mrb[55].mxu0  ;;  %15198 = vmatpush3.bf16.msra.mxu0 %v15998_v26 }
 0x94f   :  { %v4203_v43 = vrot.slane %v4196_v16, %v17059_v12  ;;  %v3939_v40 = vld [vmem:[#allocation2 + $0x4b] ss:$8 sm:$0x7]  ;;  %15199 = vmatprep.subr.bf16.mxu0 %v16914_v7 }
 0x951   :  { %v4211_v35 = vcombine.low %v4203_v43, %v4210_v28  ;;  %v4212_v44 = vcombine.high %v4203_v43, %v4210_v28 }
 0x953   :  { %v4219_v36 = vrot.slane %v4211_v35, %v17059_v12  ;;  %v4226_v52 = vrot.slane %v4212_v44, %v17059_v12  ;;  %v3941_v35 = vld [vmem:[#allocation2 + $0xab] ss:$8 sm:$0x7] }
 0x955   :  { %v4229_v55 = vadd.f32 %v4219_v36, %v3935_v30  ;;  %v4230_v51 = vadd.f32 %v4226_v52, %v3937_v8  ;;  %v15999_v36 = vld [vmem:[#allocation6 + $0x20] ss:$12 sps:$4 sm:$0xff]  }
 0x956   :  { %15200 = vmatpush3.bf16.msra.mxu0 %v15999_v36 }
 0x957   :  { %v14010_v53 = vmul.f32 -1.442695, %v4229_v55  ;;  %v14011_v14 = vmul.f32 -1.442695, %v4230_v51  ;;  %15201 = vmatprep.subr.bf16.mxu0 %v16914_v7 }
 0x959   :  { %16512 = vpow2.f32 %v14010_v53 }
 0x95a   :  { %16514 = vpow2.f32 %v14011_v14 }
 0x963   :  { %v16513_v24 = vpop.eup %16512 }
 0x964   :  { %v16515_v56 = vpop.eup %16514  ;;  %v4237_v58 = vadd.f32 1.0, %v16513_v24  ;;  %v16000_v24 = vld [vmem:[#allocation6 + $0x38] ss:$12 sps:$4 sm:$0xff]  }
 0x965   :  { %v4238_v62 = vadd.f32 1.0, %v16515_v56  ;;  %15202 = vmatpush3.bf16.msra.mxu0 %v16000_v24 }
 0x966   :  { %16516 = vrcp.f32 %v4237_v58  ;;  %15203 = vmatprep.subr.bf16.mxu0 %v16914_v7 }
 0x967   :  { %16518 = vrcp.f32 %v4238_v62  ;;  %v16001_v62 = vld [vmem:[#allocation6 + $0x50] ss:$12 sps:$4 sm:$0xff]  }
 0x969   :  { %15204 = vmatpush3.bf16.msra.mxu0 %v16001_v62 }
 0x96a   :  { %15205 = vmatprep.subr.bf16.mxu0 %v16914_v7 }
 0x96b   :  { %v4532_v4 = vpop.f32.mrb[48].mxu1  ;;  %v4573_v22 = vpop.f32.mrb[56].mxu0 }
 0x96c   :  { %v4534_v45 = vpop.f32.mrb[49].mxu1  ;;  %v15195_v57 = vpop.f32.mrb[57].mxu0  ;;  %v4596_v63 = vrot.slane %v4573_v22, %v17059_v12  ;;  %v16002_v22 = vld [vmem:[#allocation6 + $0x68] ss:$12 sps:$4 sm:$0xff]  }
 0x96d   :  { %v4582_v0 = vcombine.low %v4532_v4, %v4534_v45  ;;  %v4536_v11 = vpop.f32.mrb[50].mxu1  ;;  %v4576_v37 = vpop.f32.mrb[58].mxu0  ;;  %15206 = vmatpush3.bf16.msra.mxu0 %v16002_v22  ;;  %v16003_v45 = vld [vmem:[#allocation6 + $0x80] ss:$12 sps:$4 sm:$0xff]  }
 0x96e   :  { %v4537_v46 = vpop.f32.mrb[51].mxu1  ;;  %v15196_v41 = vpop.f32.mrb[59].mxu0  ;;  %15207 = vmatprep.subr.bf16.mxu0 %v16914_v7 }
 0x96f   :  { %v4589_v15 = vrot.slane %v4582_v0, %v17059_v12  ;;  %v16004_v46 = vld [vmem:[#allocation6 + $0x98] ss:$12 sps:$4 sm:$0xff]   ;;  %v16005_v41 = vld [vmem:[#allocation6 + $0xb0] ss:$12 sps:$4 sm:$0xff]  }
 0x970   :  { %v17987_v34 = vpop.eup %16516 }
 0x971   :  { %v17989_v48 = vpop.eup %16518  ;;  %v4597_v31 = vcombine.low %v4589_v15, %v4596_v63  ;;  %v4598_v27 = vcombine.high %v4589_v15, %v4596_v63  ;;  %v4243_v16 = vmul.f32 2.0, %v17987_v34  ;;  %15208 = vmatpush3.bf16.msra.mxu0 %v16003_v45  ;;  %v4287_v36 = vrot.slane %v17987_v34, 1 }
 0x972   :  { %v4244_v61 = vmul.f32 2.0, %v17989_v48  ;;  %v4249_v39 = vcombine.low %v17987_v34, %v17989_v48  ;;  %15209 = vmatprep.subr.bf16.mxu0 %v16914_v7  ;;  %v4322_v62 = vrot.slane %v17987_v34, 2 }
 0x973   :  { %v4605_v20 = vrot.slane %v4597_v31, %v17059_v12  ;;  %v4612_v28 = vrot.slane %v4598_v27, %v17059_v12  ;;  %v14012_v43 = vadd.f32 -1.0, %v4243_v16 }
 0x974   :  { %v14013_v44 = vadd.f32 -1.0, %v4244_v61  ;;  %v4256_v8 = vrot.slane %v4249_v39, %v17059_v12 }
 0x975   :  { %v4615_v52 = vadd.f32 %v4605_v20, %v3939_v40  ;;  %v4616_v30 = vadd.f32 %v4612_v28, %v3941_v35  ;;  %15210 = vmatpush3.bf16.msra.mxu0 %v16004_v46 }
 0x976   :  { %v4267_v55 = vcombine.low %v14012_v43, %v14013_v44  ;;  %v4263_v56 = vrot.slane %v4256_v8, %v17059_v12  ;;  %15211 = vmatprep.subr.bf16.mxu0 %v16914_v7 }
 0x977   :  { %v14038_v51 = vmul.f32 -1.442695, %v4615_v52  ;;  %v14039_v53 = vmul.f32 -1.442695, %v4616_v30  ;;  %v4288_v30 = vrot.slane %v17989_v48, 1 }
 0x978   :  { %v4274_v14 = vrot.slane %v4267_v55, %v17059_v12  ;;  %v4291_v55 = vmul.f32 %v4287_v36, %v17880_v42  ;;  %v4323_v42 = vrot.slane %v17989_v48, 2  ;;  %v16007_v48 = vld [vmem:[#allocation9 + $0x20] ss:$12 sps:$4 sm:$0xff]  }
 0x979   :  { %16520 = vpow2.f32 %v14038_v51  ;;  %15212 = vmatpush3.bf16.msra.mxu0 %v16005_v41 }
 0x97a   :  { %16522 = vpow2.f32 %v14039_v53  ;;  %v4281_v58 = vrot.slane %v4274_v14, %v17059_v12  ;;  %15217 = vmatprep.subr.bf16.mxu0 %v16914_v7  ;;  %v4292_v14 = vmul.f32 %v4288_v30, %v17882_v18 }
 0x97c   :  { %v4283_v4 = vsel %vm817_vm9, %v4263_v56, %v4281_v58 }
 0x97d   :  { %4284 = vrot.lane.b32.xlu0 %v4283_v4, %s16917_s6 }
 0x983   :  { %v16521_v57 = vpop.eup %16520 }
 0x984   :  { %v16523_v0 = vpop.eup %16522  ;;  %v4623_v11 = vadd.f32 1.0, %v16521_v57 }
 0x985   :  { %v4624_v37 = vadd.f32 1.0, %v16523_v0 }
 0x986   :  { %16524 = vrcp.f32 %v4623_v11 }
 0x987   :  { %16526 = vrcp.f32 %v4624_v37 }
 0x990   :  { %v18012_v63 = vpop.eup %16524 }
 0x991   :  { %v18014_v15 = vpop.eup %16526  ;;  %v4629_v26 = vmul.f32 2.0, %v18012_v63  ;;  %v4673_v34 = vrot.slane %v18012_v63, 1 }
 0x992   :  { %v4630_v31 = vmul.f32 2.0, %v18014_v15  ;;  %v4635_v27 = vcombine.low %v18012_v63, %v18014_v15 }
 0x993   :  { %v14040_v16 = vadd.f32 -1.0, %v4629_v26  ;;  %v16006_v26 = vld [vmem:[#allocation9 + $0x8] ss:$12 sps:$4 sm:$0xff]  }
 0x994   :  { %v14041_v61 = vadd.f32 -1.0, %v4630_v31  ;;  %v4642_v39 = vrot.slane %v4635_v27, %v17059_v12 }
 0x996   :  { %v4653_v40 = vcombine.low %v14040_v16, %v14041_v61  ;;  %v4649_v28 = vrot.slane %v4642_v39, %v17059_v12  ;;  %v4674_v61 = vrot.slane %v18014_v15, 1 }
 0x998   :  { %v4660_v20 = vrot.slane %v4653_v40, %v17059_v12  ;;  %v4677_v40 = vmul.f32 %v4673_v34, %v17913_v33  ;;  %v4708_v33 = vrot.slane %v18012_v63, 2 }
 0x99a   :  { %v4667_v43 = vrot.slane %v4660_v20, %v17059_v12 }
 0x99c   :  { %v4669_v35 = vsel %vm817_vm9, %v4649_v28, %v4667_v43  ;;  %v16008_v28 = vld [vmem:[#allocation9 + $0x38] ss:$12 sps:$4 sm:$0xff]   ;;  %v4678_v43 = vmul.f32 %v4674_v61, %v17919_v60 }
 0x99d   :  { %4670 = vrot.lane.b32.xlu1 %v4669_v35, %s16917_s6 }
 0x9ef   :  { %v4285_v44 = vpop.permute.xlu0 %4284 }
 0x9f0   :  { %v4286_v52 = vmul.f32 %v4285_v44, %v4283_v4 }
 0x9f2   :  { %v4300_v8 = vrot.slane %v4286_v52, %v17059_v12 }
 0x9f4   :  { %v4301_v51 = vcombine.high %v4300_v8, %v4300_v8  ;;  %v4308_v53 = vrot.slane %v4300_v8, %v17059_v12 }
 0x9f6   :  { %v4315_v24 = vrot.slane %v4301_v51, %v17059_v12  ;;  %v18034_v56 = vadd.f32 %v4308_v53, %v4291_v55 }
 0x9f8   :  { %v18036_v58 = vadd.f32 %v4315_v24, %v4292_v14  ;;  %16528 = vtanh.f32 %v18034_v56 }
 0x9fa   :  { %16530 = vtanh.f32 %v18036_v58 }
 0xa02   :  { %v16529_v4 = vpop.eup %16528 }
 0xa03   :  { %v4326_v22 = vmul.f32 %v16529_v4, %v4322_v62 }
 0xa04   :  { %v16531_v45 = vpop.eup %16530 }
 0xa05   :  { %v4327_v57 = vmul.f32 %v16531_v45, %v4323_v42  ;;  %4714 = vst [vmem:[#allocation3 + $0x4] sm:$0x1] %v4326_v22  ;;  %v4726_v18 = vpack.c.bf16 %v4326_v22, %v4326_v22 }
 0xa07   :  { %4715 = vst [vmem:[#allocation3 + $0x14] sm:$0x1] %v4327_v57  ;;  %v4727_v0 = vpack.c.bf16 %v4327_v57, %v4327_v57  ;;  %v4762_v37 = vunpack.c.l.b16 %v4726_v18 }
 0xa09   :  { %v4763_v11 = vunpack.c.l.b16 %v4727_v0  ;;  %v4719_v0 = vld [vmem:[#allocation2 + $0x5] ss:$8 sm:$0x7] }
 0xa0b   :  { %v4764_v46 = vrot.slane %v4763_v11, 7  ;;  %v4721_v11 = vld [vmem:[#allocation2 + $0x65] ss:$8 sm:$0x7] }
 0xa0d   :  { %v4765_v41 = vsel %vm1628_vm10, %v4764_v46, %v4762_v37 }
 0xa0e   :  { %v4766_v31 = vpack.c.b16 %v4765_v41, %v4765_v41 }
 0xa0f   :  { %v4671_v27 = vpop.permute.xlu1 %4670 }
 0xa10   :  { %v4672_v16 = vmul.f32 %v4671_v27, %v4669_v35  ;;  %4929 = vmatmul.mubr.bf16.vlgmr.msra.gmra.mrb[52].mxu1 %v4766_v31  ;;  %15214 = vmatmul.mubr.bf16.vlgmr.msra.gmra.mrb[60].mxu0 %v4766_v31 }
 0xa11   :  { %5283 = vmatpush1.bf16.msra.mxu1 %v17889_v29  ;;  %15218 = vmatpush3.bf16.msra.mxu0 %v16006_v26 }
 0xa12   :  { %v4686_v39 = vrot.slane %v4672_v16, %v17059_v12  ;;  %5284 = vmatprep.subr.bf16.mxu1 %v17891_v47  ;;  %15219 = vmatprep.subr.bf16.mxu0 %v16914_v7 }
 0xa13   :  { %5314 = vmatprep.mubr.bf16.mxu1 %v16916_v10  ;;  %15233 = vmatprep.mubr.msk.bf16.mxu0 %vm16913_vm0, %v16914_v7 }
 0xa14   :  { %v4687_v20 = vcombine.high %v4686_v39, %v4686_v39  ;;  %v4694_v29 = vrot.slane %v4686_v39, %v17059_v12 }
 0xa15   :  { %5285 = vmatpush1.bf16.msra.mxu1 %v17895_v9  ;;  %15220 = vmatpush3.bf16.msra.mxu0 %v16007_v48  ;;  %v16009_v9 = vld [vmem:[#allocation9 + $0x50] ss:$12 sps:$4 sm:$0xff]  }
 0xa16   :  { %v4701_v47 = vrot.slane %v4687_v20, %v17059_v12  ;;  %v18057_v35 = vadd.f32 %v4694_v29, %v4677_v40  ;;  %5286 = vmatprep.subr.bf16.mxu1 %v17901_v25  ;;  %15221 = vmatprep.subr.bf16.mxu0 %v16914_v7  ;;  %v16010_v25 = vld [vmem:[#allocation9 + $0x68] ss:$12 sps:$4 sm:$0xff]  }
 0xa18   :  { %v18061_v44 = vadd.f32 %v4701_v47, %v4678_v43  ;;  %16532 = vtanh.f32 %v18057_v35 }
 0xa19   :  { %5287 = vmatpush1.bf16.msra.mxu1 %v17909_v32  ;;  %15222 = vmatpush3.bf16.msra.mxu0 %v16008_v28  ;;  %v16011_v32 = vld [vmem:[#allocation9 + $0x80] ss:$12 sps:$4 sm:$0xff]  }
 0xa1a   :  { %16534 = vtanh.f32 %v18061_v44  ;;  %5288 = vmatprep.subr.bf16.mxu1 %v17917_v54  ;;  %15223 = vmatprep.subr.bf16.mxu0 %v16914_v7  ;;  %v4709_v54 = vrot.slane %v18014_v15, 2 }
 0xa1d   :  { %5289 = vmatpush1.bf16.msra.mxu1 %v17923_v19  ;;  %15224 = vmatpush3.bf16.msra.mxu0 %v16009_v9 }
 0xa1e   :  { %5290 = vmatprep.subr.bf16.mxu1 %v17928_v38  ;;  %15225 = vmatprep.subr.bf16.mxu0 %v16914_v7  ;;  %v16012_v38 = vld [vmem:[#allocation9 + $0x98] ss:$12 sps:$4 sm:$0xff]  }
 0xa21   :  { %5291 = vmatpush1.bf16.msra.mxu1 %v17931_v1  ;;  %15226 = vmatpush3.bf16.msra.mxu0 %v16010_v25 }
 0xa22   :  { %v16533_v60 = vpop.eup %16532  ;;  %5292 = vmatprep.subr.bf16.mxu1 %v17935_v59  ;;  %15227 = vmatprep.subr.bf16.mxu0 %v16914_v7  ;;  %v16013_v59 = vld [vmem:[#allocation9 + $0xb0] ss:$12 sps:$4 sm:$0xff]  }
 0xa23   :  { %v4712_v19 = vmul.f32 %v16533_v60, %v4708_v33  ;;  %v18098_v60 = vld [vmem:[#allocation6] ss:$12 sps:$4 sm:$0xff]  }
 0xa24   :  { %v16535_v36 = vpop.eup %16534 }
 0xa25   :  { %5293 = vmatpush1.bf16.msra.mxu1 %v17938_v50  ;;  %15228 = vmatpush3.bf16.msra.mxu0 %v16011_v32  ;;  %v4713_v52 = vmul.f32 %v16535_v36, %v4709_v54  ;;  %4716 = vst [vmem:[#allocation4 + $0xb] sm:$0x1] %v4712_v19  ;;  %v5112_v1 = vpack.c.bf16 %v4712_v19, %v4712_v19  ;;  %v18094_v32 = vld [vmem:[#allocation6 + $0x4] ss:$12 sps:$4 sm:$0xff]   ;;  %v16017_v54 = vld [vmem:[#allocation6 + $0x8] ss:$12 sps:$4 sm:$0xff]  }
 0xa26   :  { %5294 = vmatprep.subr.bf16.mxu1 %v17943_v17  ;;  %15229 = vmatprep.subr.bf16.mxu0 %v16914_v7 }
 0xa27   :  { %4717 = vst [vmem:[#allocation4 + $0x1b] sm:$0x1] %v4713_v52  ;;  %v5113_v63 = vpack.c.bf16 %v4713_v52, %v4713_v52  ;;  %v5148_v50 = vunpack.c.l.b16 %v5112_v1  ;;  %v4723_v1 = vld [vmem:[#allocation2 + $0x4a] ss:$8 sm:$0x7] }
 0xa29   :  { %5295 = vmatpush1.bf16.msra.mxu1 %v17947_v49  ;;  %15230 = vmatpush3.bf16.msra.mxu0 %v16012_v38  ;;  %v5149_v15 = vunpack.c.l.b16 %v5113_v63 }
 0xa2a   :  { %5296 = vmatprep.subr.bf16.mxu1 %v17951_v21  ;;  %15231 = vmatprep.subr.bf16.mxu0 %v16914_v7 }
 0xa2b   :  { %v5150_v30 = vrot.slane %v5149_v15, 7  ;;  %v4725_v15 = vld [vmem:[#allocation2 + $0xaa] ss:$8 sm:$0x7] }
 0xa2d   :  { %5297 = vmatpush1.bf16.msra.mxu1 %v17954_v3  ;;  %15232 = vmatpush3.bf16.msra.mxu0 %v16013_v59  ;;  %v5151_v17 = vsel %vm1628_vm10, %v5150_v30, %v5148_v50 }
 0xa2e   :  { %v5152_v8 = vpack.c.b16 %v5151_v17, %v5151_v17  ;;  %15237 = vmatprep.subr.bf16.mxu0 %v16914_v7  ;;  %5680 = vmatprep.subr.bf16.mxu1 %v18094_v32 }
 0xa30   :  { %5315 = vmatmul.mubr.bf16.vlgmr.msra.gmra.mrb[56].mxu1 %v5152_v8  ;;  %15234 = vmatmul.mubr.bf16.vlgmr.msra.gmra.mrb[64].mxu0 %v5152_v8  ;;  %v18110_v8 = vld [vmem:[#allocation6 + $0x1c] ss:$12 sps:$4 sm:$0xff]  }
 0xa31   :  { %5712 = vmatprep.mubr.bf16.mxu1 %v16916_v10  ;;  %15253 = vmatprep.mubr.msk.bf16.mxu0 %vm16913_vm0, %v16914_v7 }
 0xa32   :  { %5681 = vmatpush1.bf16.msra.mxu1 %v18098_v60  ;;  %15238 = vmatpush3.bf16.msra.mxu0 %v16017_v54  ;;  %v18169_v54 = vld [vmem:[#allocation9 + $0x4] ss:$12 sps:$4 sm:$0xff]  }
 0xa33   :  { %15239 = vmatprep.subr.bf16.mxu0 %v16914_v7  ;;  %5682 = vmatprep.subr.bf16.mxu1 %v18110_v8 }
 0xae3   :  { %v4930_v49 = vpop.f32.mrb[52].mxu1  ;;  %v4971_v21 = vpop.f32.mrb[60].mxu0 }
 0xae4   :  { %v4932_v55 = vpop.f32.mrb[53].mxu1  ;;  %v15215_v51 = vpop.f32.mrb[61].mxu0  ;;  %v4994_v4 = vrot.slane %v4971_v21, %v17059_v12  ;;  %v18113_v21 = vld [vmem:[#allocation6 + $0x18] ss:$12 sps:$4 sm:$0xff]  }
 0xae5   :  { %v4980_v53 = vcombine.low %v4930_v49, %v4932_v55  ;;  %v4934_v14 = vpop.f32.mrb[54].mxu1  ;;  %v4974_v3 = vpop.f32.mrb[62].mxu0  ;;  %v16021_v55 = vld [vmem:[#allocation6 + $0x20] ss:$12 sps:$4 sm:$0xff]   ;;  %5683 = vmatpush1.bf16.msra.mxu1 %v18113_v21 }
 0xae6   :  { %v4935_v24 = vpop.f32.mrb[55].mxu1  ;;  %v15216_v62 = vpop.f32.mrb[63].mxu0  ;;  %15240 = vmatpush3.bf16.msra.mxu0 %v16021_v55 }
 0xae7   :  { %v4987_v42 = vrot.slane %v4980_v53, %v17059_v12  ;;  %15241 = vmatprep.subr.bf16.mxu0 %v16914_v7 }
 0xae9   :  { %v4995_v22 = vcombine.low %v4987_v42, %v4994_v4  ;;  %v4996_v45 = vcombine.high %v4987_v42, %v4994_v4  ;;  %v18118_v4 = vld [vmem:[#allocation6 + $0x34] ss:$12 sps:$4 sm:$0xff]  }
 0xaea   :  { %5684 = vmatprep.subr.bf16.mxu1 %v18118_v4 }
 0xaeb   :  { %v5003_v57 = vrot.slane %v4995_v22, %v17059_v12  ;;  %v5010_v18 = vrot.slane %v4996_v45, %v17059_v12  ;;  %v18122_v22 = vld [vmem:[#allocation6 + $0x30] ss:$12 sps:$4 sm:$0xff]   ;;  %v16025_v45 = vld [vmem:[#allocation6 + $0x38] ss:$12 sps:$4 sm:$0xff]  }
 0xaec   :  { %5685 = vmatpush1.bf16.msra.mxu1 %v18122_v22  ;;  %15242 = vmatpush3.bf16.msra.mxu0 %v16025_v45 }
 0xaed   :  { %v5013_v37 = vadd.f32 %v5003_v57, %v4719_v0  ;;  %v5014_v46 = vadd.f32 %v5010_v18, %v4721_v11  ;;  %v18128_v0 = vld [vmem:[#allocation6 + $0x48] ss:$12 sps:$4 sm:$0xff]   ;;  %v18130_v11 = vld [vmem:[#allocation6 + $0x4c] ss:$12 sps:$4 sm:$0xff]   ;;  %15243 = vmatprep.subr.bf16.mxu0 %v16914_v7 }
 0xaee   :  { %5686 = vmatprep.subr.bf16.mxu1 %v18130_v11 }
 0xaef   :  { %v14066_v41 = vmul.f32 -1.442695, %v5013_v37  ;;  %v14067_v26 = vmul.f32 -1.442695, %v5014_v46  ;;  %v16029_v37 = vld [vmem:[#allocation6 + $0x50] ss:$12 sps:$4 sm:$0xff]  }
 0xaf0   :  { %v18133_v46 = vld [vmem:[#allocation6 + $0x64] ss:$12 sps:$4 sm:$0xff]   ;;  %5687 = vmatpush1.bf16.msra.mxu1 %v18128_v0  ;;  %15244 = vmatpush3.bf16.msra.mxu0 %v16029_v37 }
 0xaf1   :  { %16536 = vpow2.f32 %v14066_v41  ;;  %5688 = vmatprep.subr.bf16.mxu1 %v18133_v46  ;;  %15245 = vmatprep.subr.bf16.mxu0 %v16914_v7 }
 0xaf2   :  { %16538 = vpow2.f32 %v14067_v26  ;;  %v18140_v26 = vld [vmem:[#allocation6 + $0x60] ss:$12 sps:$4 sm:$0xff]  }
 0xaf4   :  { %5689 = vmatpush1.bf16.msra.mxu1 %v18140_v26 }
 0xafb   :  { %v16537_v31 = vpop.eup %16536 }
 0xafc   :  { %v16539_v27 = vpop.eup %16538  ;;  %v5021_v34 = vadd.f32 1.0, %v16537_v31  ;;  %v16033_v31 = vld [vmem:[#allocation6 + $0x68] ss:$12 sps:$4 sm:$0xff]  }
 0xafd   :  { %v5022_v16 = vadd.f32 1.0, %v16539_v27  ;;  %v18144_v27 = vld [vmem:[#allocation6 + $0x7c] ss:$12 sps:$4 sm:$0xff]   ;;  %15246 = vmatpush3.bf16.msra.mxu0 %v16033_v31 }
 0xafe   :  { %16540 = vrcp.f32 %v5021_v34  ;;  %v18147_v34 = vld [vmem:[#allocation6 + $0x78] ss:$12 sps:$4 sm:$0xff]   ;;  %5690 = vmatprep.subr.bf16.mxu1 %v18144_v27  ;;  %15247 = vmatprep.subr.bf16.mxu0 %v16914_v7 }
 0xaff   :  { %16542 = vrcp.f32 %v5022_v16  ;;  %v16037_v16 = vld [vmem:[#allocation6 + $0x80] ss:$12 sps:$4 sm:$0xff]   ;;  %5691 = vmatpush1.bf16.msra.mxu1 %v18147_v34 }
 0xb01   :  { %15248 = vmatpush3.bf16.msra.mxu0 %v16037_v16 }
 0xb02   :  { %15249 = vmatprep.subr.bf16.mxu0 %v16914_v7 }
 0xb03   :  { %v5316_v48 = vpop.f32.mrb[56].mxu1  ;;  %v5357_v61 = vpop.f32.mrb[64].mxu0 }
 0xb04   :  { %v5318_v39 = vpop.f32.mrb[57].mxu1  ;;  %v15235_v40 = vpop.f32.mrb[65].mxu0  ;;  %v5380_v9 = vrot.slane %v5357_v61, %v17059_v12  ;;  %v18151_v61 = vld [vmem:[#allocation6 + $0x94] ss:$12 sps:$4 sm:$0xff]  }
 0xb05   :  { %v5366_v20 = vcombine.low %v5316_v48, %v5318_v39  ;;  %v5320_v29 = vpop.f32.mrb[58].mxu1  ;;  %v5360_v28 = vpop.f32.mrb[66].mxu0  ;;  %5692 = vmatprep.subr.bf16.mxu1 %v18151_v61 }
 0xb06   :  { %v5321_v43 = vpop.f32.mrb[59].mxu1  ;;  %v15236_v47 = vpop.f32.mrb[67].mxu0  ;;  %v18154_v29 = vld [vmem:[#allocation6 + $0x90] ss:$12 sps:$4 sm:$0xff]   ;;  %v16041_v28 = vld [vmem:[#allocation6 + $0x98] ss:$12 sps:$4 sm:$0xff]  }
 0xb07   :  { %v5373_v25 = vrot.slane %v5366_v20, %v17059_v12  ;;  %v18158_v43 = vld [vmem:[#allocation6 + $0xac] ss:$12 sps:$4 sm:$0xff]   ;;  %5693 = vmatpush1.bf16.msra.mxu1 %v18154_v29  ;;  %15250 = vmatpush3.bf16.msra.mxu0 %v16041_v28  ;;  %v18161_v47 = vld [vmem:[#allocation6 + $0xa8] ss:$12 sps:$4 sm:$0xff]  }
 0xb08   :  { %v18096_v33 = vpop.eup %16540  ;;  %5694 = vmatprep.subr.bf16.mxu1 %v18158_v43  ;;  %15251 = vmatprep.subr.bf16.mxu0 %v16914_v7 }
 0xb09   :  { %v18100_v19 = vpop.eup %16542  ;;  %v5381_v36 = vcombine.low %v5373_v25, %v5380_v9  ;;  %v5382_v38 = vcombine.high %v5373_v25, %v5380_v9  ;;  %v5027_v52 = vmul.f32 2.0, %v18096_v33  ;;  %v16045_v9 = vld [vmem:[#allocation6 + $0xb0] ss:$12 sps:$4 sm:$0xff]  }
 0xb0a   :  { %v5028_v63 = vmul.f32 2.0, %v18100_v19  ;;  %v5033_v59 = vcombine.low %v18096_v33, %v18100_v19 }
 0xb0b   :  { %v5389_v50 = vrot.slane %v5381_v36, %v17059_v12  ;;  %v5396_v30 = vrot.slane %v5382_v38, %v17059_v12  ;;  %v14068_v17 = vadd.f32 -1.0, %v5027_v52  ;;  %5695 = vmatpush1.bf16.msra.mxu1 %v18161_v47  ;;  %15252 = vmatpush3.bf16.msra.mxu0 %v16045_v9 }
 0xb0c   :  { %v14069_v49 = vadd.f32 -1.0, %v5028_v63  ;;  %v5040_v14 = vrot.slane %v5033_v59, %v17059_v12  ;;  %15257 = vmatprep.subr.bf16.mxu0 %v16914_v7  ;;  %6066 = vmatprep.subr.bf16.mxu1 %v18169_v54 }
 0xb0d   :  { %v5399_v51 = vadd.f32 %v5389_v50, %v4723_v1  ;;  %v5400_v53 = vadd.f32 %v5396_v30, %v4725_v15 }
 0xb0e   :  { %v5051_v3 = vcombine.low %v14068_v17, %v14069_v49  ;;  %v5047_v57 = vrot.slane %v5040_v14, %v17059_v12 }
 0xb0f   :  { %v14094_v24 = vmul.f32 -1.442695, %v5399_v51  ;;  %v14095_v62 = vmul.f32 -1.442695, %v5400_v53  ;;  %v5071_v53 = vrot.slane %v18096_v33, 1 }
 0xb10   :  { %v5058_v42 = vrot.slane %v5051_v3, %v17059_v12  ;;  %v5072_v3 = vrot.slane %v18100_v19, 1 }
 0xb11   :  { %16544 = vpow2.f32 %v14094_v24 }
 0xb12   :  { %16546 = vpow2.f32 %v14095_v62  ;;  %v5065_v18 = vrot.slane %v5058_v42, %v17059_v12  ;;  %v5075_v62 = vmul.f32 %v5071_v53, %v18034_v56  ;;  %v5107_v56 = vrot.slane %v18100_v19, 2  ;;  %v18213_v53 = vld [vmem:[#allocation9 + $0x34] ss:$12 sps:$4 sm:$0xff]  }
 0xb14   :  { %v5067_v41 = vsel %vm817_vm9, %v5047_v57, %v5065_v18  ;;  %v5076_v57 = vmul.f32 %v5072_v3, %v18036_v58 }
 0xb15   :  { %5068 = vrot.lane.b32.xlu0 %v5067_v41, %s16917_s6 }
 0xb1b   :  { %v16545_v48 = vpop.eup %16544 }
 0xb1c   :  { %v16547_v39 = vpop.eup %16546  ;;  %v5407_v40 = vadd.f32 1.0, %v16545_v48 }
 0xb1d   :  { %v5408_v20 = vadd.f32 1.0, %v16547_v39 }
 0xb1e   :  { %16548 = vrcp.f32 %v5407_v40 }
 0xb1f   :  { %16550 = vrcp.f32 %v5408_v20 }
 0xb28   :  { %v18167_v25 = vpop.eup %16548 }
 0xb29   :  { %v18171_v36 = vpop.eup %16550  ;;  %v5413_v38 = vmul.f32 2.0, %v18167_v25  ;;  %v5457_v19 = vrot.slane %v18167_v25, 1 }
 0xb2a   :  { %v5414_v52 = vmul.f32 2.0, %v18171_v36  ;;  %v5419_v1 = vcombine.low %v18167_v25, %v18171_v36 }
 0xb2b   :  { %v14096_v63 = vadd.f32 -1.0, %v5413_v38 }
 0xb2c   :  { %v14097_v59 = vadd.f32 -1.0, %v5414_v52  ;;  %v5426_v15 = vrot.slane %v5419_v1, %v17059_v12  ;;  %v18201_v1 = vld [vmem:[#allocation9] ss:$12 sps:$4 sm:$0xff]  }
 0xb2e   :  { %v5437_v50 = vcombine.low %v14096_v63, %v14097_v59  ;;  %v5433_v17 = vrot.slane %v5426_v15, %v17059_v12  ;;  %v16049_v63 = vld [vmem:[#allocation9 + $0x8] ss:$12 sps:$4 sm:$0xff]  }
 0xb30   :  { %v5444_v30 = vrot.slane %v5437_v50, %v17059_v12 }
 0xb32   :  { %v5451_v49 = vrot.slane %v5444_v30, %v17059_v12  ;;  %v18207_v30 = vld [vmem:[#allocation9 + $0x18] ss:$12 sps:$4 sm:$0xff]  }
 0xb34   :  { %v5453_v55 = vsel %vm817_vm9, %v5433_v17, %v5451_v49  ;;  %v16053_v17 = vld [vmem:[#allocation9 + $0x20] ss:$12 sps:$4 sm:$0xff]   ;;  %v5458_v49 = vrot.slane %v18171_v36, 1 }
 0xb35   :  { %5454 = vrot.lane.b32.xlu1 %v5453_v55, %s16917_s6 }
 0xb87   :  { %v5069_v51 = vpop.permute.xlu0 %5068 }
 0xb88   :  { %v5070_v14 = vmul.f32 %v5069_v51, %v5067_v41  ;;  %v5106_v41 = vrot.slane %v18096_v33, 2  ;;  %v18203_v33 = vld [vmem:[#allocation9 + $0x1c] ss:$12 sps:$4 sm:$0xff]  }
 0xb8a   :  { %v5084_v24 = vrot.slane %v5070_v14, %v17059_v12 }
 0xb8c   :  { %v5085_v42 = vcombine.high %v5084_v24, %v5084_v24  ;;  %v5092_v45 = vrot.slane %v5084_v24, %v17059_v12  ;;  %v18221_v24 = vld [vmem:[#allocation9 + $0x30] ss:$12 sps:$4 sm:$0xff]  }
 0xb8e   :  { %v5099_v18 = vrot.slane %v5085_v42, %v17059_v12  ;;  %v18192_v37 = vadd.f32 %v5092_v45, %v5075_v62  ;;  %v16057_v62 = vld [vmem:[#allocation9 + $0x38] ss:$12 sps:$4 sm:$0xff]   ;;  %v5462_v42 = vmul.f32 %v5458_v49, %v18061_v44  ;;  %v16061_v44 = vld [vmem:[#allocation9 + $0x50] ss:$12 sps:$4 sm:$0xff]  }
 0xb8f   :  { %v16077_v49 = vld [vmem:[#allocation9 + $0xb0] ss:$12 sps:$4 sm:$0xff]  }
 0xb90   :  { %v18194_v31 = vadd.f32 %v5099_v18, %v5076_v57  ;;  %16552 = vtanh.f32 %v18192_v37 }
 0xb92   :  { %16554 = vtanh.f32 %v18194_v31 }
 0xb9a   :  { %v16553_v16 = vpop.eup %16552 }
 0xb9b   :  { %v5110_v48 = vmul.f32 %v16553_v16, %v5106_v41  ;;  %v18235_v41 = vld [vmem:[#allocation9 + $0x48] ss:$12 sps:$4 sm:$0xff]   ;;  %v18240_v16 = vld [vmem:[#allocation9 + $0x64] ss:$12 sps:$4 sm:$0xff]  }
 0xb9c   :  { %v16555_v39 = vpop.eup %16554 }
 0xb9d   :  { %v5111_v40 = vmul.f32 %v16555_v39, %v5107_v56  ;;  %5498 = vst [vmem:[#allocation3 + $0x5] sm:$0x1] %v5110_v48  ;;  %v5510_v58 = vpack.c.bf16 %v5110_v48, %v5110_v48  ;;  %v18243_v56 = vld [vmem:[#allocation9 + $0x60] ss:$12 sps:$4 sm:$0xff]   ;;  %v16065_v48 = vld [vmem:[#allocation9 + $0x68] ss:$12 sps:$4 sm:$0xff]  }
 0xb9e   :  { %v18247_v39 = vld [vmem:[#allocation9 + $0x7c] ss:$12 sps:$4 sm:$0xff]  }
 0xb9f   :  { %5499 = vst [vmem:[#allocation3 + $0x15] sm:$0x1] %v5111_v40  ;;  %v5511_v20 = vpack.c.bf16 %v5111_v40, %v5111_v40  ;;  %v5546_v9 = vunpack.c.l.b16 %v5510_v58  ;;  %v18250_v40 = vld [vmem:[#allocation9 + $0x78] ss:$12 sps:$4 sm:$0xff]   ;;  %v16069_v58 = vld [vmem:[#allocation9 + $0x80] ss:$12 sps:$4 sm:$0xff]  }
 0xba1   :  { %v5547_v28 = vunpack.c.l.b16 %v5511_v20  ;;  %v5492_v20 = vrot.slane %v18167_v25, 2  ;;  %v18263_v25 = vld [vmem:[#allocation9 + $0xac] ss:$12 sps:$4 sm:$0xff]  }
 0xba3   :  { %v5548_v38 = vrot.slane %v5547_v28, 7 }
 0xba5   :  { %v5549_v52 = vsel %vm1628_vm10, %v5548_v38, %v5546_v9  ;;  %v18255_v9 = vld [vmem:[#allocation9 + $0x94] ss:$12 sps:$4 sm:$0xff]   ;;  %v5493_v38 = vrot.slane %v18171_v36, 2 }
 0xba6   :  { %v5550_v59 = vpack.c.b16 %v5549_v52, %v5549_v52  ;;  %v18266_v36 = vld [vmem:[#allocation9 + $0xa8] ss:$12 sps:$4 sm:$0xff]  }
 0xba7   :  { %v5455_v15 = vpop.permute.xlu1 %5454 }
 0xba8   :  { %v5456_v50 = vmul.f32 %v5455_v15, %v5453_v55  ;;  %5713 = vmatmul.mubr.bf16.vlgmr.msra.gmra.mrb[60].mxu1 %v5550_v59  ;;  %15254 = vmatmul.mubr.bf16.vlgmr.msra.gmra.mrb[68].mxu0 %v5550_v59  ;;  %v5461_v55 = vmul.f32 %v5457_v19, %v18057_v35  ;;  %v18229_v35 = vld [vmem:[#allocation9 + $0x4c] ss:$12 sps:$4 sm:$0xff]   ;;  %v18259_v59 = vld [vmem:[#allocation9 + $0x90] ss:$12 sps:$4 sm:$0xff]  }
 0xba9   :  { %6067 = vmatpush1.bf16.msra.mxu1 %v18201_v1  ;;  %15258 = vmatpush3.bf16.msra.mxu0 %v16049_v63  ;;  %v16073_v15 = vld [vmem:[#allocation9 + $0x98] ss:$12 sps:$4 sm:$0xff]  }
 0xbaa   :  { %v5470_v51 = vrot.slane %v5456_v50, %v17059_v12  ;;  %6068 = vmatprep.subr.bf16.mxu1 %v18203_v33  ;;  %15259 = vmatprep.subr.bf16.mxu0 %v16914_v7 }
 0xbab   :  { %6098 = vmatprep.mubr.bf16.mxu1 %v16916_v10  ;;  %15273 = vmatprep.mubr.msk.bf16.mxu0 %vm16913_vm0, %v16914_v7 }
 0xbac   :  { %v5471_v14 = vcombine.high %v5470_v51, %v5470_v51  ;;  %v5478_v3 = vrot.slane %v5470_v51, %v17059_v12 }
 0xbad   :  { %6069 = vmatpush1.bf16.msra.mxu1 %v18207_v30  ;;  %15260 = vmatpush3.bf16.msra.mxu0 %v16053_v17 }
 0xbae   :  { %v5485_v45 = vrot.slane %v5471_v14, %v17059_v12  ;;  %v18225_v57 = vadd.f32 %v5478_v3, %v5461_v55  ;;  %6070 = vmatprep.subr.bf16.mxu1 %v18213_v53  ;;  %15261 = vmatprep.subr.bf16.mxu0 %v16914_v7 }
 0xbb0   :  { %v18231_v18 = vadd.f32 %v5485_v45, %v5462_v42  ;;  %16556 = vtanh.f32 %v18225_v57 }
 0xbb1   :  { %6071 = vmatpush1.bf16.msra.mxu1 %v18221_v24  ;;  %15262 = vmatpush3.bf16.msra.mxu0 %v16057_v62 }
 0xbb2   :  { %16558 = vtanh.f32 %v18231_v18  ;;  %6072 = vmatprep.subr.bf16.mxu1 %v18229_v35  ;;  %15263 = vmatprep.subr.bf16.mxu0 %v16914_v7 }
 0xbb5   :  { %6073 = vmatpush1.bf16.msra.mxu1 %v18235_v41  ;;  %15264 = vmatpush3.bf16.msra.mxu0 %v16061_v44 }
 0xbb6   :  { %6074 = vmatprep.subr.bf16.mxu1 %v18240_v16  ;;  %15265 = vmatprep.subr.bf16.mxu0 %v16914_v7 }
 0xbb9   :  { %6075 = vmatpush1.bf16.msra.mxu1 %v18243_v56  ;;  %15266 = vmatpush3.bf16.msra.mxu0 %v16065_v48 }
 0xbba   :  { %v16557_v28 = vpop.eup %16556  ;;  %6076 = vmatprep.subr.bf16.mxu1 %v18247_v39  ;;  %15267 = vmatprep.subr.bf16.mxu0 %v16914_v7 }
 0xbbb   :  { %v5496_v52 = vmul.f32 %v16557_v28, %v5492_v20 }
 0xbbc   :  { %v16559_v63 = vpop.eup %16558 }
 0xbbd   :  { %6077 = vmatpush1.bf16.msra.mxu1 %v18250_v40  ;;  %15268 = vmatpush3.bf16.msra.mxu0 %v16069_v58  ;;  %v5497_v19 = vmul.f32 %v16559_v63, %v5493_v38  ;;  %5500 = vst [vmem:[#allocation4 + $0xa] sm:$0x1] %v5496_v52  ;;  %v5896_v50 = vpack.c.bf16 %v5496_v52, %v5496_v52 }
 0xbbe   :  { %6078 = vmatprep.subr.bf16.mxu1 %v18255_v9  ;;  %15269 = vmatprep.subr.bf16.mxu0 %v16914_v7 }
 0xbbf   :  { %5501 = vst [vmem:[#allocation4 + $0x1a] sm:$0x1] %v5497_v19  ;;  %v5897_v17 = vpack.c.bf16 %v5497_v19, %v5497_v19  ;;  %v5932_v55 = vunpack.c.l.b16 %v5896_v50 }
 0xbc1   :  { %6079 = vmatpush1.bf16.msra.mxu1 %v18259_v59  ;;  %15270 = vmatpush3.bf16.msra.mxu0 %v16073_v15  ;;  %v5933_v51 = vunpack.c.l.b16 %v5897_v17 }
 0xbc2   :  { %6080 = vmatprep.subr.bf16.mxu1 %v18263_v25  ;;  %15271 = vmatprep.subr.bf16.mxu0 %v16914_v7 }
 0xbc3   :  { %v5934_v14 = vrot.slane %v5933_v51, 7 }
 0xbc5   :  { %6081 = vmatpush1.bf16.msra.mxu1 %v18266_v36  ;;  %15272 = vmatpush3.bf16.msra.mxu0 %v16077_v49  ;;  %v5935_v3 = vsel %vm1628_vm10, %v5934_v14, %v5932_v55 }
 0xbc6   :  { %v5936_v62 = vpack.c.b16 %v5935_v3, %v5935_v3  ;;  %6464 = vmatprep.subr.bf16.mxu1 %v18094_v32  ;;  %15277 = vmatprep.subr.bf16.mxu0 %v16914_v7 }
 0xbc8   :  { %6099 = vmatmul.mubr.bf16.vlgmr.msra.gmra.mrb[64].mxu1 %v5936_v62  ;;  %15274 = vmatmul.mubr.bf16.vlgmr.msra.gmra.mrb[72].mxu0 %v5936_v62 }
 0xbc9   :  { %6465 = vmatpush1.bf16.msra.mxu1 %v18098_v60  ;;  %6496 = vmatprep.mubr.bf16.mxu1 %v16916_v10 }
 0xbca   :  { %6466 = vmatprep.subr.bf16.mxu1 %v18110_v8  ;;  %15293 = vmatprep.mubr.msk.bf16.mxu0 %vm16913_vm0, %v16914_v7 }
 0xbcd   :  { %6467 = vmatpush1.bf16.msra.mxu1 %v18113_v21 }
 0xbce   :  { %6468 = vmatprep.subr.bf16.mxu1 %v18118_v4 }
 0xbd1   :  { %6469 = vmatpush1.bf16.msra.mxu1 %v18122_v22 }
 0xbd2   :  { %6470 = vmatprep.subr.bf16.mxu1 %v18130_v11 }
 0xbd5   :  { %6471 = vmatpush1.bf16.msra.mxu1 %v18128_v0 }
 0xbd6   :  { %6472 = vmatprep.subr.bf16.mxu1 %v18133_v46 }
 0xbd9   :  { %6473 = vmatpush1.bf16.msra.mxu1 %v18140_v26 }
 0xbda   :  { %6474 = vmatprep.subr.bf16.mxu1 %v18144_v27 }
 0xbdd   :  { %6475 = vmatpush1.bf16.msra.mxu1 %v18147_v34 }
 0xbde   :  { %6476 = vmatprep.subr.bf16.mxu1 %v18151_v61 }
 0xbe1   :  { %6477 = vmatpush1.bf16.msra.mxu1 %v18154_v29 }
 0xbe2   :  { %6478 = vmatprep.subr.bf16.mxu1 %v18158_v43 }
 0xbe5   :  { %6479 = vmatpush1.bf16.msra.mxu1 %v18161_v47  ;;  %v5503_v47 = vld [vmem:[#allocation2 + $0x6] ss:$8 sm:$0x7] }
 0xbe6   :  { %6850 = vmatprep.subr.bf16.mxu1 %v18169_v54  ;;  %v5505_v54 = vld [vmem:[#allocation2 + $0x66] ss:$8 sm:$0x7] }
 0xc7b   :  { %v5714_v32 = vpop.f32.mrb[60].mxu1  ;;  %v5755_v60 = vpop.f32.mrb[68].mxu0 }
 0xc7c   :  { %v5716_v8 = vpop.f32.mrb[61].mxu1  ;;  %v15255_v21 = vpop.f32.mrb[69].mxu0  ;;  %v5778_v26 = vrot.slane %v5755_v60, %v17059_v12 }
 0xc7d   :  { %v5764_v4 = vcombine.low %v5714_v32, %v5716_v8  ;;  %v5718_v22 = vpop.f32.mrb[62].mxu1  ;;  %v5758_v0 = vpop.f32.mrb[70].mxu0  ;;  %v16078_v32 = vld [vmem:[#allocation6 + $0x8] ss:$12 sps:$4 sm:$0xff]  }
 0xc7e   :  { %v5719_v11 = vpop.f32.mrb[63].mxu1  ;;  %v15256_v46 = vpop.f32.mrb[71].mxu0  ;;  %15278 = vmatpush3.bf16.msra.mxu0 %v16078_v32 }
 0xc7f   :  { %v5771_v27 = vrot.slane %v5764_v4, %v17059_v12  ;;  %v5507_v11 = vld [vmem:[#allocation2 + $0x49] ss:$8 sm:$0x7]  ;;  %15279 = vmatprep.subr.bf16.mxu0 %v16914_v7 }
 0xc81   :  { %v5779_v34 = vcombine.low %v5771_v27, %v5778_v26  ;;  %v5780_v61 = vcombine.high %v5771_v27, %v5778_v26 }
 0xc83   :  { %v5787_v29 = vrot.slane %v5779_v34, %v17059_v12  ;;  %v5794_v43 = vrot.slane %v5780_v61, %v17059_v12  ;;  %v5509_v34 = vld [vmem:[#allocation2 + $0xa9] ss:$8 sm:$0x7] }
 0xc85   :  { %v5797_v42 = vadd.f32 %v5787_v29, %v5503_v47  ;;  %v5798_v45 = vadd.f32 %v5794_v43, %v5505_v54  ;;  %v16079_v29 = vld [vmem:[#allocation6 + $0x20] ss:$12 sps:$4 sm:$0xff]  }
 0xc86   :  { %15280 = vmatpush3.bf16.msra.mxu0 %v16079_v29 }
 0xc87   :  { %v14122_v44 = vmul.f32 -1.442695, %v5797_v42  ;;  %v14123_v48 = vmul.f32 -1.442695, %v5798_v45  ;;  %15281 = vmatprep.subr.bf16.mxu0 %v16914_v7 }
 0xc89   :  { %16560 = vpow2.f32 %v14122_v44 }
 0xc8a   :  { %16562 = vpow2.f32 %v14123_v48 }
 0xc93   :  { %v16561_v58 = vpop.eup %16560 }
 0xc94   :  { %v16563_v20 = vpop.eup %16562  ;;  %v5805_v28 = vadd.f32 1.0, %v16561_v58  ;;  %v16080_v58 = vld [vmem:[#allocation6 + $0x38] ss:$12 sps:$4 sm:$0xff]  }
 0xc95   :  { %v5806_v38 = vadd.f32 1.0, %v16563_v20  ;;  %15282 = vmatpush3.bf16.msra.mxu0 %v16080_v58 }
 0xc96   :  { %16564 = vrcp.f32 %v5805_v28  ;;  %15283 = vmatprep.subr.bf16.mxu0 %v16914_v7 }
 0xc97   :  { %16566 = vrcp.f32 %v5806_v38  ;;  %v16081_v38 = vld [vmem:[#allocation6 + $0x50] ss:$12 sps:$4 sm:$0xff]  }
 0xc99   :  { %15284 = vmatpush3.bf16.msra.mxu0 %v16081_v38 }
 0xc9a   :  { %15285 = vmatprep.subr.bf16.mxu0 %v16914_v7 }
 0xc9b   :  { %v6100_v52 = vpop.f32.mrb[64].mxu1  ;;  %v6141_v63 = vpop.f32.mrb[72].mxu0 }
 0xc9c   :  { %v6102_v15 = vpop.f32.mrb[65].mxu1  ;;  %v15275_v19 = vpop.f32.mrb[73].mxu0  ;;  %v6164_v14 = vrot.slane %v6141_v63, %v17059_v12  ;;  %v16082_v63 = vld [vmem:[#allocation6 + $0x68] ss:$12 sps:$4 sm:$0xff]  }
 0xc9d   :  { %v6150_v50 = vcombine.low %v6100_v52, %v6102_v15  ;;  %v6104_v17 = vpop.f32.mrb[66].mxu1  ;;  %v6144_v49 = vpop.f32.mrb[74].mxu0  ;;  %15286 = vmatpush3.bf16.msra.mxu0 %v16082_v63  ;;  %v16083_v15 = vld [vmem:[#allocation6 + $0x80] ss:$12 sps:$4 sm:$0xff]  }
 0xc9e   :  { %v6105_v51 = vpop.f32.mrb[67].mxu1  ;;  %v15276_v55 = vpop.f32.mrb[75].mxu0  ;;  %15287 = vmatprep.subr.bf16.mxu0 %v16914_v7 }
 0xc9f   :  { %v6157_v3 = vrot.slane %v6150_v50, %v17059_v12  ;;  %v16084_v51 = vld [vmem:[#allocation6 + $0x98] ss:$12 sps:$4 sm:$0xff]   ;;  %v16085_v55 = vld [vmem:[#allocation6 + $0xb0] ss:$12 sps:$4 sm:$0xff]  }
 0xca0   :  { %v18299_v62 = vpop.eup %16564 }
 0xca1   :  { %v18301_v60 = vpop.eup %16566  ;;  %v6165_v8 = vcombine.low %v6157_v3, %v6164_v14  ;;  %v6166_v21 = vcombine.high %v6157_v3, %v6164_v14  ;;  %v5811_v4 = vmul.f32 2.0, %v18299_v62  ;;  %15288 = vmatpush3.bf16.msra.mxu0 %v16083_v15  ;;  %v5855_v29 = vrot.slane %v18299_v62, 1 }
 0xca2   :  { %v5812_v22 = vmul.f32 2.0, %v18301_v60  ;;  %v5817_v0 = vcombine.low %v18299_v62, %v18301_v60  ;;  %15289 = vmatprep.subr.bf16.mxu0 %v16914_v7  ;;  %v5890_v38 = vrot.slane %v18299_v62, 2 }
 0xca3   :  { %v6173_v46 = vrot.slane %v6165_v8, %v17059_v12  ;;  %v6180_v26 = vrot.slane %v6166_v21, %v17059_v12  ;;  %v14124_v27 = vadd.f32 -1.0, %v5811_v4 }
 0xca4   :  { %v14125_v61 = vadd.f32 -1.0, %v5812_v22  ;;  %v5824_v54 = vrot.slane %v5817_v0, %v17059_v12 }
 0xca5   :  { %v6183_v43 = vadd.f32 %v6173_v46, %v5507_v11  ;;  %v6184_v47 = vadd.f32 %v6180_v26, %v5509_v34  ;;  %15290 = vmatpush3.bf16.msra.mxu0 %v16084_v51 }
 0xca6   :  { %v5835_v42 = vcombine.low %v14124_v27, %v14125_v61  ;;  %v5831_v20 = vrot.slane %v5824_v54, %v17059_v12  ;;  %15291 = vmatprep.subr.bf16.mxu0 %v16914_v7 }
 0xca7   :  { %v14150_v45 = vmul.f32 -1.442695, %v6183_v43  ;;  %v14151_v44 = vmul.f32 -1.442695, %v6184_v47  ;;  %v5856_v47 = vrot.slane %v18301_v60, 1 }
 0xca8   :  { %v5842_v48 = vrot.slane %v5835_v42, %v17059_v12  ;;  %v5859_v42 = vmul.f32 %v5855_v29, %v18192_v37  ;;  %v5891_v37 = vrot.slane %v18301_v60, 2  ;;  %v16087_v60 = vld [vmem:[#allocation9 + $0x20] ss:$12 sps:$4 sm:$0xff]  }
 0xca9   :  { %16568 = vpow2.f32 %v14150_v45  ;;  %15292 = vmatpush3.bf16.msra.mxu0 %v16085_v55 }
 0xcaa   :  { %16570 = vpow2.f32 %v14151_v44  ;;  %v5849_v28 = vrot.slane %v5842_v48, %v17059_v12  ;;  %15297 = vmatprep.subr.bf16.mxu0 %v16914_v7  ;;  %v5860_v48 = vmul.f32 %v5856_v47, %v18194_v31 }
 0xcac   :  { %v5851_v52 = vsel %vm817_vm9, %v5831_v20, %v5849_v28 }
 0xcad   :  { %5852 = vrot.lane.b32.xlu0 %v5851_v52, %s16917_s6 }
 0xcb3   :  { %v16569_v19 = vpop.eup %16568 }
 0xcb4   :  { %v16571_v50 = vpop.eup %16570  ;;  %v6191_v17 = vadd.f32 1.0, %v16569_v19 }
 0xcb5   :  { %v6192_v49 = vadd.f32 1.0, %v16571_v50 }
 0xcb6   :  { %16572 = vrcp.f32 %v6191_v17 }
 0xcb7   :  { %16574 = vrcp.f32 %v6192_v49 }
 0xcc0   :  { %v18324_v14 = vpop.eup %16572 }
 0xcc1   :  { %v18326_v3 = vpop.eup %16574  ;;  %v6197_v32 = vmul.f32 2.0, %v18324_v14  ;;  %v6241_v62 = vrot.slane %v18324_v14, 1 }
 0xcc2   :  { %v6198_v8 = vmul.f32 2.0, %v18326_v3  ;;  %v6203_v21 = vcombine.low %v18324_v14, %v18326_v3 }
 0xcc3   :  { %v14152_v4 = vadd.f32 -1.0, %v6197_v32  ;;  %v16086_v32 = vld [vmem:[#allocation9 + $0x8] ss:$12 sps:$4 sm:$0xff]  }
 0xcc4   :  { %v14153_v22 = vadd.f32 -1.0, %v6198_v8  ;;  %v6210_v0 = vrot.slane %v6203_v21, %v17059_v12 }
 0xcc6   :  { %v6221_v11 = vcombine.low %v14152_v4, %v14153_v22  ;;  %v6217_v26 = vrot.slane %v6210_v0, %v17059_v12  ;;  %v6242_v22 = vrot.slane %v18326_v3, 1 }
 0xcc8   :  { %v6228_v46 = vrot.slane %v6221_v11, %v17059_v12  ;;  %v6245_v11 = vmul.f32 %v6241_v62, %v18225_v57  ;;  %v6276_v57 = vrot.slane %v18324_v14, 2 }
 0xcca   :  { %v6235_v27 = vrot.slane %v6228_v46, %v17059_v12 }
 0xccc   :  { %v6237_v34 = vsel %vm817_vm9, %v6217_v26, %v6235_v27  ;;  %v16088_v26 = vld [vmem:[#allocation9 + $0x38] ss:$12 sps:$4 sm:$0xff]   ;;  %v6246_v27 = vmul.f32 %v6242_v22, %v18231_v18 }
 0xccd   :  { %6238 = vrot.lane.b32.xlu1 %v6237_v34, %s16917_s6 }
 0xd1f   :  { %v5853_v61 = vpop.permute.xlu0 %5852 }
 0xd20   :  { %v5854_v43 = vmul.f32 %v5853_v61, %v5851_v52 }
 0xd22   :  { %v5868_v54 = vrot.slane %v5854_v43, %v17059_v12 }
 0xd24   :  { %v5869_v45 = vcombine.high %v5868_v54, %v5868_v54  ;;  %v5876_v44 = vrot.slane %v5868_v54, %v17059_v12 }
 0xd26   :  { %v5883_v58 = vrot.slane %v5869_v45, %v17059_v12  ;;  %v18346_v20 = vadd.f32 %v5876_v44, %v5859_v42 }
 0xd28   :  { %v18348_v28 = vadd.f32 %v5883_v58, %v5860_v48  ;;  %16576 = vtanh.f32 %v18346_v20 }
 0xd2a   :  { %16578 = vtanh.f32 %v18348_v28 }
 0xd32   :  { %v16577_v52 = vpop.eup %16576 }
 0xd33   :  { %v5894_v63 = vmul.f32 %v16577_v52, %v5890_v38 }
 0xd34   :  { %v16579_v15 = vpop.eup %16578 }
 0xd35   :  { %v5895_v19 = vmul.f32 %v16579_v15, %v5891_v37  ;;  %6282 = vst [vmem:[#allocation3 + $0x6] sm:$0x1] %v5894_v63  ;;  %v6294_v31 = vpack.c.bf16 %v5894_v63, %v5894_v63 }
 0xd37   :  { %6283 = vst [vmem:[#allocation3 + $0x16] sm:$0x1] %v5895_v19  ;;  %v6295_v50 = vpack.c.bf16 %v5895_v19, %v5895_v19  ;;  %v6330_v49 = vunpack.c.l.b16 %v6294_v31 }
 0xd39   :  { %v6331_v17 = vunpack.c.l.b16 %v6295_v50  ;;  %v6287_v50 = vld [vmem:[#allocation2 + $0x7] ss:$8 sm:$0x7] }
 0xd3b   :  { %v6332_v51 = vrot.slane %v6331_v17, 7  ;;  %v6289_v17 = vld [vmem:[#allocation2 + $0x67] ss:$8 sm:$0x7] }
 0xd3d   :  { %v6333_v55 = vsel %vm1628_vm10, %v6332_v51, %v6330_v49 }
 0xd3e   :  { %v6334_v8 = vpack.c.b16 %v6333_v55, %v6333_v55 }
 0xd3f   :  { %v6239_v21 = vpop.permute.xlu1 %6238 }
 0xd40   :  { %v6240_v4 = vmul.f32 %v6239_v21, %v6237_v34  ;;  %6497 = vmatmul.mubr.bf16.vlgmr.msra.gmra.mrb[68].mxu1 %v6334_v8  ;;  %15294 = vmatmul.mubr.bf16.vlgmr.msra.gmra.mrb[76].mxu0 %v6334_v8 }
 0xd41   :  { %6851 = vmatpush1.bf16.msra.mxu1 %v18201_v1  ;;  %15298 = vmatpush3.bf16.msra.mxu0 %v16086_v32 }
 0xd42   :  { %v6254_v0 = vrot.slane %v6240_v4, %v17059_v12  ;;  %6852 = vmatprep.subr.bf16.mxu1 %v18203_v33  ;;  %15299 = vmatprep.subr.bf16.mxu0 %v16914_v7 }
 0xd43   :  { %6882 = vmatprep.mubr.bf16.mxu1 %v16916_v10  ;;  %15313 = vmatprep.mubr.msk.bf16.mxu0 %vm16913_vm0, %v16914_v7 }
 0xd44   :  { %v6255_v46 = vcombine.high %v6254_v0, %v6254_v0  ;;  %v6262_v1 = vrot.slane %v6254_v0, %v17059_v12 }
 0xd45   :  { %6853 = vmatpush1.bf16.msra.mxu1 %v18207_v30  ;;  %15300 = vmatpush3.bf16.msra.mxu0 %v16087_v60  ;;  %v16089_v30 = vld [vmem:[#allocation9 + $0x50] ss:$12 sps:$4 sm:$0xff]  }
 0xd46   :  { %v6269_v33 = vrot.slane %v6255_v46, %v17059_v12  ;;  %v18369_v34 = vadd.f32 %v6262_v1, %v6245_v11  ;;  %6854 = vmatprep.subr.bf16.mxu1 %v18213_v53  ;;  %15301 = vmatprep.subr.bf16.mxu0 %v16914_v7  ;;  %v16090_v53 = vld [vmem:[#allocation9 + $0x68] ss:$12 sps:$4 sm:$0xff]  }
 0xd48   :  { %v18373_v61 = vadd.f32 %v6269_v33, %v6246_v27  ;;  %16580 = vtanh.f32 %v18369_v34 }
 0xd49   :  { %6855 = vmatpush1.bf16.msra.mxu1 %v18221_v24  ;;  %15302 = vmatpush3.bf16.msra.mxu0 %v16088_v26  ;;  %v16091_v24 = vld [vmem:[#allocation9 + $0x80] ss:$12 sps:$4 sm:$0xff]  }
 0xd4a   :  { %16582 = vtanh.f32 %v18373_v61  ;;  %6856 = vmatprep.subr.bf16.mxu1 %v18229_v35  ;;  %15303 = vmatprep.subr.bf16.mxu0 %v16914_v7  ;;  %v6277_v35 = vrot.slane %v18326_v3, 2 }
 0xd4d   :  { %6857 = vmatpush1.bf16.msra.mxu1 %v18235_v41  ;;  %15304 = vmatpush3.bf16.msra.mxu0 %v16089_v30 }
 0xd4e   :  { %6858 = vmatprep.subr.bf16.mxu1 %v18240_v16  ;;  %15305 = vmatprep.subr.bf16.mxu0 %v16914_v7  ;;  %v16092_v16 = vld [vmem:[#allocation9 + $0x98] ss:$12 sps:$4 sm:$0xff]  }
 0xd51   :  { %6859 = vmatpush1.bf16.msra.mxu1 %v18243_v56  ;;  %15306 = vmatpush3.bf16.msra.mxu0 %v16090_v53 }
 0xd52   :  { %v16581_v18 = vpop.eup %16580  ;;  %6860 = vmatprep.subr.bf16.mxu1 %v18247_v39  ;;  %15307 = vmatprep.subr.bf16.mxu0 %v16914_v7  ;;  %v16093_v39 = vld [vmem:[#allocation9 + $0xb0] ss:$12 sps:$4 sm:$0xff]  }
 0xd53   :  { %v6280_v41 = vmul.f32 %v16581_v18, %v6276_v57  ;;  %v18410_v18 = vld [vmem:[#allocation6] ss:$12 sps:$4 sm:$0xff]  }
 0xd54   :  { %v16583_v29 = vpop.eup %16582 }
 0xd55   :  { %6861 = vmatpush1.bf16.msra.mxu1 %v18250_v40  ;;  %15308 = vmatpush3.bf16.msra.mxu0 %v16091_v24  ;;  %v6281_v43 = vmul.f32 %v16583_v29, %v6277_v35  ;;  %6284 = vst [vmem:[#allocation4 + $0x9] sm:$0x1] %v6280_v41  ;;  %v6680_v56 = vpack.c.bf16 %v6280_v41, %v6280_v41  ;;  %v18406_v24 = vld [vmem:[#allocation6 + $0x4] ss:$12 sps:$4 sm:$0xff]   ;;  %v16097_v35 = vld [vmem:[#allocation6 + $0x8] ss:$12 sps:$4 sm:$0xff]  }
 0xd56   :  { %6862 = vmatprep.subr.bf16.mxu1 %v18255_v9  ;;  %15309 = vmatprep.subr.bf16.mxu0 %v16914_v7 }
 0xd57   :  { %6285 = vst [vmem:[#allocation4 + $0x19] sm:$0x1] %v6281_v43  ;;  %v6681_v14 = vpack.c.bf16 %v6281_v43, %v6281_v43  ;;  %v6716_v40 = vunpack.c.l.b16 %v6680_v56  ;;  %v6291_v56 = vld [vmem:[#allocation2 + $0x48] ss:$8 sm:$0x7] }
 0xd59   :  { %6863 = vmatpush1.bf16.msra.mxu1 %v18259_v59  ;;  %15310 = vmatpush3.bf16.msra.mxu0 %v16092_v16  ;;  %v6717_v3 = vunpack.c.l.b16 %v6681_v14 }
 0xd5a   :  { %6864 = vmatprep.subr.bf16.mxu1 %v18263_v25  ;;  %15311 = vmatprep.subr.bf16.mxu0 %v16914_v7 }
 0xd5b   :  { %v6718_v47 = vrot.slane %v6717_v3, 7  ;;  %v6293_v3 = vld [vmem:[#allocation2 + $0xa8] ss:$8 sm:$0x7] }
 0xd5d   :  { %6865 = vmatpush1.bf16.msra.mxu1 %v18266_v36  ;;  %15312 = vmatpush3.bf16.msra.mxu0 %v16093_v39  ;;  %v6719_v9 = vsel %vm1628_vm10, %v6718_v47, %v6716_v40 }
 0xd5e   :  { %v6720_v54 = vpack.c.b16 %v6719_v9, %v6719_v9  ;;  %15317 = vmatprep.subr.bf16.mxu0 %v16914_v7  ;;  %7248 = vmatprep.subr.bf16.mxu1 %v18406_v24 }
 0xd60   :  { %6883 = vmatmul.mubr.bf16.vlgmr.msra.gmra.mrb[72].mxu1 %v6720_v54  ;;  %15314 = vmatmul.mubr.bf16.vlgmr.msra.gmra.mrb[80].mxu0 %v6720_v54  ;;  %v18422_v54 = vld [vmem:[#allocation6 + $0x1c] ss:$12 sps:$4 sm:$0xff]  }
 0xd61   :  { %7280 = vmatprep.mubr.bf16.mxu1 %v16916_v10  ;;  %15333 = vmatprep.mubr.msk.bf16.mxu0 %vm16913_vm0, %v16914_v7 }
 0xd62   :  { %7249 = vmatpush1.bf16.msra.mxu1 %v18410_v18  ;;  %15318 = vmatpush3.bf16.msra.mxu0 %v16097_v35  ;;  %v18481_v35 = vld [vmem:[#allocation9 + $0x4] ss:$12 sps:$4 sm:$0xff]  }
 0xd63   :  { %15319 = vmatprep.subr.bf16.mxu0 %v16914_v7  ;;  %7250 = vmatprep.subr.bf16.mxu1 %v18422_v54 }
 0xe13   :  { %v6498_v59 = vpop.f32.mrb[68].mxu1  ;;  %v6539_v25 = vpop.f32.mrb[76].mxu0 }
 0xe14   :  { %v6500_v42 = vpop.f32.mrb[69].mxu1  ;;  %v15295_v45 = vpop.f32.mrb[77].mxu0  ;;  %v6562_v52 = vrot.slane %v6539_v25, %v17059_v12  ;;  %v18425_v25 = vld [vmem:[#allocation6 + $0x18] ss:$12 sps:$4 sm:$0xff]  }
 0xe15   :  { %v6548_v44 = vcombine.low %v6498_v59, %v6500_v42  ;;  %v6502_v48 = vpop.f32.mrb[70].mxu1  ;;  %v6542_v36 = vpop.f32.mrb[78].mxu0  ;;  %v16101_v42 = vld [vmem:[#allocation6 + $0x20] ss:$12 sps:$4 sm:$0xff]   ;;  %7251 = vmatpush1.bf16.msra.mxu1 %v18425_v25 }
 0xe16   :  { %v6503_v58 = vpop.f32.mrb[71].mxu1  ;;  %v15296_v38 = vpop.f32.mrb[79].mxu0  ;;  %15320 = vmatpush3.bf16.msra.mxu0 %v16101_v42 }
 0xe17   :  { %v6555_v37 = vrot.slane %v6548_v44, %v17059_v12  ;;  %15321 = vmatprep.subr.bf16.mxu0 %v16914_v7 }
 0xe19   :  { %v6563_v63 = vcombine.low %v6555_v37, %v6562_v52  ;;  %v6564_v15 = vcombine.high %v6555_v37, %v6562_v52  ;;  %v18430_v52 = vld [vmem:[#allocation6 + $0x34] ss:$12 sps:$4 sm:$0xff]  }
 0xe1a   :  { %7252 = vmatprep.subr.bf16.mxu1 %v18430_v52 }
 0xe1b   :  { %v6571_v19 = vrot.slane %v6563_v63, %v17059_v12  ;;  %v6578_v31 = vrot.slane %v6564_v15, %v17059_v12  ;;  %v18434_v63 = vld [vmem:[#allocation6 + $0x30] ss:$12 sps:$4 sm:$0xff]   ;;  %v16105_v15 = vld [vmem:[#allocation6 + $0x38] ss:$12 sps:$4 sm:$0xff]  }
 0xe1c   :  { %7253 = vmatpush1.bf16.msra.mxu1 %v18434_v63  ;;  %15322 = vmatpush3.bf16.msra.mxu0 %v16105_v15 }
 0xe1d   :  { %v6581_v49 = vadd.f32 %v6571_v19, %v6287_v50  ;;  %v6582_v51 = vadd.f32 %v6578_v31, %v6289_v17  ;;  %v18440_v50 = vld [vmem:[#allocation6 + $0x48] ss:$12 sps:$4 sm:$0xff]   ;;  %v18442_v17 = vld [vmem:[#allocation6 + $0x4c] ss:$12 sps:$4 sm:$0xff]   ;;  %15323 = vmatprep.subr.bf16.mxu0 %v16914_v7 }
 0xe1e   :  { %7254 = vmatprep.subr.bf16.mxu1 %v18442_v17 }
 0xe1f   :  { %v14178_v55 = vmul.f32 -1.442695, %v6581_v49  ;;  %v14179_v32 = vmul.f32 -1.442695, %v6582_v51  ;;  %v16109_v49 = vld [vmem:[#allocation6 + $0x50] ss:$12 sps:$4 sm:$0xff]  }
 0xe20   :  { %v18445_v51 = vld [vmem:[#allocation6 + $0x64] ss:$12 sps:$4 sm:$0xff]   ;;  %7255 = vmatpush1.bf16.msra.mxu1 %v18440_v50  ;;  %15324 = vmatpush3.bf16.msra.mxu0 %v16109_v49 }
 0xe21   :  { %16584 = vpow2.f32 %v14178_v55  ;;  %7256 = vmatprep.subr.bf16.mxu1 %v18445_v51  ;;  %15325 = vmatprep.subr.bf16.mxu0 %v16914_v7 }
 0xe22   :  { %16586 = vpow2.f32 %v14179_v32  ;;  %v18452_v32 = vld [vmem:[#allocation6 + $0x60] ss:$12 sps:$4 sm:$0xff]  }
 0xe24   :  { %7257 = vmatpush1.bf16.msra.mxu1 %v18452_v32 }
 0xe2b   :  { %v16585_v8 = vpop.eup %16584 }
 0xe2c   :  { %v16587_v21 = vpop.eup %16586  ;;  %v6589_v62 = vadd.f32 1.0, %v16585_v8  ;;  %v16113_v8 = vld [vmem:[#allocation6 + $0x68] ss:$12 sps:$4 sm:$0xff]  }
 0xe2d   :  { %v6590_v4 = vadd.f32 1.0, %v16587_v21  ;;  %v18456_v21 = vld [vmem:[#allocation6 + $0x7c] ss:$12 sps:$4 sm:$0xff]   ;;  %15326 = vmatpush3.bf16.msra.mxu0 %v16113_v8 }
 0xe2e   :  { %16588 = vrcp.f32 %v6589_v62  ;;  %v18459_v62 = vld [vmem:[#allocation6 + $0x78] ss:$12 sps:$4 sm:$0xff]   ;;  %7258 = vmatprep.subr.bf16.mxu1 %v18456_v21  ;;  %15327 = vmatprep.subr.bf16.mxu0 %v16914_v7 }
 0xe2f   :  { %16590 = vrcp.f32 %v6590_v4  ;;  %v16117_v4 = vld [vmem:[#allocation6 + $0x80] ss:$12 sps:$4 sm:$0xff]   ;;  %7259 = vmatpush1.bf16.msra.mxu1 %v18459_v62 }
 0xe31   :  { %15328 = vmatpush3.bf16.msra.mxu0 %v16117_v4 }
 0xe32   :  { %15329 = vmatprep.subr.bf16.mxu0 %v16914_v7 }
 0xe33   :  { %v6884_v60 = vpop.f32.mrb[72].mxu1  ;;  %v6925_v22 = vpop.f32.mrb[80].mxu0 }
 0xe34   :  { %v6886_v0 = vpop.f32.mrb[73].mxu1  ;;  %v15315_v11 = vpop.f32.mrb[81].mxu0  ;;  %v6948_v30 = vrot.slane %v6925_v22, %v17059_v12  ;;  %v18463_v22 = vld [vmem:[#allocation6 + $0x94] ss:$12 sps:$4 sm:$0xff]  }
 0xe35   :  { %v6934_v46 = vcombine.low %v6884_v60, %v6886_v0  ;;  %v6888_v1 = vpop.f32.mrb[74].mxu1  ;;  %v6928_v26 = vpop.f32.mrb[82].mxu0  ;;  %7260 = vmatprep.subr.bf16.mxu1 %v18463_v22 }
 0xe36   :  { %v6889_v27 = vpop.f32.mrb[75].mxu1  ;;  %v15316_v33 = vpop.f32.mrb[83].mxu0  ;;  %v18466_v1 = vld [vmem:[#allocation6 + $0x90] ss:$12 sps:$4 sm:$0xff]   ;;  %v16121_v26 = vld [vmem:[#allocation6 + $0x98] ss:$12 sps:$4 sm:$0xff]  }
 0xe37   :  { %v6941_v53 = vrot.slane %v6934_v46, %v17059_v12  ;;  %v18470_v27 = vld [vmem:[#allocation6 + $0xac] ss:$12 sps:$4 sm:$0xff]   ;;  %7261 = vmatpush1.bf16.msra.mxu1 %v18466_v1  ;;  %15330 = vmatpush3.bf16.msra.mxu0 %v16121_v26  ;;  %v18473_v33 = vld [vmem:[#allocation6 + $0xa8] ss:$12 sps:$4 sm:$0xff]  }
 0xe38   :  { %v18408_v57 = vpop.eup %16588  ;;  %7262 = vmatprep.subr.bf16.mxu1 %v18470_v27  ;;  %15331 = vmatprep.subr.bf16.mxu0 %v16914_v7 }
 0xe39   :  { %v18412_v41 = vpop.eup %16590  ;;  %v6949_v29 = vcombine.low %v6941_v53, %v6948_v30  ;;  %v6950_v16 = vcombine.high %v6941_v53, %v6948_v30  ;;  %v6595_v43 = vmul.f32 2.0, %v18408_v57  ;;  %v16125_v30 = vld [vmem:[#allocation6 + $0xb0] ss:$12 sps:$4 sm:$0xff]  }
 0xe3a   :  { %v6596_v14 = vmul.f32 2.0, %v18412_v41  ;;  %v6601_v39 = vcombine.low %v18408_v57, %v18412_v41 }
 0xe3b   :  { %v6957_v40 = vrot.slane %v6949_v29, %v17059_v12  ;;  %v6964_v47 = vrot.slane %v6950_v16, %v17059_v12  ;;  %v14180_v9 = vadd.f32 -1.0, %v6595_v43  ;;  %7263 = vmatpush1.bf16.msra.mxu1 %v18473_v33  ;;  %15332 = vmatpush3.bf16.msra.mxu0 %v16125_v30 }
 0xe3c   :  { %v14181_v59 = vadd.f32 -1.0, %v6596_v14  ;;  %v6608_v48 = vrot.slane %v6601_v39, %v17059_v12  ;;  %15337 = vmatprep.subr.bf16.mxu0 %v16914_v7  ;;  %7634 = vmatprep.subr.bf16.mxu1 %v18481_v35 }
 0xe3d   :  { %v6967_v45 = vadd.f32 %v6957_v40, %v6291_v56  ;;  %v6968_v44 = vadd.f32 %v6964_v47, %v6293_v3 }
 0xe3e   :  { %v6619_v36 = vcombine.low %v14180_v9, %v14181_v59  ;;  %v6615_v19 = vrot.slane %v6608_v48, %v17059_v12 }
 0xe3f   :  { %v14206_v58 = vmul.f32 -1.442695, %v6967_v45  ;;  %v14207_v38 = vmul.f32 -1.442695, %v6968_v44  ;;  %v6639_v44 = vrot.slane %v18408_v57, 1 }
 0xe40   :  { %v6626_v37 = vrot.slane %v6619_v36, %v17059_v12  ;;  %v6640_v36 = vrot.slane %v18412_v41, 1 }
 0xe41   :  { %16592 = vpow2.f32 %v14206_v58 }
 0xe42   :  { %16594 = vpow2.f32 %v14207_v38  ;;  %v6633_v31 = vrot.slane %v6626_v37, %v17059_v12  ;;  %v6643_v38 = vmul.f32 %v6639_v44, %v18346_v20  ;;  %v6675_v20 = vrot.slane %v18412_v41, 2  ;;  %v18525_v44 = vld [vmem:[#allocation9 + $0x34] ss:$12 sps:$4 sm:$0xff]  }
 0xe44   :  { %v6635_v55 = vsel %vm817_vm9, %v6615_v19, %v6633_v31  ;;  %v6644_v19 = vmul.f32 %v6640_v36, %v18348_v28 }
 0xe45   :  { %6636 = vrot.lane.b32.xlu0 %v6635_v55, %s16917_s6 }
 0xe4b   :  { %v16593_v60 = vpop.eup %16592 }
 0xe4c   :  { %v16595_v0 = vpop.eup %16594  ;;  %v6975_v11 = vadd.f32 1.0, %v16593_v60 }
 0xe4d   :  { %v6976_v46 = vadd.f32 1.0, %v16595_v0 }
 0xe4e   :  { %16596 = vrcp.f32 %v6975_v11 }
 0xe4f   :  { %16598 = vrcp.f32 %v6976_v46 }
 0xe58   :  { %v18479_v53 = vpop.eup %16596 }
 0xe59   :  { %v18483_v29 = vpop.eup %16598  ;;  %v6981_v16 = vmul.f32 2.0, %v18479_v53  ;;  %v7025_v41 = vrot.slane %v18479_v53, 1 }
 0xe5a   :  { %v6982_v43 = vmul.f32 2.0, %v18483_v29  ;;  %v6987_v56 = vcombine.low %v18479_v53, %v18483_v29 }
 0xe5b   :  { %v14208_v14 = vadd.f32 -1.0, %v6981_v16 }
 0xe5c   :  { %v14209_v39 = vadd.f32 -1.0, %v6982_v43  ;;  %v6994_v3 = vrot.slane %v6987_v56, %v17059_v12  ;;  %v18513_v56 = vld [vmem:[#allocation9] ss:$12 sps:$4 sm:$0xff]  }
 0xe5e   :  { %v7005_v40 = vcombine.low %v14208_v14, %v14209_v39  ;;  %v7001_v9 = vrot.slane %v6994_v3, %v17059_v12  ;;  %v16129_v14 = vld [vmem:[#allocation9 + $0x8] ss:$12 sps:$4 sm:$0xff]  }
 0xe60   :  { %v7012_v47 = vrot.slane %v7005_v40, %v17059_v12 }
 0xe62   :  { %v7019_v59 = vrot.slane %v7012_v47, %v17059_v12  ;;  %v18519_v47 = vld [vmem:[#allocation9 + $0x18] ss:$12 sps:$4 sm:$0xff]  }
 0xe64   :  { %v7021_v42 = vsel %vm817_vm9, %v7001_v9, %v7019_v59  ;;  %v16133_v9 = vld [vmem:[#allocation9 + $0x20] ss:$12 sps:$4 sm:$0xff]   ;;  %v7026_v59 = vrot.slane %v18483_v29, 1 }
 0xe65   :  { %7022 = vrot.lane.b32.xlu1 %v7021_v42, %s16917_s6 }
 0xeb7   :  { %v6637_v45 = vpop.permute.xlu0 %6636 }
 0xeb8   :  { %v6638_v48 = vmul.f32 %v6637_v45, %v6635_v55  ;;  %v6674_v55 = vrot.slane %v18408_v57, 2  ;;  %v18515_v57 = vld [vmem:[#allocation9 + $0x1c] ss:$12 sps:$4 sm:$0xff]  }
 0xeba   :  { %v6652_v58 = vrot.slane %v6638_v48, %v17059_v12 }
 0xebc   :  { %v6653_v37 = vcombine.high %v6652_v58, %v6652_v58  ;;  %v6660_v15 = vrot.slane %v6652_v58, %v17059_v12  ;;  %v18533_v58 = vld [vmem:[#allocation9 + $0x30] ss:$12 sps:$4 sm:$0xff]  }
 0xebe   :  { %v6667_v31 = vrot.slane %v6653_v37, %v17059_v12  ;;  %v18504_v49 = vadd.f32 %v6660_v15, %v6643_v38  ;;  %v16137_v38 = vld [vmem:[#allocation9 + $0x38] ss:$12 sps:$4 sm:$0xff]   ;;  %v7030_v37 = vmul.f32 %v7026_v59, %v18373_v61  ;;  %v16141_v61 = vld [vmem:[#allocation9 + $0x50] ss:$12 sps:$4 sm:$0xff]  }
 0xebf   :  { %v16157_v59 = vld [vmem:[#allocation9 + $0xb0] ss:$12 sps:$4 sm:$0xff]  }
 0xec0   :  { %v18506_v8 = vadd.f32 %v6667_v31, %v6644_v19  ;;  %16600 = vtanh.f32 %v18504_v49 }
 0xec2   :  { %16602 = vtanh.f32 %v18506_v8 }
 0xeca   :  { %v16601_v4 = vpop.eup %16600 }
 0xecb   :  { %v6678_v60 = vmul.f32 %v16601_v4, %v6674_v55  ;;  %v18547_v55 = vld [vmem:[#allocation9 + $0x48] ss:$12 sps:$4 sm:$0xff]   ;;  %v18552_v4 = vld [vmem:[#allocation9 + $0x64] ss:$12 sps:$4 sm:$0xff]  }
 0xecc   :  { %v16603_v0 = vpop.eup %16602 }
 0xecd   :  { %v6679_v11 = vmul.f32 %v16603_v0, %v6675_v20  ;;  %7066 = vst [vmem:[#allocation3 + $0x7] sm:$0x1] %v6678_v60  ;;  %v7078_v28 = vpack.c.bf16 %v6678_v60, %v6678_v60  ;;  %v18555_v20 = vld [vmem:[#allocation9 + $0x60] ss:$12 sps:$4 sm:$0xff]   ;;  %v16145_v60 = vld [vmem:[#allocation9 + $0x68] ss:$12 sps:$4 sm:$0xff]  }
 0xece   :  { %v18559_v0 = vld [vmem:[#allocation9 + $0x7c] ss:$12 sps:$4 sm:$0xff]  }
 0xecf   :  { %7067 = vst [vmem:[#allocation3 + $0x17] sm:$0x1] %v6679_v11  ;;  %v7079_v46 = vpack.c.bf16 %v6679_v11, %v6679_v11  ;;  %v7114_v30 = vunpack.c.l.b16 %v7078_v28  ;;  %v18562_v11 = vld [vmem:[#allocation9 + $0x78] ss:$12 sps:$4 sm:$0xff]   ;;  %v16149_v28 = vld [vmem:[#allocation9 + $0x80] ss:$12 sps:$4 sm:$0xff]  }
 0xed1   :  { %v7115_v26 = vunpack.c.l.b16 %v7079_v46  ;;  %v7060_v46 = vrot.slane %v18479_v53, 2  ;;  %v18575_v53 = vld [vmem:[#allocation9 + $0xac] ss:$12 sps:$4 sm:$0xff]  }
 0xed3   :  { %v7116_v16 = vrot.slane %v7115_v26, 7 }
 0xed5   :  { %v7117_v43 = vsel %vm1628_vm10, %v7116_v16, %v7114_v30  ;;  %v18567_v30 = vld [vmem:[#allocation9 + $0x94] ss:$12 sps:$4 sm:$0xff]   ;;  %v7061_v16 = vrot.slane %v18483_v29, 2 }
 0xed6   :  { %v7118_v39 = vpack.c.b16 %v7117_v43, %v7117_v43  ;;  %v18578_v29 = vld [vmem:[#allocation9 + $0xa8] ss:$12 sps:$4 sm:$0xff]  }
 0xed7   :  { %v7023_v3 = vpop.permute.xlu1 %7022 }
 0xed8   :  { %v7024_v40 = vmul.f32 %v7023_v3, %v7021_v42  ;;  %7281 = vmatmul.mubr.bf16.vlgmr.msra.gmra.mrb[76].mxu1 %v7118_v39  ;;  %15334 = vmatmul.mubr.bf16.vlgmr.msra.gmra.mrb[84].mxu0 %v7118_v39  ;;  %v7029_v42 = vmul.f32 %v7025_v41, %v18369_v34  ;;  %v18541_v34 = vld [vmem:[#allocation9 + $0x4c] ss:$12 sps:$4 sm:$0xff]   ;;  %v18571_v39 = vld [vmem:[#allocation9 + $0x90] ss:$12 sps:$4 sm:$0xff]  }
 0xed9   :  { %7635 = vmatpush1.bf16.msra.mxu1 %v18513_v56  ;;  %15338 = vmatpush3.bf16.msra.mxu0 %v16129_v14  ;;  %v16153_v3 = vld [vmem:[#allocation9 + $0x98] ss:$12 sps:$4 sm:$0xff]  }
 0xeda   :  { %v7038_v45 = vrot.slane %v7024_v40, %v17059_v12  ;;  %7636 = vmatprep.subr.bf16.mxu1 %v18515_v57  ;;  %15339 = vmatprep.subr.bf16.mxu0 %v16914_v7 }
 0xedb   :  { %7666 = vmatprep.mubr.bf16.mxu1 %v16916_v10  ;;  %15353 = vmatprep.mubr.msk.bf16.mxu0 %vm16913_vm0, %v16914_v7 }
 0xedc   :  { %v7039_v48 = vcombine.high %v7038_v45, %v7038_v45  ;;  %v7046_v36 = vrot.slane %v7038_v45, %v17059_v12 }
 0xedd   :  { %7637 = vmatpush1.bf16.msra.mxu1 %v18519_v47  ;;  %15340 = vmatpush3.bf16.msra.mxu0 %v16133_v9 }
 0xede   :  { %v7053_v15 = vrot.slane %v7039_v48, %v17059_v12  ;;  %v18537_v19 = vadd.f32 %v7046_v36, %v7029_v42  ;;  %7638 = vmatprep.subr.bf16.mxu1 %v18525_v44  ;;  %15341 = vmatprep.subr.bf16.mxu0 %v16914_v7 }
 0xee0   :  { %v18543_v31 = vadd.f32 %v7053_v15, %v7030_v37  ;;  %16604 = vtanh.f32 %v18537_v19 }
 0xee1   :  { %7639 = vmatpush1.bf16.msra.mxu1 %v18533_v58  ;;  %15342 = vmatpush3.bf16.msra.mxu0 %v16137_v38 }
 0xee2   :  { %16606 = vtanh.f32 %v18543_v31  ;;  %7640 = vmatprep.subr.bf16.mxu1 %v18541_v34  ;;  %15343 = vmatprep.subr.bf16.mxu0 %v16914_v7 }
 0xee5   :  { %7641 = vmatpush1.bf16.msra.mxu1 %v18547_v55  ;;  %15344 = vmatpush3.bf16.msra.mxu0 %v16141_v61 }
 0xee6   :  { %7642 = vmatprep.subr.bf16.mxu1 %v18552_v4  ;;  %15345 = vmatprep.subr.bf16.mxu0 %v16914_v7 }
 0xee9   :  { %7643 = vmatpush1.bf16.msra.mxu1 %v18555_v20  ;;  %15346 = vmatpush3.bf16.msra.mxu0 %v16145_v60 }
 0xeea   :  { %v16605_v26 = vpop.eup %16604  ;;  %7644 = vmatprep.subr.bf16.mxu1 %v18559_v0  ;;  %15347 = vmatprep.subr.bf16.mxu0 %v16914_v7 }
 0xeeb   :  { %v7064_v43 = vmul.f32 %v16605_v26, %v7060_v46 }
 0xeec   :  { %v16607_v14 = vpop.eup %16606 }
 0xeed   :  { %7645 = vmatpush1.bf16.msra.mxu1 %v18562_v11  ;;  %15348 = vmatpush3.bf16.msra.mxu0 %v16149_v28  ;;  %v7065_v41 = vmul.f32 %v16607_v14, %v7061_v16  ;;  %7068 = vst [vmem:[#allocation4 + $0x8] sm:$0x1] %v7064_v43  ;;  %v7464_v40 = vpack.c.bf16 %v7064_v43, %v7064_v43 }
 0xeee   :  { %7646 = vmatprep.subr.bf16.mxu1 %v18567_v30  ;;  %15349 = vmatprep.subr.bf16.mxu0 %v16914_v7 }
 0xeef   :  { %7069 = vst [vmem:[#allocation4 + $0x18] sm:$0x1] %v7065_v41  ;;  %v7465_v9 = vpack.c.bf16 %v7065_v41, %v7065_v41  ;;  %v7500_v42 = vunpack.c.l.b16 %v7464_v40 }
 0xef1   :  { %7647 = vmatpush1.bf16.msra.mxu1 %v18571_v39  ;;  %15350 = vmatpush3.bf16.msra.mxu0 %v16153_v3  ;;  %v7501_v45 = vunpack.c.l.b16 %v7465_v9 }
 0xef2   :  { %7648 = vmatprep.subr.bf16.mxu1 %v18575_v53  ;;  %15351 = vmatprep.subr.bf16.mxu0 %v16914_v7 }
 0xef3   :  { %v7502_v48 = vrot.slane %v7501_v45, 7 }
 0xef5   :  { %7649 = vmatpush1.bf16.msra.mxu1 %v18578_v29  ;;  %15352 = vmatpush3.bf16.msra.mxu0 %v16157_v59  ;;  %v7503_v36 = vsel %vm1628_vm10, %v7502_v48, %v7500_v42 }
 0xef6   :  { %v7504_v38 = vpack.c.b16 %v7503_v36, %v7503_v36  ;;  %8032 = vmatprep.subr.bf16.mxu1 %v18406_v24  ;;  %15357 = vmatprep.subr.bf16.mxu0 %v16914_v7 }
 0xef8   :  { %7667 = vmatmul.mubr.bf16.vlgmr.msra.gmra.mrb[80].mxu1 %v7504_v38  ;;  %15354 = vmatmul.mubr.bf16.vlgmr.msra.gmra.mrb[88].mxu0 %v7504_v38 }
 0xef9   :  { %8033 = vmatpush1.bf16.msra.mxu1 %v18410_v18  ;;  %8064 = vmatprep.mubr.bf16.mxu1 %v16916_v10 }
 0xefa   :  { %8034 = vmatprep.subr.bf16.mxu1 %v18422_v54  ;;  %15373 = vmatprep.mubr.msk.bf16.mxu0 %vm16913_vm0, %v16914_v7 }
 0xefd   :  { %8035 = vmatpush1.bf16.msra.mxu1 %v18425_v25 }
 0xefe   :  { %8036 = vmatprep.subr.bf16.mxu1 %v18430_v52 }
 0xf01   :  { %8037 = vmatpush1.bf16.msra.mxu1 %v18434_v63 }
 0xf02   :  { %8038 = vmatprep.subr.bf16.mxu1 %v18442_v17 }
 0xf05   :  { %8039 = vmatpush1.bf16.msra.mxu1 %v18440_v50 }
 0xf06   :  { %8040 = vmatprep.subr.bf16.mxu1 %v18445_v51 }
 0xf09   :  { %8041 = vmatpush1.bf16.msra.mxu1 %v18452_v32 }
 0xf0a   :  { %8042 = vmatprep.subr.bf16.mxu1 %v18456_v21 }
 0xf0d   :  { %8043 = vmatpush1.bf16.msra.mxu1 %v18459_v62 }
 0xf0e   :  { %8044 = vmatprep.subr.bf16.mxu1 %v18463_v22 }
 0xf11   :  { %8045 = vmatpush1.bf16.msra.mxu1 %v18466_v1 }
 0xf12   :  { %8046 = vmatprep.subr.bf16.mxu1 %v18470_v27 }
 0xf15   :  { %8047 = vmatpush1.bf16.msra.mxu1 %v18473_v33  ;;  %v7071_v33 = vld [vmem:[#allocation2 + $0x30] ss:$8 sm:$0x7] }
 0xf16   :  { %8418 = vmatprep.subr.bf16.mxu1 %v18481_v35  ;;  %v7073_v35 = vld [vmem:[#allocation2 + $0x90] ss:$8 sm:$0x7] }
 0xfab   :  { %v7282_v24 = vpop.f32.mrb[76].mxu1  ;;  %v7323_v18 = vpop.f32.mrb[84].mxu0 }
 0xfac   :  { %v7284_v54 = vpop.f32.mrb[77].mxu1  ;;  %v15335_v25 = vpop.f32.mrb[85].mxu0  ;;  %v7346_v32 = vrot.slane %v7323_v18, %v17059_v12 }
 0xfad   :  { %v7332_v52 = vcombine.low %v7282_v24, %v7284_v54  ;;  %v7286_v63 = vpop.f32.mrb[78].mxu1  ;;  %v7326_v50 = vpop.f32.mrb[86].mxu0  ;;  %v16158_v24 = vld [vmem:[#allocation6 + $0x8] ss:$12 sps:$4 sm:$0xff]  }
 0xfae   :  { %v7287_v17 = vpop.f32.mrb[79].mxu1  ;;  %v15336_v51 = vpop.f32.mrb[87].mxu0  ;;  %15358 = vmatpush3.bf16.msra.mxu0 %v16158_v24 }
 0xfaf   :  { %v7339_v21 = vrot.slane %v7332_v52, %v17059_v12  ;;  %v7075_v17 = vld [vmem:[#allocation2 + $0x1f] ss:$8 sm:$0x7]  ;;  %15359 = vmatprep.subr.bf16.mxu0 %v16914_v7 }
 0xfb1   :  { %v7347_v62 = vcombine.low %v7339_v21, %v7346_v32  ;;  %v7348_v22 = vcombine.high %v7339_v21, %v7346_v32 }
 0xfb3   :  { %v7355_v1 = vrot.slane %v7347_v62, %v17059_v12  ;;  %v7362_v27 = vrot.slane %v7348_v22, %v17059_v12  ;;  %v7077_v62 = vld [vmem:[#allocation2 + $0x7f] ss:$8 sm:$0x7] }
 0xfb5   :  { %v7365_v37 = vadd.f32 %v7355_v1, %v7071_v33  ;;  %v7366_v15 = vadd.f32 %v7362_v27, %v7073_v35  ;;  %v16159_v1 = vld [vmem:[#allocation6 + $0x20] ss:$12 sps:$4 sm:$0xff]  }
 0xfb6   :  { %15360 = vmatpush3.bf16.msra.mxu0 %v16159_v1 }
 0xfb7   :  { %v14234_v61 = vmul.f32 -1.442695, %v7365_v37  ;;  %v14235_v60 = vmul.f32 -1.442695, %v7366_v15  ;;  %15361 = vmatprep.subr.bf16.mxu0 %v16914_v7 }
 0xfb9   :  { %16608 = vpow2.f32 %v14234_v61 }
 0xfba   :  { %16610 = vpow2.f32 %v14235_v60 }
 0xfc3   :  { %v16609_v28 = vpop.eup %16608 }
 0xfc4   :  { %v16611_v46 = vpop.eup %16610  ;;  %v7373_v26 = vadd.f32 1.0, %v16609_v28  ;;  %v16160_v28 = vld [vmem:[#allocation6 + $0x38] ss:$12 sps:$4 sm:$0xff]  }
 0xfc5   :  { %v7374_v16 = vadd.f32 1.0, %v16611_v46  ;;  %15362 = vmatpush3.bf16.msra.mxu0 %v16160_v28 }
 0xfc6   :  { %16612 = vrcp.f32 %v7373_v26  ;;  %15363 = vmatprep.subr.bf16.mxu0 %v16914_v7 }
 0xfc7   :  { %16614 = vrcp.f32 %v7374_v16  ;;  %v16161_v16 = vld [vmem:[#allocation6 + $0x50] ss:$12 sps:$4 sm:$0xff]  }
 0xfc9   :  { %15364 = vmatpush3.bf16.msra.mxu0 %v16161_v16 }
 0xfca   :  { %15365 = vmatprep.subr.bf16.mxu0 %v16914_v7 }
 0xfcb   :  { %v7668_v43 = vpop.f32.mrb[80].mxu1  ;;  %v7709_v14 = vpop.f32.mrb[88].mxu0 }
 0xfcc   :  { %v7670_v3 = vpop.f32.mrb[81].mxu1  ;;  %v15355_v41 = vpop.f32.mrb[89].mxu0  ;;  %v7732_v48 = vrot.slane %v7709_v14, %v17059_v12  ;;  %v16162_v14 = vld [vmem:[#allocation6 + $0x68] ss:$12 sps:$4 sm:$0xff]  }
 0xfcd   :  { %v7718_v40 = vcombine.low %v7668_v43, %v7670_v3  ;;  %v7672_v9 = vpop.f32.mrb[82].mxu1  ;;  %v7712_v59 = vpop.f32.mrb[90].mxu0  ;;  %15366 = vmatpush3.bf16.msra.mxu0 %v16162_v14  ;;  %v16163_v3 = vld [vmem:[#allocation6 + $0x80] ss:$12 sps:$4 sm:$0xff]  }
 0xfce   :  { %v7673_v45 = vpop.f32.mrb[83].mxu1  ;;  %v15356_v42 = vpop.f32.mrb[91].mxu0  ;;  %15367 = vmatprep.subr.bf16.mxu0 %v16914_v7 }
 0xfcf   :  { %v7725_v36 = vrot.slane %v7718_v40, %v17059_v12  ;;  %v16164_v45 = vld [vmem:[#allocation6 + $0x98] ss:$12 sps:$4 sm:$0xff]   ;;  %v16165_v42 = vld [vmem:[#allocation6 + $0xb0] ss:$12 sps:$4 sm:$0xff]  }
 0xfd0   :  { %v18611_v38 = vpop.eup %16612 }
 0xfd1   :  { %v18613_v18 = vpop.eup %16614  ;;  %v7733_v54 = vcombine.low %v7725_v36, %v7732_v48  ;;  %v7734_v25 = vcombine.high %v7725_v36, %v7732_v48  ;;  %v7379_v52 = vmul.f32 2.0, %v18611_v38  ;;  %15368 = vmatpush3.bf16.msra.mxu0 %v16163_v3  ;;  %v7423_v1 = vrot.slane %v18611_v38, 1 }
 0xfd2   :  { %v7380_v63 = vmul.f32 2.0, %v18613_v18  ;;  %v7385_v50 = vcombine.low %v18611_v38, %v18613_v18  ;;  %15369 = vmatprep.subr.bf16.mxu0 %v16914_v7  ;;  %v7458_v16 = vrot.slane %v18611_v38, 2 }
 0xfd3   :  { %v7741_v51 = vrot.slane %v7733_v54, %v17059_v12  ;;  %v7748_v32 = vrot.slane %v7734_v25, %v17059_v12  ;;  %v14236_v21 = vadd.f32 -1.0, %v7379_v52 }
 0xfd4   :  { %v14237_v22 = vadd.f32 -1.0, %v7380_v63  ;;  %v7392_v35 = vrot.slane %v7385_v50, %v17059_v12 }
 0xfd5   :  { %v7751_v27 = vadd.f32 %v7741_v51, %v7075_v17  ;;  %v7752_v33 = vadd.f32 %v7748_v32, %v7077_v62  ;;  %15370 = vmatpush3.bf16.msra.mxu0 %v16164_v45 }
 0xfd6   :  { %v7403_v37 = vcombine.low %v14236_v21, %v14237_v22  ;;  %v7399_v46 = vrot.slane %v7392_v35, %v17059_v12  ;;  %15371 = vmatprep.subr.bf16.mxu0 %v16914_v7 }
 0xfd7   :  { %v14262_v15 = vmul.f32 -1.442695, %v7751_v27  ;;  %v14263_v61 = vmul.f32 -1.442695, %v7752_v33  ;;  %v7424_v33 = vrot.slane %v18613_v18, 1 }
 0xfd8   :  { %v7410_v60 = vrot.slane %v7403_v37, %v17059_v12  ;;  %v7427_v37 = vmul.f32 %v7423_v1, %v18504_v49  ;;  %v7459_v49 = vrot.slane %v18613_v18, 2  ;;  %v16167_v18 = vld [vmem:[#allocation9 + $0x20] ss:$12 sps:$4 sm:$0xff]  }
 0xfd9   :  { %16616 = vpow2.f32 %v14262_v15  ;;  %15372 = vmatpush3.bf16.msra.mxu0 %v16165_v42 }
 0xfda   :  { %16618 = vpow2.f32 %v14263_v61  ;;  %v7417_v26 = vrot.slane %v7410_v60, %v17059_v12  ;;  %15377 = vmatprep.subr.bf16.mxu0 %v16914_v7  ;;  %v7428_v60 = vmul.f32 %v7424_v33, %v18506_v8 }
 0xfdc   :  { %v7419_v43 = vsel %vm817_vm9, %v7399_v46, %v7417_v26 }
 0xfdd   :  { %7420 = vrot.lane.b32.xlu0 %v7419_v43, %s16917_s6 }
 0xfe3   :  { %v16617_v41 = vpop.eup %16616 }
 0xfe4   :  { %v16619_v40 = vpop.eup %16618  ;;  %v7759_v9 = vadd.f32 1.0, %v16617_v41 }
 0xfe5   :  { %v7760_v59 = vadd.f32 1.0, %v16619_v40 }
 0xfe6   :  { %16620 = vrcp.f32 %v7759_v9 }
 0xfe7   :  { %16622 = vrcp.f32 %v7760_v59 }
 0xff0   :  { %v18636_v48 = vpop.eup %16620 }
 0xff1   :  { %v18638_v36 = vpop.eup %16622  ;;  %v7765_v24 = vmul.f32 2.0, %v18636_v48  ;;  %v7809_v38 = vrot.slane %v18636_v48, 1 }
 0xff2   :  { %v7766_v54 = vmul.f32 2.0, %v18638_v36  ;;  %v7771_v25 = vcombine.low %v18636_v48, %v18638_v36 }
 0xff3   :  { %v14264_v52 = vadd.f32 -1.0, %v7765_v24  ;;  %v16166_v24 = vld [vmem:[#allocation9 + $0x8] ss:$12 sps:$4 sm:$0xff]  }
 0xff4   :  { %v14265_v63 = vadd.f32 -1.0, %v7766_v54  ;;  %v7778_v50 = vrot.slane %v7771_v25, %v17059_v12 }
 0xff6   :  { %v7789_v17 = vcombine.low %v14264_v52, %v14265_v63  ;;  %v7785_v32 = vrot.slane %v7778_v50, %v17059_v12  ;;  %v7810_v63 = vrot.slane %v18638_v36, 1 }
 0xff8   :  { %v7796_v51 = vrot.slane %v7789_v17, %v17059_v12  ;;  %v7813_v17 = vmul.f32 %v7809_v38, %v18537_v19  ;;  %v7844_v19 = vrot.slane %v18636_v48, 2 }
 0xffa   :  { %v7803_v21 = vrot.slane %v7796_v51, %v17059_v12 }
 0xffc   :  { %v7805_v62 = vsel %vm817_vm9, %v7785_v32, %v7803_v21  ;;  %v16168_v32 = vld [vmem:[#allocation9 + $0x38] ss:$12 sps:$4 sm:$0xff]   ;;  %v7814_v21 = vmul.f32 %v7810_v63, %v18543_v31 }
 0xffd   :  { %7806 = vrot.lane.b32.xlu1 %v7805_v62, %s16917_s6 }
0x104f   :  { %v7421_v22 = vpop.permute.xlu0 %7420 }
0x1050   :  { %v7422_v27 = vmul.f32 %v7421_v22, %v7419_v43 }
0x1052   :  { %v7436_v35 = vrot.slane %v7422_v27, %v17059_v12 }
0x1054   :  { %v7437_v15 = vcombine.high %v7436_v35, %v7436_v35  ;;  %v7444_v61 = vrot.slane %v7436_v35, %v17059_v12 }
0x1056   :  { %v7451_v28 = vrot.slane %v7437_v15, %v17059_v12  ;;  %v18658_v46 = vadd.f32 %v7444_v61, %v7427_v37 }
0x1058   :  { %v18660_v26 = vadd.f32 %v7451_v28, %v7428_v60  ;;  %16624 = vtanh.f32 %v18658_v46 }
0x105a   :  { %16626 = vtanh.f32 %v18660_v26 }
0x1062   :  { %v16625_v43 = vpop.eup %16624 }
0x1063   :  { %v7462_v14 = vmul.f32 %v16625_v43, %v7458_v16 }
0x1064   :  { %v16627_v3 = vpop.eup %16626 }
0x1065   :  { %v7463_v41 = vmul.f32 %v16627_v3, %v7459_v49  ;;  %7850 = vst [vmem:[#allocation3 + $0x8] sm:$0x1] %v7462_v14  ;;  %v7862_v8 = vpack.c.bf16 %v7462_v14, %v7462_v14 }
0x1067   :  { %7851 = vst [vmem:[#allocation3 + $0x18] sm:$0x1] %v7463_v41  ;;  %v7863_v40 = vpack.c.bf16 %v7463_v41, %v7463_v41  ;;  %v7898_v59 = vunpack.c.l.b16 %v7862_v8 }
0x1069   :  { %v7899_v9 = vunpack.c.l.b16 %v7863_v40  ;;  %v7855_v40 = vld [vmem:[#allocation2 + $0x31] ss:$8 sm:$0x7] }
0x106b   :  { %v7900_v45 = vrot.slane %v7899_v9, 7  ;;  %v7857_v9 = vld [vmem:[#allocation2 + $0x91] ss:$8 sm:$0x7] }
0x106d   :  { %v7901_v42 = vsel %vm1628_vm10, %v7900_v45, %v7898_v59 }
0x106e   :  { %v7902_v54 = vpack.c.b16 %v7901_v42, %v7901_v42 }
0x106f   :  { %v7807_v25 = vpop.permute.xlu1 %7806 }
0x1070   :  { %v7808_v52 = vmul.f32 %v7807_v25, %v7805_v62  ;;  %8065 = vmatmul.mubr.bf16.vlgmr.msra.gmra.mrb[84].mxu1 %v7902_v54  ;;  %15374 = vmatmul.mubr.bf16.vlgmr.msra.gmra.mrb[92].mxu0 %v7902_v54 }
0x1071   :  { %8419 = vmatpush1.bf16.msra.mxu1 %v18513_v56  ;;  %15378 = vmatpush3.bf16.msra.mxu0 %v16166_v24 }
0x1072   :  { %v7822_v50 = vrot.slane %v7808_v52, %v17059_v12  ;;  %8420 = vmatprep.subr.bf16.mxu1 %v18515_v57  ;;  %15379 = vmatprep.subr.bf16.mxu0 %v16914_v7 }
0x1073   :  { %8450 = vmatprep.mubr.bf16.mxu1 %v16916_v10  ;;  %15393 = vmatprep.mubr.msk.bf16.mxu0 %vm16913_vm0, %v16914_v7 }
0x1074   :  { %v7823_v51 = vcombine.high %v7822_v50, %v7822_v50  ;;  %v7830_v56 = vrot.slane %v7822_v50, %v17059_v12 }
0x1075   :  { %8421 = vmatpush1.bf16.msra.mxu1 %v18519_v47  ;;  %15380 = vmatpush3.bf16.msra.mxu0 %v16167_v18  ;;  %v16169_v47 = vld [vmem:[#allocation9 + $0x50] ss:$12 sps:$4 sm:$0xff]  }
0x1076   :  { %v7837_v57 = vrot.slane %v7823_v51, %v17059_v12  ;;  %v18681_v62 = vadd.f32 %v7830_v56, %v7813_v17  ;;  %8422 = vmatprep.subr.bf16.mxu1 %v18525_v44  ;;  %15381 = vmatprep.subr.bf16.mxu0 %v16914_v7  ;;  %v16170_v44 = vld [vmem:[#allocation9 + $0x68] ss:$12 sps:$4 sm:$0xff]  }
0x1078   :  { %v18685_v22 = vadd.f32 %v7837_v57, %v7814_v21  ;;  %16628 = vtanh.f32 %v18681_v62 }
0x1079   :  { %8423 = vmatpush1.bf16.msra.mxu1 %v18533_v58  ;;  %15382 = vmatpush3.bf16.msra.mxu0 %v16168_v32  ;;  %v16171_v58 = vld [vmem:[#allocation9 + $0x80] ss:$12 sps:$4 sm:$0xff]  }
0x107a   :  { %16630 = vtanh.f32 %v18685_v22  ;;  %8424 = vmatprep.subr.bf16.mxu1 %v18541_v34  ;;  %15383 = vmatprep.subr.bf16.mxu0 %v16914_v7  ;;  %v7845_v34 = vrot.slane %v18638_v36, 2 }
0x107d   :  { %8425 = vmatpush1.bf16.msra.mxu1 %v18547_v55  ;;  %15384 = vmatpush3.bf16.msra.mxu0 %v16169_v47 }
0x107e   :  { %8426 = vmatprep.subr.bf16.mxu1 %v18552_v4  ;;  %15385 = vmatprep.subr.bf16.mxu0 %v16914_v7  ;;  %v16172_v4 = vld [vmem:[#allocation9 + $0x98] ss:$12 sps:$4 sm:$0xff]  }
0x1081   :  { %8427 = vmatpush1.bf16.msra.mxu1 %v18555_v20  ;;  %15386 = vmatpush3.bf16.msra.mxu0 %v16170_v44 }
0x1082   :  { %v16629_v31 = vpop.eup %16628  ;;  %8428 = vmatprep.subr.bf16.mxu1 %v18559_v0  ;;  %15387 = vmatprep.subr.bf16.mxu0 %v16914_v7  ;;  %v16173_v0 = vld [vmem:[#allocation9 + $0xb0] ss:$12 sps:$4 sm:$0xff]  }
0x1083   :  { %v7848_v55 = vmul.f32 %v16629_v31, %v7844_v19  ;;  %v18722_v31 = vld [vmem:[#allocation6] ss:$12 sps:$4 sm:$0xff]  }
0x1084   :  { %v16631_v1 = vpop.eup %16630 }
0x1085   :  { %8429 = vmatpush1.bf16.msra.mxu1 %v18562_v11  ;;  %15388 = vmatpush3.bf16.msra.mxu0 %v16171_v58  ;;  %v7849_v27 = vmul.f32 %v16631_v1, %v7845_v34  ;;  %7852 = vst [vmem:[#allocation4 + $0x7] sm:$0x1] %v7848_v55  ;;  %v8248_v20 = vpack.c.bf16 %v7848_v55, %v7848_v55  ;;  %v18718_v58 = vld [vmem:[#allocation6 + $0x4] ss:$12 sps:$4 sm:$0xff]   ;;  %v16177_v34 = vld [vmem:[#allocation6 + $0x8] ss:$12 sps:$4 sm:$0xff]  }
0x1086   :  { %8430 = vmatprep.subr.bf16.mxu1 %v18567_v30  ;;  %15389 = vmatprep.subr.bf16.mxu0 %v16914_v7 }
0x1087   :  { %7853 = vst [vmem:[#allocation4 + $0x17] sm:$0x1] %v7849_v27  ;;  %v8249_v48 = vpack.c.bf16 %v7849_v27, %v7849_v27  ;;  %v8284_v11 = vunpack.c.l.b16 %v8248_v20  ;;  %v7859_v20 = vld [vmem:[#allocation2 + $0x1e] ss:$8 sm:$0x7] }
0x1089   :  { %8431 = vmatpush1.bf16.msra.mxu1 %v18571_v39  ;;  %15390 = vmatpush3.bf16.msra.mxu0 %v16172_v4  ;;  %v8285_v36 = vunpack.c.l.b16 %v8249_v48 }
0x108a   :  { %8432 = vmatprep.subr.bf16.mxu1 %v18575_v53  ;;  %15391 = vmatprep.subr.bf16.mxu0 %v16914_v7 }
0x108b   :  { %v8286_v33 = vrot.slane %v8285_v36, 7  ;;  %v7861_v36 = vld [vmem:[#allocation2 + $0x7e] ss:$8 sm:$0x7] }
0x108d   :  { %8433 = vmatpush1.bf16.msra.mxu1 %v18578_v29  ;;  %15392 = vmatpush3.bf16.msra.mxu0 %v16173_v0  ;;  %v8287_v30 = vsel %vm1628_vm10, %v8286_v33, %v8284_v11 }
0x108e   :  { %v8288_v35 = vpack.c.b16 %v8287_v30, %v8287_v30  ;;  %15397 = vmatprep.subr.bf16.mxu0 %v16914_v7  ;;  %8816 = vmatprep.subr.bf16.mxu1 %v18718_v58 }
0x1090   :  { %8451 = vmatmul.mubr.bf16.vlgmr.msra.gmra.mrb[88].mxu1 %v8288_v35  ;;  %15394 = vmatmul.mubr.bf16.vlgmr.msra.gmra.mrb[96].mxu0 %v8288_v35  ;;  %v18734_v35 = vld [vmem:[#allocation6 + $0x1c] ss:$12 sps:$4 sm:$0xff]  }
0x1091   :  { %8848 = vmatprep.mubr.bf16.mxu1 %v16916_v10  ;;  %15413 = vmatprep.mubr.msk.bf16.mxu0 %vm16913_vm0, %v16914_v7 }
0x1092   :  { %8817 = vmatpush1.bf16.msra.mxu1 %v18722_v31  ;;  %15398 = vmatpush3.bf16.msra.mxu0 %v16177_v34  ;;  %v18793_v34 = vld [vmem:[#allocation9 + $0x4] ss:$12 sps:$4 sm:$0xff]  }
0x1093   :  { %15399 = vmatprep.subr.bf16.mxu0 %v16914_v7  ;;  %8818 = vmatprep.subr.bf16.mxu1 %v18734_v35 }
0x1143   :  { %v8066_v39 = vpop.f32.mrb[84].mxu1  ;;  %v8107_v53 = vpop.f32.mrb[92].mxu0 }
0x1144   :  { %v8068_v37 = vpop.f32.mrb[85].mxu1  ;;  %v15375_v15 = vpop.f32.mrb[93].mxu0  ;;  %v8130_v43 = vrot.slane %v8107_v53, %v17059_v12  ;;  %v18737_v53 = vld [vmem:[#allocation6 + $0x18] ss:$12 sps:$4 sm:$0xff]  }
0x1145   :  { %v8116_v61 = vcombine.low %v8066_v39, %v8068_v37  ;;  %v8070_v60 = vpop.f32.mrb[86].mxu1  ;;  %v8110_v29 = vpop.f32.mrb[94].mxu0  ;;  %v16181_v37 = vld [vmem:[#allocation6 + $0x20] ss:$12 sps:$4 sm:$0xff]   ;;  %8819 = vmatpush1.bf16.msra.mxu1 %v18737_v53 }
0x1146   :  { %v8071_v28 = vpop.f32.mrb[87].mxu1  ;;  %v15376_v16 = vpop.f32.mrb[95].mxu0  ;;  %15400 = vmatpush3.bf16.msra.mxu0 %v16181_v37 }
0x1147   :  { %v8123_v49 = vrot.slane %v8116_v61, %v17059_v12  ;;  %15401 = vmatprep.subr.bf16.mxu0 %v16914_v7 }
0x1149   :  { %v8131_v14 = vcombine.low %v8123_v49, %v8130_v43  ;;  %v8132_v3 = vcombine.high %v8123_v49, %v8130_v43  ;;  %v18742_v43 = vld [vmem:[#allocation6 + $0x34] ss:$12 sps:$4 sm:$0xff]  }
0x114a   :  { %8820 = vmatprep.subr.bf16.mxu1 %v18742_v43 }
0x114b   :  { %v8139_v41 = vrot.slane %v8131_v14, %v17059_v12  ;;  %v8146_v8 = vrot.slane %v8132_v3, %v17059_v12  ;;  %v18746_v14 = vld [vmem:[#allocation6 + $0x30] ss:$12 sps:$4 sm:$0xff]   ;;  %v16185_v3 = vld [vmem:[#allocation6 + $0x38] ss:$12 sps:$4 sm:$0xff]  }
0x114c   :  { %8821 = vmatpush1.bf16.msra.mxu1 %v18746_v14  ;;  %15402 = vmatpush3.bf16.msra.mxu0 %v16185_v3 }
0x114d   :  { %v8149_v59 = vadd.f32 %v8139_v41, %v7855_v40  ;;  %v8150_v45 = vadd.f32 %v8146_v8, %v7857_v9  ;;  %v18752_v40 = vld [vmem:[#allocation6 + $0x48] ss:$12 sps:$4 sm:$0xff]   ;;  %v18754_v9 = vld [vmem:[#allocation6 + $0x4c] ss:$12 sps:$4 sm:$0xff]   ;;  %15403 = vmatprep.subr.bf16.mxu0 %v16914_v7 }
0x114e   :  { %8822 = vmatprep.subr.bf16.mxu1 %v18754_v9 }
0x114f   :  { %v14290_v42 = vmul.f32 -1.442695, %v8149_v59  ;;  %v14291_v24 = vmul.f32 -1.442695, %v8150_v45  ;;  %v16189_v59 = vld [vmem:[#allocation6 + $0x50] ss:$12 sps:$4 sm:$0xff]  }
0x1150   :  { %v18757_v45 = vld [vmem:[#allocation6 + $0x64] ss:$12 sps:$4 sm:$0xff]   ;;  %8823 = vmatpush1.bf16.msra.mxu1 %v18752_v40  ;;  %15404 = vmatpush3.bf16.msra.mxu0 %v16189_v59 }
0x1151   :  { %16632 = vpow2.f32 %v14290_v42  ;;  %8824 = vmatprep.subr.bf16.mxu1 %v18757_v45  ;;  %15405 = vmatprep.subr.bf16.mxu0 %v16914_v7 }
0x1152   :  { %16634 = vpow2.f32 %v14291_v24  ;;  %v18764_v24 = vld [vmem:[#allocation6 + $0x60] ss:$12 sps:$4 sm:$0xff]  }
0x1154   :  { %8825 = vmatpush1.bf16.msra.mxu1 %v18764_v24 }
0x115b   :  { %v16633_v54 = vpop.eup %16632 }
0x115c   :  { %v16635_v25 = vpop.eup %16634  ;;  %v8157_v38 = vadd.f32 1.0, %v16633_v54  ;;  %v16193_v54 = vld [vmem:[#allocation6 + $0x68] ss:$12 sps:$4 sm:$0xff]  }
0x115d   :  { %v8158_v52 = vadd.f32 1.0, %v16635_v25  ;;  %v18768_v25 = vld [vmem:[#allocation6 + $0x7c] ss:$12 sps:$4 sm:$0xff]   ;;  %15406 = vmatpush3.bf16.msra.mxu0 %v16193_v54 }
0x115e   :  { %16636 = vrcp.f32 %v8157_v38  ;;  %v18771_v38 = vld [vmem:[#allocation6 + $0x78] ss:$12 sps:$4 sm:$0xff]   ;;  %8826 = vmatprep.subr.bf16.mxu1 %v18768_v25  ;;  %15407 = vmatprep.subr.bf16.mxu0 %v16914_v7 }
0x115f   :  { %16638 = vrcp.f32 %v8158_v52  ;;  %v16197_v52 = vld [vmem:[#allocation6 + $0x80] ss:$12 sps:$4 sm:$0xff]   ;;  %8827 = vmatpush1.bf16.msra.mxu1 %v18771_v38 }
0x1161   :  { %15408 = vmatpush3.bf16.msra.mxu0 %v16197_v52 }
0x1162   :  { %15409 = vmatprep.subr.bf16.mxu0 %v16914_v7 }
0x1163   :  { %v8452_v18 = vpop.f32.mrb[88].mxu1  ;;  %v8493_v63 = vpop.f32.mrb[96].mxu0 }
0x1164   :  { %v8454_v50 = vpop.f32.mrb[89].mxu1  ;;  %v15395_v17 = vpop.f32.mrb[97].mxu0  ;;  %v8516_v47 = vrot.slane %v8493_v63, %v17059_v12  ;;  %v18775_v63 = vld [vmem:[#allocation6 + $0x94] ss:$12 sps:$4 sm:$0xff]  }
0x1165   :  { %v8502_v51 = vcombine.low %v8452_v18, %v8454_v50  ;;  %v8456_v56 = vpop.f32.mrb[90].mxu1  ;;  %v8496_v32 = vpop.f32.mrb[98].mxu0  ;;  %8828 = vmatprep.subr.bf16.mxu1 %v18775_v63 }
0x1166   :  { %v8457_v21 = vpop.f32.mrb[91].mxu1  ;;  %v15396_v57 = vpop.f32.mrb[99].mxu0  ;;  %v18778_v56 = vld [vmem:[#allocation6 + $0x90] ss:$12 sps:$4 sm:$0xff]   ;;  %v16201_v32 = vld [vmem:[#allocation6 + $0x98] ss:$12 sps:$4 sm:$0xff]  }
0x1167   :  { %v8509_v44 = vrot.slane %v8502_v51, %v17059_v12  ;;  %v18782_v21 = vld [vmem:[#allocation6 + $0xac] ss:$12 sps:$4 sm:$0xff]   ;;  %8829 = vmatpush1.bf16.msra.mxu1 %v18778_v56  ;;  %15410 = vmatpush3.bf16.msra.mxu0 %v16201_v32  ;;  %v18785_v57 = vld [vmem:[#allocation6 + $0xa8] ss:$12 sps:$4 sm:$0xff]  }
0x1168   :  { %v18720_v19 = vpop.eup %16636  ;;  %8830 = vmatprep.subr.bf16.mxu1 %v18782_v21  ;;  %15411 = vmatprep.subr.bf16.mxu0 %v16914_v7 }
0x1169   :  { %v18724_v55 = vpop.eup %16638  ;;  %v8517_v1 = vcombine.low %v8509_v44, %v8516_v47  ;;  %v8518_v4 = vcombine.high %v8509_v44, %v8516_v47  ;;  %v8163_v27 = vmul.f32 2.0, %v18720_v19  ;;  %v16205_v47 = vld [vmem:[#allocation6 + $0xb0] ss:$12 sps:$4 sm:$0xff]  }
0x116a   :  { %v8164_v48 = vmul.f32 2.0, %v18724_v55  ;;  %v8169_v0 = vcombine.low %v18720_v19, %v18724_v55 }
0x116b   :  { %v8525_v11 = vrot.slane %v8517_v1, %v17059_v12  ;;  %v8532_v33 = vrot.slane %v8518_v4, %v17059_v12  ;;  %v14292_v30 = vadd.f32 -1.0, %v8163_v27  ;;  %8831 = vmatpush1.bf16.msra.mxu1 %v18785_v57  ;;  %15412 = vmatpush3.bf16.msra.mxu0 %v16205_v47 }
0x116c   :  { %v14293_v39 = vadd.f32 -1.0, %v8164_v48  ;;  %v8176_v60 = vrot.slane %v8169_v0, %v17059_v12  ;;  %15417 = vmatprep.subr.bf16.mxu0 %v16914_v7  ;;  %9202 = vmatprep.subr.bf16.mxu1 %v18793_v34 }
0x116d   :  { %v8535_v15 = vadd.f32 %v8525_v11, %v7859_v20  ;;  %v8536_v61 = vadd.f32 %v8532_v33, %v7861_v36 }
0x116e   :  { %v8187_v29 = vcombine.low %v14292_v30, %v14293_v39  ;;  %v8183_v41 = vrot.slane %v8176_v60, %v17059_v12 }
0x116f   :  { %v14318_v28 = vmul.f32 -1.442695, %v8535_v15  ;;  %v14319_v16 = vmul.f32 -1.442695, %v8536_v61  ;;  %v8207_v61 = vrot.slane %v18720_v19, 1 }
0x1170   :  { %v8194_v49 = vrot.slane %v8187_v29, %v17059_v12  ;;  %v8208_v29 = vrot.slane %v18724_v55, 1 }
0x1171   :  { %16640 = vpow2.f32 %v14318_v28 }
0x1172   :  { %16642 = vpow2.f32 %v14319_v16  ;;  %v8201_v8 = vrot.slane %v8194_v49, %v17059_v12  ;;  %v8211_v16 = vmul.f32 %v8207_v61, %v18658_v46  ;;  %v8243_v46 = vrot.slane %v18724_v55, 2  ;;  %v18837_v61 = vld [vmem:[#allocation9 + $0x34] ss:$12 sps:$4 sm:$0xff]  }
0x1174   :  { %v8203_v42 = vsel %vm817_vm9, %v8183_v41, %v8201_v8  ;;  %v8212_v41 = vmul.f32 %v8208_v29, %v18660_v26 }
0x1175   :  { %8204 = vrot.lane.b32.xlu0 %v8203_v42, %s16917_s6 }
0x117b   :  { %v16641_v18 = vpop.eup %16640 }
0x117c   :  { %v16643_v50 = vpop.eup %16642  ;;  %v8543_v17 = vadd.f32 1.0, %v16641_v18 }
0x117d   :  { %v8544_v51 = vadd.f32 1.0, %v16643_v50 }
0x117e   :  { %16644 = vrcp.f32 %v8543_v17 }
0x117f   :  { %16646 = vrcp.f32 %v8544_v51 }
0x1188   :  { %v18791_v44 = vpop.eup %16644 }
0x1189   :  { %v18795_v1 = vpop.eup %16646  ;;  %v8549_v4 = vmul.f32 2.0, %v18791_v44  ;;  %v8593_v55 = vrot.slane %v18791_v44, 1 }
0x118a   :  { %v8550_v27 = vmul.f32 2.0, %v18795_v1  ;;  %v8555_v20 = vcombine.low %v18791_v44, %v18795_v1 }
0x118b   :  { %v14320_v48 = vadd.f32 -1.0, %v8549_v4 }
0x118c   :  { %v14321_v0 = vadd.f32 -1.0, %v8550_v27  ;;  %v8562_v36 = vrot.slane %v8555_v20, %v17059_v12  ;;  %v18825_v20 = vld [vmem:[#allocation9] ss:$12 sps:$4 sm:$0xff]  }
0x118e   :  { %v8573_v11 = vcombine.low %v14320_v48, %v14321_v0  ;;  %v8569_v30 = vrot.slane %v8562_v36, %v17059_v12  ;;  %v16209_v48 = vld [vmem:[#allocation9 + $0x8] ss:$12 sps:$4 sm:$0xff]  }
0x1190   :  { %v8580_v33 = vrot.slane %v8573_v11, %v17059_v12 }
0x1192   :  { %v8587_v39 = vrot.slane %v8580_v33, %v17059_v12  ;;  %v18831_v33 = vld [vmem:[#allocation9 + $0x18] ss:$12 sps:$4 sm:$0xff]  }
0x1194   :  { %v8589_v37 = vsel %vm817_vm9, %v8569_v30, %v8587_v39  ;;  %v16213_v30 = vld [vmem:[#allocation9 + $0x20] ss:$12 sps:$4 sm:$0xff]   ;;  %v8594_v39 = vrot.slane %v18795_v1, 1 }
0x1195   :  { %8590 = vrot.lane.b32.xlu1 %v8589_v37, %s16917_s6 }
0x11e7   :  { %v8205_v15 = vpop.permute.xlu0 %8204 }
0x11e8   :  { %v8206_v60 = vmul.f32 %v8205_v15, %v8203_v42  ;;  %v8242_v42 = vrot.slane %v18720_v19, 2  ;;  %v18827_v19 = vld [vmem:[#allocation9 + $0x1c] ss:$12 sps:$4 sm:$0xff]  }
0x11ea   :  { %v8220_v28 = vrot.slane %v8206_v60, %v17059_v12 }
0x11ec   :  { %v8221_v49 = vcombine.high %v8220_v28, %v8220_v28  ;;  %v8228_v3 = vrot.slane %v8220_v28, %v17059_v12  ;;  %v18845_v28 = vld [vmem:[#allocation9 + $0x30] ss:$12 sps:$4 sm:$0xff]  }
0x11ee   :  { %v8235_v8 = vrot.slane %v8221_v49, %v17059_v12  ;;  %v18816_v59 = vadd.f32 %v8228_v3, %v8211_v16  ;;  %v16217_v16 = vld [vmem:[#allocation9 + $0x38] ss:$12 sps:$4 sm:$0xff]   ;;  %v8598_v49 = vmul.f32 %v8594_v39, %v18685_v22  ;;  %v16221_v22 = vld [vmem:[#allocation9 + $0x50] ss:$12 sps:$4 sm:$0xff]  }
0x11ef   :  { %v16237_v39 = vld [vmem:[#allocation9 + $0xb0] ss:$12 sps:$4 sm:$0xff]  }
0x11f0   :  { %v18818_v54 = vadd.f32 %v8235_v8, %v8212_v41  ;;  %16648 = vtanh.f32 %v18816_v59 }
0x11f2   :  { %16650 = vtanh.f32 %v18818_v54 }
0x11fa   :  { %v16649_v52 = vpop.eup %16648 }
0x11fb   :  { %v8246_v18 = vmul.f32 %v16649_v52, %v8242_v42  ;;  %v18859_v42 = vld [vmem:[#allocation9 + $0x48] ss:$12 sps:$4 sm:$0xff]   ;;  %v18864_v52 = vld [vmem:[#allocation9 + $0x64] ss:$12 sps:$4 sm:$0xff]  }
0x11fc   :  { %v16651_v50 = vpop.eup %16650 }
0x11fd   :  { %v8247_v17 = vmul.f32 %v16651_v50, %v8243_v46  ;;  %8634 = vst [vmem:[#allocation3 + $0x9] sm:$0x1] %v8246_v18  ;;  %v8646_v26 = vpack.c.bf16 %v8246_v18, %v8246_v18  ;;  %v18867_v46 = vld [vmem:[#allocation9 + $0x60] ss:$12 sps:$4 sm:$0xff]   ;;  %v16225_v18 = vld [vmem:[#allocation9 + $0x68] ss:$12 sps:$4 sm:$0xff]  }
0x11fe   :  { %v18871_v50 = vld [vmem:[#allocation9 + $0x7c] ss:$12 sps:$4 sm:$0xff]  }
0x11ff   :  { %8635 = vst [vmem:[#allocation3 + $0x19] sm:$0x1] %v8247_v17  ;;  %v8647_v51 = vpack.c.bf16 %v8247_v17, %v8247_v17  ;;  %v8682_v47 = vunpack.c.l.b16 %v8646_v26  ;;  %v18874_v17 = vld [vmem:[#allocation9 + $0x78] ss:$12 sps:$4 sm:$0xff]   ;;  %v16229_v26 = vld [vmem:[#allocation9 + $0x80] ss:$12 sps:$4 sm:$0xff]  }
0x1201   :  { %v8683_v32 = vunpack.c.l.b16 %v8647_v51  ;;  %v8628_v51 = vrot.slane %v18791_v44, 2  ;;  %v18887_v44 = vld [vmem:[#allocation9 + $0xac] ss:$12 sps:$4 sm:$0xff]  }
0x1203   :  { %v8684_v4 = vrot.slane %v8683_v32, 7 }
0x1205   :  { %v8685_v27 = vsel %vm1628_vm10, %v8684_v4, %v8682_v47  ;;  %v18879_v47 = vld [vmem:[#allocation9 + $0x94] ss:$12 sps:$4 sm:$0xff]   ;;  %v8629_v4 = vrot.slane %v18795_v1, 2 }
0x1206   :  { %v8686_v0 = vpack.c.b16 %v8685_v27, %v8685_v27  ;;  %v18890_v1 = vld [vmem:[#allocation9 + $0xa8] ss:$12 sps:$4 sm:$0xff]  }
0x1207   :  { %v8591_v36 = vpop.permute.xlu1 %8590 }
0x1208   :  { %v8592_v11 = vmul.f32 %v8591_v36, %v8589_v37  ;;  %8849 = vmatmul.mubr.bf16.vlgmr.msra.gmra.mrb[92].mxu1 %v8686_v0  ;;  %15414 = vmatmul.mubr.bf16.vlgmr.msra.gmra.mrb[100].mxu0 %v8686_v0  ;;  %v8597_v37 = vmul.f32 %v8593_v55, %v18681_v62  ;;  %v18853_v62 = vld [vmem:[#allocation9 + $0x4c] ss:$12 sps:$4 sm:$0xff]   ;;  %v18883_v0 = vld [vmem:[#allocation9 + $0x90] ss:$12 sps:$4 sm:$0xff]  }
0x1209   :  { %9203 = vmatpush1.bf16.msra.mxu1 %v18825_v20  ;;  %15418 = vmatpush3.bf16.msra.mxu0 %v16209_v48  ;;  %v16233_v36 = vld [vmem:[#allocation9 + $0x98] ss:$12 sps:$4 sm:$0xff]  }
0x120a   :  { %v8606_v15 = vrot.slane %v8592_v11, %v17059_v12  ;;  %9204 = vmatprep.subr.bf16.mxu1 %v18827_v19  ;;  %15419 = vmatprep.subr.bf16.mxu0 %v16914_v7 }
0x120b   :  { %9234 = vmatprep.mubr.bf16.mxu1 %v16916_v10  ;;  %15433 = vmatprep.mubr.msk.bf16.mxu0 %vm16913_vm0, %v16914_v7 }
0x120c   :  { %v8607_v60 = vcombine.high %v8606_v15, %v8606_v15  ;;  %v8614_v29 = vrot.slane %v8606_v15, %v17059_v12 }
0x120d   :  { %9205 = vmatpush1.bf16.msra.mxu1 %v18831_v33  ;;  %15420 = vmatpush3.bf16.msra.mxu0 %v16213_v30 }
0x120e   :  { %v8621_v3 = vrot.slane %v8607_v60, %v17059_v12  ;;  %v18849_v41 = vadd.f32 %v8614_v29, %v8597_v37  ;;  %9206 = vmatprep.subr.bf16.mxu1 %v18837_v61  ;;  %15421 = vmatprep.subr.bf16.mxu0 %v16914_v7 }
0x1210   :  { %v18855_v8 = vadd.f32 %v8621_v3, %v8598_v49  ;;  %16652 = vtanh.f32 %v18849_v41 }
0x1211   :  { %9207 = vmatpush1.bf16.msra.mxu1 %v18845_v28  ;;  %15422 = vmatpush3.bf16.msra.mxu0 %v16217_v16 }
0x1212   :  { %16654 = vtanh.f32 %v18855_v8  ;;  %9208 = vmatprep.subr.bf16.mxu1 %v18853_v62  ;;  %15423 = vmatprep.subr.bf16.mxu0 %v16914_v7 }
0x1215   :  { %9209 = vmatpush1.bf16.msra.mxu1 %v18859_v42  ;;  %15424 = vmatpush3.bf16.msra.mxu0 %v16221_v22 }
0x1216   :  { %9210 = vmatprep.subr.bf16.mxu1 %v18864_v52  ;;  %15425 = vmatprep.subr.bf16.mxu0 %v16914_v7 }
0x1219   :  { %9211 = vmatpush1.bf16.msra.mxu1 %v18867_v46  ;;  %15426 = vmatpush3.bf16.msra.mxu0 %v16225_v18 }
0x121a   :  { %v16653_v32 = vpop.eup %16652  ;;  %9212 = vmatprep.subr.bf16.mxu1 %v18871_v50  ;;  %15427 = vmatprep.subr.bf16.mxu0 %v16914_v7 }
0x121b   :  { %v8632_v27 = vmul.f32 %v16653_v32, %v8628_v51 }
0x121c   :  { %v16655_v48 = vpop.eup %16654 }
0x121d   :  { %9213 = vmatpush1.bf16.msra.mxu1 %v18874_v17  ;;  %15428 = vmatpush3.bf16.msra.mxu0 %v16229_v26  ;;  %v8633_v55 = vmul.f32 %v16655_v48, %v8629_v4  ;;  %8636 = vst [vmem:[#allocation4 + $0x6] sm:$0x1] %v8632_v27  ;;  %v9032_v11 = vpack.c.bf16 %v8632_v27, %v8632_v27 }
0x121e   :  { %9214 = vmatprep.subr.bf16.mxu1 %v18879_v47  ;;  %15429 = vmatprep.subr.bf16.mxu0 %v16914_v7 }
0x121f   :  { %8637 = vst [vmem:[#allocation4 + $0x16] sm:$0x1] %v8633_v55  ;;  %v9033_v30 = vpack.c.bf16 %v8633_v55, %v8633_v55  ;;  %v9068_v37 = vunpack.c.l.b16 %v9032_v11 }
0x1221   :  { %9215 = vmatpush1.bf16.msra.mxu1 %v18883_v0  ;;  %15430 = vmatpush3.bf16.msra.mxu0 %v16233_v36  ;;  %v9069_v15 = vunpack.c.l.b16 %v9033_v30 }
0x1222   :  { %9216 = vmatprep.subr.bf16.mxu1 %v18887_v44  ;;  %15431 = vmatprep.subr.bf16.mxu0 %v16914_v7 }
0x1223   :  { %v9070_v60 = vrot.slane %v9069_v15, 7 }
0x1225   :  { %9217 = vmatpush1.bf16.msra.mxu1 %v18890_v1  ;;  %15432 = vmatpush3.bf16.msra.mxu0 %v16237_v39  ;;  %v9071_v29 = vsel %vm1628_vm10, %v9070_v60, %v9068_v37 }
0x1226   :  { %v9072_v16 = vpack.c.b16 %v9071_v29, %v9071_v29  ;;  %9600 = vmatprep.subr.bf16.mxu1 %v18718_v58  ;;  %15437 = vmatprep.subr.bf16.mxu0 %v16914_v7 }
0x1228   :  { %9235 = vmatmul.mubr.bf16.vlgmr.msra.gmra.mrb[96].mxu1 %v9072_v16  ;;  %15434 = vmatmul.mubr.bf16.vlgmr.msra.gmra.mrb[104].mxu0 %v9072_v16 }
0x1229   :  { %9601 = vmatpush1.bf16.msra.mxu1 %v18722_v31  ;;  %9632 = vmatprep.mubr.bf16.mxu1 %v16916_v10 }
0x122a   :  { %9602 = vmatprep.subr.bf16.mxu1 %v18734_v35  ;;  %15453 = vmatprep.mubr.msk.bf16.mxu0 %vm16913_vm0, %v16914_v7 }
0x122d   :  { %9603 = vmatpush1.bf16.msra.mxu1 %v18737_v53 }
0x122e   :  { %9604 = vmatprep.subr.bf16.mxu1 %v18742_v43 }
0x1231   :  { %9605 = vmatpush1.bf16.msra.mxu1 %v18746_v14 }
0x1232   :  { %9606 = vmatprep.subr.bf16.mxu1 %v18754_v9 }
0x1235   :  { %9607 = vmatpush1.bf16.msra.mxu1 %v18752_v40 }
0x1236   :  { %9608 = vmatprep.subr.bf16.mxu1 %v18757_v45 }
0x1239   :  { %9609 = vmatpush1.bf16.msra.mxu1 %v18764_v24 }
0x123a   :  { %9610 = vmatprep.subr.bf16.mxu1 %v18768_v25 }
0x123d   :  { %9611 = vmatpush1.bf16.msra.mxu1 %v18771_v38 }
0x123e   :  { %9612 = vmatprep.subr.bf16.mxu1 %v18775_v63 }
0x1241   :  { %9613 = vmatpush1.bf16.msra.mxu1 %v18778_v56 }
0x1242   :  { %9614 = vmatprep.subr.bf16.mxu1 %v18782_v21 }
0x1245   :  { %9615 = vmatpush1.bf16.msra.mxu1 %v18785_v57  ;;  %v8639_v57 = vld [vmem:[#allocation2 + $0x32] ss:$8 sm:$0x7] }
0x1246   :  { %9986 = vmatprep.subr.bf16.mxu1 %v18793_v34  ;;  %v8641_v34 = vld [vmem:[#allocation2 + $0x92] ss:$8 sm:$0x7] }
0x12db   :  { %v8850_v58 = vpop.f32.mrb[92].mxu1  ;;  %v8891_v31 = vpop.f32.mrb[100].mxu0 }
0x12dc   :  { %v8852_v35 = vpop.f32.mrb[93].mxu1  ;;  %v15415_v53 = vpop.f32.mrb[101].mxu0  ;;  %v8914_v24 = vrot.slane %v8891_v31, %v17059_v12 }
0x12dd   :  { %v8900_v43 = vcombine.low %v8850_v58, %v8852_v35  ;;  %v8854_v14 = vpop.f32.mrb[94].mxu1  ;;  %v8894_v40 = vpop.f32.mrb[102].mxu0  ;;  %v16238_v58 = vld [vmem:[#allocation6 + $0x8] ss:$12 sps:$4 sm:$0xff]  }
0x12de   :  { %v8855_v9 = vpop.f32.mrb[95].mxu1  ;;  %v15416_v45 = vpop.f32.mrb[103].mxu0  ;;  %15438 = vmatpush3.bf16.msra.mxu0 %v16238_v58 }
0x12df   :  { %v8907_v25 = vrot.slane %v8900_v43, %v17059_v12  ;;  %v8643_v9 = vld [vmem:[#allocation2 + $0x1d] ss:$8 sm:$0x7]  ;;  %15439 = vmatprep.subr.bf16.mxu0 %v16914_v7 }
0x12e1   :  { %v8915_v38 = vcombine.low %v8907_v25, %v8914_v24  ;;  %v8916_v63 = vcombine.high %v8907_v25, %v8914_v24 }
0x12e3   :  { %v8923_v56 = vrot.slane %v8915_v38, %v17059_v12  ;;  %v8930_v21 = vrot.slane %v8916_v63, %v17059_v12  ;;  %v8645_v38 = vld [vmem:[#allocation2 + $0x7d] ss:$8 sm:$0x7] }
0x12e5   :  { %v8933_v49 = vadd.f32 %v8923_v56, %v8639_v57  ;;  %v8934_v3 = vadd.f32 %v8930_v21, %v8641_v34  ;;  %v16239_v56 = vld [vmem:[#allocation6 + $0x20] ss:$12 sps:$4 sm:$0xff]  }
0x12e6   :  { %15440 = vmatpush3.bf16.msra.mxu0 %v16239_v56 }
0x12e7   :  { %v14346_v22 = vmul.f32 -1.442695, %v8933_v49  ;;  %v14347_v18 = vmul.f32 -1.442695, %v8934_v3  ;;  %15441 = vmatprep.subr.bf16.mxu0 %v16914_v7 }
0x12e9   :  { %16656 = vpow2.f32 %v14346_v22 }
0x12ea   :  { %16658 = vpow2.f32 %v14347_v18 }
0x12f3   :  { %v16657_v26 = vpop.eup %16656 }
0x12f4   :  { %v16659_v51 = vpop.eup %16658  ;;  %v8941_v32 = vadd.f32 1.0, %v16657_v26  ;;  %v16240_v26 = vld [vmem:[#allocation6 + $0x38] ss:$12 sps:$4 sm:$0xff]  }
0x12f5   :  { %v8942_v4 = vadd.f32 1.0, %v16659_v51  ;;  %15442 = vmatpush3.bf16.msra.mxu0 %v16240_v26 }
0x12f6   :  { %16660 = vrcp.f32 %v8941_v32  ;;  %15443 = vmatprep.subr.bf16.mxu0 %v16914_v7 }
0x12f7   :  { %16662 = vrcp.f32 %v8942_v4  ;;  %v16241_v4 = vld [vmem:[#allocation6 + $0x50] ss:$12 sps:$4 sm:$0xff]  }
0x12f9   :  { %15444 = vmatpush3.bf16.msra.mxu0 %v16241_v4 }
0x12fa   :  { %15445 = vmatprep.subr.bf16.mxu0 %v16914_v7 }
0x12fb   :  { %v9236_v27 = vpop.f32.mrb[96].mxu1  ;;  %v9277_v48 = vpop.f32.mrb[104].mxu0 }
0x12fc   :  { %v9238_v36 = vpop.f32.mrb[97].mxu1  ;;  %v15435_v55 = vpop.f32.mrb[105].mxu0  ;;  %v9300_v60 = vrot.slane %v9277_v48, %v17059_v12  ;;  %v16242_v48 = vld [vmem:[#allocation6 + $0x68] ss:$12 sps:$4 sm:$0xff]  }
0x12fd   :  { %v9286_v11 = vcombine.low %v9236_v27, %v9238_v36  ;;  %v9240_v30 = vpop.f32.mrb[98].mxu1  ;;  %v9280_v39 = vpop.f32.mrb[106].mxu0  ;;  %15446 = vmatpush3.bf16.msra.mxu0 %v16242_v48  ;;  %v16243_v36 = vld [vmem:[#allocation6 + $0x80] ss:$12 sps:$4 sm:$0xff]  }
0x12fe   :  { %v9241_v15 = vpop.f32.mrb[99].mxu1  ;;  %v15436_v37 = vpop.f32.mrb[107].mxu0  ;;  %15447 = vmatprep.subr.bf16.mxu0 %v16914_v7 }
0x12ff   :  { %v9293_v29 = vrot.slane %v9286_v11, %v17059_v12  ;;  %v16244_v15 = vld [vmem:[#allocation6 + $0x98] ss:$12 sps:$4 sm:$0xff]   ;;  %v16245_v37 = vld [vmem:[#allocation6 + $0xb0] ss:$12 sps:$4 sm:$0xff]  }
0x1300   :  { %v18923_v16 = vpop.eup %16660 }
0x1301   :  { %v18925_v31 = vpop.eup %16662  ;;  %v9301_v35 = vcombine.low %v9293_v29, %v9300_v60  ;;  %v9302_v53 = vcombine.high %v9293_v29, %v9300_v60  ;;  %v8947_v43 = vmul.f32 2.0, %v18923_v16  ;;  %15448 = vmatpush3.bf16.msra.mxu0 %v16243_v36  ;;  %v8991_v56 = vrot.slane %v18923_v16, 1 }
0x1302   :  { %v8948_v14 = vmul.f32 2.0, %v18925_v31  ;;  %v8953_v40 = vcombine.low %v18923_v16, %v18925_v31  ;;  %15449 = vmatprep.subr.bf16.mxu0 %v16914_v7  ;;  %v9026_v4 = vrot.slane %v18923_v16, 2 }
0x1303   :  { %v9309_v45 = vrot.slane %v9301_v35, %v17059_v12  ;;  %v9316_v24 = vrot.slane %v9302_v53, %v17059_v12  ;;  %v14348_v25 = vadd.f32 -1.0, %v8947_v43 }
0x1304   :  { %v14349_v63 = vadd.f32 -1.0, %v8948_v14  ;;  %v8960_v34 = vrot.slane %v8953_v40, %v17059_v12 }
0x1305   :  { %v9319_v21 = vadd.f32 %v9309_v45, %v8643_v9  ;;  %v9320_v57 = vadd.f32 %v9316_v24, %v8645_v38  ;;  %15450 = vmatpush3.bf16.msra.mxu0 %v16244_v15 }
0x1306   :  { %v8971_v49 = vcombine.low %v14348_v25, %v14349_v63  ;;  %v8967_v51 = vrot.slane %v8960_v34, %v17059_v12  ;;  %15451 = vmatprep.subr.bf16.mxu0 %v16914_v7 }
0x1307   :  { %v14374_v3 = vmul.f32 -1.442695, %v9319_v21  ;;  %v14375_v22 = vmul.f32 -1.442695, %v9320_v57  ;;  %v8992_v57 = vrot.slane %v18925_v31, 1 }
0x1308   :  { %v8978_v18 = vrot.slane %v8971_v49, %v17059_v12  ;;  %v8995_v49 = vmul.f32 %v8991_v56, %v18816_v59  ;;  %v9027_v59 = vrot.slane %v18925_v31, 2  ;;  %v16247_v31 = vld [vmem:[#allocation9 + $0x20] ss:$12 sps:$4 sm:$0xff]  }
0x1309   :  { %16664 = vpow2.f32 %v14374_v3  ;;  %15452 = vmatpush3.bf16.msra.mxu0 %v16245_v37 }
0x130a   :  { %16666 = vpow2.f32 %v14375_v22  ;;  %v8985_v32 = vrot.slane %v8978_v18, %v17059_v12  ;;  %15457 = vmatprep.subr.bf16.mxu0 %v16914_v7  ;;  %v8996_v18 = vmul.f32 %v8992_v57, %v18818_v54 }
0x130c   :  { %v8987_v27 = vsel %vm817_vm9, %v8967_v51, %v8985_v32 }
0x130d   :  { %8988 = vrot.lane.b32.xlu0 %v8987_v27, %s16917_s6 }
0x1313   :  { %v16665_v55 = vpop.eup %16664 }
0x1314   :  { %v16667_v11 = vpop.eup %16666  ;;  %v9327_v30 = vadd.f32 1.0, %v16665_v55 }
0x1315   :  { %v9328_v39 = vadd.f32 1.0, %v16667_v11 }
0x1316   :  { %16668 = vrcp.f32 %v9327_v30 }
0x1317   :  { %16670 = vrcp.f32 %v9328_v39 }
0x1320   :  { %v18948_v60 = vpop.eup %16668 }
0x1321   :  { %v18950_v29 = vpop.eup %16670  ;;  %v9333_v58 = vmul.f32 2.0, %v18948_v60  ;;  %v9377_v16 = vrot.slane %v18948_v60, 1 }
0x1322   :  { %v9334_v35 = vmul.f32 2.0, %v18950_v29  ;;  %v9339_v53 = vcombine.low %v18948_v60, %v18950_v29 }
0x1323   :  { %v14376_v43 = vadd.f32 -1.0, %v9333_v58  ;;  %v16246_v58 = vld [vmem:[#allocation9 + $0x8] ss:$12 sps:$4 sm:$0xff]  }
0x1324   :  { %v14377_v14 = vadd.f32 -1.0, %v9334_v35  ;;  %v9346_v40 = vrot.slane %v9339_v53, %v17059_v12 }
0x1326   :  { %v9357_v9 = vcombine.low %v14376_v43, %v14377_v14  ;;  %v9353_v24 = vrot.slane %v9346_v40, %v17059_v12  ;;  %v9378_v14 = vrot.slane %v18950_v29, 1 }
0x1328   :  { %v9364_v45 = vrot.slane %v9357_v9, %v17059_v12  ;;  %v9381_v9 = vmul.f32 %v9377_v16, %v18849_v41  ;;  %v9412_v41 = vrot.slane %v18948_v60, 2 }
0x132a   :  { %v9371_v25 = vrot.slane %v9364_v45, %v17059_v12 }
0x132c   :  { %v9373_v38 = vsel %vm817_vm9, %v9353_v24, %v9371_v25  ;;  %v16248_v24 = vld [vmem:[#allocation9 + $0x38] ss:$12 sps:$4 sm:$0xff]   ;;  %v9382_v25 = vmul.f32 %v9378_v14, %v18855_v8 }
0x132d   :  { %9374 = vrot.lane.b32.xlu1 %v9373_v38, %s16917_s6 }
0x137f   :  { %v8989_v63 = vpop.permute.xlu0 %8988 }
0x1380   :  { %v8990_v21 = vmul.f32 %v8989_v63, %v8987_v27 }
0x1382   :  { %v9004_v34 = vrot.slane %v8990_v21, %v17059_v12 }
0x1384   :  { %v9005_v3 = vcombine.high %v9004_v34, %v9004_v34  ;;  %v9012_v22 = vrot.slane %v9004_v34, %v17059_v12 }
0x1386   :  { %v9019_v26 = vrot.slane %v9005_v3, %v17059_v12  ;;  %v18970_v51 = vadd.f32 %v9012_v22, %v8995_v49 }
0x1388   :  { %v18972_v32 = vadd.f32 %v9019_v26, %v8996_v18  ;;  %16672 = vtanh.f32 %v18970_v51 }
0x138a   :  { %16674 = vtanh.f32 %v18972_v32 }
0x1392   :  { %v16673_v27 = vpop.eup %16672 }
0x1393   :  { %v9030_v48 = vmul.f32 %v16673_v27, %v9026_v4 }
0x1394   :  { %v16675_v36 = vpop.eup %16674 }
0x1395   :  { %v9031_v55 = vmul.f32 %v16675_v36, %v9027_v59  ;;  %9418 = vst [vmem:[#allocation3 + $0xa] sm:$0x1] %v9030_v48  ;;  %v9430_v54 = vpack.c.bf16 %v9030_v48, %v9030_v48 }
0x1397   :  { %9419 = vst [vmem:[#allocation3 + $0x1a] sm:$0x1] %v9031_v55  ;;  %v9431_v11 = vpack.c.bf16 %v9031_v55, %v9031_v55  ;;  %v9466_v39 = vunpack.c.l.b16 %v9430_v54 }
0x1399   :  { %v9467_v30 = vunpack.c.l.b16 %v9431_v11  ;;  %v9423_v11 = vld [vmem:[#allocation2 + $0x33] ss:$8 sm:$0x7] }
0x139b   :  { %v9468_v15 = vrot.slane %v9467_v30, 7  ;;  %v9425_v30 = vld [vmem:[#allocation2 + $0x93] ss:$8 sm:$0x7] }
0x139d   :  { %v9469_v37 = vsel %vm1628_vm10, %v9468_v15, %v9466_v39 }
0x139e   :  { %v9470_v35 = vpack.c.b16 %v9469_v37, %v9469_v37 }
0x139f   :  { %v9375_v53 = vpop.permute.xlu1 %9374 }
0x13a0   :  { %v9376_v43 = vmul.f32 %v9375_v53, %v9373_v38  ;;  %9633 = vmatmul.mubr.bf16.vlgmr.msra.gmra.mrb[100].mxu1 %v9470_v35  ;;  %15454 = vmatmul.mubr.bf16.vlgmr.msra.gmra.mrb[108].mxu0 %v9470_v35 }
0x13a1   :  { %9987 = vmatpush1.bf16.msra.mxu1 %v18825_v20  ;;  %15458 = vmatpush3.bf16.msra.mxu0 %v16246_v58 }
0x13a2   :  { %v9390_v40 = vrot.slane %v9376_v43, %v17059_v12  ;;  %9988 = vmatprep.subr.bf16.mxu1 %v18827_v19  ;;  %15459 = vmatprep.subr.bf16.mxu0 %v16914_v7 }
0x13a3   :  { %10018 = vmatprep.mubr.bf16.mxu1 %v16916_v10  ;;  %15473 = vmatprep.mubr.msk.bf16.mxu0 %vm16913_vm0, %v16914_v7 }
0x13a4   :  { %v9391_v45 = vcombine.high %v9390_v40, %v9390_v40  ;;  %v9398_v20 = vrot.slane %v9390_v40, %v17059_v12 }
0x13a5   :  { %9989 = vmatpush1.bf16.msra.mxu1 %v18831_v33  ;;  %15460 = vmatpush3.bf16.msra.mxu0 %v16247_v31  ;;  %v16249_v33 = vld [vmem:[#allocation9 + $0x50] ss:$12 sps:$4 sm:$0xff]  }
0x13a6   :  { %v9405_v19 = vrot.slane %v9391_v45, %v17059_v12  ;;  %v18993_v38 = vadd.f32 %v9398_v20, %v9381_v9  ;;  %9990 = vmatprep.subr.bf16.mxu1 %v18837_v61  ;;  %15461 = vmatprep.subr.bf16.mxu0 %v16914_v7  ;;  %v16250_v61 = vld [vmem:[#allocation9 + $0x68] ss:$12 sps:$4 sm:$0xff]  }
0x13a8   :  { %v18997_v63 = vadd.f32 %v9405_v19, %v9382_v25  ;;  %16676 = vtanh.f32 %v18993_v38 }
0x13a9   :  { %9991 = vmatpush1.bf16.msra.mxu1 %v18845_v28  ;;  %15462 = vmatpush3.bf16.msra.mxu0 %v16248_v24  ;;  %v16251_v28 = vld [vmem:[#allocation9 + $0x80] ss:$12 sps:$4 sm:$0xff]  }
0x13aa   :  { %16678 = vtanh.f32 %v18997_v63  ;;  %9992 = vmatprep.subr.bf16.mxu1 %v18853_v62  ;;  %15463 = vmatprep.subr.bf16.mxu0 %v16914_v7  ;;  %v9413_v62 = vrot.slane %v18950_v29, 2 }
0x13ad   :  { %9993 = vmatpush1.bf16.msra.mxu1 %v18859_v42  ;;  %15464 = vmatpush3.bf16.msra.mxu0 %v16249_v33 }
0x13ae   :  { %9994 = vmatprep.subr.bf16.mxu1 %v18864_v52  ;;  %15465 = vmatprep.subr.bf16.mxu0 %v16914_v7  ;;  %v16252_v52 = vld [vmem:[#allocation9 + $0x98] ss:$12 sps:$4 sm:$0xff]  }
0x13b1   :  { %9995 = vmatpush1.bf16.msra.mxu1 %v18867_v46  ;;  %15466 = vmatpush3.bf16.msra.mxu0 %v16250_v61 }
0x13b2   :  { %v16677_v8 = vpop.eup %16676  ;;  %9996 = vmatprep.subr.bf16.mxu1 %v18871_v50  ;;  %15467 = vmatprep.subr.bf16.mxu0 %v16914_v7  ;;  %v16253_v50 = vld [vmem:[#allocation9 + $0xb0] ss:$12 sps:$4 sm:$0xff]  }
0x13b3   :  { %v9416_v42 = vmul.f32 %v16677_v8, %v9412_v41  ;;  %v19034_v8 = vld [vmem:[#allocation6] ss:$12 sps:$4 sm:$0xff]  }
0x13b4   :  { %v16679_v56 = vpop.eup %16678 }
0x13b5   :  { %9997 = vmatpush1.bf16.msra.mxu1 %v18874_v17  ;;  %15468 = vmatpush3.bf16.msra.mxu0 %v16251_v28  ;;  %v9417_v21 = vmul.f32 %v16679_v56, %v9413_v62  ;;  %9420 = vst [vmem:[#allocation4 + $0x5] sm:$0x1] %v9416_v42  ;;  %v9816_v46 = vpack.c.bf16 %v9416_v42, %v9416_v42  ;;  %v19030_v28 = vld [vmem:[#allocation6 + $0x4] ss:$12 sps:$4 sm:$0xff]   ;;  %v16257_v62 = vld [vmem:[#allocation6 + $0x8] ss:$12 sps:$4 sm:$0xff]  }
0x13b6   :  { %9998 = vmatprep.subr.bf16.mxu1 %v18879_v47  ;;  %15469 = vmatprep.subr.bf16.mxu0 %v16914_v7 }
0x13b7   :  { %9421 = vst [vmem:[#allocation4 + $0x15] sm:$0x1] %v9417_v21  ;;  %v9817_v60 = vpack.c.bf16 %v9417_v21, %v9417_v21  ;;  %v9852_v17 = vunpack.c.l.b16 %v9816_v46  ;;  %v9427_v46 = vld [vmem:[#allocation2 + $0x1c] ss:$8 sm:$0x7] }
0x13b9   :  { %9999 = vmatpush1.bf16.msra.mxu1 %v18883_v0  ;;  %15470 = vmatpush3.bf16.msra.mxu0 %v16252_v52  ;;  %v9853_v29 = vunpack.c.l.b16 %v9817_v60 }
0x13ba   :  { %10000 = vmatprep.subr.bf16.mxu1 %v18887_v44  ;;  %15471 = vmatprep.subr.bf16.mxu0 %v16914_v7 }
0x13bb   :  { %v9854_v57 = vrot.slane %v9853_v29, 7  ;;  %v9429_v29 = vld [vmem:[#allocation2 + $0x7c] ss:$8 sm:$0x7] }
0x13bd   :  { %10001 = vmatpush1.bf16.msra.mxu1 %v18890_v1  ;;  %15472 = vmatpush3.bf16.msra.mxu0 %v16253_v50  ;;  %v9855_v47 = vsel %vm1628_vm10, %v9854_v57, %v9852_v17 }
0x13be   :  { %v9856_v34 = vpack.c.b16 %v9855_v47, %v9855_v47  ;;  %15477 = vmatprep.subr.bf16.mxu0 %v16914_v7  ;;  %10384 = vmatprep.subr.bf16.mxu1 %v19030_v28 }
0x13c0   :  { %10019 = vmatmul.mubr.bf16.vlgmr.msra.gmra.mrb[104].mxu1 %v9856_v34  ;;  %15474 = vmatmul.mubr.bf16.vlgmr.msra.gmra.mrb[112].mxu0 %v9856_v34  ;;  %v19046_v34 = vld [vmem:[#allocation6 + $0x1c] ss:$12 sps:$4 sm:$0xff]  }
0x13c1   :  { %10416 = vmatprep.mubr.bf16.mxu1 %v16916_v10  ;;  %15493 = vmatprep.mubr.msk.bf16.mxu0 %vm16913_vm0, %v16914_v7 }
0x13c2   :  { %10385 = vmatpush1.bf16.msra.mxu1 %v19034_v8  ;;  %15478 = vmatpush3.bf16.msra.mxu0 %v16257_v62  ;;  %v19105_v62 = vld [vmem:[#allocation9 + $0x4] ss:$12 sps:$4 sm:$0xff]  }
0x13c3   :  { %15479 = vmatprep.subr.bf16.mxu0 %v16914_v7  ;;  %10386 = vmatprep.subr.bf16.mxu1 %v19046_v34 }
0x1473   :  { %v9634_v0 = vpop.f32.mrb[100].mxu1  ;;  %v9675_v44 = vpop.f32.mrb[108].mxu0 }
0x1474   :  { %v9636_v49 = vpop.f32.mrb[101].mxu1  ;;  %v15455_v3 = vpop.f32.mrb[109].mxu0  ;;  %v9698_v27 = vrot.slane %v9675_v44, %v17059_v12  ;;  %v19049_v44 = vld [vmem:[#allocation6 + $0x18] ss:$12 sps:$4 sm:$0xff]  }
0x1475   :  { %v9684_v22 = vcombine.low %v9634_v0, %v9636_v49  ;;  %v9638_v18 = vpop.f32.mrb[102].mxu1  ;;  %v9678_v1 = vpop.f32.mrb[110].mxu0  ;;  %v16261_v49 = vld [vmem:[#allocation6 + $0x20] ss:$12 sps:$4 sm:$0xff]   ;;  %10387 = vmatpush1.bf16.msra.mxu1 %v19049_v44 }
0x1476   :  { %v9639_v26 = vpop.f32.mrb[103].mxu1  ;;  %v15456_v4 = vpop.f32.mrb[111].mxu0  ;;  %15480 = vmatpush3.bf16.msra.mxu0 %v16261_v49 }
0x1477   :  { %v9691_v59 = vrot.slane %v9684_v22, %v17059_v12  ;;  %15481 = vmatprep.subr.bf16.mxu0 %v16914_v7 }
0x1479   :  { %v9699_v48 = vcombine.low %v9691_v59, %v9698_v27  ;;  %v9700_v36 = vcombine.high %v9691_v59, %v9698_v27  ;;  %v19054_v27 = vld [vmem:[#allocation6 + $0x34] ss:$12 sps:$4 sm:$0xff]  }
0x147a   :  { %10388 = vmatprep.subr.bf16.mxu1 %v19054_v27 }
0x147b   :  { %v9707_v55 = vrot.slane %v9699_v48, %v17059_v12  ;;  %v9714_v54 = vrot.slane %v9700_v36, %v17059_v12  ;;  %v19058_v48 = vld [vmem:[#allocation6 + $0x30] ss:$12 sps:$4 sm:$0xff]   ;;  %v16265_v36 = vld [vmem:[#allocation6 + $0x38] ss:$12 sps:$4 sm:$0xff]  }
0x147c   :  { %10389 = vmatpush1.bf16.msra.mxu1 %v19058_v48  ;;  %15482 = vmatpush3.bf16.msra.mxu0 %v16265_v36 }
0x147d   :  { %v9717_v39 = vadd.f32 %v9707_v55, %v9423_v11  ;;  %v9718_v15 = vadd.f32 %v9714_v54, %v9425_v30  ;;  %v19064_v11 = vld [vmem:[#allocation6 + $0x48] ss:$12 sps:$4 sm:$0xff]   ;;  %v19066_v30 = vld [vmem:[#allocation6 + $0x4c] ss:$12 sps:$4 sm:$0xff]   ;;  %15483 = vmatprep.subr.bf16.mxu0 %v16914_v7 }
0x147e   :  { %10390 = vmatprep.subr.bf16.mxu1 %v19066_v30 }
0x147f   :  { %v14402_v37 = vmul.f32 -1.442695, %v9717_v39  ;;  %v14403_v58 = vmul.f32 -1.442695, %v9718_v15  ;;  %v16269_v39 = vld [vmem:[#allocation6 + $0x50] ss:$12 sps:$4 sm:$0xff]  }
0x1480   :  { %v19069_v15 = vld [vmem:[#allocation6 + $0x64] ss:$12 sps:$4 sm:$0xff]   ;;  %10391 = vmatpush1.bf16.msra.mxu1 %v19064_v11  ;;  %15484 = vmatpush3.bf16.msra.mxu0 %v16269_v39 }
0x1481   :  { %16680 = vpow2.f32 %v14402_v37  ;;  %10392 = vmatprep.subr.bf16.mxu1 %v19069_v15  ;;  %15485 = vmatprep.subr.bf16.mxu0 %v16914_v7 }
0x1482   :  { %16682 = vpow2.f32 %v14403_v58  ;;  %v19076_v58 = vld [vmem:[#allocation6 + $0x60] ss:$12 sps:$4 sm:$0xff]  }
0x1484   :  { %10393 = vmatpush1.bf16.msra.mxu1 %v19076_v58 }
0x148b   :  { %v16681_v35 = vpop.eup %16680 }
0x148c   :  { %v16683_v53 = vpop.eup %16682  ;;  %v9725_v16 = vadd.f32 1.0, %v16681_v35  ;;  %v16273_v35 = vld [vmem:[#allocation6 + $0x68] ss:$12 sps:$4 sm:$0xff]  }
0x148d   :  { %v9726_v43 = vadd.f32 1.0, %v16683_v53  ;;  %v19080_v53 = vld [vmem:[#allocation6 + $0x7c] ss:$12 sps:$4 sm:$0xff]   ;;  %15486 = vmatpush3.bf16.msra.mxu0 %v16273_v35 }
0x148e   :  { %16684 = vrcp.f32 %v9725_v16  ;;  %v19083_v16 = vld [vmem:[#allocation6 + $0x78] ss:$12 sps:$4 sm:$0xff]   ;;  %10394 = vmatprep.subr.bf16.mxu1 %v19080_v53  ;;  %15487 = vmatprep.subr.bf16.mxu0 %v16914_v7 }
0x148f   :  { %16686 = vrcp.f32 %v9726_v43  ;;  %v16277_v43 = vld [vmem:[#allocation6 + $0x80] ss:$12 sps:$4 sm:$0xff]   ;;  %10395 = vmatpush1.bf16.msra.mxu1 %v19083_v16 }
0x1491   :  { %15488 = vmatpush3.bf16.msra.mxu0 %v16277_v43 }
0x1492   :  { %15489 = vmatprep.subr.bf16.mxu0 %v16914_v7 }
0x1493   :  { %v10020_v31 = vpop.f32.mrb[104].mxu1  ;;  %v10061_v14 = vpop.f32.mrb[112].mxu0 }
0x1494   :  { %v10022_v40 = vpop.f32.mrb[105].mxu1  ;;  %v15475_v9 = vpop.f32.mrb[113].mxu0  ;;  %v10084_v33 = vrot.slane %v10061_v14, %v17059_v12  ;;  %v19087_v14 = vld [vmem:[#allocation6 + $0x94] ss:$12 sps:$4 sm:$0xff]  }
0x1495   :  { %v10070_v45 = vcombine.low %v10020_v31, %v10022_v40  ;;  %v10024_v20 = vpop.f32.mrb[106].mxu1  ;;  %v10064_v24 = vpop.f32.mrb[114].mxu0  ;;  %10396 = vmatprep.subr.bf16.mxu1 %v19087_v14 }
0x1496   :  { %v10025_v25 = vpop.f32.mrb[107].mxu1  ;;  %v15476_v19 = vpop.f32.mrb[115].mxu0  ;;  %v19090_v20 = vld [vmem:[#allocation6 + $0x90] ss:$12 sps:$4 sm:$0xff]   ;;  %v16281_v24 = vld [vmem:[#allocation6 + $0x98] ss:$12 sps:$4 sm:$0xff]  }
0x1497   :  { %v10077_v61 = vrot.slane %v10070_v45, %v17059_v12  ;;  %v19094_v25 = vld [vmem:[#allocation6 + $0xac] ss:$12 sps:$4 sm:$0xff]   ;;  %10397 = vmatpush1.bf16.msra.mxu1 %v19090_v20  ;;  %15490 = vmatpush3.bf16.msra.mxu0 %v16281_v24  ;;  %v19097_v19 = vld [vmem:[#allocation6 + $0xa8] ss:$12 sps:$4 sm:$0xff]  }
0x1498   :  { %v19032_v41 = vpop.eup %16684  ;;  %10398 = vmatprep.subr.bf16.mxu1 %v19094_v25  ;;  %15491 = vmatprep.subr.bf16.mxu0 %v16914_v7 }
0x1499   :  { %v19036_v42 = vpop.eup %16686  ;;  %v10085_v56 = vcombine.low %v10077_v61, %v10084_v33  ;;  %v10086_v52 = vcombine.high %v10077_v61, %v10084_v33  ;;  %v9731_v21 = vmul.f32 2.0, %v19032_v41  ;;  %v16285_v33 = vld [vmem:[#allocation6 + $0xb0] ss:$12 sps:$4 sm:$0xff]  }
0x149a   :  { %v9732_v60 = vmul.f32 2.0, %v19036_v42  ;;  %v9737_v50 = vcombine.low %v19032_v41, %v19036_v42 }
0x149b   :  { %v10093_v17 = vrot.slane %v10085_v56, %v17059_v12  ;;  %v10100_v57 = vrot.slane %v10086_v52, %v17059_v12  ;;  %v14404_v47 = vadd.f32 -1.0, %v9731_v21  ;;  %10399 = vmatpush1.bf16.msra.mxu1 %v19097_v19  ;;  %15492 = vmatpush3.bf16.msra.mxu0 %v16285_v33 }
0x149c   :  { %v14405_v0 = vadd.f32 -1.0, %v9732_v60  ;;  %v9744_v18 = vrot.slane %v9737_v50, %v17059_v12  ;;  %15497 = vmatprep.subr.bf16.mxu0 %v16914_v7  ;;  %10770 = vmatprep.subr.bf16.mxu1 %v19105_v62 }
0x149d   :  { %v10103_v3 = vadd.f32 %v10093_v17, %v9427_v46  ;;  %v10104_v22 = vadd.f32 %v10100_v57, %v9429_v29 }
0x149e   :  { %v9755_v1 = vcombine.low %v14404_v47, %v14405_v0  ;;  %v9751_v55 = vrot.slane %v9744_v18, %v17059_v12 }
0x149f   :  { %v14430_v26 = vmul.f32 -1.442695, %v10103_v3  ;;  %v14431_v4 = vmul.f32 -1.442695, %v10104_v22  ;;  %v9775_v22 = vrot.slane %v19032_v41, 1 }
0x14a0   :  { %v9762_v59 = vrot.slane %v9755_v1, %v17059_v12  ;;  %v9776_v1 = vrot.slane %v19036_v42, 1 }
0x14a1   :  { %16688 = vpow2.f32 %v14430_v26 }
0x14a2   :  { %16690 = vpow2.f32 %v14431_v4  ;;  %v9769_v54 = vrot.slane %v9762_v59, %v17059_v12  ;;  %v9779_v4 = vmul.f32 %v9775_v22, %v18970_v51  ;;  %v9811_v51 = vrot.slane %v19036_v42, 2  ;;  %v19149_v22 = vld [vmem:[#allocation9 + $0x34] ss:$12 sps:$4 sm:$0xff]  }
0x14a4   :  { %v9771_v37 = vsel %vm817_vm9, %v9751_v55, %v9769_v54  ;;  %v9780_v55 = vmul.f32 %v9776_v1, %v18972_v32 }
0x14a5   :  { %9772 = vrot.lane.b32.xlu0 %v9771_v37, %s16917_s6 }
0x14ab   :  { %v16689_v31 = vpop.eup %16688 }
0x14ac   :  { %v16691_v40 = vpop.eup %16690  ;;  %v10111_v9 = vadd.f32 1.0, %v16689_v31 }
0x14ad   :  { %v10112_v45 = vadd.f32 1.0, %v16691_v40 }
0x14ae   :  { %16692 = vrcp.f32 %v10111_v9 }
0x14af   :  { %16694 = vrcp.f32 %v10112_v45 }
0x14b8   :  { %v19103_v61 = vpop.eup %16692 }
0x14b9   :  { %v19107_v56 = vpop.eup %16694  ;;  %v10117_v52 = vmul.f32 2.0, %v19103_v61  ;;  %v10161_v42 = vrot.slane %v19103_v61, 1 }
0x14ba   :  { %v10118_v21 = vmul.f32 2.0, %v19107_v56  ;;  %v10123_v46 = vcombine.low %v19103_v61, %v19107_v56 }
0x14bb   :  { %v14432_v60 = vadd.f32 -1.0, %v10117_v52 }
0x14bc   :  { %v14433_v50 = vadd.f32 -1.0, %v10118_v21  ;;  %v10130_v29 = vrot.slane %v10123_v46, %v17059_v12  ;;  %v19137_v46 = vld [vmem:[#allocation9] ss:$12 sps:$4 sm:$0xff]  }
0x14be   :  { %v10141_v17 = vcombine.low %v14432_v60, %v14433_v50  ;;  %v10137_v47 = vrot.slane %v10130_v29, %v17059_v12  ;;  %v16289_v60 = vld [vmem:[#allocation9 + $0x8] ss:$12 sps:$4 sm:$0xff]  }
0x14c0   :  { %v10148_v57 = vrot.slane %v10141_v17, %v17059_v12 }
0x14c2   :  { %v10155_v0 = vrot.slane %v10148_v57, %v17059_v12  ;;  %v19143_v57 = vld [vmem:[#allocation9 + $0x18] ss:$12 sps:$4 sm:$0xff]  }
0x14c4   :  { %v10157_v49 = vsel %vm817_vm9, %v10137_v47, %v10155_v0  ;;  %v16293_v47 = vld [vmem:[#allocation9 + $0x20] ss:$12 sps:$4 sm:$0xff]   ;;  %v10162_v0 = vrot.slane %v19107_v56, 1 }
0x14c5   :  { %10158 = vrot.lane.b32.xlu1 %v10157_v49, %s16917_s6 }
0x1517   :  { %v9773_v3 = vpop.permute.xlu0 %9772 }
0x1518   :  { %v9774_v18 = vmul.f32 %v9773_v3, %v9771_v37  ;;  %v9810_v37 = vrot.slane %v19032_v41, 2  ;;  %v19139_v41 = vld [vmem:[#allocation9 + $0x1c] ss:$12 sps:$4 sm:$0xff]  }
0x151a   :  { %v9788_v26 = vrot.slane %v9774_v18, %v17059_v12 }
0x151c   :  { %v9789_v59 = vcombine.high %v9788_v26, %v9788_v26  ;;  %v9796_v36 = vrot.slane %v9788_v26, %v17059_v12  ;;  %v19157_v26 = vld [vmem:[#allocation9 + $0x30] ss:$12 sps:$4 sm:$0xff]  }
0x151e   :  { %v9803_v54 = vrot.slane %v9789_v59, %v17059_v12  ;;  %v19128_v39 = vadd.f32 %v9796_v36, %v9779_v4  ;;  %v16297_v4 = vld [vmem:[#allocation9 + $0x38] ss:$12 sps:$4 sm:$0xff]   ;;  %v10166_v59 = vmul.f32 %v10162_v0, %v18997_v63  ;;  %v16301_v63 = vld [vmem:[#allocation9 + $0x50] ss:$12 sps:$4 sm:$0xff]  }
0x151f   :  { %v16317_v0 = vld [vmem:[#allocation9 + $0xb0] ss:$12 sps:$4 sm:$0xff]  }
0x1520   :  { %v19130_v35 = vadd.f32 %v9803_v54, %v9780_v55  ;;  %16696 = vtanh.f32 %v19128_v39 }
0x1522   :  { %16698 = vtanh.f32 %v19130_v35 }
0x152a   :  { %v16697_v43 = vpop.eup %16696 }
0x152b   :  { %v9814_v31 = vmul.f32 %v16697_v43, %v9810_v37  ;;  %v19171_v37 = vld [vmem:[#allocation9 + $0x48] ss:$12 sps:$4 sm:$0xff]   ;;  %v19176_v43 = vld [vmem:[#allocation9 + $0x64] ss:$12 sps:$4 sm:$0xff]  }
0x152c   :  { %v16699_v40 = vpop.eup %16698 }
0x152d   :  { %v9815_v9 = vmul.f32 %v16699_v40, %v9811_v51  ;;  %10202 = vst [vmem:[#allocation3 + $0xb] sm:$0x1] %v9814_v31  ;;  %v10214_v32 = vpack.c.bf16 %v9814_v31, %v9814_v31  ;;  %v19179_v51 = vld [vmem:[#allocation9 + $0x60] ss:$12 sps:$4 sm:$0xff]   ;;  %v16305_v31 = vld [vmem:[#allocation9 + $0x68] ss:$12 sps:$4 sm:$0xff]  }
0x152e   :  { %v19183_v40 = vld [vmem:[#allocation9 + $0x7c] ss:$12 sps:$4 sm:$0xff]  }
0x152f   :  { %10203 = vst [vmem:[#allocation3 + $0x1b] sm:$0x1] %v9815_v9  ;;  %v10215_v45 = vpack.c.bf16 %v9815_v9, %v9815_v9  ;;  %v10250_v33 = vunpack.c.l.b16 %v10214_v32  ;;  %v19186_v9 = vld [vmem:[#allocation9 + $0x78] ss:$12 sps:$4 sm:$0xff]   ;;  %v16309_v32 = vld [vmem:[#allocation9 + $0x80] ss:$12 sps:$4 sm:$0xff]  }
0x1531   :  { %v10251_v24 = vunpack.c.l.b16 %v10215_v45  ;;  %v10196_v45 = vrot.slane %v19103_v61, 2  ;;  %v19199_v61 = vld [vmem:[#allocation9 + $0xac] ss:$12 sps:$4 sm:$0xff]  }
0x1533   :  { %v10252_v52 = vrot.slane %v10251_v24, 7 }
0x1535   :  { %v10253_v21 = vsel %vm1628_vm10, %v10252_v52, %v10250_v33  ;;  %v19191_v33 = vld [vmem:[#allocation9 + $0x94] ss:$12 sps:$4 sm:$0xff]   ;;  %v10197_v52 = vrot.slane %v19107_v56, 2 }
0x1536   :  { %v10254_v50 = vpack.c.b16 %v10253_v21, %v10253_v21  ;;  %v19202_v56 = vld [vmem:[#allocation9 + $0xa8] ss:$12 sps:$4 sm:$0xff]  }
0x1537   :  { %v10159_v29 = vpop.permute.xlu1 %10158 }
0x1538   :  { %v10160_v17 = vmul.f32 %v10159_v29, %v10157_v49  ;;  %10417 = vmatmul.mubr.bf16.vlgmr.msra.gmra.mrb[108].mxu1 %v10254_v50  ;;  %15494 = vmatmul.mubr.bf16.vlgmr.msra.gmra.mrb[116].mxu0 %v10254_v50  ;;  %v10165_v49 = vmul.f32 %v10161_v42, %v18993_v38  ;;  %v19165_v38 = vld [vmem:[#allocation9 + $0x4c] ss:$12 sps:$4 sm:$0xff]   ;;  %v19195_v50 = vld [vmem:[#allocation9 + $0x90] ss:$12 sps:$4 sm:$0xff]  }
0x1539   :  { %10771 = vmatpush1.bf16.msra.mxu1 %v19137_v46  ;;  %15498 = vmatpush3.bf16.msra.mxu0 %v16289_v60  ;;  %v16313_v29 = vld [vmem:[#allocation9 + $0x98] ss:$12 sps:$4 sm:$0xff]  }
0x153a   :  { %v10174_v3 = vrot.slane %v10160_v17, %v17059_v12  ;;  %10772 = vmatprep.subr.bf16.mxu1 %v19139_v41  ;;  %15499 = vmatprep.subr.bf16.mxu0 %v16914_v7 }
0x153b   :  { %10802 = vmatprep.mubr.bf16.mxu1 %v16916_v10  ;;  %15513 = vmatprep.mubr.msk.bf16.mxu0 %vm16913_vm0, %v16914_v7 }
0x153c   :  { %v10175_v18 = vcombine.high %v10174_v3, %v10174_v3  ;;  %v10182_v1 = vrot.slane %v10174_v3, %v17059_v12 }
0x153d   :  { %10773 = vmatpush1.bf16.msra.mxu1 %v19143_v57  ;;  %15500 = vmatpush3.bf16.msra.mxu0 %v16293_v47 }
0x153e   :  { %v10189_v36 = vrot.slane %v10175_v18, %v17059_v12  ;;  %v19161_v55 = vadd.f32 %v10182_v1, %v10165_v49  ;;  %10774 = vmatprep.subr.bf16.mxu1 %v19149_v22  ;;  %15501 = vmatprep.subr.bf16.mxu0 %v16914_v7 }
0x1540   :  { %v19167_v54 = vadd.f32 %v10189_v36, %v10166_v59  ;;  %16700 = vtanh.f32 %v19161_v55 }
0x1541   :  { %10775 = vmatpush1.bf16.msra.mxu1 %v19157_v26  ;;  %15502 = vmatpush3.bf16.msra.mxu0 %v16297_v4 }
0x1542   :  { %16702 = vtanh.f32 %v19167_v54  ;;  %10776 = vmatprep.subr.bf16.mxu1 %v19165_v38  ;;  %15503 = vmatprep.subr.bf16.mxu0 %v16914_v7 }
0x1545   :  { %10777 = vmatpush1.bf16.msra.mxu1 %v19171_v37  ;;  %15504 = vmatpush3.bf16.msra.mxu0 %v16301_v63 }
0x1546   :  { %10778 = vmatprep.subr.bf16.mxu1 %v19176_v43  ;;  %15505 = vmatprep.subr.bf16.mxu0 %v16914_v7 }
0x1549   :  { %10779 = vmatpush1.bf16.msra.mxu1 %v19179_v51  ;;  %15506 = vmatpush3.bf16.msra.mxu0 %v16305_v31 }
0x154a   :  { %v16701_v24 = vpop.eup %16700  ;;  %10780 = vmatprep.subr.bf16.mxu1 %v19183_v40  ;;  %15507 = vmatprep.subr.bf16.mxu0 %v16914_v7 }
0x154b   :  { %v10200_v21 = vmul.f32 %v16701_v24, %v10196_v45 }
0x154c   :  { %v16703_v60 = vpop.eup %16702 }
0x154d   :  { %10781 = vmatpush1.bf16.msra.mxu1 %v19186_v9  ;;  %15508 = vmatpush3.bf16.msra.mxu0 %v16309_v32  ;;  %v10201_v42 = vmul.f32 %v16703_v60, %v10197_v52  ;;  %10204 = vst [vmem:[#allocation4 + $0x4] sm:$0x1] %v10200_v21  ;;  %v10600_v17 = vpack.c.bf16 %v10200_v21, %v10200_v21 }
0x154e   :  { %10782 = vmatprep.subr.bf16.mxu1 %v19191_v33  ;;  %15509 = vmatprep.subr.bf16.mxu0 %v16914_v7 }
0x154f   :  { %10205 = vst [vmem:[#allocation4 + $0x14] sm:$0x1] %v10201_v42  ;;  %v10601_v47 = vpack.c.bf16 %v10201_v42, %v10201_v42  ;;  %v10636_v49 = vunpack.c.l.b16 %v10600_v17 }
0x1551   :  { %10783 = vmatpush1.bf16.msra.mxu1 %v19195_v50  ;;  %15510 = vmatpush3.bf16.msra.mxu0 %v16313_v29  ;;  %v10637_v3 = vunpack.c.l.b16 %v10601_v47 }
0x1552   :  { %10784 = vmatprep.subr.bf16.mxu1 %v19199_v61  ;;  %15511 = vmatprep.subr.bf16.mxu0 %v16914_v7 }
0x1553   :  { %v10638_v18 = vrot.slane %v10637_v3, 7 }
0x1555   :  { %10785 = vmatpush1.bf16.msra.mxu1 %v19202_v56  ;;  %15512 = vmatpush3.bf16.msra.mxu0 %v16317_v0  ;;  %v10639_v1 = vsel %vm1628_vm10, %v10638_v18, %v10636_v49 }
0x1556   :  { %v10640_v4 = vpack.c.b16 %v10639_v1, %v10639_v1  ;;  %11168 = vmatprep.subr.bf16.mxu1 %v19030_v28  ;;  %15517 = vmatprep.subr.bf16.mxu0 %v16914_v7 }
0x1558   :  { %10803 = vmatmul.mubr.bf16.vlgmr.msra.gmra.mrb[112].mxu1 %v10640_v4  ;;  %15514 = vmatmul.mubr.bf16.vlgmr.msra.gmra.mrb[120].mxu0 %v10640_v4 }
0x1559   :  { %11169 = vmatpush1.bf16.msra.mxu1 %v19034_v8  ;;  %11200 = vmatprep.mubr.bf16.mxu1 %v16916_v10 }
0x155a   :  { %11170 = vmatprep.subr.bf16.mxu1 %v19046_v34  ;;  %15533 = vmatprep.mubr.msk.bf16.mxu0 %vm16913_vm0, %v16914_v7 }
0x155d   :  { %11171 = vmatpush1.bf16.msra.mxu1 %v19049_v44 }
0x155e   :  { %11172 = vmatprep.subr.bf16.mxu1 %v19054_v27 }
0x1561   :  { %11173 = vmatpush1.bf16.msra.mxu1 %v19058_v48 }
0x1562   :  { %11174 = vmatprep.subr.bf16.mxu1 %v19066_v30 }
0x1565   :  { %11175 = vmatpush1.bf16.msra.mxu1 %v19064_v11 }
0x1566   :  { %11176 = vmatprep.subr.bf16.mxu1 %v19069_v15 }
0x1569   :  { %11177 = vmatpush1.bf16.msra.mxu1 %v19076_v58 }
0x156a   :  { %11178 = vmatprep.subr.bf16.mxu1 %v19080_v53 }
0x156d   :  { %11179 = vmatpush1.bf16.msra.mxu1 %v19083_v16 }
0x156e   :  { %11180 = vmatprep.subr.bf16.mxu1 %v19087_v14 }
0x1571   :  { %11181 = vmatpush1.bf16.msra.mxu1 %v19090_v20 }
0x1572   :  { %11182 = vmatprep.subr.bf16.mxu1 %v19094_v25 }
0x1575   :  { %11183 = vmatpush1.bf16.msra.mxu1 %v19097_v19  ;;  %v10207_v19 = vld [vmem:[#allocation2 + $0x34] ss:$8 sm:$0x7] }
0x1576   :  { %11554 = vmatprep.subr.bf16.mxu1 %v19105_v62  ;;  %v10209_v62 = vld [vmem:[#allocation2 + $0x94] ss:$8 sm:$0x7] }
0x160b   :  { %v10418_v28 = vpop.f32.mrb[108].mxu1  ;;  %v10459_v8 = vpop.f32.mrb[116].mxu0 }
0x160c   :  { %v10420_v34 = vpop.f32.mrb[109].mxu1  ;;  %v15495_v44 = vpop.f32.mrb[117].mxu0  ;;  %v10482_v58 = vrot.slane %v10459_v8, %v17059_v12 }
0x160d   :  { %v10468_v27 = vcombine.low %v10418_v28, %v10420_v34  ;;  %v10422_v48 = vpop.f32.mrb[110].mxu1  ;;  %v10462_v11 = vpop.f32.mrb[118].mxu0 }
0x160e   :  { %v10423_v30 = vpop.f32.mrb[111].mxu1  ;;  %v15496_v15 = vpop.f32.mrb[119].mxu0 }
0x160f   :  { %v10475_v53 = vrot.slane %v10468_v27, %v17059_v12  ;;  %v16318_v27 = vld [vmem:[#allocation6 + $0x8] ss:$12 sps:$4 sm:$0xff]  }
0x1610   :  { %v10211_v30 = vld [vmem:[#allocation2 + $0x1b] ss:$8 sm:$0x7]  ;;  %15518 = vmatpush3.bf16.msra.mxu0 %v16318_v27 }
0x1611   :  { %v10483_v16 = vcombine.low %v10475_v53, %v10482_v58  ;;  %v10484_v14 = vcombine.high %v10475_v53, %v10482_v58  ;;  %15519 = vmatprep.subr.bf16.mxu0 %v16914_v7 }
0x1613   :  { %v10491_v20 = vrot.slane %v10483_v16, %v17059_v12  ;;  %v10498_v25 = vrot.slane %v10484_v14, %v17059_v12  ;;  %v10213_v16 = vld [vmem:[#allocation2 + $0x7b] ss:$8 sm:$0x7] }
0x1615   :  { %v10501_v59 = vadd.f32 %v10491_v20, %v10207_v19  ;;  %v10502_v36 = vadd.f32 %v10498_v25, %v10209_v62  ;;  %v16319_v19 = vld [vmem:[#allocation6 + $0x20] ss:$12 sps:$4 sm:$0xff]  }
0x1616   :  { %15520 = vmatpush3.bf16.msra.mxu0 %v16319_v19 }
0x1617   :  { %v14458_v63 = vmul.f32 -1.442695, %v10501_v59  ;;  %v14459_v31 = vmul.f32 -1.442695, %v10502_v36  ;;  %15521 = vmatprep.subr.bf16.mxu0 %v16914_v7 }
0x1619   :  { %16704 = vpow2.f32 %v14458_v63 }
0x161a   :  { %16706 = vpow2.f32 %v14459_v31 }
0x1623   :  { %v16705_v32 = vpop.eup %16704 }
0x1624   :  { %v16707_v45 = vpop.eup %16706  ;;  %v10509_v24 = vadd.f32 1.0, %v16705_v32  ;;  %v16320_v32 = vld [vmem:[#allocation6 + $0x38] ss:$12 sps:$4 sm:$0xff]  }
0x1625   :  { %v10510_v52 = vadd.f32 1.0, %v16707_v45  ;;  %15522 = vmatpush3.bf16.msra.mxu0 %v16320_v32 }
0x1626   :  { %16708 = vrcp.f32 %v10509_v24  ;;  %15523 = vmatprep.subr.bf16.mxu0 %v16914_v7 }
0x1627   :  { %16710 = vrcp.f32 %v10510_v52  ;;  %v16321_v52 = vld [vmem:[#allocation6 + $0x50] ss:$12 sps:$4 sm:$0xff]  }
0x1629   :  { %15524 = vmatpush3.bf16.msra.mxu0 %v16321_v52 }
0x162a   :  { %15525 = vmatprep.subr.bf16.mxu0 %v16914_v7 }
0x162b   :  { %v10804_v21 = vpop.f32.mrb[112].mxu1  ;;  %v10845_v60 = vpop.f32.mrb[120].mxu0 }
0x162c   :  { %v10806_v29 = vpop.f32.mrb[113].mxu1  ;;  %v15515_v42 = vpop.f32.mrb[121].mxu0  ;;  %v10868_v18 = vrot.slane %v10845_v60, %v17059_v12  ;;  %v16322_v60 = vld [vmem:[#allocation6 + $0x68] ss:$12 sps:$4 sm:$0xff]  }
0x162d   :  { %v10854_v17 = vcombine.low %v10804_v21, %v10806_v29  ;;  %v10808_v47 = vpop.f32.mrb[114].mxu1  ;;  %v10848_v0 = vpop.f32.mrb[122].mxu0  ;;  %15526 = vmatpush3.bf16.msra.mxu0 %v16322_v60  ;;  %v16323_v42 = vld [vmem:[#allocation6 + $0x80] ss:$12 sps:$4 sm:$0xff]  }
0x162e   :  { %v10809_v3 = vpop.f32.mrb[115].mxu1  ;;  %v15516_v49 = vpop.f32.mrb[123].mxu0  ;;  %15527 = vmatprep.subr.bf16.mxu0 %v16914_v7 }
0x162f   :  { %v10861_v1 = vrot.slane %v10854_v17, %v17059_v12  ;;  %v16324_v3 = vld [vmem:[#allocation6 + $0x98] ss:$12 sps:$4 sm:$0xff]   ;;  %v16325_v49 = vld [vmem:[#allocation6 + $0xb0] ss:$12 sps:$4 sm:$0xff]  }
0x1630   :  { %v19235_v4 = vpop.eup %16708 }
0x1631   :  { %v19237_v28 = vpop.eup %16710  ;;  %v10869_v8 = vcombine.low %v10861_v1, %v10868_v18  ;;  %v10870_v34 = vcombine.high %v10861_v1, %v10868_v18  ;;  %v10515_v44 = vmul.f32 2.0, %v19235_v4  ;;  %15528 = vmatpush3.bf16.msra.mxu0 %v16323_v42  ;;  %v10594_v52 = vrot.slane %v19235_v4, 2 }
0x1632   :  { %v10516_v48 = vmul.f32 2.0, %v19237_v28  ;;  %v10521_v11 = vcombine.low %v19235_v4, %v19237_v28  ;;  %15529 = vmatprep.subr.bf16.mxu0 %v16914_v7  ;;  %v10560_v19 = vrot.slane %v19237_v28, 1 }
0x1633   :  { %v10877_v15 = vrot.slane %v10869_v8, %v17059_v12  ;;  %v10884_v58 = vrot.slane %v10870_v34, %v17059_v12  ;;  %v14460_v53 = vadd.f32 -1.0, %v10515_v44 }
0x1634   :  { %v14461_v14 = vadd.f32 -1.0, %v10516_v48  ;;  %v10528_v62 = vrot.slane %v10521_v11, %v17059_v12 }
0x1635   :  { %v10887_v20 = vadd.f32 %v10877_v15, %v10211_v30  ;;  %v10888_v25 = vadd.f32 %v10884_v58, %v10213_v16  ;;  %15530 = vmatpush3.bf16.msra.mxu0 %v16324_v3 }
0x1636   :  { %v10539_v59 = vcombine.low %v14460_v53, %v14461_v14  ;;  %v10535_v45 = vrot.slane %v10528_v62, %v17059_v12  ;;  %15531 = vmatprep.subr.bf16.mxu0 %v16914_v7 }
0x1637   :  { %v14486_v36 = vmul.f32 -1.442695, %v10887_v20  ;;  %v14487_v63 = vmul.f32 -1.442695, %v10888_v25  ;;  %v10559_v20 = vrot.slane %v19235_v4, 1 }
0x1638   :  { %v10546_v31 = vrot.slane %v10539_v59, %v17059_v12 }
0x1639   :  { %16712 = vpow2.f32 %v14486_v36  ;;  %15532 = vmatpush3.bf16.msra.mxu0 %v16325_v49  ;;  %v10563_v59 = vmul.f32 %v10559_v20, %v19128_v39  ;;  %v10595_v39 = vrot.slane %v19237_v28, 2  ;;  %v16327_v28 = vld [vmem:[#allocation9 + $0x20] ss:$12 sps:$4 sm:$0xff]  }
0x163a   :  { %16714 = vpow2.f32 %v14487_v63  ;;  %v10553_v24 = vrot.slane %v10546_v31, %v17059_v12  ;;  %15537 = vmatprep.subr.bf16.mxu0 %v16914_v7  ;;  %v10564_v31 = vmul.f32 %v10560_v19, %v19130_v35 }
0x163c   :  { %v10555_v21 = vsel %vm817_vm9, %v10535_v45, %v10553_v24 }
0x163d   :  { %10556 = vrot.lane.b32.xlu0 %v10555_v21, %s16917_s6 }
0x1643   :  { %v16713_v29 = vpop.eup %16712 }
0x1644   :  { %v16715_v17 = vpop.eup %16714  ;;  %v10895_v47 = vadd.f32 1.0, %v16713_v29 }
0x1645   :  { %v10896_v0 = vadd.f32 1.0, %v16715_v17 }
0x1646   :  { %16716 = vrcp.f32 %v10895_v47 }
0x1647   :  { %16718 = vrcp.f32 %v10896_v0 }
0x1650   :  { %v19259_v18 = vpop.eup %16716 }
0x1651   :  { %v19262_v1 = vpop.eup %16718  ;;  %v10901_v8 = vmul.f32 2.0, %v19259_v18  ;;  %v10945_v4 = vrot.slane %v19259_v18, 1 }
0x1652   :  { %v10902_v34 = vmul.f32 2.0, %v19262_v1  ;;  %v10907_v44 = vcombine.low %v19259_v18, %v19262_v1 }
0x1653   :  { %v14488_v27 = vadd.f32 -1.0, %v10901_v8  ;;  %v16326_v8 = vld [vmem:[#allocation9 + $0x8] ss:$12 sps:$4 sm:$0xff]  }
0x1654   :  { %v14489_v48 = vadd.f32 -1.0, %v10902_v34  ;;  %v10914_v11 = vrot.slane %v10907_v44, %v17059_v12 }
0x1656   :  { %v10925_v30 = vcombine.low %v14488_v27, %v14489_v48  ;;  %v10921_v58 = vrot.slane %v10914_v11, %v17059_v12  ;;  %v10946_v48 = vrot.slane %v19262_v1, 1 }
0x1658   :  { %v10932_v15 = vrot.slane %v10925_v30, %v17059_v12  ;;  %v10949_v30 = vmul.f32 %v10945_v4, %v19161_v55  ;;  %v10980_v55 = vrot.slane %v19259_v18, 2 }
0x165a   :  { %v10939_v53 = vrot.slane %v10932_v15, %v17059_v12 }
0x165c   :  { %v10941_v16 = vsel %vm817_vm9, %v10921_v58, %v10939_v53  ;;  %v16328_v58 = vld [vmem:[#allocation9 + $0x38] ss:$12 sps:$4 sm:$0xff]   ;;  %v10950_v53 = vmul.f32 %v10946_v48, %v19167_v54 }
0x165d   :  { %10942 = vrot.lane.b32.xlu1 %v10941_v16, %s16917_s6 }
0x16af   :  { %v10557_v14 = vpop.permute.xlu0 %10556 }
0x16b0   :  { %v10558_v25 = vmul.f32 %v10557_v14, %v10555_v21 }
0x16b2   :  { %v10572_v62 = vrot.slane %v10558_v25, %v17059_v12 }
0x16b4   :  { %v10573_v36 = vcombine.high %v10572_v62, %v10572_v62  ;;  %v10580_v63 = vrot.slane %v10572_v62, %v17059_v12 }
0x16b6   :  { %v10587_v32 = vrot.slane %v10573_v36, %v17059_v12  ;;  %v19282_v45 = vadd.f32 %v10580_v63, %v10563_v59 }
0x16b8   :  { %v19284_v24 = vadd.f32 %v10587_v32, %v10564_v31  ;;  %16720 = vtanh.f32 %v19282_v45 }
0x16ba   :  { %16722 = vtanh.f32 %v19284_v24 }
0x16c2   :  { %v16721_v21 = vpop.eup %16720 }
0x16c3   :  { %v10598_v60 = vmul.f32 %v16721_v21, %v10594_v52 }
0x16c4   :  { %v16723_v29 = vpop.eup %16722 }
0x16c5   :  { %v10599_v42 = vmul.f32 %v16723_v29, %v10595_v39  ;;  %10986 = vst [vmem:[#allocation3 + $0xc] sm:$0x1] %v10598_v60  ;;  %v10998_v35 = vpack.c.bf16 %v10598_v60, %v10598_v60 }
0x16c7   :  { %10987 = vst [vmem:[#allocation3 + $0x1c] sm:$0x1] %v10599_v42  ;;  %v10999_v17 = vpack.c.bf16 %v10599_v42, %v10599_v42  ;;  %v11034_v0 = vunpack.c.l.b16 %v10998_v35 }
0x16c9   :  { %v11035_v47 = vunpack.c.l.b16 %v10999_v17  ;;  %v10991_v17 = vld [vmem:[#allocation2 + $0x35] ss:$8 sm:$0x7] }
0x16cb   :  { %v11036_v3 = vrot.slane %v11035_v47, 7  ;;  %v10993_v47 = vld [vmem:[#allocation2 + $0x95] ss:$8 sm:$0x7] }
0x16cd   :  { %v11037_v49 = vsel %vm1628_vm10, %v11036_v3, %v11034_v0 }
0x16ce   :  { %v11038_v34 = vpack.c.b16 %v11037_v49, %v11037_v49 }
0x16cf   :  { %v10943_v44 = vpop.permute.xlu1 %10942 }
0x16d0   :  { %v10944_v27 = vmul.f32 %v10943_v44, %v10941_v16  ;;  %11201 = vmatmul.mubr.bf16.vlgmr.msra.gmra.mrb[116].mxu1 %v11038_v34  ;;  %15534 = vmatmul.mubr.bf16.vlgmr.msra.gmra.mrb[124].mxu0 %v11038_v34 }
0x16d1   :  { %11555 = vmatpush1.bf16.msra.mxu1 %v19137_v46  ;;  %15538 = vmatpush3.bf16.msra.mxu0 %v16326_v8 }
0x16d2   :  { %v10958_v11 = vrot.slane %v10944_v27, %v17059_v12  ;;  %11556 = vmatprep.subr.bf16.mxu1 %v19139_v41  ;;  %15539 = vmatprep.subr.bf16.mxu0 %v16914_v7 }
0x16d3   :  { %11586 = vmatprep.mubr.bf16.mxu1 %v16916_v10  ;;  %15553 = vmatprep.mubr.msk.bf16.mxu0 %vm16913_vm0, %v16914_v7 }
0x16d4   :  { %v10959_v15 = vcombine.high %v10958_v11, %v10958_v11  ;;  %v10966_v46 = vrot.slane %v10958_v11, %v17059_v12 }
0x16d5   :  { %11557 = vmatpush1.bf16.msra.mxu1 %v19143_v57  ;;  %15540 = vmatpush3.bf16.msra.mxu0 %v16327_v28  ;;  %v16329_v57 = vld [vmem:[#allocation9 + $0x50] ss:$12 sps:$4 sm:$0xff]  }
0x16d6   :  { %v10973_v41 = vrot.slane %v10959_v15, %v17059_v12  ;;  %v19305_v16 = vadd.f32 %v10966_v46, %v10949_v30  ;;  %11558 = vmatprep.subr.bf16.mxu1 %v19149_v22  ;;  %15541 = vmatprep.subr.bf16.mxu0 %v16914_v7  ;;  %v16330_v22 = vld [vmem:[#allocation9 + $0x68] ss:$12 sps:$4 sm:$0xff]  }
0x16d8   :  { %v19309_v14 = vadd.f32 %v10973_v41, %v10950_v53  ;;  %16724 = vtanh.f32 %v19305_v16 }
0x16d9   :  { %11559 = vmatpush1.bf16.msra.mxu1 %v19157_v26  ;;  %15542 = vmatpush3.bf16.msra.mxu0 %v16328_v58  ;;  %v16331_v26 = vld [vmem:[#allocation9 + $0x80] ss:$12 sps:$4 sm:$0xff]  }
0x16da   :  { %16726 = vtanh.f32 %v19309_v14  ;;  %11560 = vmatprep.subr.bf16.mxu1 %v19165_v38  ;;  %15543 = vmatprep.subr.bf16.mxu0 %v16914_v7  ;;  %v10981_v38 = vrot.slane %v19262_v1, 2 }
0x16dd   :  { %11561 = vmatpush1.bf16.msra.mxu1 %v19171_v37  ;;  %15544 = vmatpush3.bf16.msra.mxu0 %v16329_v57 }
0x16de   :  { %11562 = vmatprep.subr.bf16.mxu1 %v19176_v43  ;;  %15545 = vmatprep.subr.bf16.mxu0 %v16914_v7  ;;  %v16332_v43 = vld [vmem:[#allocation9 + $0x98] ss:$12 sps:$4 sm:$0xff]  }
0x16e1   :  { %11563 = vmatpush1.bf16.msra.mxu1 %v19179_v51  ;;  %15546 = vmatpush3.bf16.msra.mxu0 %v16330_v22 }
0x16e2   :  { %v16725_v54 = vpop.eup %16724  ;;  %11564 = vmatprep.subr.bf16.mxu1 %v19183_v40  ;;  %15547 = vmatprep.subr.bf16.mxu0 %v16914_v7  ;;  %v16333_v40 = vld [vmem:[#allocation9 + $0xb0] ss:$12 sps:$4 sm:$0xff]  }
0x16e3   :  { %v10984_v37 = vmul.f32 %v16725_v54, %v10980_v55 }
0x16e4   :  { %v16727_v20 = vpop.eup %16726 }
0x16e5   :  { %11565 = vmatpush1.bf16.msra.mxu1 %v19186_v9  ;;  %15548 = vmatpush3.bf16.msra.mxu0 %v16331_v26  ;;  %v10985_v25 = vmul.f32 %v16727_v20, %v10981_v38  ;;  %10988 = vst [vmem:[#allocation4 + $0x3] sm:$0x1] %v10984_v37  ;;  %v11384_v51 = vpack.c.bf16 %v10984_v37, %v10984_v37 }
0x16e6   :  { %11566 = vmatprep.subr.bf16.mxu1 %v19191_v33  ;;  %15549 = vmatprep.subr.bf16.mxu0 %v16914_v7 }
0x16e7   :  { %10989 = vst [vmem:[#allocation4 + $0x13] sm:$0x1] %v10985_v25  ;;  %v11385_v18 = vpack.c.bf16 %v10985_v25, %v10985_v25  ;;  %v11420_v9 = vunpack.c.l.b16 %v11384_v51  ;;  %v10995_v25 = vld [vmem:[#allocation2 + $0x1a] ss:$8 sm:$0x7] }
0x16e9   :  { %11567 = vmatpush1.bf16.msra.mxu1 %v19195_v50  ;;  %15550 = vmatpush3.bf16.msra.mxu0 %v16332_v43  ;;  %v11421_v1 = vunpack.c.l.b16 %v11385_v18 }
0x16ea   :  { %11568 = vmatprep.subr.bf16.mxu1 %v19199_v61  ;;  %15551 = vmatprep.subr.bf16.mxu0 %v16914_v7 }
0x16eb   :  { %v11422_v19 = vrot.slane %v11421_v1, 7  ;;  %v10997_v1 = vld [vmem:[#allocation2 + $0x7a] ss:$8 sm:$0x7] }
0x16ed   :  { %11569 = vmatpush1.bf16.msra.mxu1 %v19202_v56  ;;  %15552 = vmatpush3.bf16.msra.mxu0 %v16333_v40  ;;  %v11423_v33 = vsel %vm1628_vm10, %v11422_v19, %v11420_v9 }
0x16ee   :  { %v11424_v62 = vpack.c.b16 %v11423_v33, %v11423_v33  ;;  %15557 = vmatprep.subr.bf16.mxu0 %v16914_v7 }
0x16f0   :  { %11587 = vmatmul.mubr.bf16.vlgmr.msra.gmra.mrb[120].mxu1 %v11424_v62  ;;  %15554 = vmatmul.mubr.bf16.vlgmr.msra.gmra.mrb[128].mxu0 %v11424_v62 }
0x16f1   :  { %11984 = vmatprep.mubr.bf16.mxu1 %v16916_v10  ;;  %15573 = vmatprep.mubr.msk.bf16.mxu0 %vm16913_vm0, %v16914_v7 }
0x17a3   :  { %v11202_v50 = vpop.f32.mrb[116].mxu1  ;;  %v11243_v61 = vpop.f32.mrb[124].mxu0 }
0x17a4   :  { %v11204_v59 = vpop.f32.mrb[117].mxu1  ;;  %v15535_v36 = vpop.f32.mrb[125].mxu0  ;;  %v11266_v21 = vrot.slane %v11243_v61, %v17059_v12 }
0x17a5   :  { %v11252_v63 = vcombine.low %v11202_v50, %v11204_v59  ;;  %v11206_v31 = vpop.f32.mrb[118].mxu1  ;;  %v11246_v56 = vpop.f32.mrb[126].mxu0 }
0x17a6   :  { %v11207_v32 = vpop.f32.mrb[119].mxu1  ;;  %v15536_v52 = vpop.f32.mrb[127].mxu0  ;;  %v19356_v56 = vld [vmem:[#allocation6] ss:$12 sps:$4 sm:$0xff]  }
0x17a7   :  { %v11259_v39 = vrot.slane %v11252_v63, %v17059_v12  ;;  %v19358_v32 = vld [vmem:[#allocation6 + $0x4] ss:$12 sps:$4 sm:$0xff]   ;;  %v16337_v52 = vld [vmem:[#allocation6 + $0x8] ss:$12 sps:$4 sm:$0xff]  }
0x17a8   :  { %11952 = vmatprep.subr.bf16.mxu1 %v19358_v32  ;;  %15558 = vmatpush3.bf16.msra.mxu0 %v16337_v52 }
0x17a9   :  { %v11267_v60 = vcombine.low %v11259_v39, %v11266_v21  ;;  %v11268_v29 = vcombine.high %v11259_v39, %v11266_v21  ;;  %v19360_v21 = vld [vmem:[#allocation6 + $0x1c] ss:$12 sps:$4 sm:$0xff]   ;;  %11953 = vmatpush1.bf16.msra.mxu1 %v19356_v56  ;;  %15559 = vmatprep.subr.bf16.mxu0 %v16914_v7 }
0x17aa   :  { %11954 = vmatprep.subr.bf16.mxu1 %v19360_v21 }
0x17ab   :  { %v11275_v42 = vrot.slane %v11267_v60, %v17059_v12  ;;  %v11282_v35 = vrot.slane %v11268_v29, %v17059_v12  ;;  %v16341_v60 = vld [vmem:[#allocation6 + $0x20] ss:$12 sps:$4 sm:$0xff]   ;;  %v19370_v29 = vld [vmem:[#allocation6 + $0x18] ss:$12 sps:$4 sm:$0xff]  }
0x17ac   :  { %15560 = vmatpush3.bf16.msra.mxu0 %v16341_v60 }
0x17ad   :  { %v11285_v0 = vadd.f32 %v11275_v42, %v10991_v17  ;;  %v11286_v3 = vadd.f32 %v11282_v35, %v10993_v47  ;;  %v19374_v42 = vld [vmem:[#allocation6 + $0x34] ss:$12 sps:$4 sm:$0xff]   ;;  %v16345_v35 = vld [vmem:[#allocation6 + $0x38] ss:$12 sps:$4 sm:$0xff]   ;;  %11955 = vmatpush1.bf16.msra.mxu1 %v19370_v29  ;;  %v19377_v17 = vld [vmem:[#allocation6 + $0x30] ss:$12 sps:$4 sm:$0xff]   ;;  %15561 = vmatprep.subr.bf16.mxu0 %v16914_v7 }
0x17ae   :  { %11956 = vmatprep.subr.bf16.mxu1 %v19374_v42  ;;  %v19381_v47 = vld [vmem:[#allocation6 + $0x4c] ss:$12 sps:$4 sm:$0xff]  }
0x17af   :  { %v14514_v49 = vmul.f32 -1.442695, %v11285_v0  ;;  %v14515_v8 = vmul.f32 -1.442695, %v11286_v3 }
0x17b0   :  { %15562 = vmatpush3.bf16.msra.mxu0 %v16345_v35 }
0x17b1   :  { %16728 = vpow2.f32 %v14514_v49  ;;  %11957 = vmatpush1.bf16.msra.mxu1 %v19377_v17  ;;  %15563 = vmatprep.subr.bf16.mxu0 %v16914_v7 }
0x17b2   :  { %16730 = vpow2.f32 %v14515_v8  ;;  %v16349_v8 = vld [vmem:[#allocation6 + $0x50] ss:$12 sps:$4 sm:$0xff]   ;;  %11958 = vmatprep.subr.bf16.mxu1 %v19381_v47 }
0x17b4   :  { %15564 = vmatpush3.bf16.msra.mxu0 %v16349_v8 }
0x17b5   :  { %15565 = vmatprep.subr.bf16.mxu0 %v16914_v7 }
0x17bb   :  { %v16729_v34 = vpop.eup %16728 }
0x17bc   :  { %v16731_v44 = vpop.eup %16730  ;;  %v11293_v4 = vadd.f32 1.0, %v16729_v34 }
0x17bd   :  { %v11294_v27 = vadd.f32 1.0, %v16731_v44  ;;  %v19384_v44 = vld [vmem:[#allocation6 + $0x48] ss:$12 sps:$4 sm:$0xff]  }
0x17be   :  { %16732 = vrcp.f32 %v11293_v4  ;;  %v19388_v4 = vld [vmem:[#allocation6 + $0x64] ss:$12 sps:$4 sm:$0xff]   ;;  %11959 = vmatpush1.bf16.msra.mxu1 %v19384_v44 }
0x17bf   :  { %16734 = vrcp.f32 %v11294_v27  ;;  %v16353_v27 = vld [vmem:[#allocation6 + $0x68] ss:$12 sps:$4 sm:$0xff]   ;;  %11960 = vmatprep.subr.bf16.mxu1 %v19388_v4 }
0x17c0   :  { %15566 = vmatpush3.bf16.msra.mxu0 %v16353_v27 }
0x17c1   :  { %15567 = vmatprep.subr.bf16.mxu0 %v16914_v7 }
0x17c3   :  { %v11588_v28 = vpop.f32.mrb[120].mxu1  ;;  %v11629_v48 = vpop.f32.mrb[128].mxu0 }
0x17c4   :  { %v11590_v11 = vpop.f32.mrb[121].mxu1  ;;  %v15555_v30 = vpop.f32.mrb[129].mxu0  ;;  %v11652_v57 = vrot.slane %v11629_v48, %v17059_v12  ;;  %v19395_v48 = vld [vmem:[#allocation6 + $0x7c] ss:$12 sps:$4 sm:$0xff]  }
0x17c5   :  { %v11638_v15 = vcombine.low %v11588_v28, %v11590_v11  ;;  %v11592_v46 = vpop.f32.mrb[122].mxu1  ;;  %v11632_v58 = vpop.f32.mrb[130].mxu0  ;;  %v19391_v28 = vld [vmem:[#allocation6 + $0x60] ss:$12 sps:$4 sm:$0xff]   ;;  %v19398_v30 = vld [vmem:[#allocation6 + $0x78] ss:$12 sps:$4 sm:$0xff]  }
0x17c6   :  { %v11593_v53 = vpop.f32.mrb[123].mxu1  ;;  %v15556_v41 = vpop.f32.mrb[131].mxu0  ;;  %v16357_v11 = vld [vmem:[#allocation6 + $0x80] ss:$12 sps:$4 sm:$0xff]   ;;  %11961 = vmatpush1.bf16.msra.mxu1 %v19391_v28  ;;  %v16361_v58 = vld [vmem:[#allocation6 + $0x98] ss:$12 sps:$4 sm:$0xff]  }
0x17c7   :  { %v11645_v22 = vrot.slane %v11638_v15, %v17059_v12  ;;  %11962 = vmatprep.subr.bf16.mxu1 %v19395_v48  ;;  %v19402_v15 = vld [vmem:[#allocation6 + $0x94] ss:$12 sps:$4 sm:$0xff]   ;;  %15568 = vmatpush3.bf16.msra.mxu0 %v16357_v11 }
0x17c8   :  { %v19342_v26 = vpop.eup %16732  ;;  %15569 = vmatprep.subr.bf16.mxu0 %v16914_v7 }
0x17c9   :  { %v19344_v55 = vpop.eup %16734  ;;  %v11653_v54 = vcombine.low %v11645_v22, %v11652_v57  ;;  %v11654_v38 = vcombine.high %v11645_v22, %v11652_v57  ;;  %v11299_v37 = vmul.f32 2.0, %v19342_v26  ;;  %v19410_v57 = vld [vmem:[#allocation6 + $0x90] ss:$12 sps:$4 sm:$0xff]  }
0x17ca   :  { %v11300_v20 = vmul.f32 2.0, %v19344_v55  ;;  %v11305_v43 = vcombine.low %v19342_v26, %v19344_v55  ;;  %11963 = vmatpush1.bf16.msra.mxu1 %v19398_v30 }
0x17cb   :  { %v11661_v51 = vrot.slane %v11653_v54, %v17059_v12  ;;  %v11668_v18 = vrot.slane %v11654_v38, %v17059_v12  ;;  %v14516_v40 = vadd.f32 -1.0, %v11299_v37  ;;  %11964 = vmatprep.subr.bf16.mxu1 %v19402_v15  ;;  %v19417_v38 = vld [vmem:[#allocation6 + $0xac] ss:$12 sps:$4 sm:$0xff]   ;;  %15570 = vmatpush3.bf16.msra.mxu0 %v16361_v58 }
0x17cc   :  { %v14517_v9 = vadd.f32 -1.0, %v11300_v20  ;;  %v11312_v62 = vrot.slane %v11305_v43, %v17059_v12  ;;  %v16365_v43 = vld [vmem:[#allocation6 + $0xb0] ss:$12 sps:$4 sm:$0xff]   ;;  %15571 = vmatprep.subr.bf16.mxu0 %v16914_v7 }
0x17cd   :  { %v11671_v19 = vadd.f32 %v11661_v51, %v10995_v25  ;;  %v11672_v33 = vadd.f32 %v11668_v18, %v10997_v1  ;;  %v19420_v25 = vld [vmem:[#allocation6 + $0xa8] ss:$12 sps:$4 sm:$0xff]  }
0x17ce   :  { %v11323_v50 = vcombine.low %v14516_v40, %v14517_v9  ;;  %v11319_v63 = vrot.slane %v11312_v62, %v17059_v12  ;;  %11965 = vmatpush1.bf16.msra.mxu1 %v19410_v57 }
0x17cf   :  { %v14542_v61 = vmul.f32 -1.442695, %v11671_v19  ;;  %v14543_v59 = vmul.f32 -1.442695, %v11672_v33  ;;  %11966 = vmatprep.subr.bf16.mxu1 %v19417_v38  ;;  %15572 = vmatpush3.bf16.msra.mxu0 %v16365_v43  ;;  %v19430_v19 = vld [vmem:[#allocation9 + $0x4] ss:$12 sps:$4 sm:$0xff]  }
0x17d0   :  { %v11330_v36 = vrot.slane %v11323_v50, %v17059_v12  ;;  %15577 = vmatprep.subr.bf16.mxu0 %v16914_v7  ;;  %v11343_v50 = vrot.slane %v19342_v26, 1 }
0x17d1   :  { %16736 = vpow2.f32 %v14542_v61 }
0x17d2   :  { %16738 = vpow2.f32 %v14543_v59  ;;  %v11337_v31 = vrot.slane %v11330_v36, %v17059_v12  ;;  %11967 = vmatpush1.bf16.msra.mxu1 %v19420_v25  ;;  %v11344_v59 = vrot.slane %v19344_v55, 1 }
0x17d3   :  { %12338 = vmatprep.subr.bf16.mxu1 %v19430_v19 }
0x17d4   :  { %v19364_v39 = vsel %vm817_vm9, %v11319_v63, %v11337_v31  ;;  %v11347_v63 = vmul.f32 %v11343_v50, %v19282_v45  ;;  %v11348_v60 = vmul.f32 %v11344_v59, %v19284_v24  ;;  %v11379_v45 = vrot.slane %v19344_v55, 2  ;;  %v19465_v50 = vld [vmem:[#allocation9 + $0x34] ss:$12 sps:$4 sm:$0xff]  }
0x17d5   :  { %11340 = vrot.lane.b32.xlu0 %v19364_v39, %s16917_s6 }
0x17db   :  { %v16737_v0 = vpop.eup %16736 }
0x17dc   :  { %v16739_v3 = vpop.eup %16738  ;;  %v11679_v49 = vadd.f32 1.0, %v16737_v0 }
0x17dd   :  { %v11680_v34 = vadd.f32 1.0, %v16739_v3 }
0x17de   :  { %16740 = vrcp.f32 %v11679_v49 }
0x17df   :  { %16742 = vrcp.f32 %v11680_v34 }
0x17e8   :  { %v19404_v46 = vpop.eup %16740 }
0x17e9   :  { %v19406_v53 = vpop.eup %16742  ;;  %v11685_v41 = vmul.f32 2.0, %v19404_v46  ;;  %v11729_v55 = vrot.slane %v19404_v46, 1 }
0x17ea   :  { %v11686_v22 = vmul.f32 2.0, %v19406_v53  ;;  %v11691_v54 = vcombine.low %v19404_v46, %v19406_v53 }
0x17eb   :  { %v14544_v37 = vadd.f32 -1.0, %v11685_v41 }
0x17ec   :  { %v14545_v20 = vadd.f32 -1.0, %v11686_v22  ;;  %v11698_v51 = vrot.slane %v11691_v54, %v17059_v12 }
0x17ee   :  { %v11709_v18 = vcombine.low %v14544_v37, %v14545_v20  ;;  %v11705_v1 = vrot.slane %v11698_v51, %v17059_v12  ;;  %v19453_v37 = vld [vmem:[#allocation9] ss:$12 sps:$4 sm:$0xff]   ;;  %v16369_v20 = vld [vmem:[#allocation9 + $0x8] ss:$12 sps:$4 sm:$0xff]  }
0x17f0   :  { %v11716_v40 = vrot.slane %v11709_v18, %v17059_v12 }
0x17f2   :  { %v11723_v9 = vrot.slane %v11716_v40, %v17059_v12  ;;  %v19459_v40 = vld [vmem:[#allocation9 + $0x18] ss:$12 sps:$4 sm:$0xff]  }
0x17f4   :  { %v11725_v33 = vsel %vm817_vm9, %v11705_v1, %v11723_v9  ;;  %v16373_v1 = vld [vmem:[#allocation9 + $0x20] ss:$12 sps:$4 sm:$0xff]   ;;  %v11730_v9 = vrot.slane %v19406_v53, 1 }
0x17f5   :  { %11726 = vrot.lane.b32.xlu1 %v11725_v33, %s16917_s6 }
0x1847   :  { %v11341_v62 = vpop.permute.xlu0 %11340 }
0x1848   :  { %v11342_v61 = vmul.f32 %v11341_v62, %v19364_v39  ;;  %v11378_v39 = vrot.slane %v19342_v26, 2  ;;  %v19455_v26 = vld [vmem:[#allocation9 + $0x1c] ss:$12 sps:$4 sm:$0xff]  }
0x184a   :  { %v11356_v36 = vrot.slane %v11342_v61, %v17059_v12 }
0x184c   :  { %v11357_v31 = vcombine.high %v11356_v36, %v11356_v36  ;;  %v11364_v52 = vrot.slane %v11356_v36, %v17059_v12  ;;  %v19473_v36 = vld [vmem:[#allocation9 + $0x30] ss:$12 sps:$4 sm:$0xff]  }
0x184e   :  { %v11371_v35 = vrot.slane %v11357_v31, %v17059_v12  ;;  %v19444_v0 = vadd.f32 %v11364_v52, %v11347_v63  ;;  %v16377_v63 = vld [vmem:[#allocation9 + $0x38] ss:$12 sps:$4 sm:$0xff]   ;;  %v11734_v31 = vmul.f32 %v11730_v9, %v19309_v14  ;;  %v16381_v14 = vld [vmem:[#allocation9 + $0x50] ss:$12 sps:$4 sm:$0xff]  }
0x184f   :  { %v16397_v9 = vld [vmem:[#allocation9 + $0xb0] ss:$12 sps:$4 sm:$0xff]  }
0x1850   :  { %v19446_v3 = vadd.f32 %v11371_v35, %v11348_v60  ;;  %16744 = vtanh.f32 %v19444_v0 }
0x1852   :  { %16746 = vtanh.f32 %v19446_v3 }
0x185a   :  { %v16745_v49 = vpop.eup %16744 }
0x185b   :  { %v11382_v8 = vmul.f32 %v16745_v49, %v11378_v39  ;;  %v19487_v39 = vld [vmem:[#allocation9 + $0x48] ss:$12 sps:$4 sm:$0xff]   ;;  %v19492_v49 = vld [vmem:[#allocation9 + $0x64] ss:$12 sps:$4 sm:$0xff]  }
0x185c   :  { %v16747_v34 = vpop.eup %16746 }
0x185d   :  { %v11383_v27 = vmul.f32 %v16747_v34, %v11379_v45  ;;  %11770 = vst [vmem:[#allocation3 + $0xd] sm:$0x1] %v11382_v8  ;;  %v11782_v24 = vpack.c.bf16 %v11382_v8, %v11382_v8  ;;  %v19495_v45 = vld [vmem:[#allocation9 + $0x60] ss:$12 sps:$4 sm:$0xff]   ;;  %v16385_v8 = vld [vmem:[#allocation9 + $0x68] ss:$12 sps:$4 sm:$0xff]  }
0x185e   :  { %v19499_v34 = vld [vmem:[#allocation9 + $0x7c] ss:$12 sps:$4 sm:$0xff]  }
0x185f   :  { %11771 = vst [vmem:[#allocation3 + $0x1d] sm:$0x1] %v11383_v27  ;;  %v11783_v11 = vpack.c.bf16 %v11383_v27, %v11383_v27  ;;  %v11818_v41 = vunpack.c.l.b16 %v11782_v24  ;;  %v19502_v27 = vld [vmem:[#allocation9 + $0x78] ss:$12 sps:$4 sm:$0xff]   ;;  %v16389_v24 = vld [vmem:[#allocation9 + $0x80] ss:$12 sps:$4 sm:$0xff]  }
0x1861   :  { %v11819_v58 = vunpack.c.l.b16 %v11783_v11  ;;  %v11764_v11 = vrot.slane %v19404_v46, 2  ;;  %v19515_v46 = vld [vmem:[#allocation9 + $0xac] ss:$12 sps:$4 sm:$0xff]  }
0x1863   :  { %v11820_v22 = vrot.slane %v11819_v58, 7 }
0x1865   :  { %v11821_v54 = vsel %vm1628_vm10, %v11820_v22, %v11818_v41  ;;  %v19507_v41 = vld [vmem:[#allocation9 + $0x94] ss:$12 sps:$4 sm:$0xff]   ;;  %v11765_v22 = vrot.slane %v19406_v53, 2 }
0x1866   :  { %v11822_v43 = vpack.c.b16 %v11821_v54, %v11821_v54  ;;  %v19518_v53 = vld [vmem:[#allocation9 + $0xa8] ss:$12 sps:$4 sm:$0xff]  }
0x1867   :  { %v11727_v51 = vpop.permute.xlu1 %11726 }
0x1868   :  { %v11728_v18 = vmul.f32 %v11727_v51, %v11725_v33  ;;  %11985 = vmatmul.mubr.bf16.vlgmr.msra.gmra.mrb[124].mxu1 %v11822_v43  ;;  %15574 = vmatmul.mubr.bf16.vlgmr.msra.gmra.mrb[132].mxu0 %v11822_v43  ;;  %v11733_v33 = vmul.f32 %v11729_v55, %v19305_v16  ;;  %v19481_v16 = vld [vmem:[#allocation9 + $0x4c] ss:$12 sps:$4 sm:$0xff]   ;;  %v19511_v43 = vld [vmem:[#allocation9 + $0x90] ss:$12 sps:$4 sm:$0xff]  }
0x1869   :  { %12339 = vmatpush1.bf16.msra.mxu1 %v19453_v37  ;;  %15578 = vmatpush3.bf16.msra.mxu0 %v16369_v20  ;;  %v16393_v51 = vld [vmem:[#allocation9 + $0x98] ss:$12 sps:$4 sm:$0xff]  }
0x186a   :  { %v11742_v62 = vrot.slane %v11728_v18, %v17059_v12  ;;  %12340 = vmatprep.subr.bf16.mxu1 %v19455_v26  ;;  %15579 = vmatprep.subr.bf16.mxu0 %v16914_v7 }
0x186b   :  { %12370 = vmatprep.mubr.bf16.mxu1 %v16916_v10  ;;  %15593 = vmatprep.mubr.msk.bf16.mxu0 %vm16913_vm0, %v16914_v7 }
0x186c   :  { %v11743_v61 = vcombine.high %v11742_v62, %v11742_v62  ;;  %v11750_v59 = vrot.slane %v11742_v62, %v17059_v12 }
0x186d   :  { %12341 = vmatpush1.bf16.msra.mxu1 %v19459_v40  ;;  %15580 = vmatpush3.bf16.msra.mxu0 %v16373_v1 }
0x186e   :  { %v11757_v52 = vrot.slane %v11743_v61, %v17059_v12  ;;  %v19477_v60 = vadd.f32 %v11750_v59, %v11733_v33  ;;  %12342 = vmatprep.subr.bf16.mxu1 %v19465_v50  ;;  %15581 = vmatprep.subr.bf16.mxu0 %v16914_v7 }
0x1870   :  { %v19483_v35 = vadd.f32 %v11757_v52, %v11734_v31  ;;  %16748 = vtanh.f32 %v19477_v60 }
0x1871   :  { %12343 = vmatpush1.bf16.msra.mxu1 %v19473_v36  ;;  %15582 = vmatpush3.bf16.msra.mxu0 %v16377_v63 }
0x1872   :  { %16750 = vtanh.f32 %v19483_v35  ;;  %12344 = vmatprep.subr.bf16.mxu1 %v19481_v16  ;;  %15583 = vmatprep.subr.bf16.mxu0 %v16914_v7 }
0x1875   :  { %12345 = vmatpush1.bf16.msra.mxu1 %v19487_v39  ;;  %15584 = vmatpush3.bf16.msra.mxu0 %v16381_v14 }
0x1876   :  { %12346 = vmatprep.subr.bf16.mxu1 %v19492_v49  ;;  %15585 = vmatprep.subr.bf16.mxu0 %v16914_v7 }
0x1879   :  { %12347 = vmatpush1.bf16.msra.mxu1 %v19495_v45  ;;  %15586 = vmatpush3.bf16.msra.mxu0 %v16385_v8 }
0x187a   :  { %v16749_v58 = vpop.eup %16748  ;;  %12348 = vmatprep.subr.bf16.mxu1 %v19499_v34  ;;  %15587 = vmatprep.subr.bf16.mxu0 %v16914_v7 }
0x187b   :  { %v11768_v54 = vmul.f32 %v16749_v58, %v11764_v11 }
0x187c   :  { %v16751_v20 = vpop.eup %16750 }
0x187d   :  { %12349 = vmatpush1.bf16.msra.mxu1 %v19502_v27  ;;  %15588 = vmatpush3.bf16.msra.mxu0 %v16389_v24  ;;  %v11769_v55 = vmul.f32 %v16751_v20, %v11765_v22  ;;  %11772 = vst [vmem:[#allocation4 + $0x2] sm:$0x1] %v11768_v54  ;;  %v12168_v18 = vpack.c.bf16 %v11768_v54, %v11768_v54 }
0x187e   :  { %12350 = vmatprep.subr.bf16.mxu1 %v19507_v41  ;;  %15589 = vmatprep.subr.bf16.mxu0 %v16914_v7 }
0x187f   :  { %11773 = vst [vmem:[#allocation4 + $0x12] sm:$0x1] %v11769_v55  ;;  %v12169_v1 = vpack.c.bf16 %v11769_v55, %v11769_v55  ;;  %v12204_v33 = vunpack.c.l.b16 %v12168_v18 }
0x1881   :  { %12351 = vmatpush1.bf16.msra.mxu1 %v19511_v43  ;;  %15590 = vmatpush3.bf16.msra.mxu0 %v16393_v51  ;;  %v12205_v62 = vunpack.c.l.b16 %v12169_v1 }
0x1882   :  { %12352 = vmatprep.subr.bf16.mxu1 %v19515_v46  ;;  %15591 = vmatprep.subr.bf16.mxu0 %v16914_v7 }
0x1883   :  { %v12206_v61 = vrot.slane %v12205_v62, 7 }
0x1885   :  { %12353 = vmatpush1.bf16.msra.mxu1 %v19518_v53  ;;  %15592 = vmatpush3.bf16.msra.mxu0 %v16397_v9  ;;  %v12207_v59 = vsel %vm1628_vm10, %v12206_v61, %v12204_v33 }
0x1886   :  { %v12208_v63 = vpack.c.b16 %v12207_v59, %v12207_v59  ;;  %12736 = vmatprep.subr.bf16.mxu1 %v19358_v32  ;;  %15597 = vmatprep.subr.bf16.mxu0 %v16914_v7 }
0x1888   :  { %12371 = vmatmul.mubr.bf16.vlgmr.msra.gmra.mrb[128].mxu1 %v12208_v63  ;;  %15594 = vmatmul.mubr.bf16.vlgmr.msra.gmra.mrb[136].mxu0 %v12208_v63 }
0x1889   :  { %12737 = vmatpush1.bf16.msra.mxu1 %v19356_v56  ;;  %12768 = vmatprep.mubr.bf16.mxu1 %v16916_v10 }
0x188a   :  { %12738 = vmatprep.subr.bf16.mxu1 %v19360_v21  ;;  %15613 = vmatprep.mubr.msk.bf16.mxu0 %vm16913_vm0, %v16914_v7 }
0x188d   :  { %12739 = vmatpush1.bf16.msra.mxu1 %v19370_v29 }
0x188e   :  { %12740 = vmatprep.subr.bf16.mxu1 %v19374_v42 }
0x1891   :  { %12741 = vmatpush1.bf16.msra.mxu1 %v19377_v17 }
0x1892   :  { %12742 = vmatprep.subr.bf16.mxu1 %v19381_v47 }
0x1895   :  { %12743 = vmatpush1.bf16.msra.mxu1 %v19384_v44 }
0x1896   :  { %12744 = vmatprep.subr.bf16.mxu1 %v19388_v4 }
0x1899   :  { %12745 = vmatpush1.bf16.msra.mxu1 %v19391_v28 }
0x189a   :  { %12746 = vmatprep.subr.bf16.mxu1 %v19395_v48 }
0x189d   :  { %12747 = vmatpush1.bf16.msra.mxu1 %v19398_v30 }
0x189e   :  { %12748 = vmatprep.subr.bf16.mxu1 %v19402_v15 }
0x18a1   :  { %12749 = vmatpush1.bf16.msra.mxu1 %v19410_v57 }
0x18a2   :  { %12750 = vmatprep.subr.bf16.mxu1 %v19417_v38 }
0x18a5   :  { %12751 = vmatpush1.bf16.msra.mxu1 %v19420_v25  ;;  %v11775_v25 = vld [vmem:[#allocation2 + $0x36] ss:$8 sm:$0x7] }
0x18a6   :  { %13122 = vmatprep.subr.bf16.mxu1 %v19430_v19  ;;  %v11777_v19 = vld [vmem:[#allocation2 + $0x96] ss:$8 sm:$0x7] }
0x193b   :  { %v11986_v56 = vpop.f32.mrb[124].mxu1  ;;  %v12027_v32 = vpop.f32.mrb[132].mxu0 }
0x193c   :  { %v11988_v21 = vpop.f32.mrb[125].mxu1  ;;  %v15575_v29 = vpop.f32.mrb[133].mxu0  ;;  %v12050_v28 = vrot.slane %v12027_v32, %v17059_v12 }
0x193d   :  { %v12036_v42 = vcombine.low %v11986_v56, %v11988_v21  ;;  %v11990_v17 = vpop.f32.mrb[126].mxu1  ;;  %v12030_v47 = vpop.f32.mrb[134].mxu0 }
0x193e   :  { %v11991_v44 = vpop.f32.mrb[127].mxu1  ;;  %v15576_v4 = vpop.f32.mrb[135].mxu0  ;;  %v11779_v47 = vld [vmem:[#allocation2 + $0x19] ss:$8 sm:$0x7] }
0x193f   :  { %v12043_v48 = vrot.slane %v12036_v42, %v17059_v12 }
0x1941   :  { %v12051_v30 = vcombine.low %v12043_v48, %v12050_v28  ;;  %v12052_v15 = vcombine.high %v12043_v48, %v12050_v28  ;;  %v11781_v48 = vld [vmem:[#allocation2 + $0x79] ss:$8 sm:$0x7] }
0x1943   :  { %v12059_v57 = vrot.slane %v12051_v30, %v17059_v12  ;;  %v12066_v38 = vrot.slane %v12052_v15, %v17059_v12 }
0x1945   :  { %v12069_v31 = vadd.f32 %v12059_v57, %v11775_v25  ;;  %v12070_v52 = vadd.f32 %v12066_v38, %v11777_v19 }
0x1947   :  { %v14570_v14 = vmul.f32 -1.442695, %v12069_v31  ;;  %v14571_v8 = vmul.f32 -1.442695, %v12070_v52 }
0x1949   :  { %16752 = vpow2.f32 %v14570_v14 }
0x194a   :  { %16754 = vpow2.f32 %v14571_v8 }
0x1953   :  { %v16753_v24 = vpop.eup %16752 }
0x1954   :  { %v16755_v11 = vpop.eup %16754  ;;  %v12077_v58 = vadd.f32 1.0, %v16753_v24  ;;  %v16398_v24 = vld [vmem:[#allocation6 + $0x8] ss:$12 sps:$4 sm:$0xff]  }
0x1955   :  { %v12078_v22 = vadd.f32 1.0, %v16755_v11  ;;  %15598 = vmatpush3.bf16.msra.mxu0 %v16398_v24 }
0x1956   :  { %16756 = vrcp.f32 %v12077_v58  ;;  %v16399_v58 = vld [vmem:[#allocation6 + $0x20] ss:$12 sps:$4 sm:$0xff]   ;;  %15599 = vmatprep.subr.bf16.mxu0 %v16914_v7 }
0x1957   :  { %16758 = vrcp.f32 %v12078_v22  ;;  %v16400_v22 = vld [vmem:[#allocation6 + $0x38] ss:$12 sps:$4 sm:$0xff]  }
0x1959   :  { %15600 = vmatpush3.bf16.msra.mxu0 %v16399_v58 }
0x195a   :  { %15601 = vmatprep.subr.bf16.mxu0 %v16914_v7 }
0x195b   :  { %v12372_v54 = vpop.f32.mrb[128].mxu1  ;;  %v12413_v20 = vpop.f32.mrb[136].mxu0 }
0x195c   :  { %v12374_v51 = vpop.f32.mrb[129].mxu1  ;;  %v15595_v55 = vpop.f32.mrb[137].mxu0  ;;  %v12436_v61 = vrot.slane %v12413_v20, %v17059_v12 }
0x195d   :  { %v12422_v18 = vcombine.low %v12372_v54, %v12374_v51  ;;  %v12376_v1 = vpop.f32.mrb[130].mxu1  ;;  %v12416_v9 = vpop.f32.mrb[138].mxu0  ;;  %15602 = vmatpush3.bf16.msra.mxu0 %v16400_v22  ;;  %v16401_v55 = vld [vmem:[#allocation6 + $0x50] ss:$12 sps:$4 sm:$0xff]  }
0x195e   :  { %v12377_v62 = vpop.f32.mrb[131].mxu1  ;;  %v15596_v33 = vpop.f32.mrb[139].mxu0  ;;  %15603 = vmatprep.subr.bf16.mxu0 %v16914_v7  ;;  %v16402_v1 = vld [vmem:[#allocation6 + $0x68] ss:$12 sps:$4 sm:$0xff]   ;;  %v16403_v9 = vld [vmem:[#allocation6 + $0x80] ss:$12 sps:$4 sm:$0xff]  }
0x195f   :  { %v12429_v59 = vrot.slane %v12422_v18, %v17059_v12  ;;  %v16404_v33 = vld [vmem:[#allocation6 + $0x98] ss:$12 sps:$4 sm:$0xff]  }
0x1960   :  { %v19551_v63 = vpop.eup %16756 }
0x1961   :  { %v19553_v56 = vpop.eup %16758  ;;  %v12437_v32 = vcombine.low %v12429_v59, %v12436_v61  ;;  %v12438_v21 = vcombine.high %v12429_v59, %v12436_v61  ;;  %v12083_v29 = vmul.f32 2.0, %v19551_v63  ;;  %15604 = vmatpush3.bf16.msra.mxu0 %v16401_v55 }
0x1962   :  { %v12084_v42 = vmul.f32 2.0, %v19553_v56  ;;  %v12089_v17 = vcombine.low %v19551_v63, %v19553_v56  ;;  %15605 = vmatprep.subr.bf16.mxu0 %v16914_v7 }
0x1963   :  { %v12445_v44 = vrot.slane %v12437_v32, %v17059_v12  ;;  %v12452_v4 = vrot.slane %v12438_v21, %v17059_v12  ;;  %v14572_v28 = vadd.f32 -1.0, %v12083_v29 }
0x1964   :  { %v14573_v30 = vadd.f32 -1.0, %v12084_v42  ;;  %v12096_v38 = vrot.slane %v12089_v17, %v17059_v12  ;;  %v16405_v17 = vld [vmem:[#allocation6 + $0xb0] ss:$12 sps:$4 sm:$0xff]  }
0x1965   :  { %v12455_v15 = vadd.f32 %v12445_v44, %v11779_v47  ;;  %v12456_v57 = vadd.f32 %v12452_v4, %v11781_v48  ;;  %15606 = vmatpush3.bf16.msra.mxu0 %v16402_v1 }
0x1966   :  { %v12107_v25 = vcombine.low %v14572_v28, %v14573_v30  ;;  %v12103_v14 = vrot.slane %v12096_v38, %v17059_v12  ;;  %15607 = vmatprep.subr.bf16.mxu0 %v16914_v7 }
0x1967   :  { %v14598_v19 = vmul.f32 -1.442695, %v12455_v15  ;;  %v14599_v31 = vmul.f32 -1.442695, %v12456_v57  ;;  %v12127_v57 = vrot.slane %v19551_v63, 1 }
0x1968   :  { %v12114_v52 = vrot.slane %v12107_v25, %v17059_v12  ;;  %v12128_v25 = vrot.slane %v19553_v56, 1 }
0x1969   :  { %16760 = vpow2.f32 %v14598_v19  ;;  %15608 = vmatpush3.bf16.msra.mxu0 %v16403_v9 }
0x196a   :  { %16762 = vpow2.f32 %v14599_v31  ;;  %v12121_v8 = vrot.slane %v12114_v52, %v17059_v12  ;;  %15609 = vmatprep.subr.bf16.mxu0 %v16914_v7  ;;  %v12131_v31 = vmul.f32 %v12127_v57, %v19444_v0  ;;  %v12163_v0 = vrot.slane %v19553_v56, 2  ;;  %v16407_v56 = vld [vmem:[#allocation9 + $0x20] ss:$12 sps:$4 sm:$0xff]  }
0x196c   :  { %v12123_v11 = vsel %vm817_vm9, %v12103_v14, %v12121_v8  ;;  %v12132_v8 = vmul.f32 %v12128_v25, %v19446_v3 }
0x196d   :  { %12124 = vrot.lane.b32.xlu0 %v12123_v11, %s16917_s6  ;;  %15610 = vmatpush3.bf16.msra.mxu0 %v16404_v33 }
0x196e   :  { %15611 = vmatprep.subr.bf16.mxu0 %v16914_v7 }
0x1971   :  { %15612 = vmatpush3.bf16.msra.mxu0 %v16405_v17 }
0x1972   :  { %15617 = vmatprep.subr.bf16.mxu0 %v16914_v7 }
0x1973   :  { %v16761_v54 = vpop.eup %16760 }
0x1974   :  { %v16763_v20 = vpop.eup %16762  ;;  %v12463_v51 = vadd.f32 1.0, %v16761_v54 }
0x1975   :  { %v12464_v18 = vadd.f32 1.0, %v16763_v20 }
0x1976   :  { %16764 = vrcp.f32 %v12463_v51 }
0x1977   :  { %16766 = vrcp.f32 %v12464_v18 }
0x1980   :  { %v19573_v62 = vpop.eup %16764 }
0x1981   :  { %v19575_v61 = vpop.eup %16766  ;;  %v12469_v59 = vmul.f32 2.0, %v19573_v62 }
0x1982   :  { %v12470_v32 = vmul.f32 2.0, %v19575_v61  ;;  %v12475_v21 = vcombine.low %v19573_v62, %v19575_v61  ;;  %v12514_v17 = vrot.slane %v19575_v61, 1 }
0x1983   :  { %v14600_v29 = vadd.f32 -1.0, %v12469_v59 }
0x1984   :  { %v14601_v42 = vadd.f32 -1.0, %v12470_v32  ;;  %v12482_v47 = vrot.slane %v12475_v21, %v17059_v12  ;;  %v16406_v32 = vld [vmem:[#allocation9 + $0x8] ss:$12 sps:$4 sm:$0xff]  }
0x1986   :  { %v12493_v44 = vcombine.low %v14600_v29, %v14601_v42  ;;  %v12489_v28 = vrot.slane %v12482_v47, %v17059_v12 }
0x1988   :  { %v12500_v4 = vrot.slane %v12493_v44, %v17059_v12 }
0x198a   :  { %v12507_v48 = vrot.slane %v12500_v4, %v17059_v12 }
0x198c   :  { %v12509_v30 = vsel %vm817_vm9, %v12489_v28, %v12507_v48  ;;  %v16408_v28 = vld [vmem:[#allocation9 + $0x38] ss:$12 sps:$4 sm:$0xff]   ;;  %v12518_v48 = vmul.f32 %v12514_v17, %v19483_v35 }
0x198d   :  { %12510 = vrot.lane.b32.xlu1 %v12509_v30, %s16917_s6 }
0x19df   :  { %v12125_v15 = vpop.permute.xlu0 %12124 }
0x19e0   :  { %v12126_v38 = vmul.f32 %v12125_v15, %v12123_v11  ;;  %v12162_v11 = vrot.slane %v19551_v63, 2  ;;  %v12513_v63 = vrot.slane %v19573_v62, 1 }
0x19e2   :  { %v12140_v19 = vrot.slane %v12126_v38, %v17059_v12  ;;  %v12517_v44 = vmul.f32 %v12513_v63, %v19477_v60  ;;  %v12548_v60 = vrot.slane %v19573_v62, 2 }
0x19e4   :  { %v12141_v52 = vcombine.high %v12140_v19, %v12140_v19  ;;  %v12148_v14 = vrot.slane %v12140_v19, %v17059_v12 }
0x19e6   :  { %v12155_v24 = vrot.slane %v12141_v52, %v17059_v12  ;;  %v19598_v58 = vadd.f32 %v12148_v14, %v12131_v31 }
0x19e8   :  { %v19600_v22 = vadd.f32 %v12155_v24, %v12132_v8  ;;  %16768 = vtanh.f32 %v19598_v58 }
0x19ea   :  { %16770 = vtanh.f32 %v19600_v22 }
0x19f2   :  { %v16769_v54 = vpop.eup %16768 }
0x19f3   :  { %v12166_v20 = vmul.f32 %v16769_v54, %v12162_v11 }
0x19f4   :  { %v16771_v51 = vpop.eup %16770 }
0x19f5   :  { %v12167_v55 = vmul.f32 %v16771_v51, %v12163_v0  ;;  %12554 = vst [vmem:[#allocation3 + $0xe] sm:$0x1] %v12166_v20  ;;  %v12566_v3 = vpack.c.bf16 %v12166_v20, %v12166_v20 }
0x19f7   :  { %12555 = vst [vmem:[#allocation3 + $0x1e] sm:$0x1] %v12167_v55  ;;  %v12567_v18 = vpack.c.bf16 %v12167_v55, %v12167_v55  ;;  %v12602_v9 = vunpack.c.l.b16 %v12566_v3  ;;  %v12561_v3 = vld [vmem:[#allocation2 + $0x97] ss:$8 sm:$0x7] }
0x19f9   :  { %v12603_v1 = vunpack.c.l.b16 %v12567_v18 }
0x19fb   :  { %v12604_v33 = vrot.slane %v12603_v1, 7 }
0x19fd   :  { %v12605_v59 = vsel %vm1628_vm10, %v12604_v33, %v12602_v9 }
0x19fe   :  { %v12606_v21 = vpack.c.b16 %v12605_v59, %v12605_v59 }
0x19ff   :  { %v12511_v29 = vpop.permute.xlu1 %12510 }
0x1a00   :  { %v12512_v42 = vmul.f32 %v12511_v29, %v12509_v30  ;;  %12769 = vmatmul.mubr.bf16.vlgmr.msra.gmra.mrb[132].mxu1 %v12606_v21  ;;  %15614 = vmatmul.mubr.bf16.vlgmr.msra.gmra.mrb[140].mxu0 %v12606_v21 }
0x1a01   :  { %13123 = vmatpush1.bf16.msra.mxu1 %v19453_v37  ;;  %15618 = vmatpush3.bf16.msra.mxu0 %v16406_v32 }
0x1a02   :  { %v12526_v47 = vrot.slane %v12512_v42, %v17059_v12  ;;  %13124 = vmatprep.subr.bf16.mxu1 %v19455_v26  ;;  %15619 = vmatprep.subr.bf16.mxu0 %v16914_v7 }
0x1a03   :  { %13154 = vmatprep.mubr.bf16.mxu1 %v16916_v10  ;;  %15633 = vmatprep.mubr.msk.bf16.mxu0 %vm16913_vm0, %v16914_v7 }
0x1a04   :  { %v12527_v4 = vcombine.high %v12526_v47, %v12526_v47  ;;  %v12534_v37 = vrot.slane %v12526_v47, %v17059_v12 }
0x1a05   :  { %13125 = vmatpush1.bf16.msra.mxu1 %v19459_v40  ;;  %15620 = vmatpush3.bf16.msra.mxu0 %v16407_v56  ;;  %v16409_v40 = vld [vmem:[#allocation9 + $0x50] ss:$12 sps:$4 sm:$0xff]  }
0x1a06   :  { %v12541_v26 = vrot.slane %v12527_v4, %v17059_v12  ;;  %v19621_v30 = vadd.f32 %v12534_v37, %v12517_v44  ;;  %13126 = vmatprep.subr.bf16.mxu1 %v19465_v50  ;;  %15621 = vmatprep.subr.bf16.mxu0 %v16914_v7  ;;  %v16410_v50 = vld [vmem:[#allocation9 + $0x68] ss:$12 sps:$4 sm:$0xff]  }
0x1a08   :  { %v19625_v10 = vadd.f32 %v12541_v26, %v12518_v48  ;;  %16772 = vtanh.f32 %v19621_v30 }
0x1a09   :  { %13127 = vmatpush1.bf16.msra.mxu1 %v19473_v36  ;;  %15622 = vmatpush3.bf16.msra.mxu0 %v16408_v28  ;;  %v16411_v36 = vld [vmem:[#allocation9 + $0x80] ss:$12 sps:$4 sm:$0xff]  }
0x1a0a   :  { %16774 = vtanh.f32 %v19625_v10  ;;  %13128 = vmatprep.subr.bf16.mxu1 %v19481_v16  ;;  %15623 = vmatprep.subr.bf16.mxu0 %v16914_v7  ;;  %v12549_v16 = vrot.slane %v19575_v61, 2 }
0x1a0d   :  { %13129 = vmatpush1.bf16.msra.mxu1 %v19487_v39  ;;  %15624 = vmatpush3.bf16.msra.mxu0 %v16409_v40 }
0x1a0e   :  { %13130 = vmatprep.subr.bf16.mxu1 %v19492_v49  ;;  %15625 = vmatprep.subr.bf16.mxu0 %v16914_v7  ;;  %v16412_v49 = vld [vmem:[#allocation9 + $0x98] ss:$12 sps:$4 sm:$0xff]  }
0x1a11   :  { %13131 = vmatpush1.bf16.msra.mxu1 %v19495_v45  ;;  %15626 = vmatpush3.bf16.msra.mxu0 %v16410_v50 }
0x1a12   :  { %v16773_v35 = vpop.eup %16772  ;;  %13132 = vmatprep.subr.bf16.mxu1 %v19499_v34  ;;  %15627 = vmatprep.subr.bf16.mxu0 %v16914_v7  ;;  %v16413_v34 = vld [vmem:[#allocation9 + $0xb0] ss:$12 sps:$4 sm:$0xff]  }
0x1a13   :  { %v12552_v39 = vmul.f32 %v16773_v35, %v12548_v60 }
0x1a14   :  { %v16775_v15 = vpop.eup %16774 }
0x1a15   :  { %13133 = vmatpush1.bf16.msra.mxu1 %v19502_v27  ;;  %15628 = vmatpush3.bf16.msra.mxu0 %v16411_v36  ;;  %v12553_v57 = vmul.f32 %v16775_v15, %v12549_v16  ;;  %12556 = vst [vmem:[#allocation4 + $0x1] sm:$0x1] %v12552_v39  ;;  %v12952_v45 = vpack.c.bf16 %v12552_v39, %v12552_v39  ;;  %v12563_v15 = vld [vmem:[#allocation2 + $0x18] ss:$8 sm:$0x7] }
0x1a16   :  { %13134 = vmatprep.subr.bf16.mxu1 %v19507_v41  ;;  %15629 = vmatprep.subr.bf16.mxu0 %v16914_v7 }
0x1a17   :  { %12557 = vst [vmem:[#allocation4 + $0x11] sm:$0x1] %v12553_v57  ;;  %v12953_v62 = vpack.c.bf16 %v12553_v57, %v12553_v57  ;;  %v12988_v27 = vunpack.c.l.b16 %v12952_v45 }
0x1a19   :  { %13135 = vmatpush1.bf16.msra.mxu1 %v19511_v43  ;;  %15630 = vmatpush3.bf16.msra.mxu0 %v16412_v49  ;;  %v12989_v61 = vunpack.c.l.b16 %v12953_v62  ;;  %v12565_v62 = vld [vmem:[#allocation2 + $0x78] ss:$8 sm:$0x7] }
0x1a1a   :  { %13136 = vmatprep.subr.bf16.mxu1 %v19515_v46  ;;  %15631 = vmatprep.subr.bf16.mxu0 %v16914_v7 }
0x1a1b   :  { %v12990_v38 = vrot.slane %v12989_v61, 7 }
0x1a1d   :  { %13137 = vmatpush1.bf16.msra.mxu1 %v19518_v53  ;;  %15632 = vmatpush3.bf16.msra.mxu0 %v16413_v34  ;;  %v12991_v41 = vsel %vm1628_vm10, %v12990_v38, %v12988_v27 }
0x1a1e   :  { %v12992_v25 = vpack.c.b16 %v12991_v41, %v12991_v41  ;;  %15721 = vmatprep.subr.bf16.mxu1 %v16911_v2  ;;  %15745 = vmatprep.subr.bf16.mxu0 %v16911_v2 }
0x1a20   :  { %13155 = vmatmul.mubr.bf16.vlgmr.msra.gmra.mrb[136].mxu1 %v12992_v25  ;;  %15634 = vmatmul.mubr.bf16.vlgmr.msra.gmra.mrb[144].mxu0 %v12992_v25 }
0x1a21   :  { %15669 = vmatprep.mubr.msk.f32.mxu1 %vm16913_vm0, %v16914_v7  ;;  %15688 = vmatprep.mubr.msk.f32.mxu0 %vm16913_vm0, %v16914_v7  ;;  %v12559_v7 = vld [vmem:[#allocation2 + $0x37] ss:$8 sm:$0x7] }
0x1ad3   :  { %v12770_v43 = vpop.f32.mrb[132].mxu1  ;;  %v12811_v46 = vpop.f32.mrb[140].mxu0 }
0x1ad4   :  { %v12772_v19 = vpop.f32.mrb[133].mxu1  ;;  %v15615_v53 = vpop.f32.mrb[141].mxu0  ;;  %v12834_v11 = vrot.slane %v12811_v46, %v17059_v12 }
0x1ad5   :  { %v12820_v31 = vcombine.low %v12770_v43, %v12772_v19  ;;  %v12774_v52 = vpop.f32.mrb[134].mxu1  ;;  %v12814_v14 = vpop.f32.mrb[142].mxu0 }
0x1ad6   :  { %v12775_v8 = vpop.f32.mrb[135].mxu1  ;;  %v15616_v24 = vpop.f32.mrb[143].mxu0 }
0x1ad7   :  { %v12827_v54 = vrot.slane %v12820_v31, %v17059_v12 }
0x1ad9   :  { %v12835_v0 = vcombine.low %v12827_v54, %v12834_v11  ;;  %v12836_v20 = vcombine.high %v12827_v54, %v12834_v11 }
0x1adb   :  { %v12843_v51 = vrot.slane %v12835_v0, %v17059_v12  ;;  %v12850_v55 = vrot.slane %v12836_v20, %v17059_v12 }
0x1add   :  { %v12853_v18 = vadd.f32 %v12843_v51, %v12559_v7  ;;  %v12854_v1 = vadd.f32 %v12850_v55, %v12561_v3 }
0x1adf   :  { %v14626_v9 = vmul.f32 -1.442695, %v12853_v18  ;;  %v14627_v33 = vmul.f32 -1.442695, %v12854_v1 }
0x1ae1   :  { %16776 = vpow2.f32 %v14626_v9 }
0x1ae2   :  { %16778 = vpow2.f32 %v14627_v33 }
0x1aeb   :  { %v16777_v59 = vpop.eup %16776 }
0x1aec   :  { %v16779_v32 = vpop.eup %16778  ;;  %v12861_v21 = vadd.f32 1.0, %v16777_v59 }
0x1aed   :  { %v12862_v29 = vadd.f32 1.0, %v16779_v32 }
0x1aee   :  { %16780 = vrcp.f32 %v12861_v21 }
0x1aef   :  { %16782 = vrcp.f32 %v12862_v29 }
0x1af3   :  { %v13156_v63 = vpop.f32.mrb[136].mxu1  ;;  %v13197_v42 = vpop.f32.mrb[144].mxu0 }
0x1af4   :  { %v13158_v56 = vpop.f32.mrb[137].mxu1  ;;  %v15635_v17 = vpop.f32.mrb[145].mxu0  ;;  %v13220_v48 = vrot.slane %v13197_v42, %v17059_v12 }
0x1af5   :  { %v13206_v47 = vcombine.low %v13156_v63, %v13158_v56  ;;  %v13160_v44 = vpop.f32.mrb[138].mxu1  ;;  %v13200_v4 = vpop.f32.mrb[146].mxu0 }
0x1af6   :  { %v13161_v37 = vpop.f32.mrb[139].mxu1  ;;  %v15636_v28 = vpop.f32.mrb[147].mxu0 }
0x1af7   :  { %v13213_v26 = vrot.slane %v13206_v47, %v17059_v12 }
0x1af8   :  { %v19660_v40 = vpop.eup %16780 }
0x1af9   :  { %v19662_v50 = vpop.eup %16782  ;;  %v13221_v36 = vcombine.low %v13213_v26, %v13220_v48  ;;  %v13222_v60 = vcombine.high %v13213_v26, %v13220_v48  ;;  %v12867_v35 = vmul.f32 2.0, %v19660_v40  ;;  %v12911_v21 = vrot.slane %v19660_v40, 1 }
0x1afa   :  { %v12868_v16 = vmul.f32 2.0, %v19662_v50  ;;  %v12873_v39 = vcombine.low %v19660_v40, %v19662_v50  ;;  %v12912_v63 = vrot.slane %v19662_v50, 1  ;;  %v12946_v48 = vrot.slane %v19660_v40, 2 }
0x1afb   :  { %v13229_v49 = vrot.slane %v13221_v36, %v17059_v12  ;;  %v13236_v57 = vrot.slane %v13222_v60, %v17059_v12  ;;  %v14628_v45 = vadd.f32 -1.0, %v12867_v35  ;;  %v12915_v56 = vmul.f32 %v12911_v21, %v19598_v58  ;;  %v14658_v58 = vld [vmem:[%s19833_s9] ss:$0 sm:$0xff] }
0x1afc   :  { %v14629_v34 = vadd.f32 -1.0, %v12868_v16  ;;  %v12880_v38 = vrot.slane %v12873_v39, %v17059_v12  ;;  %v12916_v44 = vmul.f32 %v12912_v63, %v19600_v22  ;;  %v12947_v36 = vrot.slane %v19662_v50, 2  ;;  %v13347_v39 = vld [vmem:[#allocation4 + $0x8] sm:$0xff] }
0x1afd   :  { %v13239_v61 = vadd.f32 %v13229_v49, %v12563_v15  ;;  %v13240_v27 = vadd.f32 %v13236_v57, %v12565_v62 }
0x1afe   :  { %v12891_v41 = vcombine.low %v14628_v45, %v14629_v34  ;;  %v12887_v19 = vrot.slane %v12880_v38, %v17059_v12 }
0x1aff   :  { %v14654_v25 = vmul.f32 -1.442695, %v13239_v61  ;;  %v14655_v43 = vmul.f32 -1.442695, %v13240_v27 }
0x1b00   :  { %v12898_v46 = vrot.slane %v12891_v41, %v17059_v12 }
0x1b01   :  { %16784 = vpow2.f32 %v14654_v25 }
0x1b02   :  { %16786 = vpow2.f32 %v14655_v43  ;;  %v12905_v53 = vrot.slane %v12898_v46, %v17059_v12  ;;  %v14659_v46 = vld [vmem:[#allocation5] ss:$0 sm:$0xff] }
0x1b04   :  { %v12907_v31 = vsel %vm817_vm9, %v12887_v19, %v12905_v53 }
0x1b05   :  { %12908 = vrot.lane.b32.xlu0 %v12907_v31, %s16917_s6 }
0x1b0b   :  { %v16785_v52 = vpop.eup %16784 }
0x1b0c   :  { %v16787_v14 = vpop.eup %16786  ;;  %v13247_v8 = vadd.f32 1.0, %v16785_v52 }
0x1b0d   :  { %v13248_v24 = vadd.f32 1.0, %v16787_v14 }
0x1b0e   :  { %16788 = vrcp.f32 %v13247_v8  ;;  %v13342_v8 = vld [vmem:[#allocation3] sm:$0xff] }
0x1b0f   :  { %16790 = vrcp.f32 %v13248_v24 }
0x1b18   :  { %v16789_v11 = vpop.eup %16788 }
0x1b19   :  { %v19677_v54 = vpop.eup %16790  ;;  %v13253_v0 = vmul.f32 2.0, %v16789_v11  ;;  %v13297_v57 = vrot.slane %v16789_v11, 1  ;;  %v13332_v19 = vrot.slane %v16789_v11, 2 }
0x1b1a   :  { %v13254_v20 = vmul.f32 2.0, %v19677_v54  ;;  %v13259_v51 = vcombine.low %v16789_v11, %v19677_v54  ;;  %v13298_v45 = vrot.slane %v19677_v54, 1 }
0x1b1b   :  { %v14656_v55 = vadd.f32 -1.0, %v13253_v0  ;;  %v13301_v34 = vmul.f32 %v13297_v57, %v19621_v30  ;;  %v13344_v0 = vld [vmem:[#allocation3 + $0x10] sm:$0xff] }
0x1b1c   :  { %v14657_v7 = vadd.f32 -1.0, %v13254_v20  ;;  %v13266_v3 = vrot.slane %v13259_v51, %v17059_v12  ;;  %v13302_v38 = vmul.f32 %v13298_v45, %v19625_v10 }
0x1b1e   :  { %v13277_v18 = vcombine.low %v14656_v55, %v14657_v7  ;;  %v13273_v9 = vrot.slane %v13266_v3, %v17059_v12  ;;  %v13349_v55 = vld [vmem:[#allocation4 + $0x18] sm:$0xff] }
0x1b20   :  { %v13284_v1 = vrot.slane %v13277_v18, %v17059_v12 }
0x1b22   :  { %v13291_v33 = vrot.slane %v13284_v1, %v17059_v12 }
0x1b24   :  { %v13293_v59 = vsel %vm817_vm9, %v13273_v9, %v13291_v33  ;;  %v13395_v9 = vadd.s32 4294967288, %v17049_v6 }
0x1b25   :  { %13294 = vrot.lane.b32.xlu1 %v13293_v59, %s16917_s6 }
0x1b77   :  { %v12909_v32 = vpop.permute.xlu0 %12908 }
0x1b78   :  { %v12910_v29 = vmul.f32 %v12909_v32, %v12907_v31  ;;  %v13333_v31 = vrot.slane %v19677_v54, 2  ;;  %v13393_v32 = vsub.s32 %v17049_v6, %v17047_v5 }
0x1b7a   :  { %v12924_v42 = vrot.slane %v12910_v29, %v17059_v12  ;;  %v13398_v29 = vsub.s32 %v13395_v9, %v17047_v5 }
0x1b7c   :  { %v12925_v17 = vcombine.high %v12924_v42, %v12924_v42  ;;  %v12932_v47 = vrot.slane %v12924_v42, %v17059_v12 }
0x1b7e   :  { %v12939_v4 = vrot.slane %v12925_v17, %v17059_v12  ;;  %v12942_v37 = vadd.f32 %v12932_v47, %v12915_v56 }
0x1b80   :  { %v12943_v28 = vadd.f32 %v12939_v4, %v12916_v44  ;;  %16792 = vtanh.f32 %v12942_v37 }
0x1b82   :  { %16794 = vtanh.f32 %v12943_v28 }
0x1b8a   :  { %v16793_v26 = vpop.eup %16792 }
0x1b8b   :  { %v12950_v60 = vmul.f32 %v16793_v26, %v12946_v48 }
0x1b8c   :  { %v16795_v35 = vpop.eup %16794 }
0x1b8d   :  { %v12951_v16 = vmul.f32 %v16795_v35, %v12947_v36  ;;  %13338 = vst [vmem:[#allocation3 + $0xf] sm:$0x1] %v12950_v60 }
0x1b8f   :  { %13339 = vst [vmem:[#allocation3 + $0x1f] sm:$0x1] %v12951_v16 }
0x1b94   :  { %v13343_v22 = vld [vmem:[#allocation3 + $0x8] sm:$0xff] }
0x1b95   :  { %v19702_v15 = vsel %vm817_vm9, %v13343_v22, %v13347_v39 }
0x1b96   :  { %v13362_v40 = vmul.f32 %v14658_v58, %v19702_v15  ;;  %v13345_v54 = vld [vmem:[#allocation3 + $0x18] sm:$0xff] }
0x1b97   :  { %v13295_v49 = vpop.permute.xlu1 %13294  ;;  %v19724_v7 = vsel %vm817_vm9, %v13345_v54, %v13349_v55  ;;  %v13536_v55 = vld [vmem:[%s19835_s11 + $0x18] sm:$0xff] }
0x1b98   :  { %v13296_v50 = vmul.f32 %v13295_v49, %v13293_v59  ;;  %13367 = vadd.xlane.f32.xlu1 %v13362_v40  ;;  %v13364_v3 = vmul.f32 %v14658_v58, %v19724_v7 }
0x1b9a   :  { %v13310_v62 = vrot.slane %v13296_v50, %v17059_v12 }
0x1b9c   :  { %v13311_v61 = vcombine.high %v13310_v62, %v13310_v62  ;;  %v13318_v27 = vrot.slane %v13310_v62, %v17059_v12 }
0x1b9e   :  { %v13325_v41 = vrot.slane %v13311_v61, %v17059_v12  ;;  %v13328_v25 = vadd.f32 %v13318_v27, %v13301_v34 }
0x1ba0   :  { %v13329_v43 = vadd.f32 %v13325_v41, %v13302_v38  ;;  %16796 = vtanh.f32 %v13328_v25 }
0x1ba2   :  { %16798 = vtanh.f32 %v13329_v43 }
0x1ba9   :  { %13380 = vperm.xlu1 %15772, %v14659_v46  }
0x1baa   :  { %v16797_v53 = vpop.eup %16796 }
0x1bab   :  { %v13336_v52 = vmul.f32 %v16797_v53, %v13332_v19 }
0x1bac   :  { %v16799_v14 = vpop.eup %16798 }
0x1bad   :  { %v13337_v30 = vmul.f32 %v16799_v14, %v13333_v31  ;;  %13340 = vst [vmem:[#allocation4] sm:$0x1] %v13336_v52 }
0x1baf   :  { %13341 = vst [vmem:[#allocation4 + $0x10] sm:$0x1] %v13337_v30  ;;  %v13533_v30 = vld [vmem:[%s19835_s11] sm:$0xff] }
0x1bb4   :  { %v13346_v24 = vld [vmem:[#allocation4] sm:$0xff] }
0x1bb5   :  { %v19714_v12 = vsel %vm817_vm9, %v13342_v8, %v13346_v24  ;;  %v13534_v8 = vld [vmem:[%s19835_s11 + $0x8] sm:$0xff] }
0x1bb6   :  { %v13361_v10 = vmul.f32 %v14658_v58, %v19714_v12  ;;  %v13348_v20 = vld [vmem:[#allocation4 + $0x10] sm:$0xff]  ;;  %v15722_v24 = vpack.c.bf16 %v13534_v8, %v13533_v30 }
0x1bb7   :  { %v19719_v11 = vsel %vm817_vm9, %v13344_v0, %v13348_v20 }
0x1bb8   :  { %13365 = vadd.xlane.f32.xlu0 %v13361_v10  ;;  %v13363_v51 = vmul.f32 %v14658_v58, %v19719_v11  ;;  %15723 = vmatpush3.bf16.msra.mxu1 %v15722_v24  ;;  %v13637_v24 = vld [vmem:[#allocation11 + $0x30] sm:$0xff] }
0x1bb9   :  { %15724 = vmatprep.subr.bf16.mxu1 %v16911_v2 }
0x1bbc   :  { %13369 = vadd.xlane.f32.xlu0 %v13363_v51  ;;  %v13535_v51 = vld [vmem:[%s19835_s11 + $0x10] sm:$0xff] }
0x1bc0   :  { %13371 = vadd.xlane.f32.xlu0 %v13364_v3  ;;  %v15725_v3 = vpack.c.bf16 %v13536_v55, %v13535_v51  ;;  %v14661_v55 = vld [vmem:[%s19838_s14] ss:$0 sm:$0xff] }
0x1bc2   :  { %15726 = vmatpush3.bf16.msra.mxu1 %v15725_v3 }
0x1bc3   :  { %15727 = vmatprep.subr.bf16.mxu1 %v16911_v2 }
0x1c25   :  { %v13368_v18 = vpop.xlane.xlu1 %13367 }
0x1c29   :  { %v13381_v33 = vpop.permute.xlu1 %13380 }
0x1c2a   :  { %v13384_v63 = vadd.f32 %v13381_v33, %v13368_v18 }
0x1c2c   :  { %v13399_v44 = vrot.slane %v13384_v63, %v13398_v29 }
0x1c45   :  { %v13366_v1 = vpop.xlane.xlu0 %13365 }
0x1c46   :  { %v13383_v21 = vadd.f32 %v13381_v33, %v13366_v1 }
0x1c48   :  { %v13394_v17 = vrot.slane %v13383_v21, %v13393_v32 }
0x1c49   :  { %v13370_v59 = vpop.xlane.xlu0 %13369 }
0x1c4a   :  { %v13385_v42 = vadd.f32 %v13381_v33, %v13370_v59  ;;  %v13401_v28 = vsel %vm13400_vm11, %v13399_v44, %v13394_v17  ;;  %v13538_v59 = vld [vmem:[%s19835_s11 + $0x28] sm:$0xff] }
0x1c4c   :  { %v13405_v4 = vrot.slane %v13385_v42, %v13393_v32 }
0x1c4d   :  { %v13372_v56 = vpop.xlane.xlu0 %13371 }
0x1c4e   :  { %v13386_v47 = vadd.f32 %v13381_v33, %v13372_v56  ;;  %v13537_v33 = vld [vmem:[%s19835_s11 + $0x20] sm:$0xff]  ;;  %v13543_v56 = vld [vmem:[%s19835_s11 + $0x50] sm:$0xff] }
0x1c50   :  { %v13409_v37 = vrot.slane %v13386_v47, %v13398_v29 }
0x1c52   :  { %v13410_v48 = vsel %vm13400_vm11, %v13409_v37, %v13405_v4  ;;  %v13545_v4 = vld [vmem:[%s19835_s11 + $0x60] sm:$0xff]  ;;  %v13546_v37 = vld [vmem:[%s19835_s11 + $0x68] sm:$0xff] }
0x1c53   :  { %v13411_v26 = vsel %vm1628_vm10, %v13410_v48, %v13401_v28  ;;  %v13631_v28 = vld [vmem:[#allocation11] sm:$0xff]  ;;  %v13632_v48 = vld [vmem:[#allocation11 + $0x8] sm:$0xff] }
0x1c54   :  { %v13414_v6 = vsel %vm13413_vm12, %v13411_v26, -inf  ;;  %v13633_v26 = vld [vmem:[#allocation11 + $0x10] sm:$0xff] }
0x1c55   :  { %13415 = vmax.xlane.f32.xlu0 %v13414_v6  ;;  %v15746_v6 = vpack.c.bf16 %v13632_v48, %v13631_v28 }
0x1c57   :  { %15747 = vmatpush3.bf16.msra.mxu0 %v15746_v6 }
0x1c58   :  { %15748 = vmatprep.subr.bf16.mxu0 %v16911_v2 }
0x1ce2   :  { %v13416_v5 = vpop.xlane.xlu0 %13415 }
0x1ce3   :  { %v13421_v36 = vrot.slane %v13416_v5, %v17062_v13  ;;  %v13425_v60 = vrot.slane %v13416_v5, %v17080_v23  ;;  %v13634_v5 = vld [vmem:[#allocation11 + $0x18] sm:$0xff] }
0x1ce5   :  { %v13428_v35 = vsub.f32 %v13383_v21, %v13421_v36  ;;  %v13429_v16 = vsub.f32 %v13384_v63, %v13421_v36  ;;  %v13430_v58 = vsub.f32 %v13385_v42, %v13425_v60  ;;  %v13431_v40 = vsub.f32 %v13386_v47, %v13425_v60  ;;  %v13540_v21 = vld [vmem:[%s19835_s11 + $0x38] sm:$0xff]  ;;  %v13541_v63 = vld [vmem:[%s19835_s11 + $0x40] sm:$0xff]  ;;  %v13542_v42 = vld [vmem:[%s19835_s11 + $0x48] sm:$0xff] }
0x1ce6   :  { %v15734_v17 = vpack.c.bf16 %v13542_v42, %v13541_v63  ;;  %v13544_v47 = vld [vmem:[%s19835_s11 + $0x58] sm:$0xff]  ;;  %v15740_v36 = vpack.c.bf16 %v13546_v37, %v13545_v4  ;;  %v13547_v60 = vld [vmem:[%s19835_s11 + $0x70] sm:$0xff] }
0x1ce7   :  { %v13432_v22 = vmul.f32 1.442695, %v13428_v35  ;;  %v13434_v39 = vmul.f32 1.442695, %v13429_v16  ;;  %v13436_v49 = vmul.f32 1.442695, %v13430_v58  ;;  %v15737_v44 = vpack.c.bf16 %v13544_v47, %v13543_v56 }
0x1ce8   :  { %v13438_v57 = vmul.f32 1.442695, %v13431_v40  ;;  %v13548_v35 = vld [vmem:[%s19835_s11 + $0x78] sm:$0xff]  ;;  %v15749_v16 = vpack.c.bf16 %v13634_v5, %v13633_v26  ;;  %v13635_v58 = vld [vmem:[#allocation11 + $0x20] sm:$0xff] }
0x1ce9   :  { %16800 = vpow2.f32 %v13432_v22  ;;  %v13636_v22 = vld [vmem:[#allocation11 + $0x28] sm:$0xff] }
0x1cea   :  { %16802 = vpow2.f32 %v13434_v39  ;;  %v15743_v39 = vpack.c.bf16 %v13548_v35, %v13547_v60  ;;  %15750 = vmatpush3.bf16.msra.mxu0 %v15749_v16  ;;  %v15752_v40 = vpack.c.bf16 %v13636_v22, %v13635_v58 }
0x1ceb   :  { %16804 = vpow2.f32 %v13436_v49  ;;  %15751 = vmatprep.subr.bf16.mxu0 %v16911_v2 }
0x1cec   :  { %16806 = vpow2.f32 %v13438_v57 }
0x1cee   :  { %15753 = vmatpush3.bf16.msra.mxu0 %v15752_v40 }
0x1cef   :  { %15754 = vmatprep.subr.bf16.mxu0 %v16911_v2 }
0x1cf3   :  { %v16801_v50 = vpop.eup %16800 }
0x1cf4   :  { %v16803_v45 = vpop.eup %16802  ;;  %13445 = vperm.xlu0 %15773, %v16801_v50  }
0x1cf5   :  { %13448 = vperm.xlu1 %15772, %v16803_v45   ;;  %v16805_v62 = vpop.eup %16804 }
0x1cf6   :  { %v16807_v34 = vpop.eup %16806 }
0x1cf9   :  { %13451 = vperm.xlu1 %15772, %v16805_v62  }
0x1cfd   :  { %13454 = vperm.xlu1 %15772, %v16807_v34  }
0x1d73   :  { %v13446_v27 = vpop.permute.xlu0 %13445 }
0x1d74   :  { %v13449_v61 = vpop.permute.xlu1 %13448  ;;  %v13459_v25 = vrot.slane %v13446_v27, %v13393_v32 }
0x1d75   :  { %v13463_v41 = vrot.slane %v13449_v61, %v13398_v29 }
0x1d77   :  { %v13464_v53 = vsel %vm13400_vm11, %v13463_v41, %v13459_v25 }
0x1d78   :  { %v13452_v38 = vpop.permute.xlu1 %13451 }
0x1d79   :  { %v13468_v46 = vrot.slane %v13452_v38, %v13393_v32  ;;  %v15728_v32 = vpack.c.bf16 %v13538_v59, %v13537_v33 }
0x1d7b   :  { %15729 = vmatpush3.bf16.msra.mxu1 %v15728_v32 }
0x1d7c   :  { %v13455_v43 = vpop.permute.xlu1 %13454  ;;  %15730 = vmatprep.subr.bf16.mxu1 %v16911_v2 }
0x1d7d   :  { %v13472_v19 = vrot.slane %v13455_v43, %v13398_v29 }
0x1d7f   :  { %v13473_v31 = vsel %vm13400_vm11, %v13472_v19, %v13468_v46 }
0x1d80   :  { %v13474_v52 = vsel %vm1628_vm10, %v13473_v31, %v13464_v53 }
0x1d81   :  { %v13476_v14 = vsel %vm13413_vm12, %v13474_v52, 0.0 }
0x1d82   :  { %13477 = vadd.xlane.f32.xlu1 %v13476_v14 }
0x1e0f   :  { %v13478_v10 = vpop.xlane.xlu1 %13477 }
0x1e10   :  { %16808 = vrcp.f32 %v13478_v10  ;;  %v13638_v10 = vld [vmem:[#allocation11 + $0x38] sm:$0xff] }
0x1e1a   :  { %v16809_v0 = vpop.eup %16808 }
0x1e1b   :  { %v13484_v20 = vrot.slane %v16809_v0, %v17062_v13  ;;  %v13488_v1 = vrot.slane %v16809_v0, %v17080_v23  ;;  %v13539_v23 = vld [vmem:[%s19835_s11 + $0x30] sm:$0xff]  ;;  %v15755_v0 = vpack.c.bf16 %v13638_v10, %v13637_v24 }
0x1e1c   :  { %v15731_v29 = vpack.c.bf16 %v13540_v21, %v13539_v23 }
0x1e1d   :  { %v13491_v54 = vmul.f32 %v16801_v50, %v13484_v20  ;;  %v13492_v18 = vmul.f32 %v16803_v45, %v13484_v20  ;;  %v13493_v9 = vmul.f32 %v16805_v62, %v13488_v1  ;;  %v13494_v13 = vmul.f32 %v16807_v34, %v13488_v1  ;;  %15756 = vmatpush3.bf16.msra.mxu0 %v15755_v0 }
0x1e1e   :  { %15732 = vmatpush3.bf16.msra.mxu1 %v15731_v29 }
0x1e1f   :  { %13497 = vperm.xlu0 %15773, %v13491_v54   ;;  %15733 = vmatprep.subr.bf16.mxu1 %v16911_v2 }
0x1e22   :  { %15735 = vmatpush3.bf16.msra.mxu1 %v15734_v17 }
0x1e23   :  { %13502 = vperm.xlu0 %15773, %v13492_v18   ;;  %15736 = vmatprep.subr.bf16.mxu1 %v16911_v2 }
0x1e26   :  { %15738 = vmatpush3.bf16.msra.mxu1 %v15737_v44 }
0x1e27   :  { %13507 = vperm.xlu0 %15773, %v13493_v9   ;;  %15739 = vmatprep.subr.bf16.mxu1 %v16911_v2 }
0x1e2a   :  { %15741 = vmatpush3.bf16.msra.mxu1 %v15740_v36 }
0x1e2b   :  { %13512 = vperm.xlu0 %15773, %v13494_v13   ;;  %15742 = vmatprep.subr.bf16.mxu1 %v16911_v2 }
0x1e2e   :  { %15744 = vmatpush3.bf16.msra.mxu1 %v15743_v39 }
0x1e9e   :  { %v13498_v49 = vpop.permute.xlu0 %13497 }
0x1e9f   :  { %v13515_v50 = vmul.f32 %v13498_v49, %v19714_v12 }
0x1ea2   :  { %v13503_v57 = vpop.permute.xlu0 %13502 }
0x1ea3   :  { %v13516_v45 = vmul.f32 %v13503_v57, %v19702_v15 }
0x1ea5   :  { %v13519_v62 = vadd.f32 %v13516_v45, %v13515_v50 }
0x1ea6   :  { %v13508_v34 = vpop.permute.xlu0 %13507 }
0x1ea7   :  { %v13520_v61 = vrot.slane %v13519_v62, 4  ;;  %v13517_v41 = vmul.f32 %v13508_v34, %v19719_v11  ;;  %v14660_v11 = vld [vmem:[%s19836_s12] ss:$0 sm:$0xff] }
0x1ea9   :  { %v13521_v27 = vadd.f32 %v13520_v61, %v13519_v62 }
0x1eaa   :  { %v13513_v38 = vpop.permute.xlu0 %13512 }
0x1eab   :  { %v13518_v25 = vmul.f32 %v13513_v38, %v19724_v7  ;;  %v13522_v43 = vrot.slane %v13521_v27, 2 }
0x1ead   :  { %v13526_v46 = vadd.f32 %v13518_v25, %v13517_v41  ;;  %v13523_v53 = vadd.f32 %v13522_v43, %v13521_v27 }
0x1eaf   :  { %v13527_v19 = vrot.slane %v13526_v46, 4  ;;  %v13524_v52 = vrot.slane %v13523_v53, 1 }
0x1eb1   :  { %v13528_v2 = vadd.f32 %v13527_v19, %v13526_v46  ;;  %v13525_v30 = vadd.f32 %v13524_v52, %v13523_v53 }
0x1eb3   :  { %v13529_v31 = vrot.slane %v13528_v2, 2 }
0x1eb5   :  { %v13530_v14 = vadd.f32 %v13529_v31, %v13528_v2 }
0x1eb7   :  { %v13531_v12 = vrot.slane %v13530_v14, 1 }
0x1eb9   :  { %v13532_v15 = vadd.f32 %v13531_v12, %v13530_v14 }
0x1ebb   :  { %v13558_v8 = vsel %vm1628_vm10, %v13532_v15, %v13525_v30 }
0x1ebc   :  { %15670 = vmatmul.mubr.f32.vlgmr.msra.gmra.mrb[10].mxu1 %v13558_v8 }
0x1f8f   :  { %v13626_v7 = vpop.f32.mrb[10].mxu1 }
0x1f90   :  { %v13627_v20 = vadd.f32 %v14660_v11, %v13626_v7  ;;  %v15671_v54 = vpop.f32.mrb[11].mxu1 }
0x1f92   :  { %v13630_v51 = vmax.f32 %v13627_v20, 0.0 }
0x1f94   :  { %15689 = vmatmul.mubr.msk.f32.vlgmr.msra.gmra.mrb[18].mxu0 %vm13646_vm13, %v13630_v51 }
0x2067   :  { %v13716_v3 = vpop.f32.mrb[18].mxu0 }
0x2068   :  { %v13717_v18 = vadd.f32 %v14661_v55, %v13716_v3  ;;  %v15690_v1 = vpop.f32.mrb[19].mxu0 }
0x206a   :  { %13720 = vst [vmem:[#allocation12] sm:$0x3] %v13717_v18 }
0x206b   :  { %16887 = shalt.err (!%p16884_p0)
}
0x206c   :  { %s16888_s18 = scalar_lea.hbm %s19839_s15, 32 }
0x206d   :  { %p16889_p1 = scmp.ne.s32.totalorder %s19839_s15, %s16888_s18  ;;  %p16892_p2 = scmp.lt.u32.totalorder %s16888_s18, %s19839_s15 }
0x206f   :  { %p16894_p3 = pnand %p16892_p2, %p16889_p1 }
0x2071   :  { %16897 = shalt.err (!%p16894_p3)
}
0x2072   :  { %13730 = dma.vmem_to_hbm [thread:$0]  %s13728_s21, 32, %s19839_s15, [#allocation8]  }
0x2073   :  { %16902 = dma.done.wait [#allocation8], 32  }
0x2074   :  { %16903 = vsyncadd [#allocation8], 4294967264 }
0x2075   :  { %13734 = vsyncpa [#allocation7], 1 }
0x2076   :  { %13735 = vsyncpa [#allocation10], 1 }
0x2077   :  { %13736 = vsyncpa [#allocation8], 1 }

</bundles_post_ra>
